<compile_context>
chip_gen: v7x
topology: tpu7x:2x2x1
jax: 0.10.0
libtpu: 0.0.40
codegen_flags: <defaults>
</compile_context>

<pallas_src>
import functools
import math

import jax
import jax.numpy as jnp
from jax.experimental import pallas as pl
from jax.experimental.pallas import tpu as pltpu

SELU_ALPHA = 1.6732632423543772
SELU_SCALE = 1.0507009873554805
BN_EPS = 1e-5
LN_EPS = 1e-5


# ----------------------------- in-kernel helpers (pure value math) -----------------------------

def _mm(a, w_bf16):
    """bf16 MXU matmul with f32 accumulation. `w_bf16` is already bfloat16."""
    return jnp.dot(a.astype(jnp.bfloat16), w_bf16, preferred_element_type=jnp.float32)


def _layernorm(x, g, b):
    mu = jnp.mean(x, axis=-1, keepdims=True)
    xc = x - mu
    var = jnp.mean(xc * xc, axis=-1, keepdims=True)
    return xc * jax.lax.rsqrt(var + LN_EPS) * g + b


def _selu(y):
    return SELU_SCALE * jnp.where(y > 0, y, SELU_ALPHA * (jnp.exp(y) - 1.0))


def _attn_ctx(q, k, v, nhead):
    """Multi-head attention context for one batch element / branch.

    q: (Sq, D), k/v: (Sk, D) -> (Sq, D): per-head contexts lane-concatenated so
    the caller can apply the output projection as one K=D matmul.
    Scores / softmax stay in f32; matmul operands are bf16.
    """
    D = q.shape[-1]
    hd = D // nhead
    scale = 1.0 / math.sqrt(hd)
    ctxs = []
    for h in range(nhead):
        sl = slice(h * hd, (h + 1) * hd)
        qh = q[:, sl].astype(jnp.bfloat16)
        kh = k[:, sl].astype(jnp.bfloat16)
        vh = v[:, sl].astype(jnp.bfloat16)
        # q @ k^T via dot_general (contract last dims) -> (Sq, Sk), f32
        s = jax.lax.dot_general(qh, kh, (((1,), (1,)), ((), ())),
                                preferred_element_type=jnp.float32) * scale
        s = s - jnp.max(s, axis=-1, keepdims=True)
        p = jnp.exp(s)
        p = p / jnp.sum(p, axis=-1, keepdims=True)          # exact division
        ctxs.append(jnp.dot(p.astype(jnp.bfloat16), vh,
                            preferred_element_type=jnp.float32))
    return jnp.concatenate(ctxs, axis=-1)                   # (Sq, D)


# ----------------------------- the fused forward kernel -----------------------------

def _forward_kernel(patch_ref, audio_ref,
                    pw_ref, pb_ref, cw_ref, cb_ref, bn1s_ref, bn1t_ref,
                    wqkv_ref, bqkv_ref, wo_ref, bo_ref, ln1g_ref, ln1b_ref,
                    w1_ref, b1_ref, w2_ref, b2_ref, ln2g_ref, ln2b_ref,
                    mwq_ref, mbq_ref, mwkv_ref, mbkv_ref, mwo_ref, mbo_ref,
                    mlng_ref, mlnb_ref,
                    dw_ref, db_ref, bn2s_ref, bn2t_ref, ow_ref, ob_ref,
                    o_ref, *, nhead, s_img, t_wav, b_blk):
    D = pw_ref.shape[1]
    n_img = b_blk * s_img
    n_wav = b_blk * t_wav

    # ---- embed: patch projection (image) + Conv1d(k=1) + eval BN1 (audio) ----
    patches = patch_ref[...].reshape(n_img, patch_ref.shape[-1])   # (n_img, pdim)
    audio = audio_ref[...].reshape(n_wav, audio_ref.shape[-1])     # (n_wav, ca_pad)
    img_tok = _mm(patches, pw_ref[...]) + pb_ref[...]
    aud_tok = _mm(audio, cw_ref[...]) + cb_ref[...]
    aud_tok = aud_tok * bn1s_ref[...] + bn1t_ref[...]
    # token slab: [all image rows (batch-major) ; all wave rows (batch-major)]
    x = jnp.concatenate([img_tok, aud_tok], axis=0)                # (rows, D), f32

    # ---- shared-weight transformer encoder layer (post-norm, relu FFN) ----
    # Fused QKV over ALL rows (both branches, all batches) -> one big matmul.
    qkv = _mm(x, wqkv_ref[...]) + bqkv_ref[...]                    # (rows, 3D)
    q, k, v = qkv[:, :D], qkv[:, D:2 * D], qkv[:, 2 * D:]
    # Attention per batch element, per branch (branches never mix -> no mask).
    ctx_rows = []
    for b in range(b_blk):
        sl = slice(b * s_img, (b + 1) * s_img)
        ctx_rows.append(_attn_ctx(q[sl], k[sl], v[sl], nhead))
    for b in range(b_blk):
        sl = slice(n_img + b * t_wav, n_img + (b + 1) * t_wav)
        ctx_rows.append(_attn_ctx(q[sl], k[sl], v[sl], nhead))
    ctx = jnp.concatenate(ctx_rows, axis=0)                        # (rows, D)
    x = _layernorm(x + _mm(ctx, wo_ref[...]) + bo_ref[...],
                   ln1g_ref[...], ln1b_ref[...])
    h = jnp.maximum(_mm(x, w1_ref[...]) + b1_ref[...], 0.0)
    x = _layernorm(x + _mm(h, w2_ref[...]) + b2_ref[...],
                   ln2g_ref[...], ln2b_ref[...])

    # ---- MFIE (cross-attention: image queries, wave K/V) + residual + LN ----
    # TODO(synk): MFIE internals not provided in the reference; realized as
    # multi-head cross-attention over the two branches.
    img = x[:n_img]
    wav = x[n_img:]
    q_m = _mm(img, mwq_ref[...]) + mbq_ref[...]                    # (n_img, D)
    kv_m = _mm(wav, mwkv_ref[...]) + mbkv_ref[...]                 # (n_wav, 2D)
    k_m, v_m = kv_m[:, :D], kv_m[:, D:]
    ctx_m = []
    for b in range(b_blk):
        qb = q_m[b * s_img:(b + 1) * s_img]
        kb = k_m[b * t_wav:(b + 1) * t_wav]
        vb = v_m[b * t_wav:(b + 1) * t_wav]
        ctx_m.append(_attn_ctx(qb, kb, vb, nhead))
    ctx_m = jnp.concatenate(ctx_m, axis=0)                         # (n_img, D)
    fused = _layernorm(img + _mm(ctx_m, mwo_ref[...]) + mbo_ref[...],
                       mlng_ref[...], mlnb_ref[...])

    # ---- pool over image tokens, dense, BN2(eval)+SELU, out projection ----
    pooled = jnp.concatenate(
        [jnp.mean(fused[b * s_img:(b + 1) * s_img], axis=0, keepdims=True)
         for b in range(b_blk)], axis=0)                           # (b_blk, D)
    hd2 = _mm(pooled, dw_ref[...]) + db_ref[...]
    hd2 = _selu(hd2 * bn2s_ref[...] + bn2t_ref[...])
    logits = _mm(hd2, ow_ref[...]) + ob_ref[...]                   # (b_blk, out_pad)
    o_ref[...] = logits.reshape(b_blk, 1, logits.shape[-1])


# ----------------------------- pallas_call wrapper -----------------------------

def _rep(a):
    """BlockSpec for a weight broadcast across the batch grid (whole-array block)."""
    zeros = (0,) * a.ndim
    return pl.BlockSpec(a.shape, lambda b, _z=zeros: _z)


def _pick_b_blk(B, s_tot, target_rows=256):
    """Largest divisor of B whose folded row count stays near `target_rows`."""
    cap = max(1, target_rows // s_tot)
    for cand in range(min(B, cap), 0, -1):
        if B % cand == 0:
            return cand
    return 1


def spec_wave_next_forward(pp, audio, imgs, hidden, *, nhead, patch, num_classes,
                           b_blk=None):
    B, C, H, W = imgs.shape
    ph, pw_ = H // patch, W // patch
    s_img = ph * pw_
    T = audio.shape[1]
    s_tot = s_img + T
    assert s_img % 8 == 0 and T % 8 == 0, "token counts must be sublane-aligned"

    # TODO(synk): build_backbone / ImageSEncoder / ImageMEncoder internals not
    # provided; replaced by a deterministic patch-embedding projection to d_model.
    patches = imgs.reshape(B, C, ph, patch, pw_, patch)
    patches = patches.transpose(0, 2, 4, 1, 3, 5).reshape(B, s_img, C * patch * patch)

    # pad audio channels to match the zero-padded conv weight (41 -> 48)
    ca = audio.shape[2]
    ca_pad = pp["conv_w"].shape[0]
    if ca_pad != ca:
        audio = jnp.pad(audio, ((0, 0), (0, 0), (0, ca_pad - ca)))

    if b_blk is None:
        b_blk = _pick_b_blk(B, s_tot)
    assert B % b_blk == 0

    e, m = pp["enc"], pp["mfie"]
    weights = (pp["patch_w"], pp["patch_b"], pp["conv_w"], pp["conv_b"],
               pp["bn1_scale"], pp["bn1_shift"],
               e["wqkv"], e["bqkv"], e["wo"], e["bo"], e["ln1_g"], e["ln1_b"],
               e["w1"], e["b1"], e["w2"], e["b2"], e["ln2_g"], e["ln2_b"],
               m["wq"], m["bq"], m["wkv"], m["bkv"], m["wo"], m["bo"],
               m["ln_g"], m["ln_b"],
               pp["dense_w"], pp["dense_b"], pp["bn2_scale"], pp["bn2_shift"],
               pp["out_w"], pp["out_b"])

    out_pad = pp["out_w"].shape[1]
    pdim = patches.shape[-1]

    out = pl.pallas_call(
        functools.partial(_forward_kernel, nhead=nhead, s_img=s_img,
                          t_wav=T, b_blk=b_blk),
        out_shape=jax.ShapeDtypeStruct((B, 1, out_pad), jnp.float32),
        grid=(B // b_blk,),
        in_specs=[pl.BlockSpec((b_blk, s_img, pdim), lambda b: (b, 0, 0)),
                  pl.BlockSpec((b_blk, T, ca_pad), lambda b: (b, 0, 0))]
                 + [_rep(w) for w in weights],
        out_specs=pl.BlockSpec((b_blk, 1, out_pad), lambda b: (b, 0, 0)),
        compiler_params=pltpu.CompilerParams(dimension_semantics=("parallel",)),
    )(patches, audio, *weights)

    logits = out.reshape(B, out_pad)[:, :num_classes]
    return logits, hidden                               # hidden is an opaque pass-through


# ----------------------------- parameters -----------------------------

def init_params(key, d_model, nhead, num_classes, patch_dim, ffn_dim=256):
    keys = iter(jax.random.split(key, 64))

    def dense(fan_in, fan_out):
        kw, kb = jax.random.split(next(keys))
        w = jax.random.normal(kw, (fan_in, fan_out), jnp.float32) * 0.02
        b = jax.random.normal(kb, (fan_out,), jnp.float32) * 0.01
        return w, b

    def attn_params():
        p = {}
        for name in ("q", "k", "v", "o"):
            w, b = dense(d_model, d_model)
            p["w" + name] = w
            p["b" + name] = b
        return p

    params = {}
    params["patch_w"], params["patch_b"] = dense(patch_dim, d_model)
    params["conv_w"], params["conv_b"] = dense(41, d_model)
    params["bn1_g"] = 1.0 + 0.1 * jax.random.normal(next(keys), (d_model,), jnp.float32)
    params["bn1_b"] = 0.1 * jax.random.normal(next(keys), (d_model,), jnp.float32)
    params["bn1_m"] = jnp.zeros((d_model,), jnp.float32)
    params["bn1_v"] = jnp.ones((d_model,), jnp.float32)

    enc = {"attn": attn_params()}
    enc["ln1_g"] = jnp.ones((d_model,), jnp.float32)
    enc["ln1_b"] = jnp.zeros((d_model,), jnp.float32)
    enc["w1"], enc["b1"] = dense(d_model, ffn_dim)
    enc["w2"], enc["b2"] = dense(ffn_dim, d_model)
    enc["ln2_g"] = jnp.ones((d_model,), jnp.float32)
    enc["ln2_b"] = jnp.zeros((d_model,), jnp.float32)
    params["enc"] = enc

    params["mfie"] = {"attn": attn_params(),
                      "ln_g": jnp.ones((d_model,), jnp.float32),
                      "ln_b": jnp.zeros((d_model,), jnp.float32)}

    params["dense_w"], params["dense_b"] = dense(d_model, d_model)
    params["bn2_g"] = 1.0 + 0.1 * jax.random.normal(next(keys), (d_model,), jnp.float32)
    params["bn2_b"] = 0.1 * jax.random.normal(next(keys), (d_model,), jnp.float32)
    params["bn2_m"] = jnp.zeros((d_model,), jnp.float32)
    params["bn2_v"] = jnp.ones((d_model,), jnp.float32)
    params["out_w"], params["out_b"] = dense(d_model, num_classes)
    return params


def prepare_params(raw):
    """One-time (outside jit) weight fusion/reshaping: fused QKV / KV weights,
    pre-folded eval BatchNorm affine, biases as (1, N) f32 rows, matmul weights
    cast to bf16, Conv1d channels zero-padded to a sublane multiple, and the
    output projection zero-padded to 128 lanes."""
    row = lambda v: v.reshape(1, -1).astype(jnp.float32)
    bf = lambda w: w.astype(jnp.bfloat16)

    pp = {
        "patch_w": bf(raw["patch_w"]), "patch_b": row(raw["patch_b"]),
    }
    ca = raw["conv_w"].shape[0]
    ca_pad = ((ca + 7) // 8) * 8
    pp["conv_w"] = bf(jnp.pad(raw["conv_w"], ((0, ca_pad - ca), (0, 0))))
    pp["conv_b"] = row(raw["conv_b"])
    bn1_scale = raw["bn1_g"] / jnp.sqrt(raw["bn1_v"] + BN_EPS)
    pp["bn1_scale"] = row(bn1_scale)
    pp["bn1_shift"] = row(raw["bn1_b"] - raw["bn1_m"] * bn1_scale)

    e, a = raw["enc"], raw["enc"]["attn"]
    pp["enc"] = {
        "wqkv": bf(jnp.concatenate([a["wq"], a["wk"], a["wv"]], axis=1)),
        "bqkv": row(jnp.concatenate([a["bq"], a["bk"], a["bv"]])),
        "wo": bf(a["wo"]), "bo": row(a["bo"]),
        "ln1_g": row(e["ln1_g"]), "ln1_b": row(e["ln1_b"]),
        "w1": bf(e["w1"]), "b1": row(e["b1"]),
        "w2": bf(e["w2"]), "b2": row(e["b2"]),
        "ln2_g": row(e["ln2_g"]), "ln2_b": row(e["ln2_b"]),
    }

    m, ma = raw["mfie"], raw["mfie"]["attn"]
    pp["mfie"] = {
        "wq": bf(ma["wq"]), "bq": row(ma["bq"]),
        "wkv": bf(jnp.concatenate([ma["wk"], ma["wv"]], axis=1)),
        "bkv": row(jnp.concatenate([ma["bk"], ma["bv"]])),
        "wo": bf(ma["wo"]), "bo": row(ma["bo"]),
        "ln_g": row(m["ln_g"]), "ln_b": row(m["ln_b"]),
    }

    pp["dense_w"] = bf(raw["dense_w"])
    pp["dense_b"] = row(raw["dense_b"])
    bn2_scale = raw["bn2_g"] / jnp.sqrt(raw["bn2_v"] + BN_EPS)
    pp["bn2_scale"] = row(bn2_scale)
    pp["bn2_shift"] = row(raw["bn2_b"] - raw["bn2_m"] * bn2_scale)

    nc = raw["out_w"].shape[1]
    nc_pad = ((nc + 127) // 128) * 128
    pp["out_w"] = bf(jnp.pad(raw["out_w"], ((0, 0), (0, nc_pad - nc))))
    pp["out_b"] = row(jnp.pad(raw["out_b"], (0, nc_pad - nc)))
    return pp


# ----------------------------- main -----------------------------

if __name__ == "__main__":
    key = jax.random.PRNGKey(0)

    B = 2                    # batch
    T, CA = 8, 41            # audio length, audio channels (Conv1d(41, ...))
    C, H, W = 3, 16, 16      # image
    patch = 4
    d_model = 256            # fixed by TransformerEncoderLayer(256, nhead=8, ff=256)
    nhead = 8
    num_classes = 4

    k_params, k_audio, k_imgs = jax.random.split(key, 3)
    raw_params = init_params(k_params, d_model, nhead, num_classes,
                             patch_dim=C * patch * patch)
    params = prepare_params(raw_params)   # fuse / pad / cast once, outside the hot path

    audio = jax.random.normal(k_audio, (B, T, CA), jnp.float32)
    imgs = jax.random.normal(k_imgs, (B, C, H, W), jnp.float32)
    hidden = jnp.zeros((1, B, d_model), jnp.float32)

    fwd = jax.jit(functools.partial(spec_wave_next_forward, nhead=nhead,
                                    patch=patch, num_classes=num_classes))
    logits, hidden_out = fwd(params, audio, imgs, hidden)
    jax.block_until_ready(logits)
    jax.block_until_ready(hidden_out)

    assert logits.shape == (B, num_classes)
    assert hidden_out.shape == hidden.shape
    print("KERNEL_OK")
</pallas_src>

<mosaic_0001>
module attributes {stable_mosaic.version = 11 : i64} {
  func.func @_forward_kernel(%arg0: i32, %arg1: memref<2x16x48xf32, #tpu.memory_space<vmem>>, %arg2: memref<2x8x48xf32, #tpu.memory_space<vmem>>, %arg3: memref<48x256xbf16, #tpu.memory_space<vmem>>, %arg4: memref<1x256xf32, #tpu.memory_space<vmem>>, %arg5: memref<48x256xbf16, #tpu.memory_space<vmem>>, %arg6: memref<1x256xf32, #tpu.memory_space<vmem>>, %arg7: memref<1x256xf32, #tpu.memory_space<vmem>>, %arg8: memref<1x256xf32, #tpu.memory_space<vmem>>, %arg9: memref<256x768xbf16, #tpu.memory_space<vmem>>, %arg10: memref<1x768xf32, #tpu.memory_space<vmem>>, %arg11: memref<256x256xbf16, #tpu.memory_space<vmem>>, %arg12: memref<1x256xf32, #tpu.memory_space<vmem>>, %arg13: memref<1x256xf32, #tpu.memory_space<vmem>>, %arg14: memref<1x256xf32, #tpu.memory_space<vmem>>, %arg15: memref<256x256xbf16, #tpu.memory_space<vmem>>, %arg16: memref<1x256xf32, #tpu.memory_space<vmem>>, %arg17: memref<256x256xbf16, #tpu.memory_space<vmem>>, %arg18: memref<1x256xf32, #tpu.memory_space<vmem>>, %arg19: memref<1x256xf32, #tpu.memory_space<vmem>>, %arg20: memref<1x256xf32, #tpu.memory_space<vmem>>, %arg21: memref<256x256xbf16, #tpu.memory_space<vmem>>, %arg22: memref<1x256xf32, #tpu.memory_space<vmem>>, %arg23: memref<256x512xbf16, #tpu.memory_space<vmem>>, %arg24: memref<1x512xf32, #tpu.memory_space<vmem>>, %arg25: memref<256x256xbf16, #tpu.memory_space<vmem>>, %arg26: memref<1x256xf32, #tpu.memory_space<vmem>>, %arg27: memref<1x256xf32, #tpu.memory_space<vmem>>, %arg28: memref<1x256xf32, #tpu.memory_space<vmem>>, %arg29: memref<256x256xbf16, #tpu.memory_space<vmem>>, %arg30: memref<1x256xf32, #tpu.memory_space<vmem>>, %arg31: memref<1x256xf32, #tpu.memory_space<vmem>>, %arg32: memref<1x256xf32, #tpu.memory_space<vmem>>, %arg33: memref<256x128xbf16, #tpu.memory_space<vmem>>, %arg34: memref<1x128xf32, #tpu.memory_space<vmem>>, %arg35: memref<2x1x128xf32, #tpu.memory_space<vmem>>) attributes {dimension_semantics = [#tpu.dimension_semantics<parallel>], iteration_bounds = array<i64: 1>, scalar_prefetch = 0 : i64, scratch_operands = 0 : i64, tpu.core_type = #tpu.core_type<tc>, window_params = [{transform_indices = @transform_0, window_bounds = array<i64: 2, 16, 48>}, {transform_indices = @transform_1, window_bounds = array<i64: 2, 8, 48>}, {pipeline_mode = #tpu.pipeline_mode<synchronous>, transform_indices = @transform_2, window_bounds = array<i64: 48, 256>}, {pipeline_mode = #tpu.pipeline_mode<synchronous>, transform_indices = @transform_3, window_bounds = array<i64: 1, 256>}, {pipeline_mode = #tpu.pipeline_mode<synchronous>, transform_indices = @transform_4, window_bounds = array<i64: 48, 256>}, {pipeline_mode = #tpu.pipeline_mode<synchronous>, transform_indices = @transform_5, window_bounds = array<i64: 1, 256>}, {pipeline_mode = #tpu.pipeline_mode<synchronous>, transform_indices = @transform_6, window_bounds = array<i64: 1, 256>}, {pipeline_mode = #tpu.pipeline_mode<synchronous>, transform_indices = @transform_7, window_bounds = array<i64: 1, 256>}, {pipeline_mode = #tpu.pipeline_mode<synchronous>, transform_indices = @transform_8, window_bounds = array<i64: 256, 768>}, {pipeline_mode = #tpu.pipeline_mode<synchronous>, transform_indices = @transform_9, window_bounds = array<i64: 1, 768>}, {pipeline_mode = #tpu.pipeline_mode<synchronous>, transform_indices = @transform_10, window_bounds = array<i64: 256, 256>}, {pipeline_mode = #tpu.pipeline_mode<synchronous>, transform_indices = @transform_11, window_bounds = array<i64: 1, 256>}, {pipeline_mode = #tpu.pipeline_mode<synchronous>, transform_indices = @transform_12, window_bounds = array<i64: 1, 256>}, {pipeline_mode = #tpu.pipeline_mode<synchronous>, transform_indices = @transform_13, window_bounds = array<i64: 1, 256>}, {pipeline_mode = #tpu.pipeline_mode<synchronous>, transform_indices = @transform_14, window_bounds = array<i64: 256, 256>}, {pipeline_mode = #tpu.pipeline_mode<synchronous>, transform_indices = @transform_15, window_bounds = array<i64: 1, 256>}, {pipeline_mode = #tpu.pipeline_mode<synchronous>, transform_indices = @transform_16, window_bounds = array<i64: 256, 256>}, {pipeline_mode = #tpu.pipeline_mode<synchronous>, transform_indices = @transform_17, window_bounds = array<i64: 1, 256>}, {pipeline_mode = #tpu.pipeline_mode<synchronous>, transform_indices = @transform_18, window_bounds = array<i64: 1, 256>}, {pipeline_mode = #tpu.pipeline_mode<synchronous>, transform_indices = @transform_19, window_bounds = array<i64: 1, 256>}, {pipeline_mode = #tpu.pipeline_mode<synchronous>, transform_indices = @transform_20, window_bounds = array<i64: 256, 256>}, {pipeline_mode = #tpu.pipeline_mode<synchronous>, transform_indices = @transform_21, window_bounds = array<i64: 1, 256>}, {pipeline_mode = #tpu.pipeline_mode<synchronous>, transform_indices = @transform_22, window_bounds = array<i64: 256, 512>}, {pipeline_mode = #tpu.pipeline_mode<synchronous>, transform_indices = @transform_23, window_bounds = array<i64: 1, 512>}, {pipeline_mode = #tpu.pipeline_mode<synchronous>, transform_indices = @transform_24, window_bounds = array<i64: 256, 256>}, {pipeline_mode = #tpu.pipeline_mode<synchronous>, transform_indices = @transform_25, window_bounds = array<i64: 1, 256>}, {pipeline_mode = #tpu.pipeline_mode<synchronous>, transform_indices = @transform_26, window_bounds = array<i64: 1, 256>}, {pipeline_mode = #tpu.pipeline_mode<synchronous>, transform_indices = @transform_27, window_bounds = array<i64: 1, 256>}, {pipeline_mode = #tpu.pipeline_mode<synchronous>, transform_indices = @transform_28, window_bounds = array<i64: 256, 256>}, {pipeline_mode = #tpu.pipeline_mode<synchronous>, transform_indices = @transform_29, window_bounds = array<i64: 1, 256>}, {pipeline_mode = #tpu.pipeline_mode<synchronous>, transform_indices = @transform_30, window_bounds = array<i64: 1, 256>}, {pipeline_mode = #tpu.pipeline_mode<synchronous>, transform_indices = @transform_31, window_bounds = array<i64: 1, 256>}, {pipeline_mode = #tpu.pipeline_mode<synchronous>, transform_indices = @transform_32, window_bounds = array<i64: 256, 128>}, {pipeline_mode = #tpu.pipeline_mode<synchronous>, transform_indices = @transform_33, window_bounds = array<i64: 1, 128>}, {transform_indices = @transform_34, window_bounds = array<i64: 2, 1, 128>}]} {
    %c0 = arith.constant 0 : index
    %c0_0 = arith.constant 0 : index
    %c0_1 = arith.constant 0 : index
    %0 = vector.load %arg1[%c0, %c0_0, %c0_1] : memref<2x16x48xf32, #tpu.memory_space<vmem>>, vector<2x16x48xf32>
    %1 = vector.shape_cast %0 : vector<2x16x48xf32> to vector<32x48xf32>
    %c0_2 = arith.constant 0 : index
    %c0_3 = arith.constant 0 : index
    %c0_4 = arith.constant 0 : index
    %2 = vector.load %arg2[%c0_2, %c0_3, %c0_4] : memref<2x8x48xf32, #tpu.memory_space<vmem>>, vector<2x8x48xf32>
    %3 = vector.shape_cast %2 : vector<2x8x48xf32> to vector<16x48xf32>
    %c0_5 = arith.constant 0 : index
    %c0_6 = arith.constant 0 : index
    %4 = vector.load %arg3[%c0_5, %c0_6] : memref<48x256xbf16, #tpu.memory_space<vmem>>, vector<48x256xbf16>
    %5 = arith.truncf %1 : vector<32x48xf32> to vector<32x48xbf16>
    %cst = arith.constant dense<0.000000e+00> : vector<32x256xf32>
    %6 = tpu.matmul %5, %4, %cst {dimension_numbers = #tpu.dot_dimension_numbers<[1], [0], [0], [1], [0, 0, 1, 1], [], []>} : vector<32x48xbf16>, vector<48x256xbf16>, vector<32x256xf32> -> vector<32x256xf32>
    %c0_7 = arith.constant 0 : index
    %c0_8 = arith.constant 0 : index
    %7 = vector.load %arg4[%c0_7, %c0_8] : memref<1x256xf32, #tpu.memory_space<vmem>>, vector<1x256xf32>
    %8 = vector.broadcast %7 : vector<1x256xf32> to vector<32x256xf32>
    %9 = arith.addf %6, %8 : vector<32x256xf32>
    %c0_9 = arith.constant 0 : index
    %c0_10 = arith.constant 0 : index
    %10 = vector.load %arg5[%c0_9, %c0_10] : memref<48x256xbf16, #tpu.memory_space<vmem>>, vector<48x256xbf16>
    %11 = arith.truncf %3 : vector<16x48xf32> to vector<16x48xbf16>
    %cst_11 = arith.constant dense<0.000000e+00> : vector<16x256xf32>
    %12 = tpu.matmul %11, %10, %cst_11 {dimension_numbers = #tpu.dot_dimension_numbers<[1], [0], [0], [1], [0, 0, 1, 1], [], []>} : vector<16x48xbf16>, vector<48x256xbf16>, vector<16x256xf32> -> vector<16x256xf32>
    %c0_12 = arith.constant 0 : index
    %c0_13 = arith.constant 0 : index
    %13 = vector.load %arg6[%c0_12, %c0_13] : memref<1x256xf32, #tpu.memory_space<vmem>>, vector<1x256xf32>
    %14 = vector.broadcast %13 : vector<1x256xf32> to vector<16x256xf32>
    %15 = arith.addf %12, %14 : vector<16x256xf32>
    %c0_14 = arith.constant 0 : index
    %c0_15 = arith.constant 0 : index
    %16 = vector.load %arg7[%c0_14, %c0_15] : memref<1x256xf32, #tpu.memory_space<vmem>>, vector<1x256xf32>
    %17 = vector.broadcast %16 : vector<1x256xf32> to vector<16x256xf32>
    %18 = arith.mulf %15, %17 : vector<16x256xf32>
    %c0_16 = arith.constant 0 : index
    %c0_17 = arith.constant 0 : index
    %19 = vector.load %arg8[%c0_16, %c0_17] : memref<1x256xf32, #tpu.memory_space<vmem>>, vector<1x256xf32>
    %20 = vector.broadcast %19 : vector<1x256xf32> to vector<16x256xf32>
    %21 = arith.addf %18, %20 : vector<16x256xf32>
    %22 = tpu.concatenate %9, %21 in 0 : vector<32x256xf32>, vector<16x256xf32> -> vector<48x256xf32>
    %c0_18 = arith.constant 0 : index
    %c0_19 = arith.constant 0 : index
    %23 = vector.load %arg9[%c0_18, %c0_19] : memref<256x768xbf16, #tpu.memory_space<vmem>>, vector<256x768xbf16>
    %24 = arith.truncf %22 : vector<48x256xf32> to vector<48x256xbf16>
    %cst_20 = arith.constant dense<0.000000e+00> : vector<48x768xf32>
    %25 = tpu.matmul %24, %23, %cst_20 {dimension_numbers = #tpu.dot_dimension_numbers<[1], [0], [0], [1], [0, 0, 1, 1], [], []>} : vector<48x256xbf16>, vector<256x768xbf16>, vector<48x768xf32> -> vector<48x768xf32>
    %c0_21 = arith.constant 0 : index
    %c0_22 = arith.constant 0 : index
    %26 = vector.load %arg10[%c0_21, %c0_22] : memref<1x768xf32, #tpu.memory_space<vmem>>, vector<1x768xf32>
    %27 = vector.broadcast %26 : vector<1x768xf32> to vector<48x768xf32>
    %28 = arith.addf %25, %27 : vector<48x768xf32>
    %29 = vector.extract_strided_slice %28 {offsets = [0, 0], sizes = [48, 256], strides = [1, 1]} : vector<48x768xf32> to vector<48x256xf32>
    %30 = vector.extract_strided_slice %28 {offsets = [0, 256], sizes = [48, 256], strides = [1, 1]} : vector<48x768xf32> to vector<48x256xf32>
    %31 = vector.extract_strided_slice %28 {offsets = [0, 512], sizes = [48, 256], strides = [1, 1]} : vector<48x768xf32> to vector<48x256xf32>
    %32 = vector.extract_strided_slice %29 {offsets = [0, 0], sizes = [16, 256], strides = [1, 1]} : vector<48x256xf32> to vector<16x256xf32>
    %33 = vector.extract_strided_slice %30 {offsets = [0, 0], sizes = [16, 256], strides = [1, 1]} : vector<48x256xf32> to vector<16x256xf32>
    %34 = vector.extract_strided_slice %31 {offsets = [0, 0], sizes = [16, 256], strides = [1, 1]} : vector<48x256xf32> to vector<16x256xf32>
    %35 = vector.extract_strided_slice %32 {offsets = [0, 0], sizes = [16, 32], strides = [1, 1]} : vector<16x256xf32> to vector<16x32xf32>
    %36 = arith.truncf %35 : vector<16x32xf32> to vector<16x32xbf16>
    %37 = vector.extract_strided_slice %33 {offsets = [0, 0], sizes = [16, 32], strides = [1, 1]} : vector<16x256xf32> to vector<16x32xf32>
    %38 = arith.truncf %37 : vector<16x32xf32> to vector<16x32xbf16>
    %39 = vector.extract_strided_slice %34 {offsets = [0, 0], sizes = [16, 32], strides = [1, 1]} : vector<16x256xf32> to vector<16x32xf32>
    %40 = arith.truncf %39 : vector<16x32xf32> to vector<16x32xbf16>
    %cst_23 = arith.constant dense<0.000000e+00> : vector<16x16xf32>
    %41 = tpu.matmul %36, %38, %cst_23 {dimension_numbers = #tpu.dot_dimension_numbers<[1], [1], [0], [0], [0, 0, 1, 0], [], []>} : vector<16x32xbf16>, vector<16x32xbf16>, vector<16x16xf32> -> vector<16x16xf32>
    %cst_24 = arith.constant 0.176776692 : f32
    %42 = vector.broadcast %cst_24 : f32 to vector<16x16xf32>
    %43 = arith.mulf %41, %42 : vector<16x16xf32>
    %cst_25 = arith.constant dense<0xFF800000> : vector<16xf32>
    %44 = vector.multi_reduction <maximumf>, %43, %cst_25 [1] : vector<16x16xf32> to vector<16xf32>
    %45 = vector.shape_cast %44 : vector<16xf32> to vector<16x1xf32>
    %46 = vector.broadcast %45 : vector<16x1xf32> to vector<16x16xf32>
    %47 = arith.subf %43, %46 : vector<16x16xf32>
    %48 = math.exp %47 : vector<16x16xf32>
    %cst_26 = arith.constant dense<0.000000e+00> : vector<16xf32>
    %49 = vector.multi_reduction <add>, %48, %cst_26 [1] : vector<16x16xf32> to vector<16xf32>
    %50 = vector.shape_cast %49 : vector<16xf32> to vector<16x1xf32>
    %51 = vector.broadcast %50 : vector<16x1xf32> to vector<16x16xf32>
    %52 = arith.divf %48, %51 : vector<16x16xf32>
    %53 = arith.truncf %52 : vector<16x16xf32> to vector<16x16xbf16>
    %cst_27 = arith.constant dense<0.000000e+00> : vector<16x32xf32>
    %54 = tpu.matmul %53, %40, %cst_27 {dimension_numbers = #tpu.dot_dimension_numbers<[1], [0], [0], [1], [0, 0, 1, 1], [], []>} : vector<16x16xbf16>, vector<16x32xbf16>, vector<16x32xf32> -> vector<16x32xf32>
    %55 = vector.extract_strided_slice %32 {offsets = [0, 32], sizes = [16, 32], strides = [1, 1]} : vector<16x256xf32> to vector<16x32xf32>
    %56 = arith.truncf %55 : vector<16x32xf32> to vector<16x32xbf16>
    %57 = vector.extract_strided_slice %33 {offsets = [0, 32], sizes = [16, 32], strides = [1, 1]} : vector<16x256xf32> to vector<16x32xf32>
    %58 = arith.truncf %57 : vector<16x32xf32> to vector<16x32xbf16>
    %59 = vector.extract_strided_slice %34 {offsets = [0, 32], sizes = [16, 32], strides = [1, 1]} : vector<16x256xf32> to vector<16x32xf32>
    %60 = arith.truncf %59 : vector<16x32xf32> to vector<16x32xbf16>
    %cst_28 = arith.constant dense<0.000000e+00> : vector<16x16xf32>
    %61 = tpu.matmul %56, %58, %cst_28 {dimension_numbers = #tpu.dot_dimension_numbers<[1], [1], [0], [0], [0, 0, 1, 0], [], []>} : vector<16x32xbf16>, vector<16x32xbf16>, vector<16x16xf32> -> vector<16x16xf32>
    %cst_29 = arith.constant 0.176776692 : f32
    %62 = vector.broadcast %cst_29 : f32 to vector<16x16xf32>
    %63 = arith.mulf %61, %62 : vector<16x16xf32>
    %cst_30 = arith.constant dense<0xFF800000> : vector<16xf32>
    %64 = vector.multi_reduction <maximumf>, %63, %cst_30 [1] : vector<16x16xf32> to vector<16xf32>
    %65 = vector.shape_cast %64 : vector<16xf32> to vector<16x1xf32>
    %66 = vector.broadcast %65 : vector<16x1xf32> to vector<16x16xf32>
    %67 = arith.subf %63, %66 : vector<16x16xf32>
    %68 = math.exp %67 : vector<16x16xf32>
    %cst_31 = arith.constant dense<0.000000e+00> : vector<16xf32>
    %69 = vector.multi_reduction <add>, %68, %cst_31 [1] : vector<16x16xf32> to vector<16xf32>
    %70 = vector.shape_cast %69 : vector<16xf32> to vector<16x1xf32>
    %71 = vector.broadcast %70 : vector<16x1xf32> to vector<16x16xf32>
    %72 = arith.divf %68, %71 : vector<16x16xf32>
    %73 = arith.truncf %72 : vector<16x16xf32> to vector<16x16xbf16>
    %cst_32 = arith.constant dense<0.000000e+00> : vector<16x32xf32>
    %74 = tpu.matmul %73, %60, %cst_32 {dimension_numbers = #tpu.dot_dimension_numbers<[1], [0], [0], [1], [0, 0, 1, 1], [], []>} : vector<16x16xbf16>, vector<16x32xbf16>, vector<16x32xf32> -> vector<16x32xf32>
    %75 = vector.extract_strided_slice %32 {offsets = [0, 64], sizes = [16, 32], strides = [1, 1]} : vector<16x256xf32> to vector<16x32xf32>
    %76 = arith.truncf %75 : vector<16x32xf32> to vector<16x32xbf16>
    %77 = vector.extract_strided_slice %33 {offsets = [0, 64], sizes = [16, 32], strides = [1, 1]} : vector<16x256xf32> to vector<16x32xf32>
    %78 = arith.truncf %77 : vector<16x32xf32> to vector<16x32xbf16>
    %79 = vector.extract_strided_slice %34 {offsets = [0, 64], sizes = [16, 32], strides = [1, 1]} : vector<16x256xf32> to vector<16x32xf32>
    %80 = arith.truncf %79 : vector<16x32xf32> to vector<16x32xbf16>
    %cst_33 = arith.constant dense<0.000000e+00> : vector<16x16xf32>
    %81 = tpu.matmul %76, %78, %cst_33 {dimension_numbers = #tpu.dot_dimension_numbers<[1], [1], [0], [0], [0, 0, 1, 0], [], []>} : vector<16x32xbf16>, vector<16x32xbf16>, vector<16x16xf32> -> vector<16x16xf32>
    %cst_34 = arith.constant 0.176776692 : f32
    %82 = vector.broadcast %cst_34 : f32 to vector<16x16xf32>
    %83 = arith.mulf %81, %82 : vector<16x16xf32>
    %cst_35 = arith.constant dense<0xFF800000> : vector<16xf32>
    %84 = vector.multi_reduction <maximumf>, %83, %cst_35 [1] : vector<16x16xf32> to vector<16xf32>
    %85 = vector.shape_cast %84 : vector<16xf32> to vector<16x1xf32>
    %86 = vector.broadcast %85 : vector<16x1xf32> to vector<16x16xf32>
    %87 = arith.subf %83, %86 : vector<16x16xf32>
    %88 = math.exp %87 : vector<16x16xf32>
    %cst_36 = arith.constant dense<0.000000e+00> : vector<16xf32>
    %89 = vector.multi_reduction <add>, %88, %cst_36 [1] : vector<16x16xf32> to vector<16xf32>
    %90 = vector.shape_cast %89 : vector<16xf32> to vector<16x1xf32>
    %91 = vector.broadcast %90 : vector<16x1xf32> to vector<16x16xf32>
    %92 = arith.divf %88, %91 : vector<16x16xf32>
    %93 = arith.truncf %92 : vector<16x16xf32> to vector<16x16xbf16>
    %cst_37 = arith.constant dense<0.000000e+00> : vector<16x32xf32>
    %94 = tpu.matmul %93, %80, %cst_37 {dimension_numbers = #tpu.dot_dimension_numbers<[1], [0], [0], [1], [0, 0, 1, 1], [], []>} : vector<16x16xbf16>, vector<16x32xbf16>, vector<16x32xf32> -> vector<16x32xf32>
    %95 = vector.extract_strided_slice %32 {offsets = [0, 96], sizes = [16, 32], strides = [1, 1]} : vector<16x256xf32> to vector<16x32xf32>
    %96 = arith.truncf %95 : vector<16x32xf32> to vector<16x32xbf16>
    %97 = vector.extract_strided_slice %33 {offsets = [0, 96], sizes = [16, 32], strides = [1, 1]} : vector<16x256xf32> to vector<16x32xf32>
    %98 = arith.truncf %97 : vector<16x32xf32> to vector<16x32xbf16>
    %99 = vector.extract_strided_slice %34 {offsets = [0, 96], sizes = [16, 32], strides = [1, 1]} : vector<16x256xf32> to vector<16x32xf32>
    %100 = arith.truncf %99 : vector<16x32xf32> to vector<16x32xbf16>
    %cst_38 = arith.constant dense<0.000000e+00> : vector<16x16xf32>
    %101 = tpu.matmul %96, %98, %cst_38 {dimension_numbers = #tpu.dot_dimension_numbers<[1], [1], [0], [0], [0, 0, 1, 0], [], []>} : vector<16x32xbf16>, vector<16x32xbf16>, vector<16x16xf32> -> vector<16x16xf32>
    %cst_39 = arith.constant 0.176776692 : f32
    %102 = vector.broadcast %cst_39 : f32 to vector<16x16xf32>
    %103 = arith.mulf %101, %102 : vector<16x16xf32>
    %cst_40 = arith.constant dense<0xFF800000> : vector<16xf32>
    %104 = vector.multi_reduction <maximumf>, %103, %cst_40 [1] : vector<16x16xf32> to vector<16xf32>
    %105 = vector.shape_cast %104 : vector<16xf32> to vector<16x1xf32>
    %106 = vector.broadcast %105 : vector<16x1xf32> to vector<16x16xf32>
    %107 = arith.subf %103, %106 : vector<16x16xf32>
    %108 = math.exp %107 : vector<16x16xf32>
    %cst_41 = arith.constant dense<0.000000e+00> : vector<16xf32>
    %109 = vector.multi_reduction <add>, %108, %cst_41 [1] : vector<16x16xf32> to vector<16xf32>
    %110 = vector.shape_cast %109 : vector<16xf32> to vector<16x1xf32>
    %111 = vector.broadcast %110 : vector<16x1xf32> to vector<16x16xf32>
    %112 = arith.divf %108, %111 : vector<16x16xf32>
    %113 = arith.truncf %112 : vector<16x16xf32> to vector<16x16xbf16>
    %cst_42 = arith.constant dense<0.000000e+00> : vector<16x32xf32>
    %114 = tpu.matmul %113, %100, %cst_42 {dimension_numbers = #tpu.dot_dimension_numbers<[1], [0], [0], [1], [0, 0, 1, 1], [], []>} : vector<16x16xbf16>, vector<16x32xbf16>, vector<16x32xf32> -> vector<16x32xf32>
    %115 = vector.extract_strided_slice %32 {offsets = [0, 128], sizes = [16, 32], strides = [1, 1]} : vector<16x256xf32> to vector<16x32xf32>
    %116 = arith.truncf %115 : vector<16x32xf32> to vector<16x32xbf16>
    %117 = vector.extract_strided_slice %33 {offsets = [0, 128], sizes = [16, 32], strides = [1, 1]} : vector<16x256xf32> to vector<16x32xf32>
    %118 = arith.truncf %117 : vector<16x32xf32> to vector<16x32xbf16>
    %119 = vector.extract_strided_slice %34 {offsets = [0, 128], sizes = [16, 32], strides = [1, 1]} : vector<16x256xf32> to vector<16x32xf32>
    %120 = arith.truncf %119 : vector<16x32xf32> to vector<16x32xbf16>
    %cst_43 = arith.constant dense<0.000000e+00> : vector<16x16xf32>
    %121 = tpu.matmul %116, %118, %cst_43 {dimension_numbers = #tpu.dot_dimension_numbers<[1], [1], [0], [0], [0, 0, 1, 0], [], []>} : vector<16x32xbf16>, vector<16x32xbf16>, vector<16x16xf32> -> vector<16x16xf32>
    %cst_44 = arith.constant 0.176776692 : f32
    %122 = vector.broadcast %cst_44 : f32 to vector<16x16xf32>
    %123 = arith.mulf %121, %122 : vector<16x16xf32>
    %cst_45 = arith.constant dense<0xFF800000> : vector<16xf32>
    %124 = vector.multi_reduction <maximumf>, %123, %cst_45 [1] : vector<16x16xf32> to vector<16xf32>
    %125 = vector.shape_cast %124 : vector<16xf32> to vector<16x1xf32>
    %126 = vector.broadcast %125 : vector<16x1xf32> to vector<16x16xf32>
    %127 = arith.subf %123, %126 : vector<16x16xf32>
    %128 = math.exp %127 : vector<16x16xf32>
    %cst_46 = arith.constant dense<0.000000e+00> : vector<16xf32>
    %129 = vector.multi_reduction <add>, %128, %cst_46 [1] : vector<16x16xf32> to vector<16xf32>
    %130 = vector.shape_cast %129 : vector<16xf32> to vector<16x1xf32>
    %131 = vector.broadcast %130 : vector<16x1xf32> to vector<16x16xf32>
    %132 = arith.divf %128, %131 : vector<16x16xf32>
    %133 = arith.truncf %132 : vector<16x16xf32> to vector<16x16xbf16>
    %cst_47 = arith.constant dense<0.000000e+00> : vector<16x32xf32>
    %134 = tpu.matmul %133, %120, %cst_47 {dimension_numbers = #tpu.dot_dimension_numbers<[1], [0], [0], [1], [0, 0, 1, 1], [], []>} : vector<16x16xbf16>, vector<16x32xbf16>, vector<16x32xf32> -> vector<16x32xf32>
    %135 = vector.extract_strided_slice %32 {offsets = [0, 160], sizes = [16, 32], strides = [1, 1]} : vector<16x256xf32> to vector<16x32xf32>
    %136 = arith.truncf %135 : vector<16x32xf32> to vector<16x32xbf16>
    %137 = vector.extract_strided_slice %33 {offsets = [0, 160], sizes = [16, 32], strides = [1, 1]} : vector<16x256xf32> to vector<16x32xf32>
    %138 = arith.truncf %137 : vector<16x32xf32> to vector<16x32xbf16>
    %139 = vector.extract_strided_slice %34 {offsets = [0, 160], sizes = [16, 32], strides = [1, 1]} : vector<16x256xf32> to vector<16x32xf32>
    %140 = arith.truncf %139 : vector<16x32xf32> to vector<16x32xbf16>
    %cst_48 = arith.constant dense<0.000000e+00> : vector<16x16xf32>
    %141 = tpu.matmul %136, %138, %cst_48 {dimension_numbers = #tpu.dot_dimension_numbers<[1], [1], [0], [0], [0, 0, 1, 0], [], []>} : vector<16x32xbf16>, vector<16x32xbf16>, vector<16x16xf32> -> vector<16x16xf32>
    %cst_49 = arith.constant 0.176776692 : f32
    %142 = vector.broadcast %cst_49 : f32 to vector<16x16xf32>
    %143 = arith.mulf %141, %142 : vector<16x16xf32>
    %cst_50 = arith.constant dense<0xFF800000> : vector<16xf32>
    %144 = vector.multi_reduction <maximumf>, %143, %cst_50 [1] : vector<16x16xf32> to vector<16xf32>
    %145 = vector.shape_cast %144 : vector<16xf32> to vector<16x1xf32>
    %146 = vector.broadcast %145 : vector<16x1xf32> to vector<16x16xf32>
    %147 = arith.subf %143, %146 : vector<16x16xf32>
    %148 = math.exp %147 : vector<16x16xf32>
    %cst_51 = arith.constant dense<0.000000e+00> : vector<16xf32>
    %149 = vector.multi_reduction <add>, %148, %cst_51 [1] : vector<16x16xf32> to vector<16xf32>
    %150 = vector.shape_cast %149 : vector<16xf32> to vector<16x1xf32>
    %151 = vector.broadcast %150 : vector<16x1xf32> to vector<16x16xf32>
    %152 = arith.divf %148, %151 : vector<16x16xf32>
    %153 = arith.truncf %152 : vector<16x16xf32> to vector<16x16xbf16>
    %cst_52 = arith.constant dense<0.000000e+00> : vector<16x32xf32>
    %154 = tpu.matmul %153, %140, %cst_52 {dimension_numbers = #tpu.dot_dimension_numbers<[1], [0], [0], [1], [0, 0, 1, 1], [], []>} : vector<16x16xbf16>, vector<16x32xbf16>, vector<16x32xf32> -> vector<16x32xf32>
    %155 = vector.extract_strided_slice %32 {offsets = [0, 192], sizes = [16, 32], strides = [1, 1]} : vector<16x256xf32> to vector<16x32xf32>
    %156 = arith.truncf %155 : vector<16x32xf32> to vector<16x32xbf16>
    %157 = vector.extract_strided_slice %33 {offsets = [0, 192], sizes = [16, 32], strides = [1, 1]} : vector<16x256xf32> to vector<16x32xf32>
    %158 = arith.truncf %157 : vector<16x32xf32> to vector<16x32xbf16>
    %159 = vector.extract_strided_slice %34 {offsets = [0, 192], sizes = [16, 32], strides = [1, 1]} : vector<16x256xf32> to vector<16x32xf32>
    %160 = arith.truncf %159 : vector<16x32xf32> to vector<16x32xbf16>
    %cst_53 = arith.constant dense<0.000000e+00> : vector<16x16xf32>
    %161 = tpu.matmul %156, %158, %cst_53 {dimension_numbers = #tpu.dot_dimension_numbers<[1], [1], [0], [0], [0, 0, 1, 0], [], []>} : vector<16x32xbf16>, vector<16x32xbf16>, vector<16x16xf32> -> vector<16x16xf32>
    %cst_54 = arith.constant 0.176776692 : f32
    %162 = vector.broadcast %cst_54 : f32 to vector<16x16xf32>
    %163 = arith.mulf %161, %162 : vector<16x16xf32>
    %cst_55 = arith.constant dense<0xFF800000> : vector<16xf32>
    %164 = vector.multi_reduction <maximumf>, %163, %cst_55 [1] : vector<16x16xf32> to vector<16xf32>
    %165 = vector.shape_cast %164 : vector<16xf32> to vector<16x1xf32>
    %166 = vector.broadcast %165 : vector<16x1xf32> to vector<16x16xf32>
    %167 = arith.subf %163, %166 : vector<16x16xf32>
    %168 = math.exp %167 : vector<16x16xf32>
    %cst_56 = arith.constant dense<0.000000e+00> : vector<16xf32>
    %169 = vector.multi_reduction <add>, %168, %cst_56 [1] : vector<16x16xf32> to vector<16xf32>
    %170 = vector.shape_cast %169 : vector<16xf32> to vector<16x1xf32>
    %171 = vector.broadcast %170 : vector<16x1xf32> to vector<16x16xf32>
    %172 = arith.divf %168, %171 : vector<16x16xf32>
    %173 = arith.truncf %172 : vector<16x16xf32> to vector<16x16xbf16>
    %cst_57 = arith.constant dense<0.000000e+00> : vector<16x32xf32>
    %174 = tpu.matmul %173, %160, %cst_57 {dimension_numbers = #tpu.dot_dimension_numbers<[1], [0], [0], [1], [0, 0, 1, 1], [], []>} : vector<16x16xbf16>, vector<16x32xbf16>, vector<16x32xf32> -> vector<16x32xf32>
    %175 = vector.extract_strided_slice %32 {offsets = [0, 224], sizes = [16, 32], strides = [1, 1]} : vector<16x256xf32> to vector<16x32xf32>
    %176 = arith.truncf %175 : vector<16x32xf32> to vector<16x32xbf16>
    %177 = vector.extract_strided_slice %33 {offsets = [0, 224], sizes = [16, 32], strides = [1, 1]} : vector<16x256xf32> to vector<16x32xf32>
    %178 = arith.truncf %177 : vector<16x32xf32> to vector<16x32xbf16>
    %179 = vector.extract_strided_slice %34 {offsets = [0, 224], sizes = [16, 32], strides = [1, 1]} : vector<16x256xf32> to vector<16x32xf32>
    %180 = arith.truncf %179 : vector<16x32xf32> to vector<16x32xbf16>
    %cst_58 = arith.constant dense<0.000000e+00> : vector<16x16xf32>
    %181 = tpu.matmul %176, %178, %cst_58 {dimension_numbers = #tpu.dot_dimension_numbers<[1], [1], [0], [0], [0, 0, 1, 0], [], []>} : vector<16x32xbf16>, vector<16x32xbf16>, vector<16x16xf32> -> vector<16x16xf32>
    %cst_59 = arith.constant 0.176776692 : f32
    %182 = vector.broadcast %cst_59 : f32 to vector<16x16xf32>
    %183 = arith.mulf %181, %182 : vector<16x16xf32>
    %cst_60 = arith.constant dense<0xFF800000> : vector<16xf32>
    %184 = vector.multi_reduction <maximumf>, %183, %cst_60 [1] : vector<16x16xf32> to vector<16xf32>
    %185 = vector.shape_cast %184 : vector<16xf32> to vector<16x1xf32>
    %186 = vector.broadcast %185 : vector<16x1xf32> to vector<16x16xf32>
    %187 = arith.subf %183, %186 : vector<16x16xf32>
    %188 = math.exp %187 : vector<16x16xf32>
    %cst_61 = arith.constant dense<0.000000e+00> : vector<16xf32>
    %189 = vector.multi_reduction <add>, %188, %cst_61 [1] : vector<16x16xf32> to vector<16xf32>
    %190 = vector.shape_cast %189 : vector<16xf32> to vector<16x1xf32>
    %191 = vector.broadcast %190 : vector<16x1xf32> to vector<16x16xf32>
    %192 = arith.divf %188, %191 : vector<16x16xf32>
    %193 = arith.truncf %192 : vector<16x16xf32> to vector<16x16xbf16>
    %cst_62 = arith.constant dense<0.000000e+00> : vector<16x32xf32>
    %194 = tpu.matmul %193, %180, %cst_62 {dimension_numbers = #tpu.dot_dimension_numbers<[1], [0], [0], [1], [0, 0, 1, 1], [], []>} : vector<16x16xbf16>, vector<16x32xbf16>, vector<16x32xf32> -> vector<16x32xf32>
    %195 = tpu.concatenate %54, %74, %94, %114, %134, %154, %174, %194 in 1 : vector<16x32xf32>, vector<16x32xf32>, vector<16x32xf32>, vector<16x32xf32>, vector<16x32xf32>, vector<16x32xf32>, vector<16x32xf32>, vector<16x32xf32> -> vector<16x256xf32>
    %196 = vector.extract_strided_slice %29 {offsets = [16, 0], sizes = [16, 256], strides = [1, 1]} : vector<48x256xf32> to vector<16x256xf32>
    %197 = vector.extract_strided_slice %30 {offsets = [16, 0], sizes = [16, 256], strides = [1, 1]} : vector<48x256xf32> to vector<16x256xf32>
    %198 = vector.extract_strided_slice %31 {offsets = [16, 0], sizes = [16, 256], strides = [1, 1]} : vector<48x256xf32> to vector<16x256xf32>
    %199 = vector.extract_strided_slice %196 {offsets = [0, 0], sizes = [16, 32], strides = [1, 1]} : vector<16x256xf32> to vector<16x32xf32>
    %200 = arith.truncf %199 : vector<16x32xf32> to vector<16x32xbf16>
    %201 = vector.extract_strided_slice %197 {offsets = [0, 0], sizes = [16, 32], strides = [1, 1]} : vector<16x256xf32> to vector<16x32xf32>
    %202 = arith.truncf %201 : vector<16x32xf32> to vector<16x32xbf16>
    %203 = vector.extract_strided_slice %198 {offsets = [0, 0], sizes = [16, 32], strides = [1, 1]} : vector<16x256xf32> to vector<16x32xf32>
    %204 = arith.truncf %203 : vector<16x32xf32> to vector<16x32xbf16>
    %cst_63 = arith.constant dense<0.000000e+00> : vector<16x16xf32>
    %205 = tpu.matmul %200, %202, %cst_63 {dimension_numbers = #tpu.dot_dimension_numbers<[1], [1], [0], [0], [0, 0, 1, 0], [], []>} : vector<16x32xbf16>, vector<16x32xbf16>, vector<16x16xf32> -> vector<16x16xf32>
    %cst_64 = arith.constant 0.176776692 : f32
    %206 = vector.broadcast %cst_64 : f32 to vector<16x16xf32>
    %207 = arith.mulf %205, %206 : vector<16x16xf32>
    %cst_65 = arith.constant dense<0xFF800000> : vector<16xf32>
    %208 = vector.multi_reduction <maximumf>, %207, %cst_65 [1] : vector<16x16xf32> to vector<16xf32>
    %209 = vector.shape_cast %208 : vector<16xf32> to vector<16x1xf32>
    %210 = vector.broadcast %209 : vector<16x1xf32> to vector<16x16xf32>
    %211 = arith.subf %207, %210 : vector<16x16xf32>
    %212 = math.exp %211 : vector<16x16xf32>
    %cst_66 = arith.constant dense<0.000000e+00> : vector<16xf32>
    %213 = vector.multi_reduction <add>, %212, %cst_66 [1] : vector<16x16xf32> to vector<16xf32>
    %214 = vector.shape_cast %213 : vector<16xf32> to vector<16x1xf32>
    %215 = vector.broadcast %214 : vector<16x1xf32> to vector<16x16xf32>
    %216 = arith.divf %212, %215 : vector<16x16xf32>
    %217 = arith.truncf %216 : vector<16x16xf32> to vector<16x16xbf16>
    %cst_67 = arith.constant dense<0.000000e+00> : vector<16x32xf32>
    %218 = tpu.matmul %217, %204, %cst_67 {dimension_numbers = #tpu.dot_dimension_numbers<[1], [0], [0], [1], [0, 0, 1, 1], [], []>} : vector<16x16xbf16>, vector<16x32xbf16>, vector<16x32xf32> -> vector<16x32xf32>
    %219 = vector.extract_strided_slice %196 {offsets = [0, 32], sizes = [16, 32], strides = [1, 1]} : vector<16x256xf32> to vector<16x32xf32>
    %220 = arith.truncf %219 : vector<16x32xf32> to vector<16x32xbf16>
    %221 = vector.extract_strided_slice %197 {offsets = [0, 32], sizes = [16, 32], strides = [1, 1]} : vector<16x256xf32> to vector<16x32xf32>
    %222 = arith.truncf %221 : vector<16x32xf32> to vector<16x32xbf16>
    %223 = vector.extract_strided_slice %198 {offsets = [0, 32], sizes = [16, 32], strides = [1, 1]} : vector<16x256xf32> to vector<16x32xf32>
    %224 = arith.truncf %223 : vector<16x32xf32> to vector<16x32xbf16>
    %cst_68 = arith.constant dense<0.000000e+00> : vector<16x16xf32>
    %225 = tpu.matmul %220, %222, %cst_68 {dimension_numbers = #tpu.dot_dimension_numbers<[1], [1], [0], [0], [0, 0, 1, 0], [], []>} : vector<16x32xbf16>, vector<16x32xbf16>, vector<16x16xf32> -> vector<16x16xf32>
    %cst_69 = arith.constant 0.176776692 : f32
    %226 = vector.broadcast %cst_69 : f32 to vector<16x16xf32>
    %227 = arith.mulf %225, %226 : vector<16x16xf32>
    %cst_70 = arith.constant dense<0xFF800000> : vector<16xf32>
    %228 = vector.multi_reduction <maximumf>, %227, %cst_70 [1] : vector<16x16xf32> to vector<16xf32>
    %229 = vector.shape_cast %228 : vector<16xf32> to vector<16x1xf32>
    %230 = vector.broadcast %229 : vector<16x1xf32> to vector<16x16xf32>
    %231 = arith.subf %227, %230 : vector<16x16xf32>
    %232 = math.exp %231 : vector<16x16xf32>
    %cst_71 = arith.constant dense<0.000000e+00> : vector<16xf32>
    %233 = vector.multi_reduction <add>, %232, %cst_71 [1] : vector<16x16xf32> to vector<16xf32>
    %234 = vector.shape_cast %233 : vector<16xf32> to vector<16x1xf32>
    %235 = vector.broadcast %234 : vector<16x1xf32> to vector<16x16xf32>
    %236 = arith.divf %232, %235 : vector<16x16xf32>
    %237 = arith.truncf %236 : vector<16x16xf32> to vector<16x16xbf16>
    %cst_72 = arith.constant dense<0.000000e+00> : vector<16x32xf32>
    %238 = tpu.matmul %237, %224, %cst_72 {dimension_numbers = #tpu.dot_dimension_numbers<[1], [0], [0], [1], [0, 0, 1, 1], [], []>} : vector<16x16xbf16>, vector<16x32xbf16>, vector<16x32xf32> -> vector<16x32xf32>
    %239 = vector.extract_strided_slice %196 {offsets = [0, 64], sizes = [16, 32], strides = [1, 1]} : vector<16x256xf32> to vector<16x32xf32>
    %240 = arith.truncf %239 : vector<16x32xf32> to vector<16x32xbf16>
    %241 = vector.extract_strided_slice %197 {offsets = [0, 64], sizes = [16, 32], strides = [1, 1]} : vector<16x256xf32> to vector<16x32xf32>
    %242 = arith.truncf %241 : vector<16x32xf32> to vector<16x32xbf16>
    %243 = vector.extract_strided_slice %198 {offsets = [0, 64], sizes = [16, 32], strides = [1, 1]} : vector<16x256xf32> to vector<16x32xf32>
    %244 = arith.truncf %243 : vector<16x32xf32> to vector<16x32xbf16>
    %cst_73 = arith.constant dense<0.000000e+00> : vector<16x16xf32>
    %245 = tpu.matmul %240, %242, %cst_73 {dimension_numbers = #tpu.dot_dimension_numbers<[1], [1], [0], [0], [0, 0, 1, 0], [], []>} : vector<16x32xbf16>, vector<16x32xbf16>, vector<16x16xf32> -> vector<16x16xf32>
    %cst_74 = arith.constant 0.176776692 : f32
    %246 = vector.broadcast %cst_74 : f32 to vector<16x16xf32>
    %247 = arith.mulf %245, %246 : vector<16x16xf32>
    %cst_75 = arith.constant dense<0xFF800000> : vector<16xf32>
    %248 = vector.multi_reduction <maximumf>, %247, %cst_75 [1] : vector<16x16xf32> to vector<16xf32>
    %249 = vector.shape_cast %248 : vector<16xf32> to vector<16x1xf32>
    %250 = vector.broadcast %249 : vector<16x1xf32> to vector<16x16xf32>
    %251 = arith.subf %247, %250 : vector<16x16xf32>
    %252 = math.exp %251 : vector<16x16xf32>
    %cst_76 = arith.constant dense<0.000000e+00> : vector<16xf32>
    %253 = vector.multi_reduction <add>, %252, %cst_76 [1] : vector<16x16xf32> to vector<16xf32>
    %254 = vector.shape_cast %253 : vector<16xf32> to vector<16x1xf32>
    %255 = vector.broadcast %254 : vector<16x1xf32> to vector<16x16xf32>
    %256 = arith.divf %252, %255 : vector<16x16xf32>
    %257 = arith.truncf %256 : vector<16x16xf32> to vector<16x16xbf16>
    %cst_77 = arith.constant dense<0.000000e+00> : vector<16x32xf32>
    %258 = tpu.matmul %257, %244, %cst_77 {dimension_numbers = #tpu.dot_dimension_numbers<[1], [0], [0], [1], [0, 0, 1, 1], [], []>} : vector<16x16xbf16>, vector<16x32xbf16>, vector<16x32xf32> -> vector<16x32xf32>
    %259 = vector.extract_strided_slice %196 {offsets = [0, 96], sizes = [16, 32], strides = [1, 1]} : vector<16x256xf32> to vector<16x32xf32>
    %260 = arith.truncf %259 : vector<16x32xf32> to vector<16x32xbf16>
    %261 = vector.extract_strided_slice %197 {offsets = [0, 96], sizes = [16, 32], strides = [1, 1]} : vector<16x256xf32> to vector<16x32xf32>
    %262 = arith.truncf %261 : vector<16x32xf32> to vector<16x32xbf16>
    %263 = vector.extract_strided_slice %198 {offsets = [0, 96], sizes = [16, 32], strides = [1, 1]} : vector<16x256xf32> to vector<16x32xf32>
    %264 = arith.truncf %263 : vector<16x32xf32> to vector<16x32xbf16>
    %cst_78 = arith.constant dense<0.000000e+00> : vector<16x16xf32>
    %265 = tpu.matmul %260, %262, %cst_78 {dimension_numbers = #tpu.dot_dimension_numbers<[1], [1], [0], [0], [0, 0, 1, 0], [], []>} : vector<16x32xbf16>, vector<16x32xbf16>, vector<16x16xf32> -> vector<16x16xf32>
    %cst_79 = arith.constant 0.176776692 : f32
    %266 = vector.broadcast %cst_79 : f32 to vector<16x16xf32>
    %267 = arith.mulf %265, %266 : vector<16x16xf32>
    %cst_80 = arith.constant dense<0xFF800000> : vector<16xf32>
    %268 = vector.multi_reduction <maximumf>, %267, %cst_80 [1] : vector<16x16xf32> to vector<16xf32>
    %269 = vector.shape_cast %268 : vector<16xf32> to vector<16x1xf32>
    %270 = vector.broadcast %269 : vector<16x1xf32> to vector<16x16xf32>
    %271 = arith.subf %267, %270 : vector<16x16xf32>
    %272 = math.exp %271 : vector<16x16xf32>
    %cst_81 = arith.constant dense<0.000000e+00> : vector<16xf32>
    %273 = vector.multi_reduction <add>, %272, %cst_81 [1] : vector<16x16xf32> to vector<16xf32>
    %274 = vector.shape_cast %273 : vector<16xf32> to vector<16x1xf32>
    %275 = vector.broadcast %274 : vector<16x1xf32> to vector<16x16xf32>
    %276 = arith.divf %272, %275 : vector<16x16xf32>
    %277 = arith.truncf %276 : vector<16x16xf32> to vector<16x16xbf16>
    %cst_82 = arith.constant dense<0.000000e+00> : vector<16x32xf32>
    %278 = tpu.matmul %277, %264, %cst_82 {dimension_numbers = #tpu.dot_dimension_numbers<[1], [0], [0], [1], [0, 0, 1, 1], [], []>} : vector<16x16xbf16>, vector<16x32xbf16>, vector<16x32xf32> -> vector<16x32xf32>
    %279 = vector.extract_strided_slice %196 {offsets = [0, 128], sizes = [16, 32], strides = [1, 1]} : vector<16x256xf32> to vector<16x32xf32>
    %280 = arith.truncf %279 : vector<16x32xf32> to vector<16x32xbf16>
    %281 = vector.extract_strided_slice %197 {offsets = [0, 128], sizes = [16, 32], strides = [1, 1]} : vector<16x256xf32> to vector<16x32xf32>
    %282 = arith.truncf %281 : vector<16x32xf32> to vector<16x32xbf16>
    %283 = vector.extract_strided_slice %198 {offsets = [0, 128], sizes = [16, 32], strides = [1, 1]} : vector<16x256xf32> to vector<16x32xf32>
    %284 = arith.truncf %283 : vector<16x32xf32> to vector<16x32xbf16>
    %cst_83 = arith.constant dense<0.000000e+00> : vector<16x16xf32>
    %285 = tpu.matmul %280, %282, %cst_83 {dimension_numbers = #tpu.dot_dimension_numbers<[1], [1], [0], [0], [0, 0, 1, 0], [], []>} : vector<16x32xbf16>, vector<16x32xbf16>, vector<16x16xf32> -> vector<16x16xf32>
    %cst_84 = arith.constant 0.176776692 : f32
    %286 = vector.broadcast %cst_84 : f32 to vector<16x16xf32>
    %287 = arith.mulf %285, %286 : vector<16x16xf32>
    %cst_85 = arith.constant dense<0xFF800000> : vector<16xf32>
    %288 = vector.multi_reduction <maximumf>, %287, %cst_85 [1] : vector<16x16xf32> to vector<16xf32>
    %289 = vector.shape_cast %288 : vector<16xf32> to vector<16x1xf32>
    %290 = vector.broadcast %289 : vector<16x1xf32> to vector<16x16xf32>
    %291 = arith.subf %287, %290 : vector<16x16xf32>
    %292 = math.exp %291 : vector<16x16xf32>
    %cst_86 = arith.constant dense<0.000000e+00> : vector<16xf32>
    %293 = vector.multi_reduction <add>, %292, %cst_86 [1] : vector<16x16xf32> to vector<16xf32>
    %294 = vector.shape_cast %293 : vector<16xf32> to vector<16x1xf32>
    %295 = vector.broadcast %294 : vector<16x1xf32> to vector<16x16xf32>
    %296 = arith.divf %292, %295 : vector<16x16xf32>
    %297 = arith.truncf %296 : vector<16x16xf32> to vector<16x16xbf16>
    %cst_87 = arith.constant dense<0.000000e+00> : vector<16x32xf32>
    %298 = tpu.matmul %297, %284, %cst_87 {dimension_numbers = #tpu.dot_dimension_numbers<[1], [0], [0], [1], [0, 0, 1, 1], [], []>} : vector<16x16xbf16>, vector<16x32xbf16>, vector<16x32xf32> -> vector<16x32xf32>
    %299 = vector.extract_strided_slice %196 {offsets = [0, 160], sizes = [16, 32], strides = [1, 1]} : vector<16x256xf32> to vector<16x32xf32>
    %300 = arith.truncf %299 : vector<16x32xf32> to vector<16x32xbf16>
    %301 = vector.extract_strided_slice %197 {offsets = [0, 160], sizes = [16, 32], strides = [1, 1]} : vector<16x256xf32> to vector<16x32xf32>
    %302 = arith.truncf %301 : vector<16x32xf32> to vector<16x32xbf16>
    %303 = vector.extract_strided_slice %198 {offsets = [0, 160], sizes = [16, 32], strides = [1, 1]} : vector<16x256xf32> to vector<16x32xf32>
    %304 = arith.truncf %303 : vector<16x32xf32> to vector<16x32xbf16>
    %cst_88 = arith.constant dense<0.000000e+00> : vector<16x16xf32>
    %305 = tpu.matmul %300, %302, %cst_88 {dimension_numbers = #tpu.dot_dimension_numbers<[1], [1], [0], [0], [0, 0, 1, 0], [], []>} : vector<16x32xbf16>, vector<16x32xbf16>, vector<16x16xf32> -> vector<16x16xf32>
    %cst_89 = arith.constant 0.176776692 : f32
    %306 = vector.broadcast %cst_89 : f32 to vector<16x16xf32>
    %307 = arith.mulf %305, %306 : vector<16x16xf32>
    %cst_90 = arith.constant dense<0xFF800000> : vector<16xf32>
    %308 = vector.multi_reduction <maximumf>, %307, %cst_90 [1] : vector<16x16xf32> to vector<16xf32>
    %309 = vector.shape_cast %308 : vector<16xf32> to vector<16x1xf32>
    %310 = vector.broadcast %309 : vector<16x1xf32> to vector<16x16xf32>
    %311 = arith.subf %307, %310 : vector<16x16xf32>
    %312 = math.exp %311 : vector<16x16xf32>
    %cst_91 = arith.constant dense<0.000000e+00> : vector<16xf32>
    %313 = vector.multi_reduction <add>, %312, %cst_91 [1] : vector<16x16xf32> to vector<16xf32>
    %314 = vector.shape_cast %313 : vector<16xf32> to vector<16x1xf32>
    %315 = vector.broadcast %314 : vector<16x1xf32> to vector<16x16xf32>
    %316 = arith.divf %312, %315 : vector<16x16xf32>
    %317 = arith.truncf %316 : vector<16x16xf32> to vector<16x16xbf16>
    %cst_92 = arith.constant dense<0.000000e+00> : vector<16x32xf32>
    %318 = tpu.matmul %317, %304, %cst_92 {dimension_numbers = #tpu.dot_dimension_numbers<[1], [0], [0], [1], [0, 0, 1, 1], [], []>} : vector<16x16xbf16>, vector<16x32xbf16>, vector<16x32xf32> -> vector<16x32xf32>
    %319 = vector.extract_strided_slice %196 {offsets = [0, 192], sizes = [16, 32], strides = [1, 1]} : vector<16x256xf32> to vector<16x32xf32>
    %320 = arith.truncf %319 : vector<16x32xf32> to vector<16x32xbf16>
    %321 = vector.extract_strided_slice %197 {offsets = [0, 192], sizes = [16, 32], strides = [1, 1]} : vector<16x256xf32> to vector<16x32xf32>
    %322 = arith.truncf %321 : vector<16x32xf32> to vector<16x32xbf16>
    %323 = vector.extract_strided_slice %198 {offsets = [0, 192], sizes = [16, 32], strides = [1, 1]} : vector<16x256xf32> to vector<16x32xf32>
    %324 = arith.truncf %323 : vector<16x32xf32> to vector<16x32xbf16>
    %cst_93 = arith.constant dense<0.000000e+00> : vector<16x16xf32>
    %325 = tpu.matmul %320, %322, %cst_93 {dimension_numbers = #tpu.dot_dimension_numbers<[1], [1], [0], [0], [0, 0, 1, 0], [], []>} : vector<16x32xbf16>, vector<16x32xbf16>, vector<16x16xf32> -> vector<16x16xf32>
    %cst_94 = arith.constant 0.176776692 : f32
    %326 = vector.broadcast %cst_94 : f32 to vector<16x16xf32>
    %327 = arith.mulf %325, %326 : vector<16x16xf32>
    %cst_95 = arith.constant dense<0xFF800000> : vector<16xf32>
    %328 = vector.multi_reduction <maximumf>, %327, %cst_95 [1] : vector<16x16xf32> to vector<16xf32>
    %329 = vector.shape_cast %328 : vector<16xf32> to vector<16x1xf32>
    %330 = vector.broadcast %329 : vector<16x1xf32> to vector<16x16xf32>
    %331 = arith.subf %327, %330 : vector<16x16xf32>
    %332 = math.exp %331 : vector<16x16xf32>
    %cst_96 = arith.constant dense<0.000000e+00> : vector<16xf32>
    %333 = vector.multi_reduction <add>, %332, %cst_96 [1] : vector<16x16xf32> to vector<16xf32>
    %334 = vector.shape_cast %333 : vector<16xf32> to vector<16x1xf32>
    %335 = vector.broadcast %334 : vector<16x1xf32> to vector<16x16xf32>
    %336 = arith.divf %332, %335 : vector<16x16xf32>
    %337 = arith.truncf %336 : vector<16x16xf32> to vector<16x16xbf16>
    %cst_97 = arith.constant dense<0.000000e+00> : vector<16x32xf32>
    %338 = tpu.matmul %337, %324, %cst_97 {dimension_numbers = #tpu.dot_dimension_numbers<[1], [0], [0], [1], [0, 0, 1, 1], [], []>} : vector<16x16xbf16>, vector<16x32xbf16>, vector<16x32xf32> -> vector<16x32xf32>
    %339 = vector.extract_strided_slice %196 {offsets = [0, 224], sizes = [16, 32], strides = [1, 1]} : vector<16x256xf32> to vector<16x32xf32>
    %340 = arith.truncf %339 : vector<16x32xf32> to vector<16x32xbf16>
    %341 = vector.extract_strided_slice %197 {offsets = [0, 224], sizes = [16, 32], strides = [1, 1]} : vector<16x256xf32> to vector<16x32xf32>
    %342 = arith.truncf %341 : vector<16x32xf32> to vector<16x32xbf16>
    %343 = vector.extract_strided_slice %198 {offsets = [0, 224], sizes = [16, 32], strides = [1, 1]} : vector<16x256xf32> to vector<16x32xf32>
    %344 = arith.truncf %343 : vector<16x32xf32> to vector<16x32xbf16>
    %cst_98 = arith.constant dense<0.000000e+00> : vector<16x16xf32>
    %345 = tpu.matmul %340, %342, %cst_98 {dimension_numbers = #tpu.dot_dimension_numbers<[1], [1], [0], [0], [0, 0, 1, 0], [], []>} : vector<16x32xbf16>, vector<16x32xbf16>, vector<16x16xf32> -> vector<16x16xf32>
    %cst_99 = arith.constant 0.176776692 : f32
    %346 = vector.broadcast %cst_99 : f32 to vector<16x16xf32>
    %347 = arith.mulf %345, %346 : vector<16x16xf32>
    %cst_100 = arith.constant dense<0xFF800000> : vector<16xf32>
    %348 = vector.multi_reduction <maximumf>, %347, %cst_100 [1] : vector<16x16xf32> to vector<16xf32>
    %349 = vector.shape_cast %348 : vector<16xf32> to vector<16x1xf32>
    %350 = vector.broadcast %349 : vector<16x1xf32> to vector<16x16xf32>
    %351 = arith.subf %347, %350 : vector<16x16xf32>
    %352 = math.exp %351 : vector<16x16xf32>
    %cst_101 = arith.constant dense<0.000000e+00> : vector<16xf32>
    %353 = vector.multi_reduction <add>, %352, %cst_101 [1] : vector<16x16xf32> to vector<16xf32>
    %354 = vector.shape_cast %353 : vector<16xf32> to vector<16x1xf32>
    %355 = vector.broadcast %354 : vector<16x1xf32> to vector<16x16xf32>
    %356 = arith.divf %352, %355 : vector<16x16xf32>
    %357 = arith.truncf %356 : vector<16x16xf32> to vector<16x16xbf16>
    %cst_102 = arith.constant dense<0.000000e+00> : vector<16x32xf32>
    %358 = tpu.matmul %357, %344, %cst_102 {dimension_numbers = #tpu.dot_dimension_numbers<[1], [0], [0], [1], [0, 0, 1, 1], [], []>} : vector<16x16xbf16>, vector<16x32xbf16>, vector<16x32xf32> -> vector<16x32xf32>
    %359 = tpu.concatenate %218, %238, %258, %278, %298, %318, %338, %358 in 1 : vector<16x32xf32>, vector<16x32xf32>, vector<16x32xf32>, vector<16x32xf32>, vector<16x32xf32>, vector<16x32xf32>, vector<16x32xf32>, vector<16x32xf32> -> vector<16x256xf32>
    %360 = vector.extract_strided_slice %29 {offsets = [32, 0], sizes = [8, 256], strides = [1, 1]} : vector<48x256xf32> to vector<8x256xf32>
    %361 = vector.extract_strided_slice %30 {offsets = [32, 0], sizes = [8, 256], strides = [1, 1]} : vector<48x256xf32> to vector<8x256xf32>
    %362 = vector.extract_strided_slice %31 {offsets = [32, 0], sizes = [8, 256], strides = [1, 1]} : vector<48x256xf32> to vector<8x256xf32>
    %363 = vector.extract_strided_slice %360 {offsets = [0, 0], sizes = [8, 32], strides = [1, 1]} : vector<8x256xf32> to vector<8x32xf32>
    %364 = arith.truncf %363 : vector<8x32xf32> to vector<8x32xbf16>
    %365 = vector.extract_strided_slice %361 {offsets = [0, 0], sizes = [8, 32], strides = [1, 1]} : vector<8x256xf32> to vector<8x32xf32>
    %366 = arith.truncf %365 : vector<8x32xf32> to vector<8x32xbf16>
    %367 = vector.extract_strided_slice %362 {offsets = [0, 0], sizes = [8, 32], strides = [1, 1]} : vector<8x256xf32> to vector<8x32xf32>
    %368 = arith.truncf %367 : vector<8x32xf32> to vector<8x32xbf16>
    %cst_103 = arith.constant dense<0.000000e+00> : vector<8x8xf32>
    %369 = tpu.matmul %364, %366, %cst_103 {dimension_numbers = #tpu.dot_dimension_numbers<[1], [1], [0], [0], [0, 0, 1, 0], [], []>} : vector<8x32xbf16>, vector<8x32xbf16>, vector<8x8xf32> -> vector<8x8xf32>
    %cst_104 = arith.constant 0.176776692 : f32
    %370 = vector.broadcast %cst_104 : f32 to vector<8x8xf32>
    %371 = arith.mulf %369, %370 : vector<8x8xf32>
    %cst_105 = arith.constant dense<0xFF800000> : vector<8xf32>
    %372 = vector.multi_reduction <maximumf>, %371, %cst_105 [1] : vector<8x8xf32> to vector<8xf32>
    %373 = vector.shape_cast %372 : vector<8xf32> to vector<8x1xf32>
    %374 = vector.broadcast %373 : vector<8x1xf32> to vector<8x8xf32>
    %375 = arith.subf %371, %374 : vector<8x8xf32>
    %376 = math.exp %375 : vector<8x8xf32>
    %cst_106 = arith.constant dense<0.000000e+00> : vector<8xf32>
    %377 = vector.multi_reduction <add>, %376, %cst_106 [1] : vector<8x8xf32> to vector<8xf32>
    %378 = vector.shape_cast %377 : vector<8xf32> to vector<8x1xf32>
    %379 = vector.broadcast %378 : vector<8x1xf32> to vector<8x8xf32>
    %380 = arith.divf %376, %379 : vector<8x8xf32>
    %381 = arith.truncf %380 : vector<8x8xf32> to vector<8x8xbf16>
    %cst_107 = arith.constant dense<0.000000e+00> : vector<8x32xf32>
    %382 = tpu.matmul %381, %368, %cst_107 {dimension_numbers = #tpu.dot_dimension_numbers<[1], [0], [0], [1], [0, 0, 1, 1], [], []>} : vector<8x8xbf16>, vector<8x32xbf16>, vector<8x32xf32> -> vector<8x32xf32>
    %383 = vector.extract_strided_slice %360 {offsets = [0, 32], sizes = [8, 32], strides = [1, 1]} : vector<8x256xf32> to vector<8x32xf32>
    %384 = arith.truncf %383 : vector<8x32xf32> to vector<8x32xbf16>
    %385 = vector.extract_strided_slice %361 {offsets = [0, 32], sizes = [8, 32], strides = [1, 1]} : vector<8x256xf32> to vector<8x32xf32>
    %386 = arith.truncf %385 : vector<8x32xf32> to vector<8x32xbf16>
    %387 = vector.extract_strided_slice %362 {offsets = [0, 32], sizes = [8, 32], strides = [1, 1]} : vector<8x256xf32> to vector<8x32xf32>
    %388 = arith.truncf %387 : vector<8x32xf32> to vector<8x32xbf16>
    %cst_108 = arith.constant dense<0.000000e+00> : vector<8x8xf32>
    %389 = tpu.matmul %384, %386, %cst_108 {dimension_numbers = #tpu.dot_dimension_numbers<[1], [1], [0], [0], [0, 0, 1, 0], [], []>} : vector<8x32xbf16>, vector<8x32xbf16>, vector<8x8xf32> -> vector<8x8xf32>
    %cst_109 = arith.constant 0.176776692 : f32
    %390 = vector.broadcast %cst_109 : f32 to vector<8x8xf32>
    %391 = arith.mulf %389, %390 : vector<8x8xf32>
    %cst_110 = arith.constant dense<0xFF800000> : vector<8xf32>
    %392 = vector.multi_reduction <maximumf>, %391, %cst_110 [1] : vector<8x8xf32> to vector<8xf32>
    %393 = vector.shape_cast %392 : vector<8xf32> to vector<8x1xf32>
    %394 = vector.broadcast %393 : vector<8x1xf32> to vector<8x8xf32>
    %395 = arith.subf %391, %394 : vector<8x8xf32>
    %396 = math.exp %395 : vector<8x8xf32>
    %cst_111 = arith.constant dense<0.000000e+00> : vector<8xf32>
    %397 = vector.multi_reduction <add>, %396, %cst_111 [1] : vector<8x8xf32> to vector<8xf32>
    %398 = vector.shape_cast %397 : vector<8xf32> to vector<8x1xf32>
    %399 = vector.broadcast %398 : vector<8x1xf32> to vector<8x8xf32>
    %400 = arith.divf %396, %399 : vector<8x8xf32>
    %401 = arith.truncf %400 : vector<8x8xf32> to vector<8x8xbf16>
    %cst_112 = arith.constant dense<0.000000e+00> : vector<8x32xf32>
    %402 = tpu.matmul %401, %388, %cst_112 {dimension_numbers = #tpu.dot_dimension_numbers<[1], [0], [0], [1], [0, 0, 1, 1], [], []>} : vector<8x8xbf16>, vector<8x32xbf16>, vector<8x32xf32> -> vector<8x32xf32>
    %403 = vector.extract_strided_slice %360 {offsets = [0, 64], sizes = [8, 32], strides = [1, 1]} : vector<8x256xf32> to vector<8x32xf32>
    %404 = arith.truncf %403 : vector<8x32xf32> to vector<8x32xbf16>
    %405 = vector.extract_strided_slice %361 {offsets = [0, 64], sizes = [8, 32], strides = [1, 1]} : vector<8x256xf32> to vector<8x32xf32>
    %406 = arith.truncf %405 : vector<8x32xf32> to vector<8x32xbf16>
    %407 = vector.extract_strided_slice %362 {offsets = [0, 64], sizes = [8, 32], strides = [1, 1]} : vector<8x256xf32> to vector<8x32xf32>
    %408 = arith.truncf %407 : vector<8x32xf32> to vector<8x32xbf16>
    %cst_113 = arith.constant dense<0.000000e+00> : vector<8x8xf32>
    %409 = tpu.matmul %404, %406, %cst_113 {dimension_numbers = #tpu.dot_dimension_numbers<[1], [1], [0], [0], [0, 0, 1, 0], [], []>} : vector<8x32xbf16>, vector<8x32xbf16>, vector<8x8xf32> -> vector<8x8xf32>
    %cst_114 = arith.constant 0.176776692 : f32
    %410 = vector.broadcast %cst_114 : f32 to vector<8x8xf32>
    %411 = arith.mulf %409, %410 : vector<8x8xf32>
    %cst_115 = arith.constant dense<0xFF800000> : vector<8xf32>
    %412 = vector.multi_reduction <maximumf>, %411, %cst_115 [1] : vector<8x8xf32> to vector<8xf32>
    %413 = vector.shape_cast %412 : vector<8xf32> to vector<8x1xf32>
    %414 = vector.broadcast %413 : vector<8x1xf32> to vector<8x8xf32>
    %415 = arith.subf %411, %414 : vector<8x8xf32>
    %416 = math.exp %415 : vector<8x8xf32>
    %cst_116 = arith.constant dense<0.000000e+00> : vector<8xf32>
    %417 = vector.multi_reduction <add>, %416, %cst_116 [1] : vector<8x8xf32> to vector<8xf32>
    %418 = vector.shape_cast %417 : vector<8xf32> to vector<8x1xf32>
    %419 = vector.broadcast %418 : vector<8x1xf32> to vector<8x8xf32>
    %420 = arith.divf %416, %419 : vector<8x8xf32>
    %421 = arith.truncf %420 : vector<8x8xf32> to vector<8x8xbf16>
    %cst_117 = arith.constant dense<0.000000e+00> : vector<8x32xf32>
    %422 = tpu.matmul %421, %408, %cst_117 {dimension_numbers = #tpu.dot_dimension_numbers<[1], [0], [0], [1], [0, 0, 1, 1], [], []>} : vector<8x8xbf16>, vector<8x32xbf16>, vector<8x32xf32> -> vector<8x32xf32>
    %423 = vector.extract_strided_slice %360 {offsets = [0, 96], sizes = [8, 32], strides = [1, 1]} : vector<8x256xf32> to vector<8x32xf32>
    %424 = arith.truncf %423 : vector<8x32xf32> to vector<8x32xbf16>
    %425 = vector.extract_strided_slice %361 {offsets = [0, 96], sizes = [8, 32], strides = [1, 1]} : vector<8x256xf32> to vector<8x32xf32>
    %426 = arith.truncf %425 : vector<8x32xf32> to vector<8x32xbf16>
    %427 = vector.extract_strided_slice %362 {offsets = [0, 96], sizes = [8, 32], strides = [1, 1]} : vector<8x256xf32> to vector<8x32xf32>
    %428 = arith.truncf %427 : vector<8x32xf32> to vector<8x32xbf16>
    %cst_118 = arith.constant dense<0.000000e+00> : vector<8x8xf32>
    %429 = tpu.matmul %424, %426, %cst_118 {dimension_numbers = #tpu.dot_dimension_numbers<[1], [1], [0], [0], [0, 0, 1, 0], [], []>} : vector<8x32xbf16>, vector<8x32xbf16>, vector<8x8xf32> -> vector<8x8xf32>
    %cst_119 = arith.constant 0.176776692 : f32
    %430 = vector.broadcast %cst_119 : f32 to vector<8x8xf32>
    %431 = arith.mulf %429, %430 : vector<8x8xf32>
    %cst_120 = arith.constant dense<0xFF800000> : vector<8xf32>
    %432 = vector.multi_reduction <maximumf>, %431, %cst_120 [1] : vector<8x8xf32> to vector<8xf32>
    %433 = vector.shape_cast %432 : vector<8xf32> to vector<8x1xf32>
    %434 = vector.broadcast %433 : vector<8x1xf32> to vector<8x8xf32>
    %435 = arith.subf %431, %434 : vector<8x8xf32>
    %436 = math.exp %435 : vector<8x8xf32>
    %cst_121 = arith.constant dense<0.000000e+00> : vector<8xf32>
    %437 = vector.multi_reduction <add>, %436, %cst_121 [1] : vector<8x8xf32> to vector<8xf32>
    %438 = vector.shape_cast %437 : vector<8xf32> to vector<8x1xf32>
    %439 = vector.broadcast %438 : vector<8x1xf32> to vector<8x8xf32>
    %440 = arith.divf %436, %439 : vector<8x8xf32>
    %441 = arith.truncf %440 : vector<8x8xf32> to vector<8x8xbf16>
    %cst_122 = arith.constant dense<0.000000e+00> : vector<8x32xf32>
    %442 = tpu.matmul %441, %428, %cst_122 {dimension_numbers = #tpu.dot_dimension_numbers<[1], [0], [0], [1], [0, 0, 1, 1], [], []>} : vector<8x8xbf16>, vector<8x32xbf16>, vector<8x32xf32> -> vector<8x32xf32>
    %443 = vector.extract_strided_slice %360 {offsets = [0, 128], sizes = [8, 32], strides = [1, 1]} : vector<8x256xf32> to vector<8x32xf32>
    %444 = arith.truncf %443 : vector<8x32xf32> to vector<8x32xbf16>
    %445 = vector.extract_strided_slice %361 {offsets = [0, 128], sizes = [8, 32], strides = [1, 1]} : vector<8x256xf32> to vector<8x32xf32>
    %446 = arith.truncf %445 : vector<8x32xf32> to vector<8x32xbf16>
    %447 = vector.extract_strided_slice %362 {offsets = [0, 128], sizes = [8, 32], strides = [1, 1]} : vector<8x256xf32> to vector<8x32xf32>
    %448 = arith.truncf %447 : vector<8x32xf32> to vector<8x32xbf16>
    %cst_123 = arith.constant dense<0.000000e+00> : vector<8x8xf32>
    %449 = tpu.matmul %444, %446, %cst_123 {dimension_numbers = #tpu.dot_dimension_numbers<[1], [1], [0], [0], [0, 0, 1, 0], [], []>} : vector<8x32xbf16>, vector<8x32xbf16>, vector<8x8xf32> -> vector<8x8xf32>
    %cst_124 = arith.constant 0.176776692 : f32
    %450 = vector.broadcast %cst_124 : f32 to vector<8x8xf32>
    %451 = arith.mulf %449, %450 : vector<8x8xf32>
    %cst_125 = arith.constant dense<0xFF800000> : vector<8xf32>
    %452 = vector.multi_reduction <maximumf>, %451, %cst_125 [1] : vector<8x8xf32> to vector<8xf32>
    %453 = vector.shape_cast %452 : vector<8xf32> to vector<8x1xf32>
    %454 = vector.broadcast %453 : vector<8x1xf32> to vector<8x8xf32>
    %455 = arith.subf %451, %454 : vector<8x8xf32>
    %456 = math.exp %455 : vector<8x8xf32>
    %cst_126 = arith.constant dense<0.000000e+00> : vector<8xf32>
    %457 = vector.multi_reduction <add>, %456, %cst_126 [1] : vector<8x8xf32> to vector<8xf32>
    %458 = vector.shape_cast %457 : vector<8xf32> to vector<8x1xf32>
    %459 = vector.broadcast %458 : vector<8x1xf32> to vector<8x8xf32>
    %460 = arith.divf %456, %459 : vector<8x8xf32>
    %461 = arith.truncf %460 : vector<8x8xf32> to vector<8x8xbf16>
    %cst_127 = arith.constant dense<0.000000e+00> : vector<8x32xf32>
    %462 = tpu.matmul %461, %448, %cst_127 {dimension_numbers = #tpu.dot_dimension_numbers<[1], [0], [0], [1], [0, 0, 1, 1], [], []>} : vector<8x8xbf16>, vector<8x32xbf16>, vector<8x32xf32> -> vector<8x32xf32>
    %463 = vector.extract_strided_slice %360 {offsets = [0, 160], sizes = [8, 32], strides = [1, 1]} : vector<8x256xf32> to vector<8x32xf32>
    %464 = arith.truncf %463 : vector<8x32xf32> to vector<8x32xbf16>
    %465 = vector.extract_strided_slice %361 {offsets = [0, 160], sizes = [8, 32], strides = [1, 1]} : vector<8x256xf32> to vector<8x32xf32>
    %466 = arith.truncf %465 : vector<8x32xf32> to vector<8x32xbf16>
    %467 = vector.extract_strided_slice %362 {offsets = [0, 160], sizes = [8, 32], strides = [1, 1]} : vector<8x256xf32> to vector<8x32xf32>
    %468 = arith.truncf %467 : vector<8x32xf32> to vector<8x32xbf16>
    %cst_128 = arith.constant dense<0.000000e+00> : vector<8x8xf32>
    %469 = tpu.matmul %464, %466, %cst_128 {dimension_numbers = #tpu.dot_dimension_numbers<[1], [1], [0], [0], [0, 0, 1, 0], [], []>} : vector<8x32xbf16>, vector<8x32xbf16>, vector<8x8xf32> -> vector<8x8xf32>
    %cst_129 = arith.constant 0.176776692 : f32
    %470 = vector.broadcast %cst_129 : f32 to vector<8x8xf32>
    %471 = arith.mulf %469, %470 : vector<8x8xf32>
    %cst_130 = arith.constant dense<0xFF800000> : vector<8xf32>
    %472 = vector.multi_reduction <maximumf>, %471, %cst_130 [1] : vector<8x8xf32> to vector<8xf32>
    %473 = vector.shape_cast %472 : vector<8xf32> to vector<8x1xf32>
    %474 = vector.broadcast %473 : vector<8x1xf32> to vector<8x8xf32>
    %475 = arith.subf %471, %474 : vector<8x8xf32>
    %476 = math.exp %475 : vector<8x8xf32>
    %cst_131 = arith.constant dense<0.000000e+00> : vector<8xf32>
    %477 = vector.multi_reduction <add>, %476, %cst_131 [1] : vector<8x8xf32> to vector<8xf32>
    %478 = vector.shape_cast %477 : vector<8xf32> to vector<8x1xf32>
    %479 = vector.broadcast %478 : vector<8x1xf32> to vector<8x8xf32>
    %480 = arith.divf %476, %479 : vector<8x8xf32>
    %481 = arith.truncf %480 : vector<8x8xf32> to vector<8x8xbf16>
    %cst_132 = arith.constant dense<0.000000e+00> : vector<8x32xf32>
    %482 = tpu.matmul %481, %468, %cst_132 {dimension_numbers = #tpu.dot_dimension_numbers<[1], [0], [0], [1], [0, 0, 1, 1], [], []>} : vector<8x8xbf16>, vector<8x32xbf16>, vector<8x32xf32> -> vector<8x32xf32>
    %483 = vector.extract_strided_slice %360 {offsets = [0, 192], sizes = [8, 32], strides = [1, 1]} : vector<8x256xf32> to vector<8x32xf32>
    %484 = arith.truncf %483 : vector<8x32xf32> to vector<8x32xbf16>
    %485 = vector.extract_strided_slice %361 {offsets = [0, 192], sizes = [8, 32], strides = [1, 1]} : vector<8x256xf32> to vector<8x32xf32>
    %486 = arith.truncf %485 : vector<8x32xf32> to vector<8x32xbf16>
    %487 = vector.extract_strided_slice %362 {offsets = [0, 192], sizes = [8, 32], strides = [1, 1]} : vector<8x256xf32> to vector<8x32xf32>
    %488 = arith.truncf %487 : vector<8x32xf32> to vector<8x32xbf16>
    %cst_133 = arith.constant dense<0.000000e+00> : vector<8x8xf32>
    %489 = tpu.matmul %484, %486, %cst_133 {dimension_numbers = #tpu.dot_dimension_numbers<[1], [1], [0], [0], [0, 0, 1, 0], [], []>} : vector<8x32xbf16>, vector<8x32xbf16>, vector<8x8xf32> -> vector<8x8xf32>
    %cst_134 = arith.constant 0.176776692 : f32
    %490 = vector.broadcast %cst_134 : f32 to vector<8x8xf32>
    %491 = arith.mulf %489, %490 : vector<8x8xf32>
    %cst_135 = arith.constant dense<0xFF800000> : vector<8xf32>
    %492 = vector.multi_reduction <maximumf>, %491, %cst_135 [1] : vector<8x8xf32> to vector<8xf32>
    %493 = vector.shape_cast %492 : vector<8xf32> to vector<8x1xf32>
    %494 = vector.broadcast %493 : vector<8x1xf32> to vector<8x8xf32>
    %495 = arith.subf %491, %494 : vector<8x8xf32>
    %496 = math.exp %495 : vector<8x8xf32>
    %cst_136 = arith.constant dense<0.000000e+00> : vector<8xf32>
    %497 = vector.multi_reduction <add>, %496, %cst_136 [1] : vector<8x8xf32> to vector<8xf32>
    %498 = vector.shape_cast %497 : vector<8xf32> to vector<8x1xf32>
    %499 = vector.broadcast %498 : vector<8x1xf32> to vector<8x8xf32>
    %500 = arith.divf %496, %499 : vector<8x8xf32>
    %501 = arith.truncf %500 : vector<8x8xf32> to vector<8x8xbf16>
    %cst_137 = arith.constant dense<0.000000e+00> : vector<8x32xf32>
    %502 = tpu.matmul %501, %488, %cst_137 {dimension_numbers = #tpu.dot_dimension_numbers<[1], [0], [0], [1], [0, 0, 1, 1], [], []>} : vector<8x8xbf16>, vector<8x32xbf16>, vector<8x32xf32> -> vector<8x32xf32>
    %503 = vector.extract_strided_slice %360 {offsets = [0, 224], sizes = [8, 32], strides = [1, 1]} : vector<8x256xf32> to vector<8x32xf32>
    %504 = arith.truncf %503 : vector<8x32xf32> to vector<8x32xbf16>
    %505 = vector.extract_strided_slice %361 {offsets = [0, 224], sizes = [8, 32], strides = [1, 1]} : vector<8x256xf32> to vector<8x32xf32>
    %506 = arith.truncf %505 : vector<8x32xf32> to vector<8x32xbf16>
    %507 = vector.extract_strided_slice %362 {offsets = [0, 224], sizes = [8, 32], strides = [1, 1]} : vector<8x256xf32> to vector<8x32xf32>
    %508 = arith.truncf %507 : vector<8x32xf32> to vector<8x32xbf16>
    %cst_138 = arith.constant dense<0.000000e+00> : vector<8x8xf32>
    %509 = tpu.matmul %504, %506, %cst_138 {dimension_numbers = #tpu.dot_dimension_numbers<[1], [1], [0], [0], [0, 0, 1, 0], [], []>} : vector<8x32xbf16>, vector<8x32xbf16>, vector<8x8xf32> -> vector<8x8xf32>
    %cst_139 = arith.constant 0.176776692 : f32
    %510 = vector.broadcast %cst_139 : f32 to vector<8x8xf32>
    %511 = arith.mulf %509, %510 : vector<8x8xf32>
    %cst_140 = arith.constant dense<0xFF800000> : vector<8xf32>
    %512 = vector.multi_reduction <maximumf>, %511, %cst_140 [1] : vector<8x8xf32> to vector<8xf32>
    %513 = vector.shape_cast %512 : vector<8xf32> to vector<8x1xf32>
    %514 = vector.broadcast %513 : vector<8x1xf32> to vector<8x8xf32>
    %515 = arith.subf %511, %514 : vector<8x8xf32>
    %516 = math.exp %515 : vector<8x8xf32>
    %cst_141 = arith.constant dense<0.000000e+00> : vector<8xf32>
    %517 = vector.multi_reduction <add>, %516, %cst_141 [1] : vector<8x8xf32> to vector<8xf32>
    %518 = vector.shape_cast %517 : vector<8xf32> to vector<8x1xf32>
    %519 = vector.broadcast %518 : vector<8x1xf32> to vector<8x8xf32>
    %520 = arith.divf %516, %519 : vector<8x8xf32>
    %521 = arith.truncf %520 : vector<8x8xf32> to vector<8x8xbf16>
    %cst_142 = arith.constant dense<0.000000e+00> : vector<8x32xf32>
    %522 = tpu.matmul %521, %508, %cst_142 {dimension_numbers = #tpu.dot_dimension_numbers<[1], [0], [0], [1], [0, 0, 1, 1], [], []>} : vector<8x8xbf16>, vector<8x32xbf16>, vector<8x32xf32> -> vector<8x32xf32>
    %523 = tpu.concatenate %382, %402, %422, %442, %462, %482, %502, %522 in 1 : vector<8x32xf32>, vector<8x32xf32>, vector<8x32xf32>, vector<8x32xf32>, vector<8x32xf32>, vector<8x32xf32>, vector<8x32xf32>, vector<8x32xf32> -> vector<8x256xf32>
    %524 = vector.extract_strided_slice %29 {offsets = [40, 0], sizes = [8, 256], strides = [1, 1]} : vector<48x256xf32> to vector<8x256xf32>
    %525 = vector.extract_strided_slice %30 {offsets = [40, 0], sizes = [8, 256], strides = [1, 1]} : vector<48x256xf32> to vector<8x256xf32>
    %526 = vector.extract_strided_slice %31 {offsets = [40, 0], sizes = [8, 256], strides = [1, 1]} : vector<48x256xf32> to vector<8x256xf32>
    %527 = vector.extract_strided_slice %524 {offsets = [0, 0], sizes = [8, 32], strides = [1, 1]} : vector<8x256xf32> to vector<8x32xf32>
    %528 = arith.truncf %527 : vector<8x32xf32> to vector<8x32xbf16>
    %529 = vector.extract_strided_slice %525 {offsets = [0, 0], sizes = [8, 32], strides = [1, 1]} : vector<8x256xf32> to vector<8x32xf32>
    %530 = arith.truncf %529 : vector<8x32xf32> to vector<8x32xbf16>
    %531 = vector.extract_strided_slice %526 {offsets = [0, 0], sizes = [8, 32], strides = [1, 1]} : vector<8x256xf32> to vector<8x32xf32>
    %532 = arith.truncf %531 : vector<8x32xf32> to vector<8x32xbf16>
    %cst_143 = arith.constant dense<0.000000e+00> : vector<8x8xf32>
    %533 = tpu.matmul %528, %530, %cst_143 {dimension_numbers = #tpu.dot_dimension_numbers<[1], [1], [0], [0], [0, 0, 1, 0], [], []>} : vector<8x32xbf16>, vector<8x32xbf16>, vector<8x8xf32> -> vector<8x8xf32>
    %cst_144 = arith.constant 0.176776692 : f32
    %534 = vector.broadcast %cst_144 : f32 to vector<8x8xf32>
    %535 = arith.mulf %533, %534 : vector<8x8xf32>
    %cst_145 = arith.constant dense<0xFF800000> : vector<8xf32>
    %536 = vector.multi_reduction <maximumf>, %535, %cst_145 [1] : vector<8x8xf32> to vector<8xf32>
    %537 = vector.shape_cast %536 : vector<8xf32> to vector<8x1xf32>
    %538 = vector.broadcast %537 : vector<8x1xf32> to vector<8x8xf32>
    %539 = arith.subf %535, %538 : vector<8x8xf32>
    %540 = math.exp %539 : vector<8x8xf32>
    %cst_146 = arith.constant dense<0.000000e+00> : vector<8xf32>
    %541 = vector.multi_reduction <add>, %540, %cst_146 [1] : vector<8x8xf32> to vector<8xf32>
    %542 = vector.shape_cast %541 : vector<8xf32> to vector<8x1xf32>
    %543 = vector.broadcast %542 : vector<8x1xf32> to vector<8x8xf32>
    %544 = arith.divf %540, %543 : vector<8x8xf32>
    %545 = arith.truncf %544 : vector<8x8xf32> to vector<8x8xbf16>
    %cst_147 = arith.constant dense<0.000000e+00> : vector<8x32xf32>
    %546 = tpu.matmul %545, %532, %cst_147 {dimension_numbers = #tpu.dot_dimension_numbers<[1], [0], [0], [1], [0, 0, 1, 1], [], []>} : vector<8x8xbf16>, vector<8x32xbf16>, vector<8x32xf32> -> vector<8x32xf32>
    %547 = vector.extract_strided_slice %524 {offsets = [0, 32], sizes = [8, 32], strides = [1, 1]} : vector<8x256xf32> to vector<8x32xf32>
    %548 = arith.truncf %547 : vector<8x32xf32> to vector<8x32xbf16>
    %549 = vector.extract_strided_slice %525 {offsets = [0, 32], sizes = [8, 32], strides = [1, 1]} : vector<8x256xf32> to vector<8x32xf32>
    %550 = arith.truncf %549 : vector<8x32xf32> to vector<8x32xbf16>
    %551 = vector.extract_strided_slice %526 {offsets = [0, 32], sizes = [8, 32], strides = [1, 1]} : vector<8x256xf32> to vector<8x32xf32>
    %552 = arith.truncf %551 : vector<8x32xf32> to vector<8x32xbf16>
    %cst_148 = arith.constant dense<0.000000e+00> : vector<8x8xf32>
    %553 = tpu.matmul %548, %550, %cst_148 {dimension_numbers = #tpu.dot_dimension_numbers<[1], [1], [0], [0], [0, 0, 1, 0], [], []>} : vector<8x32xbf16>, vector<8x32xbf16>, vector<8x8xf32> -> vector<8x8xf32>
    %cst_149 = arith.constant 0.176776692 : f32
    %554 = vector.broadcast %cst_149 : f32 to vector<8x8xf32>
    %555 = arith.mulf %553, %554 : vector<8x8xf32>
    %cst_150 = arith.constant dense<0xFF800000> : vector<8xf32>
    %556 = vector.multi_reduction <maximumf>, %555, %cst_150 [1] : vector<8x8xf32> to vector<8xf32>
    %557 = vector.shape_cast %556 : vector<8xf32> to vector<8x1xf32>
    %558 = vector.broadcast %557 : vector<8x1xf32> to vector<8x8xf32>
    %559 = arith.subf %555, %558 : vector<8x8xf32>
    %560 = math.exp %559 : vector<8x8xf32>
    %cst_151 = arith.constant dense<0.000000e+00> : vector<8xf32>
    %561 = vector.multi_reduction <add>, %560, %cst_151 [1] : vector<8x8xf32> to vector<8xf32>
    %562 = vector.shape_cast %561 : vector<8xf32> to vector<8x1xf32>
    %563 = vector.broadcast %562 : vector<8x1xf32> to vector<8x8xf32>
    %564 = arith.divf %560, %563 : vector<8x8xf32>
    %565 = arith.truncf %564 : vector<8x8xf32> to vector<8x8xbf16>
    %cst_152 = arith.constant dense<0.000000e+00> : vector<8x32xf32>
    %566 = tpu.matmul %565, %552, %cst_152 {dimension_numbers = #tpu.dot_dimension_numbers<[1], [0], [0], [1], [0, 0, 1, 1], [], []>} : vector<8x8xbf16>, vector<8x32xbf16>, vector<8x32xf32> -> vector<8x32xf32>
    %567 = vector.extract_strided_slice %524 {offsets = [0, 64], sizes = [8, 32], strides = [1, 1]} : vector<8x256xf32> to vector<8x32xf32>
    %568 = arith.truncf %567 : vector<8x32xf32> to vector<8x32xbf16>
    %569 = vector.extract_strided_slice %525 {offsets = [0, 64], sizes = [8, 32], strides = [1, 1]} : vector<8x256xf32> to vector<8x32xf32>
    %570 = arith.truncf %569 : vector<8x32xf32> to vector<8x32xbf16>
    %571 = vector.extract_strided_slice %526 {offsets = [0, 64], sizes = [8, 32], strides = [1, 1]} : vector<8x256xf32> to vector<8x32xf32>
    %572 = arith.truncf %571 : vector<8x32xf32> to vector<8x32xbf16>
    %cst_153 = arith.constant dense<0.000000e+00> : vector<8x8xf32>
    %573 = tpu.matmul %568, %570, %cst_153 {dimension_numbers = #tpu.dot_dimension_numbers<[1], [1], [0], [0], [0, 0, 1, 0], [], []>} : vector<8x32xbf16>, vector<8x32xbf16>, vector<8x8xf32> -> vector<8x8xf32>
    %cst_154 = arith.constant 0.176776692 : f32
    %574 = vector.broadcast %cst_154 : f32 to vector<8x8xf32>
    %575 = arith.mulf %573, %574 : vector<8x8xf32>
    %cst_155 = arith.constant dense<0xFF800000> : vector<8xf32>
    %576 = vector.multi_reduction <maximumf>, %575, %cst_155 [1] : vector<8x8xf32> to vector<8xf32>
    %577 = vector.shape_cast %576 : vector<8xf32> to vector<8x1xf32>
    %578 = vector.broadcast %577 : vector<8x1xf32> to vector<8x8xf32>
    %579 = arith.subf %575, %578 : vector<8x8xf32>
    %580 = math.exp %579 : vector<8x8xf32>
    %cst_156 = arith.constant dense<0.000000e+00> : vector<8xf32>
    %581 = vector.multi_reduction <add>, %580, %cst_156 [1] : vector<8x8xf32> to vector<8xf32>
    %582 = vector.shape_cast %581 : vector<8xf32> to vector<8x1xf32>
    %583 = vector.broadcast %582 : vector<8x1xf32> to vector<8x8xf32>
    %584 = arith.divf %580, %583 : vector<8x8xf32>
    %585 = arith.truncf %584 : vector<8x8xf32> to vector<8x8xbf16>
    %cst_157 = arith.constant dense<0.000000e+00> : vector<8x32xf32>
    %586 = tpu.matmul %585, %572, %cst_157 {dimension_numbers = #tpu.dot_dimension_numbers<[1], [0], [0], [1], [0, 0, 1, 1], [], []>} : vector<8x8xbf16>, vector<8x32xbf16>, vector<8x32xf32> -> vector<8x32xf32>
    %587 = vector.extract_strided_slice %524 {offsets = [0, 96], sizes = [8, 32], strides = [1, 1]} : vector<8x256xf32> to vector<8x32xf32>
    %588 = arith.truncf %587 : vector<8x32xf32> to vector<8x32xbf16>
    %589 = vector.extract_strided_slice %525 {offsets = [0, 96], sizes = [8, 32], strides = [1, 1]} : vector<8x256xf32> to vector<8x32xf32>
    %590 = arith.truncf %589 : vector<8x32xf32> to vector<8x32xbf16>
    %591 = vector.extract_strided_slice %526 {offsets = [0, 96], sizes = [8, 32], strides = [1, 1]} : vector<8x256xf32> to vector<8x32xf32>
    %592 = arith.truncf %591 : vector<8x32xf32> to vector<8x32xbf16>
    %cst_158 = arith.constant dense<0.000000e+00> : vector<8x8xf32>
    %593 = tpu.matmul %588, %590, %cst_158 {dimension_numbers = #tpu.dot_dimension_numbers<[1], [1], [0], [0], [0, 0, 1, 0], [], []>} : vector<8x32xbf16>, vector<8x32xbf16>, vector<8x8xf32> -> vector<8x8xf32>
    %cst_159 = arith.constant 0.176776692 : f32
    %594 = vector.broadcast %cst_159 : f32 to vector<8x8xf32>
    %595 = arith.mulf %593, %594 : vector<8x8xf32>
    %cst_160 = arith.constant dense<0xFF800000> : vector<8xf32>
    %596 = vector.multi_reduction <maximumf>, %595, %cst_160 [1] : vector<8x8xf32> to vector<8xf32>
    %597 = vector.shape_cast %596 : vector<8xf32> to vector<8x1xf32>
    %598 = vector.broadcast %597 : vector<8x1xf32> to vector<8x8xf32>
    %599 = arith.subf %595, %598 : vector<8x8xf32>
    %600 = math.exp %599 : vector<8x8xf32>
    %cst_161 = arith.constant dense<0.000000e+00> : vector<8xf32>
    %601 = vector.multi_reduction <add>, %600, %cst_161 [1] : vector<8x8xf32> to vector<8xf32>
    %602 = vector.shape_cast %601 : vector<8xf32> to vector<8x1xf32>
    %603 = vector.broadcast %602 : vector<8x1xf32> to vector<8x8xf32>
    %604 = arith.divf %600, %603 : vector<8x8xf32>
    %605 = arith.truncf %604 : vector<8x8xf32> to vector<8x8xbf16>
    %cst_162 = arith.constant dense<0.000000e+00> : vector<8x32xf32>
    %606 = tpu.matmul %605, %592, %cst_162 {dimension_numbers = #tpu.dot_dimension_numbers<[1], [0], [0], [1], [0, 0, 1, 1], [], []>} : vector<8x8xbf16>, vector<8x32xbf16>, vector<8x32xf32> -> vector<8x32xf32>
    %607 = vector.extract_strided_slice %524 {offsets = [0, 128], sizes = [8, 32], strides = [1, 1]} : vector<8x256xf32> to vector<8x32xf32>
    %608 = arith.truncf %607 : vector<8x32xf32> to vector<8x32xbf16>
    %609 = vector.extract_strided_slice %525 {offsets = [0, 128], sizes = [8, 32], strides = [1, 1]} : vector<8x256xf32> to vector<8x32xf32>
    %610 = arith.truncf %609 : vector<8x32xf32> to vector<8x32xbf16>
    %611 = vector.extract_strided_slice %526 {offsets = [0, 128], sizes = [8, 32], strides = [1, 1]} : vector<8x256xf32> to vector<8x32xf32>
    %612 = arith.truncf %611 : vector<8x32xf32> to vector<8x32xbf16>
    %cst_163 = arith.constant dense<0.000000e+00> : vector<8x8xf32>
    %613 = tpu.matmul %608, %610, %cst_163 {dimension_numbers = #tpu.dot_dimension_numbers<[1], [1], [0], [0], [0, 0, 1, 0], [], []>} : vector<8x32xbf16>, vector<8x32xbf16>, vector<8x8xf32> -> vector<8x8xf32>
    %cst_164 = arith.constant 0.176776692 : f32
    %614 = vector.broadcast %cst_164 : f32 to vector<8x8xf32>
    %615 = arith.mulf %613, %614 : vector<8x8xf32>
    %cst_165 = arith.constant dense<0xFF800000> : vector<8xf32>
    %616 = vector.multi_reduction <maximumf>, %615, %cst_165 [1] : vector<8x8xf32> to vector<8xf32>
    %617 = vector.shape_cast %616 : vector<8xf32> to vector<8x1xf32>
    %618 = vector.broadcast %617 : vector<8x1xf32> to vector<8x8xf32>
    %619 = arith.subf %615, %618 : vector<8x8xf32>
    %620 = math.exp %619 : vector<8x8xf32>
    %cst_166 = arith.constant dense<0.000000e+00> : vector<8xf32>
    %621 = vector.multi_reduction <add>, %620, %cst_166 [1] : vector<8x8xf32> to vector<8xf32>
    %622 = vector.shape_cast %621 : vector<8xf32> to vector<8x1xf32>
    %623 = vector.broadcast %622 : vector<8x1xf32> to vector<8x8xf32>
    %624 = arith.divf %620, %623 : vector<8x8xf32>
    %625 = arith.truncf %624 : vector<8x8xf32> to vector<8x8xbf16>
    %cst_167 = arith.constant dense<0.000000e+00> : vector<8x32xf32>
    %626 = tpu.matmul %625, %612, %cst_167 {dimension_numbers = #tpu.dot_dimension_numbers<[1], [0], [0], [1], [0, 0, 1, 1], [], []>} : vector<8x8xbf16>, vector<8x32xbf16>, vector<8x32xf32> -> vector<8x32xf32>
    %627 = vector.extract_strided_slice %524 {offsets = [0, 160], sizes = [8, 32], strides = [1, 1]} : vector<8x256xf32> to vector<8x32xf32>
    %628 = arith.truncf %627 : vector<8x32xf32> to vector<8x32xbf16>
    %629 = vector.extract_strided_slice %525 {offsets = [0, 160], sizes = [8, 32], strides = [1, 1]} : vector<8x256xf32> to vector<8x32xf32>
    %630 = arith.truncf %629 : vector<8x32xf32> to vector<8x32xbf16>
    %631 = vector.extract_strided_slice %526 {offsets = [0, 160], sizes = [8, 32], strides = [1, 1]} : vector<8x256xf32> to vector<8x32xf32>
    %632 = arith.truncf %631 : vector<8x32xf32> to vector<8x32xbf16>
    %cst_168 = arith.constant dense<0.000000e+00> : vector<8x8xf32>
    %633 = tpu.matmul %628, %630, %cst_168 {dimension_numbers = #tpu.dot_dimension_numbers<[1], [1], [0], [0], [0, 0, 1, 0], [], []>} : vector<8x32xbf16>, vector<8x32xbf16>, vector<8x8xf32> -> vector<8x8xf32>
    %cst_169 = arith.constant 0.176776692 : f32
    %634 = vector.broadcast %cst_169 : f32 to vector<8x8xf32>
    %635 = arith.mulf %633, %634 : vector<8x8xf32>
    %cst_170 = arith.constant dense<0xFF800000> : vector<8xf32>
    %636 = vector.multi_reduction <maximumf>, %635, %cst_170 [1] : vector<8x8xf32> to vector<8xf32>
    %637 = vector.shape_cast %636 : vector<8xf32> to vector<8x1xf32>
    %638 = vector.broadcast %637 : vector<8x1xf32> to vector<8x8xf32>
    %639 = arith.subf %635, %638 : vector<8x8xf32>
    %640 = math.exp %639 : vector<8x8xf32>
    %cst_171 = arith.constant dense<0.000000e+00> : vector<8xf32>
    %641 = vector.multi_reduction <add>, %640, %cst_171 [1] : vector<8x8xf32> to vector<8xf32>
    %642 = vector.shape_cast %641 : vector<8xf32> to vector<8x1xf32>
    %643 = vector.broadcast %642 : vector<8x1xf32> to vector<8x8xf32>
    %644 = arith.divf %640, %643 : vector<8x8xf32>
    %645 = arith.truncf %644 : vector<8x8xf32> to vector<8x8xbf16>
    %cst_172 = arith.constant dense<0.000000e+00> : vector<8x32xf32>
    %646 = tpu.matmul %645, %632, %cst_172 {dimension_numbers = #tpu.dot_dimension_numbers<[1], [0], [0], [1], [0, 0, 1, 1], [], []>} : vector<8x8xbf16>, vector<8x32xbf16>, vector<8x32xf32> -> vector<8x32xf32>
    %647 = vector.extract_strided_slice %524 {offsets = [0, 192], sizes = [8, 32], strides = [1, 1]} : vector<8x256xf32> to vector<8x32xf32>
    %648 = arith.truncf %647 : vector<8x32xf32> to vector<8x32xbf16>
    %649 = vector.extract_strided_slice %525 {offsets = [0, 192], sizes = [8, 32], strides = [1, 1]} : vector<8x256xf32> to vector<8x32xf32>
    %650 = arith.truncf %649 : vector<8x32xf32> to vector<8x32xbf16>
    %651 = vector.extract_strided_slice %526 {offsets = [0, 192], sizes = [8, 32], strides = [1, 1]} : vector<8x256xf32> to vector<8x32xf32>
    %652 = arith.truncf %651 : vector<8x32xf32> to vector<8x32xbf16>
    %cst_173 = arith.constant dense<0.000000e+00> : vector<8x8xf32>
    %653 = tpu.matmul %648, %650, %cst_173 {dimension_numbers = #tpu.dot_dimension_numbers<[1], [1], [0], [0], [0, 0, 1, 0], [], []>} : vector<8x32xbf16>, vector<8x32xbf16>, vector<8x8xf32> -> vector<8x8xf32>
    %cst_174 = arith.constant 0.176776692 : f32
    %654 = vector.broadcast %cst_174 : f32 to vector<8x8xf32>
    %655 = arith.mulf %653, %654 : vector<8x8xf32>
    %cst_175 = arith.constant dense<0xFF800000> : vector<8xf32>
    %656 = vector.multi_reduction <maximumf>, %655, %cst_175 [1] : vector<8x8xf32> to vector<8xf32>
    %657 = vector.shape_cast %656 : vector<8xf32> to vector<8x1xf32>
    %658 = vector.broadcast %657 : vector<8x1xf32> to vector<8x8xf32>
    %659 = arith.subf %655, %658 : vector<8x8xf32>
    %660 = math.exp %659 : vector<8x8xf32>
    %cst_176 = arith.constant dense<0.000000e+00> : vector<8xf32>
    %661 = vector.multi_reduction <add>, %660, %cst_176 [1] : vector<8x8xf32> to vector<8xf32>
    %662 = vector.shape_cast %661 : vector<8xf32> to vector<8x1xf32>
    %663 = vector.broadcast %662 : vector<8x1xf32> to vector<8x8xf32>
    %664 = arith.divf %660, %663 : vector<8x8xf32>
    %665 = arith.truncf %664 : vector<8x8xf32> to vector<8x8xbf16>
    %cst_177 = arith.constant dense<0.000000e+00> : vector<8x32xf32>
    %666 = tpu.matmul %665, %652, %cst_177 {dimension_numbers = #tpu.dot_dimension_numbers<[1], [0], [0], [1], [0, 0, 1, 1], [], []>} : vector<8x8xbf16>, vector<8x32xbf16>, vector<8x32xf32> -> vector<8x32xf32>
    %667 = vector.extract_strided_slice %524 {offsets = [0, 224], sizes = [8, 32], strides = [1, 1]} : vector<8x256xf32> to vector<8x32xf32>
    %668 = arith.truncf %667 : vector<8x32xf32> to vector<8x32xbf16>
    %669 = vector.extract_strided_slice %525 {offsets = [0, 224], sizes = [8, 32], strides = [1, 1]} : vector<8x256xf32> to vector<8x32xf32>
    %670 = arith.truncf %669 : vector<8x32xf32> to vector<8x32xbf16>
    %671 = vector.extract_strided_slice %526 {offsets = [0, 224], sizes = [8, 32], strides = [1, 1]} : vector<8x256xf32> to vector<8x32xf32>
    %672 = arith.truncf %671 : vector<8x32xf32> to vector<8x32xbf16>
    %cst_178 = arith.constant dense<0.000000e+00> : vector<8x8xf32>
    %673 = tpu.matmul %668, %670, %cst_178 {dimension_numbers = #tpu.dot_dimension_numbers<[1], [1], [0], [0], [0, 0, 1, 0], [], []>} : vector<8x32xbf16>, vector<8x32xbf16>, vector<8x8xf32> -> vector<8x8xf32>
    %cst_179 = arith.constant 0.176776692 : f32
    %674 = vector.broadcast %cst_179 : f32 to vector<8x8xf32>
    %675 = arith.mulf %673, %674 : vector<8x8xf32>
    %cst_180 = arith.constant dense<0xFF800000> : vector<8xf32>
    %676 = vector.multi_reduction <maximumf>, %675, %cst_180 [1] : vector<8x8xf32> to vector<8xf32>
    %677 = vector.shape_cast %676 : vector<8xf32> to vector<8x1xf32>
    %678 = vector.broadcast %677 : vector<8x1xf32> to vector<8x8xf32>
    %679 = arith.subf %675, %678 : vector<8x8xf32>
    %680 = math.exp %679 : vector<8x8xf32>
    %cst_181 = arith.constant dense<0.000000e+00> : vector<8xf32>
    %681 = vector.multi_reduction <add>, %680, %cst_181 [1] : vector<8x8xf32> to vector<8xf32>
    %682 = vector.shape_cast %681 : vector<8xf32> to vector<8x1xf32>
    %683 = vector.broadcast %682 : vector<8x1xf32> to vector<8x8xf32>
    %684 = arith.divf %680, %683 : vector<8x8xf32>
    %685 = arith.truncf %684 : vector<8x8xf32> to vector<8x8xbf16>
    %cst_182 = arith.constant dense<0.000000e+00> : vector<8x32xf32>
    %686 = tpu.matmul %685, %672, %cst_182 {dimension_numbers = #tpu.dot_dimension_numbers<[1], [0], [0], [1], [0, 0, 1, 1], [], []>} : vector<8x8xbf16>, vector<8x32xbf16>, vector<8x32xf32> -> vector<8x32xf32>
    %687 = tpu.concatenate %546, %566, %586, %606, %626, %646, %666, %686 in 1 : vector<8x32xf32>, vector<8x32xf32>, vector<8x32xf32>, vector<8x32xf32>, vector<8x32xf32>, vector<8x32xf32>, vector<8x32xf32>, vector<8x32xf32> -> vector<8x256xf32>
    %688 = tpu.concatenate %195, %359, %523, %687 in 0 : vector<16x256xf32>, vector<16x256xf32>, vector<8x256xf32>, vector<8x256xf32> -> vector<48x256xf32>
    %c0_183 = arith.constant 0 : index
    %c0_184 = arith.constant 0 : index
    %689 = vector.load %arg11[%c0_183, %c0_184] : memref<256x256xbf16, #tpu.memory_space<vmem>>, vector<256x256xbf16>
    %690 = arith.truncf %688 : vector<48x256xf32> to vector<48x256xbf16>
    %cst_185 = arith.constant dense<0.000000e+00> : vector<48x256xf32>
    %691 = tpu.matmul %690, %689, %cst_185 {dimension_numbers = #tpu.dot_dimension_numbers<[1], [0], [0], [1], [0, 0, 1, 1], [], []>} : vector<48x256xbf16>, vector<256x256xbf16>, vector<48x256xf32> -> vector<48x256xf32>
    %692 = arith.addf %22, %691 : vector<48x256xf32>
    %c0_186 = arith.constant 0 : index
    %c0_187 = arith.constant 0 : index
    %693 = vector.load %arg12[%c0_186, %c0_187] : memref<1x256xf32, #tpu.memory_space<vmem>>, vector<1x256xf32>
    %694 = vector.broadcast %693 : vector<1x256xf32> to vector<48x256xf32>
    %695 = arith.addf %692, %694 : vector<48x256xf32>
    %c0_188 = arith.constant 0 : index
    %c0_189 = arith.constant 0 : index
    %696 = vector.load %arg13[%c0_188, %c0_189] : memref<1x256xf32, #tpu.memory_space<vmem>>, vector<1x256xf32>
    %c0_190 = arith.constant 0 : index
    %c0_191 = arith.constant 0 : index
    %697 = vector.load %arg14[%c0_190, %c0_191] : memref<1x256xf32, #tpu.memory_space<vmem>>, vector<1x256xf32>
    %cst_192 = arith.constant dense<0.000000e+00> : vector<48xf32>
    %698 = vector.multi_reduction <add>, %695, %cst_192 [1] : vector<48x256xf32> to vector<48xf32>
    %699 = vector.shape_cast %698 : vector<48xf32> to vector<48x1xf32>
    %cst_193 = arith.constant 2.560000e+02 : f32
    %700 = vector.broadcast %cst_193 : f32 to vector<48x1xf32>
    %701 = arith.divf %699, %700 : vector<48x1xf32>
    %702 = vector.broadcast %701 : vector<48x1xf32> to vector<48x256xf32>
    %703 = arith.subf %695, %702 : vector<48x256xf32>
    %704 = arith.mulf %703, %703 : vector<48x256xf32>
    %cst_194 = arith.constant dense<0.000000e+00> : vector<48xf32>
    %705 = vector.multi_reduction <add>, %704, %cst_194 [1] : vector<48x256xf32> to vector<48xf32>
    %706 = vector.shape_cast %705 : vector<48xf32> to vector<48x1xf32>
    %cst_195 = arith.constant 2.560000e+02 : f32
    %707 = vector.broadcast %cst_195 : f32 to vector<48x1xf32>
    %708 = arith.divf %706, %707 : vector<48x1xf32>
    %cst_196 = arith.constant 9.99999974E-6 : f32
    %709 = vector.broadcast %cst_196 : f32 to vector<48x1xf32>
    %710 = arith.addf %708, %709 : vector<48x1xf32>
    %711 = math.rsqrt %710 : vector<48x1xf32>
    %712 = vector.broadcast %711 : vector<48x1xf32> to vector<48x256xf32>
    %713 = arith.mulf %703, %712 : vector<48x256xf32>
    %714 = vector.broadcast %696 : vector<1x256xf32> to vector<48x256xf32>
    %715 = arith.mulf %713, %714 : vector<48x256xf32>
    %716 = vector.broadcast %697 : vector<1x256xf32> to vector<48x256xf32>
    %717 = arith.addf %715, %716 : vector<48x256xf32>
    %c0_197 = arith.constant 0 : index
    %c0_198 = arith.constant 0 : index
    %718 = vector.load %arg15[%c0_197, %c0_198] : memref<256x256xbf16, #tpu.memory_space<vmem>>, vector<256x256xbf16>
    %719 = arith.truncf %717 : vector<48x256xf32> to vector<48x256xbf16>
    %cst_199 = arith.constant dense<0.000000e+00> : vector<48x256xf32>
    %720 = tpu.matmul %719, %718, %cst_199 {dimension_numbers = #tpu.dot_dimension_numbers<[1], [0], [0], [1], [0, 0, 1, 1], [], []>} : vector<48x256xbf16>, vector<256x256xbf16>, vector<48x256xf32> -> vector<48x256xf32>
    %c0_200 = arith.constant 0 : index
    %c0_201 = arith.constant 0 : index
    %721 = vector.load %arg16[%c0_200, %c0_201] : memref<1x256xf32, #tpu.memory_space<vmem>>, vector<1x256xf32>
    %722 = vector.broadcast %721 : vector<1x256xf32> to vector<48x256xf32>
    %723 = arith.addf %720, %722 : vector<48x256xf32>
    %cst_202 = arith.constant 0.000000e+00 : f32
    %724 = vector.broadcast %cst_202 : f32 to vector<48x256xf32>
    %725 = arith.maximumf %723, %724 : vector<48x256xf32>
    %c0_203 = arith.constant 0 : index
    %c0_204 = arith.constant 0 : index
    %726 = vector.load %arg17[%c0_203, %c0_204] : memref<256x256xbf16, #tpu.memory_space<vmem>>, vector<256x256xbf16>
    %727 = arith.truncf %725 : vector<48x256xf32> to vector<48x256xbf16>
    %cst_205 = arith.constant dense<0.000000e+00> : vector<48x256xf32>
    %728 = tpu.matmul %727, %726, %cst_205 {dimension_numbers = #tpu.dot_dimension_numbers<[1], [0], [0], [1], [0, 0, 1, 1], [], []>} : vector<48x256xbf16>, vector<256x256xbf16>, vector<48x256xf32> -> vector<48x256xf32>
    %729 = arith.addf %717, %728 : vector<48x256xf32>
    %c0_206 = arith.constant 0 : index
    %c0_207 = arith.constant 0 : index
    %730 = vector.load %arg18[%c0_206, %c0_207] : memref<1x256xf32, #tpu.memory_space<vmem>>, vector<1x256xf32>
    %731 = vector.broadcast %730 : vector<1x256xf32> to vector<48x256xf32>
    %732 = arith.addf %729, %731 : vector<48x256xf32>
    %c0_208 = arith.constant 0 : index
    %c0_209 = arith.constant 0 : index
    %733 = vector.load %arg19[%c0_208, %c0_209] : memref<1x256xf32, #tpu.memory_space<vmem>>, vector<1x256xf32>
    %c0_210 = arith.constant 0 : index
    %c0_211 = arith.constant 0 : index
    %734 = vector.load %arg20[%c0_210, %c0_211] : memref<1x256xf32, #tpu.memory_space<vmem>>, vector<1x256xf32>
    %cst_212 = arith.constant dense<0.000000e+00> : vector<48xf32>
    %735 = vector.multi_reduction <add>, %732, %cst_212 [1] : vector<48x256xf32> to vector<48xf32>
    %736 = vector.shape_cast %735 : vector<48xf32> to vector<48x1xf32>
    %cst_213 = arith.constant 2.560000e+02 : f32
    %737 = vector.broadcast %cst_213 : f32 to vector<48x1xf32>
    %738 = arith.divf %736, %737 : vector<48x1xf32>
    %739 = vector.broadcast %738 : vector<48x1xf32> to vector<48x256xf32>
    %740 = arith.subf %732, %739 : vector<48x256xf32>
    %741 = arith.mulf %740, %740 : vector<48x256xf32>
    %cst_214 = arith.constant dense<0.000000e+00> : vector<48xf32>
    %742 = vector.multi_reduction <add>, %741, %cst_214 [1] : vector<48x256xf32> to vector<48xf32>
    %743 = vector.shape_cast %742 : vector<48xf32> to vector<48x1xf32>
    %cst_215 = arith.constant 2.560000e+02 : f32
    %744 = vector.broadcast %cst_215 : f32 to vector<48x1xf32>
    %745 = arith.divf %743, %744 : vector<48x1xf32>
    %cst_216 = arith.constant 9.99999974E-6 : f32
    %746 = vector.broadcast %cst_216 : f32 to vector<48x1xf32>
    %747 = arith.addf %745, %746 : vector<48x1xf32>
    %748 = math.rsqrt %747 : vector<48x1xf32>
    %749 = vector.broadcast %748 : vector<48x1xf32> to vector<48x256xf32>
    %750 = arith.mulf %740, %749 : vector<48x256xf32>
    %751 = vector.broadcast %733 : vector<1x256xf32> to vector<48x256xf32>
    %752 = arith.mulf %750, %751 : vector<48x256xf32>
    %753 = vector.broadcast %734 : vector<1x256xf32> to vector<48x256xf32>
    %754 = arith.addf %752, %753 : vector<48x256xf32>
    %755 = vector.extract_strided_slice %754 {offsets = [0, 0], sizes = [32, 256], strides = [1, 1]} : vector<48x256xf32> to vector<32x256xf32>
    %756 = vector.extract_strided_slice %754 {offsets = [32, 0], sizes = [16, 256], strides = [1, 1]} : vector<48x256xf32> to vector<16x256xf32>
    %c0_217 = arith.constant 0 : index
    %c0_218 = arith.constant 0 : index
    %757 = vector.load %arg21[%c0_217, %c0_218] : memref<256x256xbf16, #tpu.memory_space<vmem>>, vector<256x256xbf16>
    %758 = arith.truncf %755 : vector<32x256xf32> to vector<32x256xbf16>
    %cst_219 = arith.constant dense<0.000000e+00> : vector<32x256xf32>
    %759 = tpu.matmul %758, %757, %cst_219 {dimension_numbers = #tpu.dot_dimension_numbers<[1], [0], [0], [1], [0, 0, 1, 1], [], []>} : vector<32x256xbf16>, vector<256x256xbf16>, vector<32x256xf32> -> vector<32x256xf32>
    %c0_220 = arith.constant 0 : index
    %c0_221 = arith.constant 0 : index
    %760 = vector.load %arg22[%c0_220, %c0_221] : memref<1x256xf32, #tpu.memory_space<vmem>>, vector<1x256xf32>
    %761 = vector.broadcast %760 : vector<1x256xf32> to vector<32x256xf32>
    %762 = arith.addf %759, %761 : vector<32x256xf32>
    %c0_222 = arith.constant 0 : index
    %c0_223 = arith.constant 0 : index
    %763 = vector.load %arg23[%c0_222, %c0_223] : memref<256x512xbf16, #tpu.memory_space<vmem>>, vector<256x512xbf16>
    %764 = arith.truncf %756 : vector<16x256xf32> to vector<16x256xbf16>
    %cst_224 = arith.constant dense<0.000000e+00> : vector<16x512xf32>
    %765 = tpu.matmul %764, %763, %cst_224 {dimension_numbers = #tpu.dot_dimension_numbers<[1], [0], [0], [1], [0, 0, 1, 1], [], []>} : vector<16x256xbf16>, vector<256x512xbf16>, vector<16x512xf32> -> vector<16x512xf32>
    %c0_225 = arith.constant 0 : index
    %c0_226 = arith.constant 0 : index
    %766 = vector.load %arg24[%c0_225, %c0_226] : memref<1x512xf32, #tpu.memory_space<vmem>>, vector<1x512xf32>
    %767 = vector.broadcast %766 : vector<1x512xf32> to vector<16x512xf32>
    %768 = arith.addf %765, %767 : vector<16x512xf32>
    %769 = vector.extract_strided_slice %768 {offsets = [0, 0], sizes = [16, 256], strides = [1, 1]} : vector<16x512xf32> to vector<16x256xf32>
    %770 = vector.extract_strided_slice %768 {offsets = [0, 256], sizes = [16, 256], strides = [1, 1]} : vector<16x512xf32> to vector<16x256xf32>
    %771 = vector.extract_strided_slice %762 {offsets = [0, 0], sizes = [16, 256], strides = [1, 1]} : vector<32x256xf32> to vector<16x256xf32>
    %772 = vector.extract_strided_slice %769 {offsets = [0, 0], sizes = [8, 256], strides = [1, 1]} : vector<16x256xf32> to vector<8x256xf32>
    %773 = vector.extract_strided_slice %770 {offsets = [0, 0], sizes = [8, 256], strides = [1, 1]} : vector<16x256xf32> to vector<8x256xf32>
    %774 = vector.extract_strided_slice %771 {offsets = [0, 0], sizes = [16, 32], strides = [1, 1]} : vector<16x256xf32> to vector<16x32xf32>
    %775 = arith.truncf %774 : vector<16x32xf32> to vector<16x32xbf16>
    %776 = vector.extract_strided_slice %772 {offsets = [0, 0], sizes = [8, 32], strides = [1, 1]} : vector<8x256xf32> to vector<8x32xf32>
    %777 = arith.truncf %776 : vector<8x32xf32> to vector<8x32xbf16>
    %778 = vector.extract_strided_slice %773 {offsets = [0, 0], sizes = [8, 32], strides = [1, 1]} : vector<8x256xf32> to vector<8x32xf32>
    %779 = arith.truncf %778 : vector<8x32xf32> to vector<8x32xbf16>
    %cst_227 = arith.constant dense<0.000000e+00> : vector<16x8xf32>
    %780 = tpu.matmul %775, %777, %cst_227 {dimension_numbers = #tpu.dot_dimension_numbers<[1], [1], [0], [0], [0, 0, 1, 0], [], []>} : vector<16x32xbf16>, vector<8x32xbf16>, vector<16x8xf32> -> vector<16x8xf32>
    %cst_228 = arith.constant 0.176776692 : f32
    %781 = vector.broadcast %cst_228 : f32 to vector<16x8xf32>
    %782 = arith.mulf %780, %781 : vector<16x8xf32>
    %cst_229 = arith.constant dense<0xFF800000> : vector<16xf32>
    %783 = vector.multi_reduction <maximumf>, %782, %cst_229 [1] : vector<16x8xf32> to vector<16xf32>
    %784 = vector.shape_cast %783 : vector<16xf32> to vector<16x1xf32>
    %785 = vector.broadcast %784 : vector<16x1xf32> to vector<16x8xf32>
    %786 = arith.subf %782, %785 : vector<16x8xf32>
    %787 = math.exp %786 : vector<16x8xf32>
    %cst_230 = arith.constant dense<0.000000e+00> : vector<16xf32>
    %788 = vector.multi_reduction <add>, %787, %cst_230 [1] : vector<16x8xf32> to vector<16xf32>
    %789 = vector.shape_cast %788 : vector<16xf32> to vector<16x1xf32>
    %790 = vector.broadcast %789 : vector<16x1xf32> to vector<16x8xf32>
    %791 = arith.divf %787, %790 : vector<16x8xf32>
    %792 = arith.truncf %791 : vector<16x8xf32> to vector<16x8xbf16>
    %cst_231 = arith.constant dense<0.000000e+00> : vector<16x32xf32>
    %793 = tpu.matmul %792, %779, %cst_231 {dimension_numbers = #tpu.dot_dimension_numbers<[1], [0], [0], [1], [0, 0, 1, 1], [], []>} : vector<16x8xbf16>, vector<8x32xbf16>, vector<16x32xf32> -> vector<16x32xf32>
    %794 = vector.extract_strided_slice %771 {offsets = [0, 32], sizes = [16, 32], strides = [1, 1]} : vector<16x256xf32> to vector<16x32xf32>
    %795 = arith.truncf %794 : vector<16x32xf32> to vector<16x32xbf16>
    %796 = vector.extract_strided_slice %772 {offsets = [0, 32], sizes = [8, 32], strides = [1, 1]} : vector<8x256xf32> to vector<8x32xf32>
    %797 = arith.truncf %796 : vector<8x32xf32> to vector<8x32xbf16>
    %798 = vector.extract_strided_slice %773 {offsets = [0, 32], sizes = [8, 32], strides = [1, 1]} : vector<8x256xf32> to vector<8x32xf32>
    %799 = arith.truncf %798 : vector<8x32xf32> to vector<8x32xbf16>
    %cst_232 = arith.constant dense<0.000000e+00> : vector<16x8xf32>
    %800 = tpu.matmul %795, %797, %cst_232 {dimension_numbers = #tpu.dot_dimension_numbers<[1], [1], [0], [0], [0, 0, 1, 0], [], []>} : vector<16x32xbf16>, vector<8x32xbf16>, vector<16x8xf32> -> vector<16x8xf32>
    %cst_233 = arith.constant 0.176776692 : f32
    %801 = vector.broadcast %cst_233 : f32 to vector<16x8xf32>
    %802 = arith.mulf %800, %801 : vector<16x8xf32>
    %cst_234 = arith.constant dense<0xFF800000> : vector<16xf32>
    %803 = vector.multi_reduction <maximumf>, %802, %cst_234 [1] : vector<16x8xf32> to vector<16xf32>
    %804 = vector.shape_cast %803 : vector<16xf32> to vector<16x1xf32>
    %805 = vector.broadcast %804 : vector<16x1xf32> to vector<16x8xf32>
    %806 = arith.subf %802, %805 : vector<16x8xf32>
    %807 = math.exp %806 : vector<16x8xf32>
    %cst_235 = arith.constant dense<0.000000e+00> : vector<16xf32>
    %808 = vector.multi_reduction <add>, %807, %cst_235 [1] : vector<16x8xf32> to vector<16xf32>
    %809 = vector.shape_cast %808 : vector<16xf32> to vector<16x1xf32>
    %810 = vector.broadcast %809 : vector<16x1xf32> to vector<16x8xf32>
    %811 = arith.divf %807, %810 : vector<16x8xf32>
    %812 = arith.truncf %811 : vector<16x8xf32> to vector<16x8xbf16>
    %cst_236 = arith.constant dense<0.000000e+00> : vector<16x32xf32>
    %813 = tpu.matmul %812, %799, %cst_236 {dimension_numbers = #tpu.dot_dimension_numbers<[1], [0], [0], [1], [0, 0, 1, 1], [], []>} : vector<16x8xbf16>, vector<8x32xbf16>, vector<16x32xf32> -> vector<16x32xf32>
    %814 = vector.extract_strided_slice %771 {offsets = [0, 64], sizes = [16, 32], strides = [1, 1]} : vector<16x256xf32> to vector<16x32xf32>
    %815 = arith.truncf %814 : vector<16x32xf32> to vector<16x32xbf16>
    %816 = vector.extract_strided_slice %772 {offsets = [0, 64], sizes = [8, 32], strides = [1, 1]} : vector<8x256xf32> to vector<8x32xf32>
    %817 = arith.truncf %816 : vector<8x32xf32> to vector<8x32xbf16>
    %818 = vector.extract_strided_slice %773 {offsets = [0, 64], sizes = [8, 32], strides = [1, 1]} : vector<8x256xf32> to vector<8x32xf32>
    %819 = arith.truncf %818 : vector<8x32xf32> to vector<8x32xbf16>
    %cst_237 = arith.constant dense<0.000000e+00> : vector<16x8xf32>
    %820 = tpu.matmul %815, %817, %cst_237 {dimension_numbers = #tpu.dot_dimension_numbers<[1], [1], [0], [0], [0, 0, 1, 0], [], []>} : vector<16x32xbf16>, vector<8x32xbf16>, vector<16x8xf32> -> vector<16x8xf32>
    %cst_238 = arith.constant 0.176776692 : f32
    %821 = vector.broadcast %cst_238 : f32 to vector<16x8xf32>
    %822 = arith.mulf %820, %821 : vector<16x8xf32>
    %cst_239 = arith.constant dense<0xFF800000> : vector<16xf32>
    %823 = vector.multi_reduction <maximumf>, %822, %cst_239 [1] : vector<16x8xf32> to vector<16xf32>
    %824 = vector.shape_cast %823 : vector<16xf32> to vector<16x1xf32>
    %825 = vector.broadcast %824 : vector<16x1xf32> to vector<16x8xf32>
    %826 = arith.subf %822, %825 : vector<16x8xf32>
    %827 = math.exp %826 : vector<16x8xf32>
    %cst_240 = arith.constant dense<0.000000e+00> : vector<16xf32>
    %828 = vector.multi_reduction <add>, %827, %cst_240 [1] : vector<16x8xf32> to vector<16xf32>
    %829 = vector.shape_cast %828 : vector<16xf32> to vector<16x1xf32>
    %830 = vector.broadcast %829 : vector<16x1xf32> to vector<16x8xf32>
    %831 = arith.divf %827, %830 : vector<16x8xf32>
    %832 = arith.truncf %831 : vector<16x8xf32> to vector<16x8xbf16>
    %cst_241 = arith.constant dense<0.000000e+00> : vector<16x32xf32>
    %833 = tpu.matmul %832, %819, %cst_241 {dimension_numbers = #tpu.dot_dimension_numbers<[1], [0], [0], [1], [0, 0, 1, 1], [], []>} : vector<16x8xbf16>, vector<8x32xbf16>, vector<16x32xf32> -> vector<16x32xf32>
    %834 = vector.extract_strided_slice %771 {offsets = [0, 96], sizes = [16, 32], strides = [1, 1]} : vector<16x256xf32> to vector<16x32xf32>
    %835 = arith.truncf %834 : vector<16x32xf32> to vector<16x32xbf16>
    %836 = vector.extract_strided_slice %772 {offsets = [0, 96], sizes = [8, 32], strides = [1, 1]} : vector<8x256xf32> to vector<8x32xf32>
    %837 = arith.truncf %836 : vector<8x32xf32> to vector<8x32xbf16>
    %838 = vector.extract_strided_slice %773 {offsets = [0, 96], sizes = [8, 32], strides = [1, 1]} : vector<8x256xf32> to vector<8x32xf32>
    %839 = arith.truncf %838 : vector<8x32xf32> to vector<8x32xbf16>
    %cst_242 = arith.constant dense<0.000000e+00> : vector<16x8xf32>
    %840 = tpu.matmul %835, %837, %cst_242 {dimension_numbers = #tpu.dot_dimension_numbers<[1], [1], [0], [0], [0, 0, 1, 0], [], []>} : vector<16x32xbf16>, vector<8x32xbf16>, vector<16x8xf32> -> vector<16x8xf32>
    %cst_243 = arith.constant 0.176776692 : f32
    %841 = vector.broadcast %cst_243 : f32 to vector<16x8xf32>
    %842 = arith.mulf %840, %841 : vector<16x8xf32>
    %cst_244 = arith.constant dense<0xFF800000> : vector<16xf32>
    %843 = vector.multi_reduction <maximumf>, %842, %cst_244 [1] : vector<16x8xf32> to vector<16xf32>
    %844 = vector.shape_cast %843 : vector<16xf32> to vector<16x1xf32>
    %845 = vector.broadcast %844 : vector<16x1xf32> to vector<16x8xf32>
    %846 = arith.subf %842, %845 : vector<16x8xf32>
    %847 = math.exp %846 : vector<16x8xf32>
    %cst_245 = arith.constant dense<0.000000e+00> : vector<16xf32>
    %848 = vector.multi_reduction <add>, %847, %cst_245 [1] : vector<16x8xf32> to vector<16xf32>
    %849 = vector.shape_cast %848 : vector<16xf32> to vector<16x1xf32>
    %850 = vector.broadcast %849 : vector<16x1xf32> to vector<16x8xf32>
    %851 = arith.divf %847, %850 : vector<16x8xf32>
    %852 = arith.truncf %851 : vector<16x8xf32> to vector<16x8xbf16>
    %cst_246 = arith.constant dense<0.000000e+00> : vector<16x32xf32>
    %853 = tpu.matmul %852, %839, %cst_246 {dimension_numbers = #tpu.dot_dimension_numbers<[1], [0], [0], [1], [0, 0, 1, 1], [], []>} : vector<16x8xbf16>, vector<8x32xbf16>, vector<16x32xf32> -> vector<16x32xf32>
    %854 = vector.extract_strided_slice %771 {offsets = [0, 128], sizes = [16, 32], strides = [1, 1]} : vector<16x256xf32> to vector<16x32xf32>
    %855 = arith.truncf %854 : vector<16x32xf32> to vector<16x32xbf16>
    %856 = vector.extract_strided_slice %772 {offsets = [0, 128], sizes = [8, 32], strides = [1, 1]} : vector<8x256xf32> to vector<8x32xf32>
    %857 = arith.truncf %856 : vector<8x32xf32> to vector<8x32xbf16>
    %858 = vector.extract_strided_slice %773 {offsets = [0, 128], sizes = [8, 32], strides = [1, 1]} : vector<8x256xf32> to vector<8x32xf32>
    %859 = arith.truncf %858 : vector<8x32xf32> to vector<8x32xbf16>
    %cst_247 = arith.constant dense<0.000000e+00> : vector<16x8xf32>
    %860 = tpu.matmul %855, %857, %cst_247 {dimension_numbers = #tpu.dot_dimension_numbers<[1], [1], [0], [0], [0, 0, 1, 0], [], []>} : vector<16x32xbf16>, vector<8x32xbf16>, vector<16x8xf32> -> vector<16x8xf32>
    %cst_248 = arith.constant 0.176776692 : f32
    %861 = vector.broadcast %cst_248 : f32 to vector<16x8xf32>
    %862 = arith.mulf %860, %861 : vector<16x8xf32>
    %cst_249 = arith.constant dense<0xFF800000> : vector<16xf32>
    %863 = vector.multi_reduction <maximumf>, %862, %cst_249 [1] : vector<16x8xf32> to vector<16xf32>
    %864 = vector.shape_cast %863 : vector<16xf32> to vector<16x1xf32>
    %865 = vector.broadcast %864 : vector<16x1xf32> to vector<16x8xf32>
    %866 = arith.subf %862, %865 : vector<16x8xf32>
    %867 = math.exp %866 : vector<16x8xf32>
    %cst_250 = arith.constant dense<0.000000e+00> : vector<16xf32>
    %868 = vector.multi_reduction <add>, %867, %cst_250 [1] : vector<16x8xf32> to vector<16xf32>
    %869 = vector.shape_cast %868 : vector<16xf32> to vector<16x1xf32>
    %870 = vector.broadcast %869 : vector<16x1xf32> to vector<16x8xf32>
    %871 = arith.divf %867, %870 : vector<16x8xf32>
    %872 = arith.truncf %871 : vector<16x8xf32> to vector<16x8xbf16>
    %cst_251 = arith.constant dense<0.000000e+00> : vector<16x32xf32>
    %873 = tpu.matmul %872, %859, %cst_251 {dimension_numbers = #tpu.dot_dimension_numbers<[1], [0], [0], [1], [0, 0, 1, 1], [], []>} : vector<16x8xbf16>, vector<8x32xbf16>, vector<16x32xf32> -> vector<16x32xf32>
    %874 = vector.extract_strided_slice %771 {offsets = [0, 160], sizes = [16, 32], strides = [1, 1]} : vector<16x256xf32> to vector<16x32xf32>
    %875 = arith.truncf %874 : vector<16x32xf32> to vector<16x32xbf16>
    %876 = vector.extract_strided_slice %772 {offsets = [0, 160], sizes = [8, 32], strides = [1, 1]} : vector<8x256xf32> to vector<8x32xf32>
    %877 = arith.truncf %876 : vector<8x32xf32> to vector<8x32xbf16>
    %878 = vector.extract_strided_slice %773 {offsets = [0, 160], sizes = [8, 32], strides = [1, 1]} : vector<8x256xf32> to vector<8x32xf32>
    %879 = arith.truncf %878 : vector<8x32xf32> to vector<8x32xbf16>
    %cst_252 = arith.constant dense<0.000000e+00> : vector<16x8xf32>
    %880 = tpu.matmul %875, %877, %cst_252 {dimension_numbers = #tpu.dot_dimension_numbers<[1], [1], [0], [0], [0, 0, 1, 0], [], []>} : vector<16x32xbf16>, vector<8x32xbf16>, vector<16x8xf32> -> vector<16x8xf32>
    %cst_253 = arith.constant 0.176776692 : f32
    %881 = vector.broadcast %cst_253 : f32 to vector<16x8xf32>
    %882 = arith.mulf %880, %881 : vector<16x8xf32>
    %cst_254 = arith.constant dense<0xFF800000> : vector<16xf32>
    %883 = vector.multi_reduction <maximumf>, %882, %cst_254 [1] : vector<16x8xf32> to vector<16xf32>
    %884 = vector.shape_cast %883 : vector<16xf32> to vector<16x1xf32>
    %885 = vector.broadcast %884 : vector<16x1xf32> to vector<16x8xf32>
    %886 = arith.subf %882, %885 : vector<16x8xf32>
    %887 = math.exp %886 : vector<16x8xf32>
    %cst_255 = arith.constant dense<0.000000e+00> : vector<16xf32>
    %888 = vector.multi_reduction <add>, %887, %cst_255 [1] : vector<16x8xf32> to vector<16xf32>
    %889 = vector.shape_cast %888 : vector<16xf32> to vector<16x1xf32>
    %890 = vector.broadcast %889 : vector<16x1xf32> to vector<16x8xf32>
    %891 = arith.divf %887, %890 : vector<16x8xf32>
    %892 = arith.truncf %891 : vector<16x8xf32> to vector<16x8xbf16>
    %cst_256 = arith.constant dense<0.000000e+00> : vector<16x32xf32>
    %893 = tpu.matmul %892, %879, %cst_256 {dimension_numbers = #tpu.dot_dimension_numbers<[1], [0], [0], [1], [0, 0, 1, 1], [], []>} : vector<16x8xbf16>, vector<8x32xbf16>, vector<16x32xf32> -> vector<16x32xf32>
    %894 = vector.extract_strided_slice %771 {offsets = [0, 192], sizes = [16, 32], strides = [1, 1]} : vector<16x256xf32> to vector<16x32xf32>
    %895 = arith.truncf %894 : vector<16x32xf32> to vector<16x32xbf16>
    %896 = vector.extract_strided_slice %772 {offsets = [0, 192], sizes = [8, 32], strides = [1, 1]} : vector<8x256xf32> to vector<8x32xf32>
    %897 = arith.truncf %896 : vector<8x32xf32> to vector<8x32xbf16>
    %898 = vector.extract_strided_slice %773 {offsets = [0, 192], sizes = [8, 32], strides = [1, 1]} : vector<8x256xf32> to vector<8x32xf32>
    %899 = arith.truncf %898 : vector<8x32xf32> to vector<8x32xbf16>
    %cst_257 = arith.constant dense<0.000000e+00> : vector<16x8xf32>
    %900 = tpu.matmul %895, %897, %cst_257 {dimension_numbers = #tpu.dot_dimension_numbers<[1], [1], [0], [0], [0, 0, 1, 0], [], []>} : vector<16x32xbf16>, vector<8x32xbf16>, vector<16x8xf32> -> vector<16x8xf32>
    %cst_258 = arith.constant 0.176776692 : f32
    %901 = vector.broadcast %cst_258 : f32 to vector<16x8xf32>
    %902 = arith.mulf %900, %901 : vector<16x8xf32>
    %cst_259 = arith.constant dense<0xFF800000> : vector<16xf32>
    %903 = vector.multi_reduction <maximumf>, %902, %cst_259 [1] : vector<16x8xf32> to vector<16xf32>
    %904 = vector.shape_cast %903 : vector<16xf32> to vector<16x1xf32>
    %905 = vector.broadcast %904 : vector<16x1xf32> to vector<16x8xf32>
    %906 = arith.subf %902, %905 : vector<16x8xf32>
    %907 = math.exp %906 : vector<16x8xf32>
    %cst_260 = arith.constant dense<0.000000e+00> : vector<16xf32>
    %908 = vector.multi_reduction <add>, %907, %cst_260 [1] : vector<16x8xf32> to vector<16xf32>
    %909 = vector.shape_cast %908 : vector<16xf32> to vector<16x1xf32>
    %910 = vector.broadcast %909 : vector<16x1xf32> to vector<16x8xf32>
    %911 = arith.divf %907, %910 : vector<16x8xf32>
    %912 = arith.truncf %911 : vector<16x8xf32> to vector<16x8xbf16>
    %cst_261 = arith.constant dense<0.000000e+00> : vector<16x32xf32>
    %913 = tpu.matmul %912, %899, %cst_261 {dimension_numbers = #tpu.dot_dimension_numbers<[1], [0], [0], [1], [0, 0, 1, 1], [], []>} : vector<16x8xbf16>, vector<8x32xbf16>, vector<16x32xf32> -> vector<16x32xf32>
    %914 = vector.extract_strided_slice %771 {offsets = [0, 224], sizes = [16, 32], strides = [1, 1]} : vector<16x256xf32> to vector<16x32xf32>
    %915 = arith.truncf %914 : vector<16x32xf32> to vector<16x32xbf16>
    %916 = vector.extract_strided_slice %772 {offsets = [0, 224], sizes = [8, 32], strides = [1, 1]} : vector<8x256xf32> to vector<8x32xf32>
    %917 = arith.truncf %916 : vector<8x32xf32> to vector<8x32xbf16>
    %918 = vector.extract_strided_slice %773 {offsets = [0, 224], sizes = [8, 32], strides = [1, 1]} : vector<8x256xf32> to vector<8x32xf32>
    %919 = arith.truncf %918 : vector<8x32xf32> to vector<8x32xbf16>
    %cst_262 = arith.constant dense<0.000000e+00> : vector<16x8xf32>
    %920 = tpu.matmul %915, %917, %cst_262 {dimension_numbers = #tpu.dot_dimension_numbers<[1], [1], [0], [0], [0, 0, 1, 0], [], []>} : vector<16x32xbf16>, vector<8x32xbf16>, vector<16x8xf32> -> vector<16x8xf32>
    %cst_263 = arith.constant 0.176776692 : f32
    %921 = vector.broadcast %cst_263 : f32 to vector<16x8xf32>
    %922 = arith.mulf %920, %921 : vector<16x8xf32>
    %cst_264 = arith.constant dense<0xFF800000> : vector<16xf32>
    %923 = vector.multi_reduction <maximumf>, %922, %cst_264 [1] : vector<16x8xf32> to vector<16xf32>
    %924 = vector.shape_cast %923 : vector<16xf32> to vector<16x1xf32>
    %925 = vector.broadcast %924 : vector<16x1xf32> to vector<16x8xf32>
    %926 = arith.subf %922, %925 : vector<16x8xf32>
    %927 = math.exp %926 : vector<16x8xf32>
    %cst_265 = arith.constant dense<0.000000e+00> : vector<16xf32>
    %928 = vector.multi_reduction <add>, %927, %cst_265 [1] : vector<16x8xf32> to vector<16xf32>
    %929 = vector.shape_cast %928 : vector<16xf32> to vector<16x1xf32>
    %930 = vector.broadcast %929 : vector<16x1xf32> to vector<16x8xf32>
    %931 = arith.divf %927, %930 : vector<16x8xf32>
    %932 = arith.truncf %931 : vector<16x8xf32> to vector<16x8xbf16>
    %cst_266 = arith.constant dense<0.000000e+00> : vector<16x32xf32>
    %933 = tpu.matmul %932, %919, %cst_266 {dimension_numbers = #tpu.dot_dimension_numbers<[1], [0], [0], [1], [0, 0, 1, 1], [], []>} : vector<16x8xbf16>, vector<8x32xbf16>, vector<16x32xf32> -> vector<16x32xf32>
    %934 = tpu.concatenate %793, %813, %833, %853, %873, %893, %913, %933 in 1 : vector<16x32xf32>, vector<16x32xf32>, vector<16x32xf32>, vector<16x32xf32>, vector<16x32xf32>, vector<16x32xf32>, vector<16x32xf32>, vector<16x32xf32> -> vector<16x256xf32>
    %935 = vector.extract_strided_slice %762 {offsets = [16, 0], sizes = [16, 256], strides = [1, 1]} : vector<32x256xf32> to vector<16x256xf32>
    %936 = vector.extract_strided_slice %769 {offsets = [8, 0], sizes = [8, 256], strides = [1, 1]} : vector<16x256xf32> to vector<8x256xf32>
    %937 = vector.extract_strided_slice %770 {offsets = [8, 0], sizes = [8, 256], strides = [1, 1]} : vector<16x256xf32> to vector<8x256xf32>
    %938 = vector.extract_strided_slice %935 {offsets = [0, 0], sizes = [16, 32], strides = [1, 1]} : vector<16x256xf32> to vector<16x32xf32>
    %939 = arith.truncf %938 : vector<16x32xf32> to vector<16x32xbf16>
    %940 = vector.extract_strided_slice %936 {offsets = [0, 0], sizes = [8, 32], strides = [1, 1]} : vector<8x256xf32> to vector<8x32xf32>
    %941 = arith.truncf %940 : vector<8x32xf32> to vector<8x32xbf16>
    %942 = vector.extract_strided_slice %937 {offsets = [0, 0], sizes = [8, 32], strides = [1, 1]} : vector<8x256xf32> to vector<8x32xf32>
    %943 = arith.truncf %942 : vector<8x32xf32> to vector<8x32xbf16>
    %cst_267 = arith.constant dense<0.000000e+00> : vector<16x8xf32>
    %944 = tpu.matmul %939, %941, %cst_267 {dimension_numbers = #tpu.dot_dimension_numbers<[1], [1], [0], [0], [0, 0, 1, 0], [], []>} : vector<16x32xbf16>, vector<8x32xbf16>, vector<16x8xf32> -> vector<16x8xf32>
    %cst_268 = arith.constant 0.176776692 : f32
    %945 = vector.broadcast %cst_268 : f32 to vector<16x8xf32>
    %946 = arith.mulf %944, %945 : vector<16x8xf32>
    %cst_269 = arith.constant dense<0xFF800000> : vector<16xf32>
    %947 = vector.multi_reduction <maximumf>, %946, %cst_269 [1] : vector<16x8xf32> to vector<16xf32>
    %948 = vector.shape_cast %947 : vector<16xf32> to vector<16x1xf32>
    %949 = vector.broadcast %948 : vector<16x1xf32> to vector<16x8xf32>
    %950 = arith.subf %946, %949 : vector<16x8xf32>
    %951 = math.exp %950 : vector<16x8xf32>
    %cst_270 = arith.constant dense<0.000000e+00> : vector<16xf32>
    %952 = vector.multi_reduction <add>, %951, %cst_270 [1] : vector<16x8xf32> to vector<16xf32>
    %953 = vector.shape_cast %952 : vector<16xf32> to vector<16x1xf32>
    %954 = vector.broadcast %953 : vector<16x1xf32> to vector<16x8xf32>
    %955 = arith.divf %951, %954 : vector<16x8xf32>
    %956 = arith.truncf %955 : vector<16x8xf32> to vector<16x8xbf16>
    %cst_271 = arith.constant dense<0.000000e+00> : vector<16x32xf32>
    %957 = tpu.matmul %956, %943, %cst_271 {dimension_numbers = #tpu.dot_dimension_numbers<[1], [0], [0], [1], [0, 0, 1, 1], [], []>} : vector<16x8xbf16>, vector<8x32xbf16>, vector<16x32xf32> -> vector<16x32xf32>
    %958 = vector.extract_strided_slice %935 {offsets = [0, 32], sizes = [16, 32], strides = [1, 1]} : vector<16x256xf32> to vector<16x32xf32>
    %959 = arith.truncf %958 : vector<16x32xf32> to vector<16x32xbf16>
    %960 = vector.extract_strided_slice %936 {offsets = [0, 32], sizes = [8, 32], strides = [1, 1]} : vector<8x256xf32> to vector<8x32xf32>
    %961 = arith.truncf %960 : vector<8x32xf32> to vector<8x32xbf16>
    %962 = vector.extract_strided_slice %937 {offsets = [0, 32], sizes = [8, 32], strides = [1, 1]} : vector<8x256xf32> to vector<8x32xf32>
    %963 = arith.truncf %962 : vector<8x32xf32> to vector<8x32xbf16>
    %cst_272 = arith.constant dense<0.000000e+00> : vector<16x8xf32>
    %964 = tpu.matmul %959, %961, %cst_272 {dimension_numbers = #tpu.dot_dimension_numbers<[1], [1], [0], [0], [0, 0, 1, 0], [], []>} : vector<16x32xbf16>, vector<8x32xbf16>, vector<16x8xf32> -> vector<16x8xf32>
    %cst_273 = arith.constant 0.176776692 : f32
    %965 = vector.broadcast %cst_273 : f32 to vector<16x8xf32>
    %966 = arith.mulf %964, %965 : vector<16x8xf32>
    %cst_274 = arith.constant dense<0xFF800000> : vector<16xf32>
    %967 = vector.multi_reduction <maximumf>, %966, %cst_274 [1] : vector<16x8xf32> to vector<16xf32>
    %968 = vector.shape_cast %967 : vector<16xf32> to vector<16x1xf32>
    %969 = vector.broadcast %968 : vector<16x1xf32> to vector<16x8xf32>
    %970 = arith.subf %966, %969 : vector<16x8xf32>
    %971 = math.exp %970 : vector<16x8xf32>
    %cst_275 = arith.constant dense<0.000000e+00> : vector<16xf32>
    %972 = vector.multi_reduction <add>, %971, %cst_275 [1] : vector<16x8xf32> to vector<16xf32>
    %973 = vector.shape_cast %972 : vector<16xf32> to vector<16x1xf32>
    %974 = vector.broadcast %973 : vector<16x1xf32> to vector<16x8xf32>
    %975 = arith.divf %971, %974 : vector<16x8xf32>
    %976 = arith.truncf %975 : vector<16x8xf32> to vector<16x8xbf16>
    %cst_276 = arith.constant dense<0.000000e+00> : vector<16x32xf32>
    %977 = tpu.matmul %976, %963, %cst_276 {dimension_numbers = #tpu.dot_dimension_numbers<[1], [0], [0], [1], [0, 0, 1, 1], [], []>} : vector<16x8xbf16>, vector<8x32xbf16>, vector<16x32xf32> -> vector<16x32xf32>
    %978 = vector.extract_strided_slice %935 {offsets = [0, 64], sizes = [16, 32], strides = [1, 1]} : vector<16x256xf32> to vector<16x32xf32>
    %979 = arith.truncf %978 : vector<16x32xf32> to vector<16x32xbf16>
    %980 = vector.extract_strided_slice %936 {offsets = [0, 64], sizes = [8, 32], strides = [1, 1]} : vector<8x256xf32> to vector<8x32xf32>
    %981 = arith.truncf %980 : vector<8x32xf32> to vector<8x32xbf16>
    %982 = vector.extract_strided_slice %937 {offsets = [0, 64], sizes = [8, 32], strides = [1, 1]} : vector<8x256xf32> to vector<8x32xf32>
    %983 = arith.truncf %982 : vector<8x32xf32> to vector<8x32xbf16>
    %cst_277 = arith.constant dense<0.000000e+00> : vector<16x8xf32>
    %984 = tpu.matmul %979, %981, %cst_277 {dimension_numbers = #tpu.dot_dimension_numbers<[1], [1], [0], [0], [0, 0, 1, 0], [], []>} : vector<16x32xbf16>, vector<8x32xbf16>, vector<16x8xf32> -> vector<16x8xf32>
    %cst_278 = arith.constant 0.176776692 : f32
    %985 = vector.broadcast %cst_278 : f32 to vector<16x8xf32>
    %986 = arith.mulf %984, %985 : vector<16x8xf32>
    %cst_279 = arith.constant dense<0xFF800000> : vector<16xf32>
    %987 = vector.multi_reduction <maximumf>, %986, %cst_279 [1] : vector<16x8xf32> to vector<16xf32>
    %988 = vector.shape_cast %987 : vector<16xf32> to vector<16x1xf32>
    %989 = vector.broadcast %988 : vector<16x1xf32> to vector<16x8xf32>
    %990 = arith.subf %986, %989 : vector<16x8xf32>
    %991 = math.exp %990 : vector<16x8xf32>
    %cst_280 = arith.constant dense<0.000000e+00> : vector<16xf32>
    %992 = vector.multi_reduction <add>, %991, %cst_280 [1] : vector<16x8xf32> to vector<16xf32>
    %993 = vector.shape_cast %992 : vector<16xf32> to vector<16x1xf32>
    %994 = vector.broadcast %993 : vector<16x1xf32> to vector<16x8xf32>
    %995 = arith.divf %991, %994 : vector<16x8xf32>
    %996 = arith.truncf %995 : vector<16x8xf32> to vector<16x8xbf16>
    %cst_281 = arith.constant dense<0.000000e+00> : vector<16x32xf32>
    %997 = tpu.matmul %996, %983, %cst_281 {dimension_numbers = #tpu.dot_dimension_numbers<[1], [0], [0], [1], [0, 0, 1, 1], [], []>} : vector<16x8xbf16>, vector<8x32xbf16>, vector<16x32xf32> -> vector<16x32xf32>
    %998 = vector.extract_strided_slice %935 {offsets = [0, 96], sizes = [16, 32], strides = [1, 1]} : vector<16x256xf32> to vector<16x32xf32>
    %999 = arith.truncf %998 : vector<16x32xf32> to vector<16x32xbf16>
    %1000 = vector.extract_strided_slice %936 {offsets = [0, 96], sizes = [8, 32], strides = [1, 1]} : vector<8x256xf32> to vector<8x32xf32>
    %1001 = arith.truncf %1000 : vector<8x32xf32> to vector<8x32xbf16>
    %1002 = vector.extract_strided_slice %937 {offsets = [0, 96], sizes = [8, 32], strides = [1, 1]} : vector<8x256xf32> to vector<8x32xf32>
    %1003 = arith.truncf %1002 : vector<8x32xf32> to vector<8x32xbf16>
    %cst_282 = arith.constant dense<0.000000e+00> : vector<16x8xf32>
    %1004 = tpu.matmul %999, %1001, %cst_282 {dimension_numbers = #tpu.dot_dimension_numbers<[1], [1], [0], [0], [0, 0, 1, 0], [], []>} : vector<16x32xbf16>, vector<8x32xbf16>, vector<16x8xf32> -> vector<16x8xf32>
    %cst_283 = arith.constant 0.176776692 : f32
    %1005 = vector.broadcast %cst_283 : f32 to vector<16x8xf32>
    %1006 = arith.mulf %1004, %1005 : vector<16x8xf32>
    %cst_284 = arith.constant dense<0xFF800000> : vector<16xf32>
    %1007 = vector.multi_reduction <maximumf>, %1006, %cst_284 [1] : vector<16x8xf32> to vector<16xf32>
    %1008 = vector.shape_cast %1007 : vector<16xf32> to vector<16x1xf32>
    %1009 = vector.broadcast %1008 : vector<16x1xf32> to vector<16x8xf32>
    %1010 = arith.subf %1006, %1009 : vector<16x8xf32>
    %1011 = math.exp %1010 : vector<16x8xf32>
    %cst_285 = arith.constant dense<0.000000e+00> : vector<16xf32>
    %1012 = vector.multi_reduction <add>, %1011, %cst_285 [1] : vector<16x8xf32> to vector<16xf32>
    %1013 = vector.shape_cast %1012 : vector<16xf32> to vector<16x1xf32>
    %1014 = vector.broadcast %1013 : vector<16x1xf32> to vector<16x8xf32>
    %1015 = arith.divf %1011, %1014 : vector<16x8xf32>
    %1016 = arith.truncf %1015 : vector<16x8xf32> to vector<16x8xbf16>
    %cst_286 = arith.constant dense<0.000000e+00> : vector<16x32xf32>
    %1017 = tpu.matmul %1016, %1003, %cst_286 {dimension_numbers = #tpu.dot_dimension_numbers<[1], [0], [0], [1], [0, 0, 1, 1], [], []>} : vector<16x8xbf16>, vector<8x32xbf16>, vector<16x32xf32> -> vector<16x32xf32>
    %1018 = vector.extract_strided_slice %935 {offsets = [0, 128], sizes = [16, 32], strides = [1, 1]} : vector<16x256xf32> to vector<16x32xf32>
    %1019 = arith.truncf %1018 : vector<16x32xf32> to vector<16x32xbf16>
    %1020 = vector.extract_strided_slice %936 {offsets = [0, 128], sizes = [8, 32], strides = [1, 1]} : vector<8x256xf32> to vector<8x32xf32>
    %1021 = arith.truncf %1020 : vector<8x32xf32> to vector<8x32xbf16>
    %1022 = vector.extract_strided_slice %937 {offsets = [0, 128], sizes = [8, 32], strides = [1, 1]} : vector<8x256xf32> to vector<8x32xf32>
    %1023 = arith.truncf %1022 : vector<8x32xf32> to vector<8x32xbf16>
    %cst_287 = arith.constant dense<0.000000e+00> : vector<16x8xf32>
    %1024 = tpu.matmul %1019, %1021, %cst_287 {dimension_numbers = #tpu.dot_dimension_numbers<[1], [1], [0], [0], [0, 0, 1, 0], [], []>} : vector<16x32xbf16>, vector<8x32xbf16>, vector<16x8xf32> -> vector<16x8xf32>
    %cst_288 = arith.constant 0.176776692 : f32
    %1025 = vector.broadcast %cst_288 : f32 to vector<16x8xf32>
    %1026 = arith.mulf %1024, %1025 : vector<16x8xf32>
    %cst_289 = arith.constant dense<0xFF800000> : vector<16xf32>
    %1027 = vector.multi_reduction <maximumf>, %1026, %cst_289 [1] : vector<16x8xf32> to vector<16xf32>
    %1028 = vector.shape_cast %1027 : vector<16xf32> to vector<16x1xf32>
    %1029 = vector.broadcast %1028 : vector<16x1xf32> to vector<16x8xf32>
    %1030 = arith.subf %1026, %1029 : vector<16x8xf32>
    %1031 = math.exp %1030 : vector<16x8xf32>
    %cst_290 = arith.constant dense<0.000000e+00> : vector<16xf32>
    %1032 = vector.multi_reduction <add>, %1031, %cst_290 [1] : vector<16x8xf32> to vector<16xf32>
    %1033 = vector.shape_cast %1032 : vector<16xf32> to vector<16x1xf32>
    %1034 = vector.broadcast %1033 : vector<16x1xf32> to vector<16x8xf32>
    %1035 = arith.divf %1031, %1034 : vector<16x8xf32>
    %1036 = arith.truncf %1035 : vector<16x8xf32> to vector<16x8xbf16>
    %cst_291 = arith.constant dense<0.000000e+00> : vector<16x32xf32>
    %1037 = tpu.matmul %1036, %1023, %cst_291 {dimension_numbers = #tpu.dot_dimension_numbers<[1], [0], [0], [1], [0, 0, 1, 1], [], []>} : vector<16x8xbf16>, vector<8x32xbf16>, vector<16x32xf32> -> vector<16x32xf32>
    %1038 = vector.extract_strided_slice %935 {offsets = [0, 160], sizes = [16, 32], strides = [1, 1]} : vector<16x256xf32> to vector<16x32xf32>
    %1039 = arith.truncf %1038 : vector<16x32xf32> to vector<16x32xbf16>
    %1040 = vector.extract_strided_slice %936 {offsets = [0, 160], sizes = [8, 32], strides = [1, 1]} : vector<8x256xf32> to vector<8x32xf32>
    %1041 = arith.truncf %1040 : vector<8x32xf32> to vector<8x32xbf16>
    %1042 = vector.extract_strided_slice %937 {offsets = [0, 160], sizes = [8, 32], strides = [1, 1]} : vector<8x256xf32> to vector<8x32xf32>
    %1043 = arith.truncf %1042 : vector<8x32xf32> to vector<8x32xbf16>
    %cst_292 = arith.constant dense<0.000000e+00> : vector<16x8xf32>
    %1044 = tpu.matmul %1039, %1041, %cst_292 {dimension_numbers = #tpu.dot_dimension_numbers<[1], [1], [0], [0], [0, 0, 1, 0], [], []>} : vector<16x32xbf16>, vector<8x32xbf16>, vector<16x8xf32> -> vector<16x8xf32>
    %cst_293 = arith.constant 0.176776692 : f32
    %1045 = vector.broadcast %cst_293 : f32 to vector<16x8xf32>
    %1046 = arith.mulf %1044, %1045 : vector<16x8xf32>
    %cst_294 = arith.constant dense<0xFF800000> : vector<16xf32>
    %1047 = vector.multi_reduction <maximumf>, %1046, %cst_294 [1] : vector<16x8xf32> to vector<16xf32>
    %1048 = vector.shape_cast %1047 : vector<16xf32> to vector<16x1xf32>
    %1049 = vector.broadcast %1048 : vector<16x1xf32> to vector<16x8xf32>
    %1050 = arith.subf %1046, %1049 : vector<16x8xf32>
    %1051 = math.exp %1050 : vector<16x8xf32>
    %cst_295 = arith.constant dense<0.000000e+00> : vector<16xf32>
    %1052 = vector.multi_reduction <add>, %1051, %cst_295 [1] : vector<16x8xf32> to vector<16xf32>
    %1053 = vector.shape_cast %1052 : vector<16xf32> to vector<16x1xf32>
    %1054 = vector.broadcast %1053 : vector<16x1xf32> to vector<16x8xf32>
    %1055 = arith.divf %1051, %1054 : vector<16x8xf32>
    %1056 = arith.truncf %1055 : vector<16x8xf32> to vector<16x8xbf16>
    %cst_296 = arith.constant dense<0.000000e+00> : vector<16x32xf32>
    %1057 = tpu.matmul %1056, %1043, %cst_296 {dimension_numbers = #tpu.dot_dimension_numbers<[1], [0], [0], [1], [0, 0, 1, 1], [], []>} : vector<16x8xbf16>, vector<8x32xbf16>, vector<16x32xf32> -> vector<16x32xf32>
    %1058 = vector.extract_strided_slice %935 {offsets = [0, 192], sizes = [16, 32], strides = [1, 1]} : vector<16x256xf32> to vector<16x32xf32>
    %1059 = arith.truncf %1058 : vector<16x32xf32> to vector<16x32xbf16>
    %1060 = vector.extract_strided_slice %936 {offsets = [0, 192], sizes = [8, 32], strides = [1, 1]} : vector<8x256xf32> to vector<8x32xf32>
    %1061 = arith.truncf %1060 : vector<8x32xf32> to vector<8x32xbf16>
    %1062 = vector.extract_strided_slice %937 {offsets = [0, 192], sizes = [8, 32], strides = [1, 1]} : vector<8x256xf32> to vector<8x32xf32>
    %1063 = arith.truncf %1062 : vector<8x32xf32> to vector<8x32xbf16>
    %cst_297 = arith.constant dense<0.000000e+00> : vector<16x8xf32>
    %1064 = tpu.matmul %1059, %1061, %cst_297 {dimension_numbers = #tpu.dot_dimension_numbers<[1], [1], [0], [0], [0, 0, 1, 0], [], []>} : vector<16x32xbf16>, vector<8x32xbf16>, vector<16x8xf32> -> vector<16x8xf32>
    %cst_298 = arith.constant 0.176776692 : f32
    %1065 = vector.broadcast %cst_298 : f32 to vector<16x8xf32>
    %1066 = arith.mulf %1064, %1065 : vector<16x8xf32>
    %cst_299 = arith.constant dense<0xFF800000> : vector<16xf32>
    %1067 = vector.multi_reduction <maximumf>, %1066, %cst_299 [1] : vector<16x8xf32> to vector<16xf32>
    %1068 = vector.shape_cast %1067 : vector<16xf32> to vector<16x1xf32>
    %1069 = vector.broadcast %1068 : vector<16x1xf32> to vector<16x8xf32>
    %1070 = arith.subf %1066, %1069 : vector<16x8xf32>
    %1071 = math.exp %1070 : vector<16x8xf32>
    %cst_300 = arith.constant dense<0.000000e+00> : vector<16xf32>
    %1072 = vector.multi_reduction <add>, %1071, %cst_300 [1] : vector<16x8xf32> to vector<16xf32>
    %1073 = vector.shape_cast %1072 : vector<16xf32> to vector<16x1xf32>
    %1074 = vector.broadcast %1073 : vector<16x1xf32> to vector<16x8xf32>
    %1075 = arith.divf %1071, %1074 : vector<16x8xf32>
    %1076 = arith.truncf %1075 : vector<16x8xf32> to vector<16x8xbf16>
    %cst_301 = arith.constant dense<0.000000e+00> : vector<16x32xf32>
    %1077 = tpu.matmul %1076, %1063, %cst_301 {dimension_numbers = #tpu.dot_dimension_numbers<[1], [0], [0], [1], [0, 0, 1, 1], [], []>} : vector<16x8xbf16>, vector<8x32xbf16>, vector<16x32xf32> -> vector<16x32xf32>
    %1078 = vector.extract_strided_slice %935 {offsets = [0, 224], sizes = [16, 32], strides = [1, 1]} : vector<16x256xf32> to vector<16x32xf32>
    %1079 = arith.truncf %1078 : vector<16x32xf32> to vector<16x32xbf16>
    %1080 = vector.extract_strided_slice %936 {offsets = [0, 224], sizes = [8, 32], strides = [1, 1]} : vector<8x256xf32> to vector<8x32xf32>
    %1081 = arith.truncf %1080 : vector<8x32xf32> to vector<8x32xbf16>
    %1082 = vector.extract_strided_slice %937 {offsets = [0, 224], sizes = [8, 32], strides = [1, 1]} : vector<8x256xf32> to vector<8x32xf32>
    %1083 = arith.truncf %1082 : vector<8x32xf32> to vector<8x32xbf16>
    %cst_302 = arith.constant dense<0.000000e+00> : vector<16x8xf32>
    %1084 = tpu.matmul %1079, %1081, %cst_302 {dimension_numbers = #tpu.dot_dimension_numbers<[1], [1], [0], [0], [0, 0, 1, 0], [], []>} : vector<16x32xbf16>, vector<8x32xbf16>, vector<16x8xf32> -> vector<16x8xf32>
    %cst_303 = arith.constant 0.176776692 : f32
    %1085 = vector.broadcast %cst_303 : f32 to vector<16x8xf32>
    %1086 = arith.mulf %1084, %1085 : vector<16x8xf32>
    %cst_304 = arith.constant dense<0xFF800000> : vector<16xf32>
    %1087 = vector.multi_reduction <maximumf>, %1086, %cst_304 [1] : vector<16x8xf32> to vector<16xf32>
    %1088 = vector.shape_cast %1087 : vector<16xf32> to vector<16x1xf32>
    %1089 = vector.broadcast %1088 : vector<16x1xf32> to vector<16x8xf32>
    %1090 = arith.subf %1086, %1089 : vector<16x8xf32>
    %1091 = math.exp %1090 : vector<16x8xf32>
    %cst_305 = arith.constant dense<0.000000e+00> : vector<16xf32>
    %1092 = vector.multi_reduction <add>, %1091, %cst_305 [1] : vector<16x8xf32> to vector<16xf32>
    %1093 = vector.shape_cast %1092 : vector<16xf32> to vector<16x1xf32>
    %1094 = vector.broadcast %1093 : vector<16x1xf32> to vector<16x8xf32>
    %1095 = arith.divf %1091, %1094 : vector<16x8xf32>
    %1096 = arith.truncf %1095 : vector<16x8xf32> to vector<16x8xbf16>
    %cst_306 = arith.constant dense<0.000000e+00> : vector<16x32xf32>
    %1097 = tpu.matmul %1096, %1083, %cst_306 {dimension_numbers = #tpu.dot_dimension_numbers<[1], [0], [0], [1], [0, 0, 1, 1], [], []>} : vector<16x8xbf16>, vector<8x32xbf16>, vector<16x32xf32> -> vector<16x32xf32>
    %1098 = tpu.concatenate %957, %977, %997, %1017, %1037, %1057, %1077, %1097 in 1 : vector<16x32xf32>, vector<16x32xf32>, vector<16x32xf32>, vector<16x32xf32>, vector<16x32xf32>, vector<16x32xf32>, vector<16x32xf32>, vector<16x32xf32> -> vector<16x256xf32>
    %1099 = tpu.concatenate %934, %1098 in 0 : vector<16x256xf32>, vector<16x256xf32> -> vector<32x256xf32>
    %c0_307 = arith.constant 0 : index
    %c0_308 = arith.constant 0 : index
    %1100 = vector.load %arg25[%c0_307, %c0_308] : memref<256x256xbf16, #tpu.memory_space<vmem>>, vector<256x256xbf16>
    %1101 = arith.truncf %1099 : vector<32x256xf32> to vector<32x256xbf16>
    %cst_309 = arith.constant dense<0.000000e+00> : vector<32x256xf32>
    %1102 = tpu.matmul %1101, %1100, %cst_309 {dimension_numbers = #tpu.dot_dimension_numbers<[1], [0], [0], [1], [0, 0, 1, 1], [], []>} : vector<32x256xbf16>, vector<256x256xbf16>, vector<32x256xf32> -> vector<32x256xf32>
    %1103 = arith.addf %755, %1102 : vector<32x256xf32>
    %c0_310 = arith.constant 0 : index
    %c0_311 = arith.constant 0 : index
    %1104 = vector.load %arg26[%c0_310, %c0_311] : memref<1x256xf32, #tpu.memory_space<vmem>>, vector<1x256xf32>
    %1105 = vector.broadcast %1104 : vector<1x256xf32> to vector<32x256xf32>
    %1106 = arith.addf %1103, %1105 : vector<32x256xf32>
    %c0_312 = arith.constant 0 : index
    %c0_313 = arith.constant 0 : index
    %1107 = vector.load %arg27[%c0_312, %c0_313] : memref<1x256xf32, #tpu.memory_space<vmem>>, vector<1x256xf32>
    %c0_314 = arith.constant 0 : index
    %c0_315 = arith.constant 0 : index
    %1108 = vector.load %arg28[%c0_314, %c0_315] : memref<1x256xf32, #tpu.memory_space<vmem>>, vector<1x256xf32>
    %cst_316 = arith.constant dense<0.000000e+00> : vector<32xf32>
    %1109 = vector.multi_reduction <add>, %1106, %cst_316 [1] : vector<32x256xf32> to vector<32xf32>
    %1110 = vector.shape_cast %1109 : vector<32xf32> to vector<32x1xf32>
    %cst_317 = arith.constant 2.560000e+02 : f32
    %1111 = vector.broadcast %cst_317 : f32 to vector<32x1xf32>
    %1112 = arith.divf %1110, %1111 : vector<32x1xf32>
    %1113 = vector.broadcast %1112 : vector<32x1xf32> to vector<32x256xf32>
    %1114 = arith.subf %1106, %1113 : vector<32x256xf32>
    %1115 = arith.mulf %1114, %1114 : vector<32x256xf32>
    %cst_318 = arith.constant dense<0.000000e+00> : vector<32xf32>
    %1116 = vector.multi_reduction <add>, %1115, %cst_318 [1] : vector<32x256xf32> to vector<32xf32>
    %1117 = vector.shape_cast %1116 : vector<32xf32> to vector<32x1xf32>
    %cst_319 = arith.constant 2.560000e+02 : f32
    %1118 = vector.broadcast %cst_319 : f32 to vector<32x1xf32>
    %1119 = arith.divf %1117, %1118 : vector<32x1xf32>
    %cst_320 = arith.constant 9.99999974E-6 : f32
    %1120 = vector.broadcast %cst_320 : f32 to vector<32x1xf32>
    %1121 = arith.addf %1119, %1120 : vector<32x1xf32>
    %1122 = math.rsqrt %1121 : vector<32x1xf32>
    %1123 = vector.broadcast %1122 : vector<32x1xf32> to vector<32x256xf32>
    %1124 = arith.mulf %1114, %1123 : vector<32x256xf32>
    %1125 = vector.broadcast %1107 : vector<1x256xf32> to vector<32x256xf32>
    %1126 = arith.mulf %1124, %1125 : vector<32x256xf32>
    %1127 = vector.broadcast %1108 : vector<1x256xf32> to vector<32x256xf32>
    %1128 = arith.addf %1126, %1127 : vector<32x256xf32>
    %1129 = vector.extract_strided_slice %1128 {offsets = [0, 0], sizes = [16, 256], strides = [1, 1]} : vector<32x256xf32> to vector<16x256xf32>
    %cst_321 = arith.constant dense<0.000000e+00> : vector<256xf32>
    %1130 = vector.multi_reduction <add>, %1129, %cst_321 [0] : vector<16x256xf32> to vector<256xf32>
    %1131 = vector.shape_cast %1130 : vector<256xf32> to vector<1x256xf32>
    %cst_322 = arith.constant 1.600000e+01 : f32
    %1132 = vector.broadcast %cst_322 : f32 to vector<1x256xf32>
    %1133 = arith.divf %1131, %1132 : vector<1x256xf32>
    %1134 = vector.extract_strided_slice %1128 {offsets = [16, 0], sizes = [16, 256], strides = [1, 1]} : vector<32x256xf32> to vector<16x256xf32>
    %cst_323 = arith.constant dense<0.000000e+00> : vector<256xf32>
    %1135 = vector.multi_reduction <add>, %1134, %cst_323 [0] : vector<16x256xf32> to vector<256xf32>
    %1136 = vector.shape_cast %1135 : vector<256xf32> to vector<1x256xf32>
    %cst_324 = arith.constant 1.600000e+01 : f32
    %1137 = vector.broadcast %cst_324 : f32 to vector<1x256xf32>
    %1138 = arith.divf %1136, %1137 : vector<1x256xf32>
    %1139 = tpu.concatenate %1133, %1138 in 0 : vector<1x256xf32>, vector<1x256xf32> -> vector<2x256xf32>
    %c0_325 = arith.constant 0 : index
    %c0_326 = arith.constant 0 : index
    %1140 = vector.load %arg29[%c0_325, %c0_326] : memref<256x256xbf16, #tpu.memory_space<vmem>>, vector<256x256xbf16>
    %1141 = arith.truncf %1139 : vector<2x256xf32> to vector<2x256xbf16>
    %cst_327 = arith.constant dense<0.000000e+00> : vector<2x256xf32>
    %1142 = tpu.matmul %1141, %1140, %cst_327 {dimension_numbers = #tpu.dot_dimension_numbers<[1], [0], [0], [1], [0, 0, 1, 1], [], []>} : vector<2x256xbf16>, vector<256x256xbf16>, vector<2x256xf32> -> vector<2x256xf32>
    %c0_328 = arith.constant 0 : index
    %c0_329 = arith.constant 0 : index
    %1143 = vector.load %arg30[%c0_328, %c0_329] : memref<1x256xf32, #tpu.memory_space<vmem>>, vector<1x256xf32>
    %1144 = vector.broadcast %1143 : vector<1x256xf32> to vector<2x256xf32>
    %1145 = arith.addf %1142, %1144 : vector<2x256xf32>
    %c0_330 = arith.constant 0 : index
    %c0_331 = arith.constant 0 : index
    %1146 = vector.load %arg31[%c0_330, %c0_331] : memref<1x256xf32, #tpu.memory_space<vmem>>, vector<1x256xf32>
    %1147 = vector.broadcast %1146 : vector<1x256xf32> to vector<2x256xf32>
    %1148 = arith.mulf %1145, %1147 : vector<2x256xf32>
    %c0_332 = arith.constant 0 : index
    %c0_333 = arith.constant 0 : index
    %1149 = vector.load %arg32[%c0_332, %c0_333] : memref<1x256xf32, #tpu.memory_space<vmem>>, vector<1x256xf32>
    %1150 = vector.broadcast %1149 : vector<1x256xf32> to vector<2x256xf32>
    %1151 = arith.addf %1148, %1150 : vector<2x256xf32>
    %cst_334 = arith.constant 0.000000e+00 : f32
    %1152 = vector.broadcast %cst_334 : f32 to vector<2x256xf32>
    %1153 = arith.cmpf ogt, %1151, %1152 : vector<2x256xf32>
    %1154 = math.exp %1151 : vector<2x256xf32>
    %cst_335 = arith.constant 1.000000e+00 : f32
    %1155 = vector.broadcast %cst_335 : f32 to vector<2x256xf32>
    %1156 = arith.subf %1154, %1155 : vector<2x256xf32>
    %cst_336 = arith.constant 1.67326319 : f32
    %1157 = vector.broadcast %cst_336 : f32 to vector<2x256xf32>
    %1158 = arith.mulf %1157, %1156 : vector<2x256xf32>
    %1159 = arith.select %1153, %1151, %1158 : vector<2x256xi1>, vector<2x256xf32>
    %cst_337 = arith.constant 1.05070102 : f32
    %1160 = vector.broadcast %cst_337 : f32 to vector<2x256xf32>
    %1161 = arith.mulf %1160, %1159 : vector<2x256xf32>
    %c0_338 = arith.constant 0 : index
    %c0_339 = arith.constant 0 : index
    %1162 = vector.load %arg33[%c0_338, %c0_339] : memref<256x128xbf16, #tpu.memory_space<vmem>>, vector<256x128xbf16>
    %1163 = arith.truncf %1161 : vector<2x256xf32> to vector<2x256xbf16>
    %cst_340 = arith.constant dense<0.000000e+00> : vector<2x128xf32>
    %1164 = tpu.matmul %1163, %1162, %cst_340 {dimension_numbers = #tpu.dot_dimension_numbers<[1], [0], [0], [1], [0, 0, 1, 1], [], []>} : vector<2x256xbf16>, vector<256x128xbf16>, vector<2x128xf32> -> vector<2x128xf32>
    %c0_341 = arith.constant 0 : index
    %c0_342 = arith.constant 0 : index
    %1165 = vector.load %arg34[%c0_341, %c0_342] : memref<1x128xf32, #tpu.memory_space<vmem>>, vector<1x128xf32>
    %1166 = vector.broadcast %1165 : vector<1x128xf32> to vector<2x128xf32>
    %1167 = arith.addf %1164, %1166 : vector<2x128xf32>
    %1168 = vector.shape_cast %1167 : vector<2x128xf32> to vector<2x1x128xf32>
    %c0_343 = arith.constant 0 : index
    %c0_344 = arith.constant 0 : index
    %c0_345 = arith.constant 0 : index
    %1169 = vector.load %arg35[%c0_343, %c0_344, %c0_345] : memref<2x1x128xf32, #tpu.memory_space<vmem>>, vector<2x1x128xf32>
    tpu.vector_store %arg35[%c0_343, %c0_344, %c0_345], %1168 {strides = array<i32>} : memref<2x1x128xf32, #tpu.memory_space<vmem>>, vector<2x1x128xf32>,
    return
  }
  func.func @transform_0(%arg0: i32) -> (i32, i32, i32) {
    %c0_i32 = arith.constant 0 : i32
    %c0_i32_0 = arith.constant 0 : i32
    %c0_i32_1 = arith.constant 0 : i32
    return %arg0, %c0_i32, %c0_i32_0 : i32, i32, i32
  }
  func.func @transform_1(%arg0: i32) -> (i32, i32, i32) {
    %c0_i32 = arith.constant 0 : i32
    %c0_i32_0 = arith.constant 0 : i32
    %c0_i32_1 = arith.constant 0 : i32
    return %arg0, %c0_i32, %c0_i32_0 : i32, i32, i32
  }
  func.func @transform_2(%arg0: i32) -> (i32, i32) {
    %c0_i32 = arith.constant 0 : i32
    %c0_i32_0 = arith.constant 0 : i32
    %c0_i32_1 = arith.constant 0 : i32
    return %c0_i32, %c0_i32_0 : i32, i32
  }
  func.func @transform_3(%arg0: i32) -> (i32, i32) {
    %c0_i32 = arith.constant 0 : i32
    %c0_i32_0 = arith.constant 0 : i32
    %c0_i32_1 = arith.constant 0 : i32
    return %c0_i32, %c0_i32_0 : i32, i32
  }
  func.func @transform_4(%arg0: i32) -> (i32, i32) {
    %c0_i32 = arith.constant 0 : i32
    %c0_i32_0 = arith.constant 0 : i32
    %c0_i32_1 = arith.constant 0 : i32
    return %c0_i32, %c0_i32_0 : i32, i32
  }
  func.func @transform_5(%arg0: i32) -> (i32, i32) {
    %c0_i32 = arith.constant 0 : i32
    %c0_i32_0 = arith.constant 0 : i32
    %c0_i32_1 = arith.constant 0 : i32
    return %c0_i32, %c0_i32_0 : i32, i32
  }
  func.func @transform_6(%arg0: i32) -> (i32, i32) {
    %c0_i32 = arith.constant 0 : i32
    %c0_i32_0 = arith.constant 0 : i32
    %c0_i32_1 = arith.constant 0 : i32
    return %c0_i32, %c0_i32_0 : i32, i32
  }
  func.func @transform_7(%arg0: i32) -> (i32, i32) {
    %c0_i32 = arith.constant 0 : i32
    %c0_i32_0 = arith.constant 0 : i32
    %c0_i32_1 = arith.constant 0 : i32
    return %c0_i32, %c0_i32_0 : i32, i32
  }
  func.func @transform_8(%arg0: i32) -> (i32, i32) {
    %c0_i32 = arith.constant 0 : i32
    %c0_i32_0 = arith.constant 0 : i32
    %c0_i32_1 = arith.constant 0 : i32
    return %c0_i32, %c0_i32_0 : i32, i32
  }
  func.func @transform_9(%arg0: i32) -> (i32, i32) {
    %c0_i32 = arith.constant 0 : i32
    %c0_i32_0 = arith.constant 0 : i32
    %c0_i32_1 = arith.constant 0 : i32
    return %c0_i32, %c0_i32_0 : i32, i32
  }
  func.func @transform_10(%arg0: i32) -> (i32, i32) {
    %c0_i32 = arith.constant 0 : i32
    %c0_i32_0 = arith.constant 0 : i32
    %c0_i32_1 = arith.constant 0 : i32
    return %c0_i32, %c0_i32_0 : i32, i32
  }
  func.func @transform_11(%arg0: i32) -> (i32, i32) {
    %c0_i32 = arith.constant 0 : i32
    %c0_i32_0 = arith.constant 0 : i32
    %c0_i32_1 = arith.constant 0 : i32
    return %c0_i32, %c0_i32_0 : i32, i32
  }
  func.func @transform_12(%arg0: i32) -> (i32, i32) {
    %c0_i32 = arith.constant 0 : i32
    %c0_i32_0 = arith.constant 0 : i32
    %c0_i32_1 = arith.constant 0 : i32
    return %c0_i32, %c0_i32_0 : i32, i32
  }
  func.func @transform_13(%arg0: i32) -> (i32, i32) {
    %c0_i32 = arith.constant 0 : i32
    %c0_i32_0 = arith.constant 0 : i32
    %c0_i32_1 = arith.constant 0 : i32
    return %c0_i32, %c0_i32_0 : i32, i32
  }
  func.func @transform_14(%arg0: i32) -> (i32, i32) {
    %c0_i32 = arith.constant 0 : i32
    %c0_i32_0 = arith.constant 0 : i32
    %c0_i32_1 = arith.constant 0 : i32
    return %c0_i32, %c0_i32_0 : i32, i32
  }
  func.func @transform_15(%arg0: i32) -> (i32, i32) {
    %c0_i32 = arith.constant 0 : i32
    %c0_i32_0 = arith.constant 0 : i32
    %c0_i32_1 = arith.constant 0 : i32
    return %c0_i32, %c0_i32_0 : i32, i32
  }
  func.func @transform_16(%arg0: i32) -> (i32, i32) {
    %c0_i32 = arith.constant 0 : i32
    %c0_i32_0 = arith.constant 0 : i32
    %c0_i32_1 = arith.constant 0 : i32
    return %c0_i32, %c0_i32_0 : i32, i32
  }
  func.func @transform_17(%arg0: i32) -> (i32, i32) {
    %c0_i32 = arith.constant 0 : i32
    %c0_i32_0 = arith.constant 0 : i32
    %c0_i32_1 = arith.constant 0 : i32
    return %c0_i32, %c0_i32_0 : i32, i32
  }
  func.func @transform_18(%arg0: i32) -> (i32, i32) {
    %c0_i32 = arith.constant 0 : i32
    %c0_i32_0 = arith.constant 0 : i32
    %c0_i32_1 = arith.constant 0 : i32
    return %c0_i32, %c0_i32_0 : i32, i32
  }
  func.func @transform_19(%arg0: i32) -> (i32, i32) {
    %c0_i32 = arith.constant 0 : i32
    %c0_i32_0 = arith.constant 0 : i32
    %c0_i32_1 = arith.constant 0 : i32
    return %c0_i32, %c0_i32_0 : i32, i32
  }
  func.func @transform_20(%arg0: i32) -> (i32, i32) {
    %c0_i32 = arith.constant 0 : i32
    %c0_i32_0 = arith.constant 0 : i32
    %c0_i32_1 = arith.constant 0 : i32
    return %c0_i32, %c0_i32_0 : i32, i32
  }
  func.func @transform_21(%arg0: i32) -> (i32, i32) {
    %c0_i32 = arith.constant 0 : i32
    %c0_i32_0 = arith.constant 0 : i32
    %c0_i32_1 = arith.constant 0 : i32
    return %c0_i32, %c0_i32_0 : i32, i32
  }
  func.func @transform_22(%arg0: i32) -> (i32, i32) {
    %c0_i32 = arith.constant 0 : i32
    %c0_i32_0 = arith.constant 0 : i32
    %c0_i32_1 = arith.constant 0 : i32
    return %c0_i32, %c0_i32_0 : i32, i32
  }
  func.func @transform_23(%arg0: i32) -> (i32, i32) {
    %c0_i32 = arith.constant 0 : i32
    %c0_i32_0 = arith.constant 0 : i32
    %c0_i32_1 = arith.constant 0 : i32
    return %c0_i32, %c0_i32_0 : i32, i32
  }
  func.func @transform_24(%arg0: i32) -> (i32, i32) {
    %c0_i32 = arith.constant 0 : i32
    %c0_i32_0 = arith.constant 0 : i32
    %c0_i32_1 = arith.constant 0 : i32
    return %c0_i32, %c0_i32_0 : i32, i32
  }
  func.func @transform_25(%arg0: i32) -> (i32, i32) {
    %c0_i32 = arith.constant 0 : i32
    %c0_i32_0 = arith.constant 0 : i32
    %c0_i32_1 = arith.constant 0 : i32
    return %c0_i32, %c0_i32_0 : i32, i32
  }
  func.func @transform_26(%arg0: i32) -> (i32, i32) {
    %c0_i32 = arith.constant 0 : i32
    %c0_i32_0 = arith.constant 0 : i32
    %c0_i32_1 = arith.constant 0 : i32
    return %c0_i32, %c0_i32_0 : i32, i32
  }
  func.func @transform_27(%arg0: i32) -> (i32, i32) {
    %c0_i32 = arith.constant 0 : i32
    %c0_i32_0 = arith.constant 0 : i32
    %c0_i32_1 = arith.constant 0 : i32
    return %c0_i32, %c0_i32_0 : i32, i32
  }
  func.func @transform_28(%arg0: i32) -> (i32, i32) {
    %c0_i32 = arith.constant 0 : i32
    %c0_i32_0 = arith.constant 0 : i32
    %c0_i32_1 = arith.constant 0 : i32
    return %c0_i32, %c0_i32_0 : i32, i32
  }
  func.func @transform_29(%arg0: i32) -> (i32, i32) {
    %c0_i32 = arith.constant 0 : i32
    %c0_i32_0 = arith.constant 0 : i32
    %c0_i32_1 = arith.constant 0 : i32
    return %c0_i32, %c0_i32_0 : i32, i32
  }
  func.func @transform_30(%arg0: i32) -> (i32, i32) {
    %c0_i32 = arith.constant 0 : i32
    %c0_i32_0 = arith.constant 0 : i32
    %c0_i32_1 = arith.constant 0 : i32
    return %c0_i32, %c0_i32_0 : i32, i32
  }
  func.func @transform_31(%arg0: i32) -> (i32, i32) {
    %c0_i32 = arith.constant 0 : i32
    %c0_i32_0 = arith.constant 0 : i32
    %c0_i32_1 = arith.constant 0 : i32
    return %c0_i32, %c0_i32_0 : i32, i32
  }
  func.func @transform_32(%arg0: i32) -> (i32, i32) {
    %c0_i32 = arith.constant 0 : i32
    %c0_i32_0 = arith.constant 0 : i32
    %c0_i32_1 = arith.constant 0 : i32
    return %c0_i32, %c0_i32_0 : i32, i32
  }
  func.func @transform_33(%arg0: i32) -> (i32, i32) {
    %c0_i32 = arith.constant 0 : i32
    %c0_i32_0 = arith.constant 0 : i32
    %c0_i32_1 = arith.constant 0 : i32
    return %c0_i32, %c0_i32_0 : i32, i32
  }
  func.func @transform_34(%arg0: i32) -> (i32, i32, i32) {
    %c0_i32 = arith.constant 0 : i32
    %c0_i32_0 = arith.constant 0 : i32
    %c0_i32_1 = arith.constant 0 : i32
    return %arg0, %c0_i32, %c0_i32_0 : i32, i32, i32
  }
}

</mosaic_0001>

<bundles_post_ra>
// kernel: spec_wave_next_forward.1
= control target key start
LH: loop header
LB: loop body
LE: loop exit
PB: predicated region body
PF: predicated region fallthrough
CT: control target
= control target key end

     0   :  { %s13483_s6 = smov 1   ;;  %s13484_s10 = smov 2   ;;  %s16625_s0 = inlined_call_operand.smem [shape: u32[35], index: -1, kind: input, shape index: {}] }
   0x1   :  { %s13563_s5 = sld [smem:[%s16625_s0]]   ;;  %s13485_s14 = smov 3  }
   0x2   :  { %s13568_s9 = sld [smem:[%s16625_s0 + %s13483_s6]]   ;;  %s13486_s18 = smov 4  }
   0x3   :  { %s13573_s13 = sld [smem:[%s16625_s0 + %s13484_s10]]   ;;  %s13487_s22 = smov 5  }
   0x4   :  { %s13578_s17 = sld [smem:[%s16625_s0 + %s13485_s14]]   ;;  %s13488_s26 = smov 6  }
   0x5   :  { %s13583_s21 = sld [smem:[%s16625_s0 + %s13486_s18]]   ;;  %s13489_s30 = smov 7  }
   0x6   :  { %s13588_s25 = sld [smem:[%s16625_s0 + %s13487_s22]]   ;;  %s13490_s4 = smov 8  }
   0x7   :  { %16690 = sst [smem:[#allocation59_spill]] %s13563_s5  ;;  %s13491_s10 = smov 9  }
   0x8   :  { %16691 = sst [smem:[#allocation60_spill]] %s13568_s9  ;;  %s13492_s15 = smov 10  }
   0x9   :  { %s13593_s29 = sld [smem:[%s16625_s0 + %s13488_s26]]   ;;  %s13493_s20 = smov 11  }
   0xa   :  { %s13598_s3 = sld [smem:[%s16625_s0 + %s13489_s30]]   ;;  %s13494_s26 = smov 12  }
   0xb   :  { %16692 = sst [smem:[#allocation61_spill]] %s13583_s21  ;;  %s13495_s1 = smov 13  }
   0xc   :  { %s13603_s8 = sld [smem:[%s16625_s0 + %s13490_s4]]   ;;  %s13496_s7 = smov 14  }
   0xd   :  { %s13608_s14 = sld [smem:[%s16625_s0 + %s13491_s10]]   ;;  %s13498_s22 = smov 16  }
   0xe   :  { %s13613_s19 = sld [smem:[%s16625_s0 + %s13492_s15]]   ;;  %s13497_s15 = smov 15  }
   0xf   :  { %s13618_s24 = sld [smem:[%s16625_s0 + %s13493_s20]]   ;;  %s13499_s28 = smov 17  }
  0x10   :  { %16693 = sst [smem:[#allocation62_spill]] %s13598_s3 }
  0x11   :  { %s13623_s30 = sld [smem:[%s16625_s0 + %s13494_s26]]  }
  0x12   :  { %16694 = sst [smem:[#allocation63_spill]] %s13603_s8 }
  0x13   :  { %s13628_s6 = sld [smem:[%s16625_s0 + %s13495_s1]]  }
  0x14   :  { %16695 = sst [smem:[#allocation64_spill]] %s13613_s19 }
  0x15   :  { %16696 = sst [smem:[#allocation65_spill]] %s13618_s24 }
  0x16   :  { %s13633_s12 = sld [smem:[%s16625_s0 + %s13496_s7]]   ;;  %s13500_s7 = smov 18  }
  0x17   :  { %s13638_s20 = sld [smem:[%s16625_s0 + %s13497_s15]]   ;;  %s13501_s15 = smov 19  }
  0x18   :  { %s13643_s27 = sld [smem:[%s16625_s0 + %s13498_s22]]   ;;  %s13502_s22 = smov 20  }
  0x19   :  { %16697 = sst [smem:[#allocation66_spill]] %s13628_s6 }
  0x1a   :  { %s13648_s4 = sld [smem:[%s16625_s0 + %s13499_s28]]   ;;  %s13503_s28 = smov 21  }
  0x1b   :  { %s13653_s19 = sld [smem:[%s16625_s0 + %s13500_s7]]   ;;  %s13504_s7 = smov 22  }
  0x1c   :  { %s13658_s9 = sld [smem:[%s16625_s0 + %s13501_s15]]   ;;  %s13505_s15 = smov 23  }
  0x1d   :  { %16698 = sst [smem:[#allocation67_spill]] %s13638_s20 }
  0x1e   :  { %s13663_s8 = sld [smem:[%s16625_s0 + %s13502_s22]]   ;;  %s13506_s22 = smov 24  }
  0x1f   :  { %s13668_s21 = sld [smem:[%s16625_s0 + %s13503_s28]]   ;;  %s13507_s28 = smov 25  }
  0x20   :  { %16699 = sst [smem:[#allocation68_spill]] %s13648_s4 }
  0x21   :  { %s13673_s5 = sld [smem:[%s16625_s0 + %s13504_s7]]   ;;  %s13508_s7 = smov 26  }
  0x22   :  { %16700 = sst [smem:[#allocation69_spill]] %s13658_s9 }
  0x23   :  { %s13678_s9 = sld [smem:[%s16625_s0 + %s13505_s15]]   ;;  %s13509_s15 = smov 27  }
  0x24   :  { %s13683_s4 = sld [smem:[%s16625_s0 + %s13506_s22]]   ;;  %s13510_s22 = smov 28  }
  0x25   :  { %16701 = sst [smem:[#allocation70_spill]] %s13668_s21 }
  0x26   :  { %s13688_s21 = sld [smem:[%s16625_s0 + %s13507_s28]]   ;;  %s13511_s28 = smov 29  }
  0x27   :  { %16702 = sst [smem:[#allocation71_spill]] %s13673_s5 }
  0x28   :  { %s13693_s5 = sld [smem:[%s16625_s0 + %s13508_s7]]   ;;  %s13512_s7 = smov 30  }
  0x29   :  { %s13698_s20 = sld [smem:[%s16625_s0 + %s13509_s15]]   ;;  %s13513_s15 = smov 31  }
  0x2a   :  { %16703 = sst [smem:[#allocation72_spill]] %s13683_s4 }
  0x2b   :  { %s13703_s4 = sld [smem:[%s16625_s0 + %s13510_s22]]   ;;  %s13514_s22 = smov 32  }
  0x2c   :  { %s13708_s6 = sld [smem:[%s16625_s0 + %s13511_s28]]   ;;  %s13515_s28 = smov 33  }
  0x2d   :  { %s13718_s24 = sld [smem:[%s16625_s0 + %s13513_s15]]  }
  0x2e   :  { %16704 = sst [smem:[#allocation73_spill]] %s13693_s5 }
  0x2f   :  { %s13713_s5 = sld [smem:[%s16625_s0 + %s13512_s7]]   ;;  %s13516_s7 = smov 34  }
  0x30   :  { %s13728_s3 = sld [smem:[%s16625_s0 + %s13515_s28]]  }
  0x31   :  { %16705 = sst [smem:[#allocation74_spill]] %s13703_s4 }
  0x32   :  { %s13723_s4 = sld [smem:[%s16625_s0 + %s13514_s22]]  }
  0x35   :  { %16706 = sst [smem:[#allocation75_spill]] %s13713_s5 }
  0x36   :  { %s13733_s5 = sld [smem:[%s16625_s0 + %s13516_s7]]  }
  0x37   :  { %74 = vsyncpa [#allocation3], 0 }
  0x38   :  { %75 = vsyncpa [#allocation6], 0 }
  0x39   :  { %76 = vsyncpa [#allocation9], 0 }
  0x3a   :  { %77 = vsyncpa [#allocation12], 0 }
  0x3b   :  { %78 = vsyncpa [#allocation15], 0 }
  0x3c   :  { %79 = vsyncpa [#allocation18], 0 }
  0x3d   :  { %80 = vsyncpa [#allocation21], 0 }
  0x3e   :  { %81 = vsyncpa [#allocation24], 0 }
  0x3f   :  { %82 = vsyncpa [#allocation27], 0 }
  0x40   :  { %83 = vsyncpa [#allocation30], 0 }
  0x41   :  { %84 = vsyncpa [#allocation33], 0 }
  0x42   :  { %85 = vsyncpa [#allocation36], 0 }
  0x43   :  { %86 = vsyncpa [#allocation39], 0 }
  0x44   :  { %87 = vsyncpa [#allocation42], 0 }
  0x45   :  { %88 = vsyncpa [#allocation4], 0  ;;  %s13517_s0 = smov [#allocation5]   ;;  %s13518_s16 = smov [#allocation8]  }
  0x46   :  { %s111_s15 = sshll.u32 %s13517_s0, 4  ;;  %s133_s18 = sshll.u32 %s13518_s16, 4  ;;  %s112_s15 = int_to_ptr.vmem [resolvable:$true] %s111_s15  ;;  %s134_s18 = int_to_ptr.vmem [resolvable:$true] %s133_s18 }
  0x47   :  { %s12859_s22 = scalar_lea.hbm %s13578_s17, 32 }
  0x48   :  { %p12860_p0 = scmp.ne.s32.totalorder %s13578_s17, %s12859_s22  ;;  %p12863_p1 = scmp.lt.u32.totalorder %s12859_s22, %s13578_s17 }
  0x4a   :  { %p12865_p2 = pnand %p12863_p1, %p12860_p0 }
  0x4c   :  { %12868 = shalt.err (!%p12865_p2)
}
  0x4d   :  { %s12869_s23 = scalar_lea.vmem %s112_s15, 32  ;;  %p12874_p4 = scmp.lt.s32.totalorder %s112_s15, %s112_s15 }
  0x4e   :  { %p12870_p3 = scmp.ne.s32.totalorder %s112_s15, %s12869_s23  ;;  %p12875_p5 = scmp.lt.s32.totalorder %s12869_s23, %s12869_s23 }
  0x50   :  { %p12876_p6 = por %p12875_p5, %p12874_p4 }
  0x52   :  { %p12877_p7 = pnand %p12876_p6, %p12870_p3 }
  0x54   :  { %12880 = shalt.err (!%p12877_p7)
}
  0x55   :  { %114 = dma.hbm_to_vmem [thread:$0]  %s13578_s17, 32, %s112_s15, [#allocation6]  }
  0x56   :  { %s12881_s26 = scalar_lea.hbm %s13593_s29, 32 }
  0x57   :  { %p12882_p8 = scmp.ne.s32.totalorder %s13593_s29, %s12881_s26  ;;  %p12885_p9 = scmp.lt.u32.totalorder %s12881_s26, %s13593_s29 }
  0x59   :  { %p12887_p10 = pnand %p12885_p9, %p12882_p8 }
  0x5b   :  { %12890 = shalt.err (!%p12887_p10)
}
  0x5c   :  { %s12891_s28 = scalar_lea.vmem %s134_s18, 32  ;;  %p12896_p12 = scmp.lt.s32.totalorder %s134_s18, %s134_s18 }
  0x5d   :  { %p12892_p11 = scmp.ne.s32.totalorder %s134_s18, %s12891_s28  ;;  %p12897_p13 = scmp.lt.s32.totalorder %s12891_s28, %s12891_s28 }
  0x5f   :  { %p12898_p0 = por %p12897_p13, %p12896_p12 }
  0x61   :  { %p12899_p1 = pnand %p12898_p0, %p12892_p11 }
  0x63   :  { %12902 = shalt.err (!%p12899_p1)
}
  0x64   :  { %136 = dma.hbm_to_vmem [thread:$0]  %s13593_s29, 32, %s134_s18, [#allocation9]  }
  0x65   :  { %s13519_s1 = smov [#allocation11]   ;;  %s13520_s17 = smov [#allocation14]  }
  0x66   :  { %s155_s2 = sshll.u32 %s13519_s1, 4  ;;  %s177_s7 = sshll.u32 %s13520_s17, 4  ;;  %s156_s2 = int_to_ptr.vmem [resolvable:$true] %s155_s2  ;;  %s178_s7 = int_to_ptr.vmem [resolvable:$true] %s177_s7 }
  0x67   :  { %s12903_s10 = scalar_lea.hbm %s13608_s14, 96 }
  0x68   :  { %p12904_p2 = scmp.ne.s32.totalorder %s13608_s14, %s12903_s10  ;;  %p12907_p3 = scmp.lt.u32.totalorder %s12903_s10, %s13608_s14 }
  0x6a   :  { %p12909_p4 = pnand %p12907_p3, %p12904_p2 }
  0x6c   :  { %12912 = shalt.err (!%p12909_p4)
}
  0x6d   :  { %s12913_s11 = scalar_lea.vmem %s156_s2, 96  ;;  %p12918_p6 = scmp.lt.s32.totalorder %s156_s2, %s156_s2 }
  0x6e   :  { %p12914_p5 = scmp.ne.s32.totalorder %s156_s2, %s12913_s11  ;;  %p12919_p7 = scmp.lt.s32.totalorder %s12913_s11, %s12913_s11 }
  0x70   :  { %p12920_p8 = por %p12919_p7, %p12918_p6 }
  0x72   :  { %p12921_p9 = pnand %p12920_p8, %p12914_p5 }
  0x74   :  { %12924 = shalt.err (!%p12921_p9)
}
  0x75   :  { %158 = dma.hbm_to_vmem [thread:$0]  %s13608_s14, 96, %s156_s2, [#allocation12]  }
  0x76   :  { %s12925_s29 = scalar_lea.hbm %s13623_s30, 32 }
  0x77   :  { %p12926_p10 = scmp.ne.s32.totalorder %s13623_s30, %s12925_s29  ;;  %p12929_p11 = scmp.lt.u32.totalorder %s12925_s29, %s13623_s30 }
  0x79   :  { %p12931_p12 = pnand %p12929_p11, %p12926_p10 }
  0x7b   :  { %12934 = shalt.err (!%p12931_p12)
}
  0x7c   :  { %s12935_s0 = scalar_lea.vmem %s178_s7, 32  ;;  %p12940_p0 = scmp.lt.s32.totalorder %s178_s7, %s178_s7 }
  0x7d   :  { %p12936_p13 = scmp.ne.s32.totalorder %s178_s7, %s12935_s0  ;;  %p12941_p1 = scmp.lt.s32.totalorder %s12935_s0, %s12935_s0 }
  0x7f   :  { %p12942_p2 = por %p12941_p1, %p12940_p0 }
  0x81   :  { %p12943_p3 = pnand %p12942_p2, %p12936_p13 }
  0x83   :  { %12946 = shalt.err (!%p12943_p3)
}
  0x84   :  { %180 = dma.hbm_to_vmem [thread:$0]  %s13623_s30, 32, %s178_s7, [#allocation15]  }
  0x85   :  { %s13521_s15 = smov [#allocation17]   ;;  %s13522_s14 = smov [#allocation20]  }
  0x86   :  { %s196_s16 = sshll.u32 %s13521_s15, 4  ;;  %s218_s18 = sshll.u32 %s13522_s14, 4  ;;  %s197_s16 = int_to_ptr.vmem [resolvable:$true] %s196_s16  ;;  %s13751_s18 = int_to_ptr.vmem [resolvable:$true] %s218_s18 }
  0x87   :  { %s12947_s22 = scalar_lea.hbm %s13633_s12, 4096 }
  0x88   :  { %p12948_p4 = scmp.ne.s32.totalorder %s13633_s12, %s12947_s22  ;;  %p12951_p5 = scmp.lt.u32.totalorder %s12947_s22, %s13633_s12 }
  0x8a   :  { %p12953_p6 = pnand %p12951_p5, %p12948_p4 }
  0x8c   :  { %12956 = shalt.err (!%p12953_p6)
}
  0x8d   :  { %s12957_s23 = scalar_lea.vmem %s197_s16, 4096  ;;  %p12962_p8 = scmp.lt.s32.totalorder %s197_s16, %s197_s16 }
  0x8e   :  { %p12958_p7 = scmp.ne.s32.totalorder %s197_s16, %s12957_s23  ;;  %p12963_p9 = scmp.lt.s32.totalorder %s12957_s23, %s12957_s23 }
  0x90   :  { %p12964_p10 = por %p12963_p9, %p12962_p8 }
  0x92   :  { %p12965_p11 = pnand %p12964_p10, %p12958_p7 }
  0x94   :  { %12968 = shalt.err (!%p12965_p11)
}
  0x95   :  { %s13523_s30 = smov 128   ;;  %s13524_s26 = smov 8  }
  0x96   :  { %202 = dma.hbm_to_vmem [thread:$0]  %s13633_s12, 4096, %s197_s16, [#allocation18], %s13523_s30, %s13523_s30, %s13524_s26  }
  0x97   :  { %s12969_s28 = scalar_lea.hbm %s13643_s27, 4096 }
  0x98   :  { %p12970_p12 = scmp.ne.s32.totalorder %s13643_s27, %s12969_s28  ;;  %p12973_p13 = scmp.lt.u32.totalorder %s12969_s28, %s13643_s27 }
  0x9a   :  { %p12975_p0 = pnand %p12973_p13, %p12970_p12 }
  0x9c   :  { %12978 = shalt.err (!%p12975_p0)
}
  0x9d   :  { %s12979_s1 = scalar_lea.vmem %s13751_s18, 4096  ;;  %p12984_p2 = scmp.lt.s32.totalorder %s13751_s18, %s13751_s18 }
  0x9e   :  { %p12980_p1 = scmp.ne.s32.totalorder %s13751_s18, %s12979_s1  ;;  %p12985_p3 = scmp.lt.s32.totalorder %s12979_s1, %s12979_s1 }
  0xa0   :  { %p12986_p4 = por %p12985_p3, %p12984_p2 }
  0xa2   :  { %p12987_p5 = pnand %p12986_p4, %p12980_p1 }
  0xa4   :  { %12990 = shalt.err (!%p12987_p5)
}
  0xa5   :  { %224 = dma.hbm_to_vmem [thread:$0]  %s13643_s27, 4096, %s13751_s18, [#allocation21], %s13523_s30, %s13523_s30, %s13524_s26  }
  0xa6   :  { %s13525_s12 = smov [#allocation23]   ;;  %s13526_s17 = smov [#allocation26]  }
  0xa7   :  { %s241_s2 = sshll.u32 %s13525_s12, 4  ;;  %s260_s7 = sshll.u32 %s13526_s17, 4  ;;  %s242_s2 = int_to_ptr.vmem [resolvable:$true] %s241_s2  ;;  %s13772_s7 = int_to_ptr.vmem [resolvable:$true] %s260_s7 }
  0xa8   :  { %s12991_s10 = scalar_lea.hbm %s13653_s19, 32 }
  0xa9   :  { %p12992_p6 = scmp.ne.s32.totalorder %s13653_s19, %s12991_s10  ;;  %p12995_p7 = scmp.lt.u32.totalorder %s12991_s10, %s13653_s19 }
  0xab   :  { %p12997_p8 = pnand %p12995_p7, %p12992_p6 }
  0xad   :  { %13000 = shalt.err (!%p12997_p8)
}
  0xae   :  { %s13001_s11 = scalar_lea.vmem %s242_s2, 32  ;;  %p13006_p10 = scmp.lt.s32.totalorder %s242_s2, %s242_s2 }
  0xaf   :  { %p13002_p9 = scmp.ne.s32.totalorder %s242_s2, %s13001_s11  ;;  %p13007_p11 = scmp.lt.s32.totalorder %s13001_s11, %s13001_s11 }
  0xb1   :  { %p13008_p12 = por %p13007_p11, %p13006_p10 }
  0xb3   :  { %p13009_p13 = pnand %p13008_p12, %p13002_p9 }
  0xb5   :  { %13012 = shalt.err (!%p13009_p13)
}
  0xb6   :  { %244 = dma.hbm_to_vmem [thread:$0]  %s13653_s19, 32, %s242_s2, [#allocation24]  }
  0xb7   :  { %s13013_s27 = scalar_lea.hbm %s13663_s8, 4096 }
  0xb8   :  { %p13014_p0 = scmp.ne.s32.totalorder %s13663_s8, %s13013_s27  ;;  %p13017_p1 = scmp.lt.u32.totalorder %s13013_s27, %s13663_s8 }
  0xba   :  { %p13019_p2 = pnand %p13017_p1, %p13014_p0 }
  0xbc   :  { %13022 = shalt.err (!%p13019_p2)
}
  0xbd   :  { %s13023_s29 = scalar_lea.vmem %s13772_s7, 4096  ;;  %p13028_p4 = scmp.lt.s32.totalorder %s13772_s7, %s13772_s7 }
  0xbe   :  { %p13024_p3 = scmp.ne.s32.totalorder %s13772_s7, %s13023_s29  ;;  %p13029_p5 = scmp.lt.s32.totalorder %s13023_s29, %s13023_s29 }
  0xc0   :  { %p13030_p6 = por %p13029_p5, %p13028_p4 }
  0xc2   :  { %p13031_p7 = pnand %p13030_p6, %p13024_p3 }
  0xc4   :  { %13034 = shalt.err (!%p13031_p7)
}
  0xc5   :  { %266 = dma.hbm_to_vmem [thread:$0]  %s13663_s8, 4096, %s13772_s7, [#allocation27], %s13523_s30, %s13523_s30, %s13524_s26  }
  0xc6   :  { %s13527_s19 = smov [#allocation29]   ;;  %s13528_s15 = smov [#allocation32]  }
  0xc7   :  { %s285_s0 = sshll.u32 %s13527_s19, 4  ;;  %s307_s16 = sshll.u32 %s13528_s15, 4  ;;  %s286_s0 = int_to_ptr.vmem [resolvable:$true] %s285_s0  ;;  %s308_s16 = int_to_ptr.vmem [resolvable:$true] %s307_s16 }
  0xc8   :  { %s13035_s14 = scalar_lea.hbm %s13678_s9, 64 }
  0xc9   :  { %p13036_p8 = scmp.ne.s32.totalorder %s13678_s9, %s13035_s14  ;;  %p13039_p9 = scmp.lt.u32.totalorder %s13035_s14, %s13678_s9 }
  0xcb   :  { %p13041_p10 = pnand %p13039_p9, %p13036_p8 }
  0xcd   :  { %13044 = shalt.err (!%p13041_p10)
}
  0xce   :  { %s13045_s18 = scalar_lea.vmem %s286_s0, 64  ;;  %p13050_p12 = scmp.lt.s32.totalorder %s286_s0, %s286_s0 }
  0xcf   :  { %p13046_p11 = scmp.ne.s32.totalorder %s286_s0, %s13045_s18  ;;  %p13051_p13 = scmp.lt.s32.totalorder %s13045_s18, %s13045_s18 }
  0xd1   :  { %p13052_p0 = por %p13051_p13, %p13050_p12 }
  0xd3   :  { %p13053_p1 = pnand %p13052_p0, %p13046_p11 }
  0xd5   :  { %13056 = shalt.err (!%p13053_p1)
}
  0xd6   :  { %288 = dma.hbm_to_vmem [thread:$0]  %s13678_s9, 64, %s286_s0, [#allocation30]  }
  0xd7   :  { %s13057_s8 = scalar_lea.hbm %s13688_s21, 32 }
  0xd8   :  { %p13058_p2 = scmp.ne.s32.totalorder %s13688_s21, %s13057_s8  ;;  %p13061_p3 = scmp.lt.u32.totalorder %s13057_s8, %s13688_s21 }
  0xda   :  { %p13063_p4 = pnand %p13061_p3, %p13058_p2 }
  0xdc   :  { %13066 = shalt.err (!%p13063_p4)
}
  0xdd   :  { %s13067_s22 = scalar_lea.vmem %s308_s16, 32  ;;  %p13072_p6 = scmp.lt.s32.totalorder %s308_s16, %s308_s16 }
  0xde   :  { %p13068_p5 = scmp.ne.s32.totalorder %s308_s16, %s13067_s22  ;;  %p13073_p7 = scmp.lt.s32.totalorder %s13067_s22, %s13067_s22 }
  0xe0   :  { %p13074_p8 = por %p13073_p7, %p13072_p6 }
  0xe2   :  { %p13075_p9 = pnand %p13074_p8, %p13068_p5 }
  0xe4   :  { %13078 = shalt.err (!%p13075_p9)
}
  0xe5   :  { %310 = dma.hbm_to_vmem [thread:$0]  %s13688_s21, 32, %s308_s16, [#allocation33]  }
  0xe6   :  { %s13529_s23 = smov [#allocation35]   ;;  %s13530_s9 = smov [#allocation38]  }
  0xe7   :  { %s327_s28 = sshll.u32 %s13529_s23, 4  ;;  %s349_s1 = sshll.u32 %s13530_s9, 4  ;;  %s328_s28 = int_to_ptr.vmem [resolvable:$true] %s327_s28  ;;  %s350_s1 = int_to_ptr.vmem [resolvable:$true] %s349_s1 }
  0xe8   :  { %s13079_s12 = scalar_lea.hbm %s13698_s20, 32 }
  0xe9   :  { %p13080_p10 = scmp.ne.s32.totalorder %s13698_s20, %s13079_s12  ;;  %p13083_p11 = scmp.lt.u32.totalorder %s13079_s12, %s13698_s20 }
  0xeb   :  { %p13085_p12 = pnand %p13083_p11, %p13080_p10 }
  0xed   :  { %13088 = shalt.err (!%p13085_p12)
}
  0xee   :  { %s13089_s2 = scalar_lea.vmem %s328_s28, 32  ;;  %p13094_p0 = scmp.lt.s32.totalorder %s328_s28, %s328_s28 }
  0xef   :  { %p13090_p13 = scmp.ne.s32.totalorder %s328_s28, %s13089_s2  ;;  %p13095_p1 = scmp.lt.s32.totalorder %s13089_s2, %s13089_s2 }
  0xf1   :  { %p13096_p2 = por %p13095_p1, %p13094_p0 }
  0xf3   :  { %p13097_p3 = pnand %p13096_p2, %p13090_p13 }
  0xf5   :  { %13100 = shalt.err (!%p13097_p3)
}
  0xf6   :  { %330 = dma.hbm_to_vmem [thread:$0]  %s13698_s20, 32, %s328_s28, [#allocation36]  }
  0xf7   :  { %s13101_s21 = scalar_lea.hbm %s13708_s6, 32 }
  0xf8   :  { %p13102_p4 = scmp.ne.s32.totalorder %s13708_s6, %s13101_s21  ;;  %p13105_p5 = scmp.lt.u32.totalorder %s13101_s21, %s13708_s6 }
  0xfa   :  { %p13107_p6 = pnand %p13105_p5, %p13102_p4 }
  0xfc   :  { %13110 = shalt.err (!%p13107_p6)
}
  0xfd   :  { %s13111_s17 = scalar_lea.vmem %s350_s1, 32  ;;  %p13116_p8 = scmp.lt.s32.totalorder %s350_s1, %s350_s1 }
  0xfe   :  { %p13112_p7 = scmp.ne.s32.totalorder %s350_s1, %s13111_s17  ;;  %p13117_p9 = scmp.lt.s32.totalorder %s13111_s17, %s13111_s17 }
 0x100   :  { %p13118_p10 = por %p13117_p9, %p13116_p8 }
 0x102   :  { %p13119_p11 = pnand %p13118_p10, %p13112_p7 }
 0x104   :  { %13122 = shalt.err (!%p13119_p11)
}
 0x105   :  { %352 = dma.hbm_to_vmem [thread:$0]  %s13708_s6, 32, %s350_s1, [#allocation39]  }
 0x106   :  { %s13531_s7 = smov [#allocation2]   ;;  %s13532_s20 = smov [#allocation7]  }
 0x107   :  { %s98_s10 = sshll.u32 %s13531_s7, 4  ;;  %s123_s11 = sshll.u32 %s13532_s20, 4  ;;  %s99_s10 = int_to_ptr.vmem [resolvable:$true] %s98_s10  ;;  %s124_s11 = int_to_ptr.vmem [resolvable:$true] %s123_s11 }
 0x108   :  { %s13123_s27 = scalar_lea.hbm %s13573_s13, 768 }
 0x109   :  { %p13124_p12 = scmp.ne.s32.totalorder %s13573_s13, %s13123_s27  ;;  %p13127_p13 = scmp.lt.u32.totalorder %s13123_s27, %s13573_s13 }
 0x10b   :  { %p13129_p0 = pnand %p13127_p13, %p13124_p12 }
 0x10d   :  { %13132 = shalt.err (!%p13129_p0)
}
 0x10e   :  { %s13133_s29 = scalar_lea.vmem %s99_s10, 768  ;;  %p13138_p2 = scmp.lt.s32.totalorder %s99_s10, %s99_s10 }
 0x10f   :  { %p13134_p1 = scmp.ne.s32.totalorder %s99_s10, %s13133_s29  ;;  %p13139_p3 = scmp.lt.s32.totalorder %s13133_s29, %s13133_s29 }
 0x111   :  { %p13140_p4 = por %p13139_p3, %p13138_p2 }
 0x113   :  { %p13141_p5 = pnand %p13140_p4, %p13134_p1 }
 0x115   :  { %13144 = shalt.err (!%p13141_p5)
}
 0x116   :  { %104 = dma.hbm_to_vmem [thread:$0]  %s13573_s13, 768, %s99_s10, [#allocation3], %s13523_s30, %s13523_s30, %s13524_s26  }
 0x117   :  { %s13145_s6 = scalar_lea.hbm %s13588_s25, 32 }
 0x118   :  { %p13146_p6 = scmp.ne.s32.totalorder %s13588_s25, %s13145_s6  ;;  %p13149_p7 = scmp.lt.u32.totalorder %s13145_s6, %s13588_s25 }
 0x11a   :  { %p13151_p8 = pnand %p13149_p7, %p13146_p6 }
 0x11c   :  { %13154 = shalt.err (!%p13151_p8)
}
 0x11d   :  { %s13155_s19 = scalar_lea.vmem %s124_s11, 32  ;;  %p13160_p10 = scmp.lt.s32.totalorder %s124_s11, %s124_s11 }
 0x11e   :  { %p13156_p9 = scmp.ne.s32.totalorder %s124_s11, %s13155_s19  ;;  %p13161_p11 = scmp.lt.s32.totalorder %s13155_s19, %s13155_s19 }
 0x120   :  { %p13162_p12 = por %p13161_p11, %p13160_p10 }
 0x122   :  { %p13163_p13 = pnand %p13162_p12, %p13156_p9 }
 0x124   :  { %13166 = shalt.err (!%p13163_p13)
}
 0x125   :  { %s16707_s0 = sld [smem:[#allocation62_spill]]  ;;  %s13533_s15 = smov [#allocation10]  }
 0x126   :  { %126 = dma.hbm_to_vmem [thread:$0]  %s13588_s25, 32, %s124_s11, [#allocation6]  }
 0x127   :  { %s143_s16 = sshll.u32 %s13533_s15, 4  ;;  %s13534_s13 = smov [#allocation13]   ;;  %s144_s16 = int_to_ptr.vmem [resolvable:$true] %s143_s16 }
 0x128   :  { %s167_s14 = sshll.u32 %s13534_s13, 4  ;;  %s168_s14 = int_to_ptr.vmem [resolvable:$true] %s167_s14 }
 0x12b   :  { %s13167_s18 = scalar_lea.hbm %s16707_s0, 32 }
 0x12c   :  { %p13168_p0 = scmp.ne.s32.totalorder %s16707_s0, %s13167_s18  ;;  %p13171_p1 = scmp.lt.u32.totalorder %s13167_s18, %s16707_s0 }
 0x12e   :  { %p13173_p2 = pnand %p13171_p1, %p13168_p0 }
 0x130   :  { %13176 = shalt.err (!%p13173_p2)
}
 0x131   :  { %s13177_s8 = scalar_lea.vmem %s144_s16, 32  ;;  %p13182_p4 = scmp.lt.s32.totalorder %s144_s16, %s144_s16 }
 0x132   :  { %p13178_p3 = scmp.ne.s32.totalorder %s144_s16, %s13177_s8  ;;  %p13183_p5 = scmp.lt.s32.totalorder %s13177_s8, %s13177_s8 }
 0x134   :  { %p13184_p6 = por %p13183_p5, %p13182_p4 }
 0x136   :  { %p13185_p7 = pnand %p13184_p6, %p13178_p3 }
 0x138   :  { %13188 = shalt.err (!%p13185_p7)
}
 0x139   :  { %s16708_s25 = sld [smem:[#allocation65_spill]] }
 0x13a   :  { %146 = dma.hbm_to_vmem [thread:$0]  %s16707_s0, 32, %s144_s16, [#allocation9]  }
 0x13f   :  { %s13189_s22 = scalar_lea.hbm %s16708_s25, 32 }
 0x140   :  { %p13190_p8 = scmp.ne.s32.totalorder %s16708_s25, %s13189_s22  ;;  %p13193_p9 = scmp.lt.u32.totalorder %s13189_s22, %s16708_s25 }
 0x142   :  { %p13195_p10 = pnand %p13193_p9, %p13190_p8 }
 0x144   :  { %13198 = shalt.err (!%p13195_p10)
}
 0x145   :  { %s13199_s23 = scalar_lea.vmem %s168_s14, 32  ;;  %p13204_p12 = scmp.lt.s32.totalorder %s168_s14, %s168_s14 }
 0x146   :  { %p13200_p11 = scmp.ne.s32.totalorder %s168_s14, %s13199_s23  ;;  %p13205_p13 = scmp.lt.s32.totalorder %s13199_s23, %s13199_s23 }
 0x148   :  { %p13206_p0 = por %p13205_p13, %p13204_p12 }
 0x14a   :  { %p13207_p1 = pnand %p13206_p0, %p13200_p11 }
 0x14c   :  { %13210 = shalt.err (!%p13207_p1)
}
 0x14d   :  { %s16709_s28 = sld [smem:[#allocation66_spill]]  ;;  %s13535_s9 = smov [#allocation16]  }
 0x14e   :  { %170 = dma.hbm_to_vmem [thread:$0]  %s16708_s25, 32, %s168_s14, [#allocation12]  }
 0x14f   :  { %s187_s1 = sshll.u32 %s13535_s9, 4  ;;  %s13536_s12 = smov [#allocation19]   ;;  %s188_s1 = int_to_ptr.vmem [resolvable:$true] %s187_s1 }
 0x150   :  { %s209_s2 = sshll.u32 %s13536_s12, 4  ;;  %s210_s2 = int_to_ptr.vmem [resolvable:$true] %s209_s2 }
 0x153   :  { %s13211_s21 = scalar_lea.hbm %s16709_s28, 32 }
 0x154   :  { %p13212_p2 = scmp.ne.s32.totalorder %s16709_s28, %s13211_s21  ;;  %p13215_p3 = scmp.lt.u32.totalorder %s13211_s21, %s16709_s28 }
 0x156   :  { %p13217_p4 = pnand %p13215_p3, %p13212_p2 }
 0x158   :  { %13220 = shalt.err (!%p13217_p4)
}
 0x159   :  { %s13221_s17 = scalar_lea.vmem %s188_s1, 32  ;;  %p13226_p6 = scmp.lt.s32.totalorder %s188_s1, %s188_s1 }
 0x15a   :  { %p13222_p5 = scmp.ne.s32.totalorder %s188_s1, %s13221_s17  ;;  %p13227_p7 = scmp.lt.s32.totalorder %s13221_s17, %s13221_s17 }
 0x15c   :  { %p13228_p8 = por %p13227_p7, %p13226_p6 }
 0x15e   :  { %p13229_p9 = pnand %p13228_p8, %p13222_p5 }
 0x160   :  { %13232 = shalt.err (!%p13229_p9)
}
 0x161   :  { %s16710_s7 = sld [smem:[#allocation67_spill]] }
 0x162   :  { %190 = dma.hbm_to_vmem [thread:$0]  %s16709_s28, 32, %s188_s1, [#allocation15]  }
 0x167   :  { %s13233_s10 = scalar_lea.hbm %s16710_s7, 32 }
 0x168   :  { %p13234_p10 = scmp.ne.s32.totalorder %s16710_s7, %s13233_s10  ;;  %p13237_p11 = scmp.lt.u32.totalorder %s13233_s10, %s16710_s7 }
 0x16a   :  { %p13239_p12 = pnand %p13237_p11, %p13234_p10 }
 0x16c   :  { %13242 = shalt.err (!%p13239_p12)
}
 0x16d   :  { %s13243_s20 = scalar_lea.vmem %s210_s2, 32  ;;  %p13248_p0 = scmp.lt.s32.totalorder %s210_s2, %s210_s2 }
 0x16e   :  { %p13244_p13 = scmp.ne.s32.totalorder %s210_s2, %s13243_s20  ;;  %p13249_p1 = scmp.lt.s32.totalorder %s13243_s20, %s13243_s20 }
 0x170   :  { %p13250_p2 = por %p13249_p1, %p13248_p0 }
 0x172   :  { %p13251_p3 = pnand %p13250_p2, %p13244_p13 }
 0x174   :  { %13254 = shalt.err (!%p13251_p3)
}
 0x175   :  { %s16711_s11 = sld [smem:[#allocation68_spill]]  ;;  %s13537_s27 = smov [#allocation22]  }
 0x176   :  { %212 = dma.hbm_to_vmem [thread:$0]  %s16710_s7, 32, %s210_s2, [#allocation18]  }
 0x177   :  { %s231_s29 = sshll.u32 %s13537_s27, 4  ;;  %s13538_s6 = smov [#allocation25]   ;;  %s232_s29 = int_to_ptr.vmem [resolvable:$true] %s231_s29 }
 0x178   :  { %s251_s19 = sshll.u32 %s13538_s6, 4  ;;  %s252_s19 = int_to_ptr.vmem [resolvable:$true] %s251_s19 }
 0x17b   :  { %s13255_s0 = scalar_lea.hbm %s16711_s11, 32 }
 0x17c   :  { %p13256_p4 = scmp.ne.s32.totalorder %s16711_s11, %s13255_s0  ;;  %p13259_p5 = scmp.lt.u32.totalorder %s13255_s0, %s16711_s11 }
 0x17e   :  { %p13261_p6 = pnand %p13259_p5, %p13256_p4 }
 0x180   :  { %13264 = shalt.err (!%p13261_p6)
}
 0x181   :  { %s13265_s15 = scalar_lea.vmem %s232_s29, 32  ;;  %p13270_p8 = scmp.lt.s32.totalorder %s232_s29, %s232_s29 }
 0x182   :  { %p13266_p7 = scmp.ne.s32.totalorder %s232_s29, %s13265_s15  ;;  %p13271_p9 = scmp.lt.s32.totalorder %s13265_s15, %s13265_s15 }
 0x184   :  { %p13272_p10 = por %p13271_p9, %p13270_p8 }
 0x186   :  { %p13273_p11 = pnand %p13272_p10, %p13266_p7 }
 0x188   :  { %13276 = shalt.err (!%p13273_p11)
}
 0x189   :  { %s16712_s16 = sld [smem:[#allocation69_spill]] }
 0x18a   :  { %234 = dma.hbm_to_vmem [thread:$0]  %s16711_s11, 32, %s232_s29, [#allocation21]  }
 0x18f   :  { %s13277_s13 = scalar_lea.hbm %s16712_s16, 32 }
 0x190   :  { %p13278_p12 = scmp.ne.s32.totalorder %s16712_s16, %s13277_s13  ;;  %p13281_p13 = scmp.lt.u32.totalorder %s13277_s13, %s16712_s16 }
 0x192   :  { %p13283_p0 = pnand %p13281_p13, %p13278_p12 }
 0x194   :  { %13286 = shalt.err (!%p13283_p0)
}
 0x195   :  { %s13287_s14 = scalar_lea.vmem %s252_s19, 32  ;;  %p13292_p2 = scmp.lt.s32.totalorder %s252_s19, %s252_s19 }
 0x196   :  { %p13288_p1 = scmp.ne.s32.totalorder %s252_s19, %s13287_s14  ;;  %p13293_p3 = scmp.lt.s32.totalorder %s13287_s14, %s13287_s14 }
 0x198   :  { %p13294_p4 = por %p13293_p3, %p13292_p2 }
 0x19a   :  { %p13295_p5 = pnand %p13294_p4, %p13288_p1 }
 0x19c   :  { %13298 = shalt.err (!%p13295_p5)
}
 0x19d   :  { %s16713_s18 = sld [smem:[#allocation70_spill]]  ;;  %s13539_s8 = smov [#allocation28]  }
 0x19e   :  { %254 = dma.hbm_to_vmem [thread:$0]  %s16712_s16, 32, %s252_s19, [#allocation24]  }
 0x19f   :  { %s273_s25 = sshll.u32 %s13539_s8, 4  ;;  %s13540_s22 = smov [#allocation31]   ;;  %s274_s25 = int_to_ptr.vmem [resolvable:$true] %s273_s25 }
 0x1a0   :  { %s294_s23 = sshll.u32 %s13540_s22, 4  ;;  %s13841_s23 = int_to_ptr.vmem [resolvable:$true] %s294_s23 }
 0x1a3   :  { %s13299_s28 = scalar_lea.hbm %s16713_s18, 32 }
 0x1a4   :  { %p13300_p6 = scmp.ne.s32.totalorder %s16713_s18, %s13299_s28  ;;  %p13303_p7 = scmp.lt.u32.totalorder %s13299_s28, %s16713_s18 }
 0x1a6   :  { %p13305_p8 = pnand %p13303_p7, %p13300_p6 }
 0x1a8   :  { %13308 = shalt.err (!%p13305_p8)
}
 0x1a9   :  { %s13309_s9 = scalar_lea.vmem %s274_s25, 32  ;;  %p13314_p10 = scmp.lt.s32.totalorder %s274_s25, %s274_s25 }
 0x1aa   :  { %p13310_p9 = scmp.ne.s32.totalorder %s274_s25, %s13309_s9  ;;  %p13315_p11 = scmp.lt.s32.totalorder %s13309_s9, %s13309_s9 }
 0x1ac   :  { %p13316_p12 = por %p13315_p11, %p13314_p10 }
 0x1ae   :  { %p13317_p13 = pnand %p13316_p12, %p13310_p9 }
 0x1b0   :  { %13320 = shalt.err (!%p13317_p13)
}
 0x1b1   :  { %s16714_s1 = sld [smem:[#allocation72_spill]] }
 0x1b2   :  { %276 = dma.hbm_to_vmem [thread:$0]  %s16713_s18, 32, %s274_s25, [#allocation27]  }
 0x1b7   :  { %s13321_s12 = scalar_lea.hbm %s16714_s1, 4096 }
 0x1b8   :  { %p13322_p0 = scmp.ne.s32.totalorder %s16714_s1, %s13321_s12  ;;  %p13325_p1 = scmp.lt.u32.totalorder %s13321_s12, %s16714_s1 }
 0x1ba   :  { %p13327_p2 = pnand %p13325_p1, %p13322_p0 }
 0x1bc   :  { %13330 = shalt.err (!%p13327_p2)
}
 0x1bd   :  { %s13331_s2 = scalar_lea.vmem %s13841_s23, 4096  ;;  %p13336_p4 = scmp.lt.s32.totalorder %s13841_s23, %s13841_s23 }
 0x1be   :  { %p13332_p3 = scmp.ne.s32.totalorder %s13841_s23, %s13331_s2  ;;  %p13337_p5 = scmp.lt.s32.totalorder %s13331_s2, %s13331_s2 }
 0x1c0   :  { %p13338_p6 = por %p13337_p5, %p13336_p4 }
 0x1c2   :  { %p13339_p7 = pnand %p13338_p6, %p13332_p3 }
 0x1c4   :  { %13342 = shalt.err (!%p13339_p7)
}
 0x1c5   :  { %s16715_s21 = sld [smem:[#allocation73_spill]]  ;;  %s13541_s17 = smov [#allocation34]  }
 0x1c6   :  { %300 = dma.hbm_to_vmem [thread:$0]  %s16714_s1, 4096, %s13841_s23, [#allocation30], %s13523_s30, %s13523_s30, %s13524_s26  }
 0x1c7   :  { %s317_s7 = sshll.u32 %s13541_s17, 4  ;;  %s13542_s10 = smov [#allocation37]   ;;  %s318_s7 = int_to_ptr.vmem [resolvable:$true] %s317_s7 }
 0x1c8   :  { %s336_s20 = sshll.u32 %s13542_s10, 4  ;;  %s13859_s20 = int_to_ptr.vmem [resolvable:$true] %s336_s20 }
 0x1cb   :  { %s13343_s11 = scalar_lea.hbm %s16715_s21, 32 }
 0x1cc   :  { %p13344_p8 = scmp.ne.s32.totalorder %s16715_s21, %s13343_s11  ;;  %p13347_p9 = scmp.lt.u32.totalorder %s13343_s11, %s16715_s21 }
 0x1ce   :  { %p13349_p10 = pnand %p13347_p9, %p13344_p8 }
 0x1d0   :  { %13352 = shalt.err (!%p13349_p10)
}
 0x1d1   :  { %s13353_s27 = scalar_lea.vmem %s318_s7, 32  ;;  %p13358_p12 = scmp.lt.s32.totalorder %s318_s7, %s318_s7 }
 0x1d2   :  { %p13354_p11 = scmp.ne.s32.totalorder %s318_s7, %s13353_s27  ;;  %p13359_p13 = scmp.lt.s32.totalorder %s13353_s27, %s13353_s27 }
 0x1d4   :  { %p13360_p0 = por %p13359_p13, %p13358_p12 }
 0x1d6   :  { %p13361_p1 = pnand %p13360_p0, %p13354_p11 }
 0x1d8   :  { %13364 = shalt.err (!%p13361_p1)
}
 0x1d9   :  { %s16716_s29 = sld [smem:[#allocation74_spill]] }
 0x1da   :  { %320 = dma.hbm_to_vmem [thread:$0]  %s16715_s21, 32, %s318_s7, [#allocation33]  }
 0x1df   :  { %s13365_s6 = scalar_lea.hbm %s16716_s29, 4096 }
 0x1e0   :  { %p13366_p2 = scmp.ne.s32.totalorder %s16716_s29, %s13365_s6  ;;  %p13369_p3 = scmp.lt.u32.totalorder %s13365_s6, %s16716_s29 }
 0x1e2   :  { %p13371_p4 = pnand %p13369_p3, %p13366_p2 }
 0x1e4   :  { %13374 = shalt.err (!%p13371_p4)
}
 0x1e5   :  { %s13375_s19 = scalar_lea.vmem %s13859_s20, 4096  ;;  %p13380_p6 = scmp.lt.s32.totalorder %s13859_s20, %s13859_s20 }
 0x1e6   :  { %p13376_p5 = scmp.ne.s32.totalorder %s13859_s20, %s13375_s19  ;;  %p13381_p7 = scmp.lt.s32.totalorder %s13375_s19, %s13375_s19 }
 0x1e8   :  { %p13382_p8 = por %p13381_p7, %p13380_p6 }
 0x1ea   :  { %p13383_p9 = pnand %p13382_p8, %p13376_p5 }
 0x1ec   :  { %13386 = shalt.err (!%p13383_p9)
}
 0x1ed   :  { %s16717_s0 = sld [smem:[#allocation75_spill]]  ;;  %s13543_s15 = smov [#allocation40]  }
 0x1ee   :  { %342 = dma.hbm_to_vmem [thread:$0]  %s16716_s29, 4096, %s13859_s20, [#allocation36], %s13523_s30, %s13523_s30, %s13524_s26  }
 0x1ef   :  { %s359_s16 = sshll.u32 %s13543_s15, 4  ;;  %s13544_s13 = smov [#allocation41]   ;;  %s360_s16 = int_to_ptr.vmem [resolvable:$true] %s359_s16 }
 0x1f0   :  { %s369_s14 = sshll.u32 %s13544_s13, 4  ;;  %s370_s14 = int_to_ptr.vmem [resolvable:$true] %s369_s14 }
 0x1f3   :  { %s13387_s18 = scalar_lea.hbm %s16717_s0, 32 }
 0x1f4   :  { %p13388_p10 = scmp.ne.s32.totalorder %s16717_s0, %s13387_s18  ;;  %p13391_p11 = scmp.lt.u32.totalorder %s13387_s18, %s16717_s0 }
 0x1f6   :  { %p13393_p12 = pnand %p13391_p11, %p13388_p10 }
 0x1f8   :  { %13396 = shalt.err (!%p13393_p12)
}
 0x1f9   :  { %s13397_s8 = scalar_lea.vmem %s360_s16, 32  ;;  %p13402_p0 = scmp.lt.s32.totalorder %s360_s16, %s360_s16 }
 0x1fa   :  { %p13398_p13 = scmp.ne.s32.totalorder %s360_s16, %s13397_s8  ;;  %p13403_p1 = scmp.lt.s32.totalorder %s13397_s8, %s13397_s8 }
 0x1fc   :  { %p13404_p2 = por %p13403_p1, %p13402_p0 }
 0x1fe   :  { %p13405_p3 = pnand %p13404_p2, %p13398_p13 }
 0x200   :  { %13408 = shalt.err (!%p13405_p3)
}
 0x201   :  { %362 = dma.hbm_to_vmem [thread:$0]  %s16717_s0, 32, %s360_s16, [#allocation39]  }
 0x202   :  { %s13409_s30 = scalar_lea.hbm %s13718_s24, 32 }
 0x203   :  { %p13410_p4 = scmp.ne.s32.totalorder %s13718_s24, %s13409_s30  ;;  %p13413_p5 = scmp.lt.u32.totalorder %s13409_s30, %s13718_s24 }
 0x205   :  { %p13415_p6 = pnand %p13413_p5, %p13410_p4 }
 0x207   :  { %13418 = shalt.err (!%p13415_p6)
}
 0x208   :  { %s13419_s26 = scalar_lea.vmem %s370_s14, 32  ;;  %p13424_p8 = scmp.lt.s32.totalorder %s370_s14, %s370_s14 }
 0x209   :  { %p13420_p7 = scmp.ne.s32.totalorder %s370_s14, %s13419_s26  ;;  %p13425_p9 = scmp.lt.s32.totalorder %s13419_s26, %s13419_s26 }
 0x20b   :  { %p13426_p10 = por %p13425_p9, %p13424_p8 }
 0x20d   :  { %p13427_p11 = pnand %p13426_p10, %p13420_p7 }
 0x20f   :  { %13430 = shalt.err (!%p13427_p11)
}
 0x210   :  { %372 = dma.hbm_to_vmem [thread:$0]  %s13718_s24, 32, %s370_s14, [#allocation42]  }
 0x211   :  { %13453 = dma.done.wait [#allocation3], 768  }
 0x212   :  { %13454 = vsyncadd [#allocation3], 4294966528 }
 0x213   :  { %13455 = dma.done.wait [#allocation6], 64  }
 0x214   :  { %13456 = vsyncadd [#allocation6], 4294967232 }
 0x215   :  { %13457 = dma.done.wait [#allocation9], 64  }
 0x216   :  { %13458 = vsyncadd [#allocation9], 4294967232 }
 0x217   :  { %13459 = dma.done.wait [#allocation12], 128  }
 0x218   :  { %13460 = vsyncadd [#allocation12], 4294967168 }
 0x219   :  { %13461 = dma.done.wait [#allocation15], 64  }
 0x21a   :  { %13462 = vsyncadd [#allocation15], 4294967232 }
 0x21b   :  { %13463 = dma.done.wait [#allocation18], 4128  }
 0x21c   :  { %13464 = vsyncadd [#allocation18], 4294963168 }
 0x21d   :  { %13465 = dma.done.wait [#allocation21], 4128  }
 0x21e   :  { %13466 = vsyncadd [#allocation21], 4294963168 }
 0x21f   :  { %13467 = dma.done.wait [#allocation24], 64  }
 0x220   :  { %13468 = vsyncadd [#allocation24], 4294967232 }
 0x221   :  { %13469 = dma.done.wait [#allocation27], 4128  }
 0x222   :  { %13470 = vsyncadd [#allocation27], 4294963168 }
 0x223   :  { %13471 = dma.done.wait [#allocation30], 4160  }
 0x224   :  { %13472 = vsyncadd [#allocation30], 4294963136 }
 0x225   :  { %13473 = dma.done.wait [#allocation33], 64  }
 0x226   :  { %13474 = vsyncadd [#allocation33], 4294967232 }
 0x227   :  { %13475 = dma.done.wait [#allocation36], 4128  }
 0x228   :  { %13476 = vsyncadd [#allocation36], 4294963168 }
 0x229   :  { %13477 = dma.done.wait [#allocation39], 64  }
 0x22a   :  { %13478 = vsyncadd [#allocation39], 4294967232 }
 0x22b   :  { %13479 = dma.done.wait [#allocation42], 32  }
 0x22c   :  { %13480 = vsyncadd [#allocation42], 4294967264  ;;  %s16718_s24 = sld [smem:[#allocation59_spill]]  ;;  %s16719_s25 = sld [smem:[#allocation61_spill]]  ;;  %v13545_v0 = vmov 0   ;;  %vm512_vm0 = vcmask 392192  }
 0x22d   :  { %551 = vmatprep.mubr.bf16.mxu1 %v13545_v0  ;;  %v11941_v1 = vld [vmem:[#allocation2 + $0x4] ss:$8 sps:$4 sm:$0xff]   ;;  %s16720_s22 = sld [smem:[#allocation63_spill]]  ;;  %v11943_v2 = vld [vmem:[#allocation2] ss:$8 sps:$4 sm:$0xff]   ;;  %s16721_s23 = sld [smem:[#allocation60_spill]] }
 0x22e   :  { %519 = vmatprep.subr.bf16.mxu1 %v11941_v1  ;;  %v11944_v3 = vld [vmem:[#allocation2 + $0x14] ss:$8 sps:$4 sm:$0xff]   ;;  %v11946_v4 = vld [vmem:[#allocation2 + $0x10] ss:$8 sps:$4 sm:$0xff]   ;;  %v11947_v5 = vld [vmem:[#allocation2 + $0x24] ss:$8 sps:$4 sm:$0xff]  }
 0x22f   :  { %520 = vmatpush1.bf16.msra.mxu1 %v11943_v2  ;;  %v11949_v6 = vld [vmem:[#allocation2 + $0x20] ss:$8 sps:$4 sm:$0xff]   ;;  %vm13547_vm1 = vmmov 0   ;;  %vm1505_vm2 = vcmask 261120   ;;  %vm1555_vm3 = vcmask 130048   ;;  %s13548_s28 = smov 96  }
 0x230   :  { %521 = vmatprep.subr.bf16.mxu1 %v11944_v3  ;;  %s13549_s9 = smov 64   ;;  %s13550_s1 = smov 32   ;;  %vm3640_vm4 = vcmask 64512   ;;  %vm3656_vm5 = vcmask 1043456   ;;  %vm2536_vm6 = vcmask 523264   ;;  %vm2539_vm7 = vcmask 785408  }
 0x231   :  { %s16806_s12 = sld [smem:[#allocation64_spill]]  ;;  %s16823_s2 = sld [smem:[#allocation71_spill]]  ;;  %vm9885_vm8 = vcmask 1040384  }
 0x232   :  { %v456_v7 = vld [vmem:[%s16718_s24] sm:$0xff]  ;;  %v457_v8 = vld [vmem:[%s16718_s24 + $0x8] sm:$0xff]  ;;  %v11955_v14 = vld [vmem:[%s16719_s25 + $0x14] ss:$8 sps:$4 sm:$0xff]  }
 0x233   :  { %522 = vmatpush1.bf16.msra.mxu1 %v11946_v4  ;;  %v11952_v9 = vld [vmem:[%s16719_s25 + $0x4] ss:$8 sps:$4 sm:$0xff]   ;;  %v11950_v10 = vld [vmem:[%s16719_s25] ss:$8 sps:$4 sm:$0xff]   ;;  %v468_v11 = vpack.c.bf16 %v457_v8, %v456_v7  ;;  %v458_v15 = vld [vmem:[%s16718_s24 + $0x10] sm:$0xff] }
 0x234   :  { %523 = vmatprep.subr.bf16.mxu1 %v11947_v5  ;;  %v11959_v12 = vld [vmem:[%s16720_s22 + $0x4] ss:$24 sps:$4 sm:$0xff]   ;;  %v11961_v13 = vld [vmem:[%s16720_s22] ss:$24 sps:$4 sm:$0xff]   ;;  %v11965_v16 = vld [vmem:[%s16720_s22 + $0x34] ss:$24 sps:$4 sm:$0xff]  }
 0x235   :  { %1313 = vmatprep.subr.bf16.mxu0 %v11959_v12  ;;  %v11967_v17 = vld [vmem:[%s16720_s22 + $0x30] ss:$24 sps:$4 sm:$0xff]   ;;  %v459_v18 = vld [vmem:[%s16718_s24 + $0x18] sm:$0xff]  ;;  %v11958_v20 = vld [vmem:[%s16719_s25 + $0x24] ss:$8 sps:$4 sm:$0xff]  }
 0x236   :  { %1314 = vmatpush1.bf16.msra.mxu0 %v11961_v13  ;;  %v11953_v19 = vld [vmem:[%s16719_s25 + $0x10] ss:$8 sps:$4 sm:$0xff]   ;;  %v11971_v21 = vld [vmem:[%s16720_s22 + $0x64] ss:$24 sps:$4 sm:$0xff]   ;;  %v469_v23 = vpack.c.bf16 %v459_v18, %v458_v15  ;;  %v11977_v24 = vld [vmem:[%s16720_s22 + $0x94] ss:$24 sps:$4 sm:$0xff]  }
 0x237   :  { %524 = vmatpush1.bf16.msra.mxu1 %v11949_v6  ;;  %1315 = vmatprep.subr.bf16.mxu0 %v11965_v16  ;;  %v11973_v22 = vld [vmem:[%s16720_s22 + $0x60] ss:$24 sps:$4 sm:$0xff]   ;;  %v11964_v26 = vld [vmem:[%s16720_s22 + $0xc] ss:$24 sps:$4 sm:$0xff]   ;;  %v11979_v28 = vld [vmem:[%s16720_s22 + $0x90] ss:$24 sps:$4 sm:$0xff]  }
 0x238   :  { %624 = vmatprep.subr.bf16.mxu1 %v11952_v9  ;;  %v11956_v25 = vld [vmem:[%s16719_s25 + $0x20] ss:$8 sps:$4 sm:$0xff]   ;;  %v11983_v29 = vld [vmem:[%s16720_s22 + $0xc4] ss:$24 sps:$4 sm:$0xff]   ;;  %v11989_v33 = vld [vmem:[%s16720_s22 + $0xf4] ss:$24 sps:$4 sm:$0xff]  }
 0x239   :  { %v460_v27 = vld [vmem:[%s16721_s23] sm:$0xff]  ;;  %v461_v30 = vld [vmem:[%s16721_s23 + $0x8] sm:$0xff]  ;;  %v11970_v35 = vld [vmem:[%s16720_s22 + $0x3c] ss:$24 sps:$4 sm:$0xff]  }
 0x23a   :  { %10451 = vmatmul.mubr.msk.bf16.vlgmr.msra.gmra.mrb[0].mxu1 %vm512_vm0, %v468_v11  ;;  %1316 = vmatpush1.bf16.msra.mxu0 %v11967_v17  ;;  %v11985_v31 = vld [vmem:[%s16720_s22 + $0xc0] ss:$24 sps:$4 sm:$0xff]   ;;  %v578_v32 = vpack.c.bf16 %v461_v30, %v460_v27  ;;  %v11991_v36 = vld [vmem:[%s16720_s22 + $0xf0] ss:$24 sps:$4 sm:$0xff]   ;;  %v11995_v37 = vld [vmem:[%s16720_s22 + $0x124] ss:$24 sps:$4 sm:$0xff]  }
 0x23b   :  { %625 = vmatpush1.bf16.msra.mxu1 %v11950_v10  ;;  %561 = vmatprep.mubr.bf16.mxu1 %v13545_v0  ;;  %v11962_v34 = vld [vmem:[%s16720_s22 + $0x8] ss:$24 sps:$4 sm:$0xff]   ;;  %v11968_v38 = vld [vmem:[%s16720_s22 + $0x38] ss:$24 sps:$4 sm:$0xff]   ;;  %v11976_v39 = vld [vmem:[%s16720_s22 + $0x6c] ss:$24 sps:$4 sm:$0xff]  }
 0x23c   :  { %626 = vmatprep.subr.bf16.mxu1 %v11955_v14  ;;  %1317 = vmatprep.subr.bf16.mxu0 %v11971_v21  ;;  %v11997_v40 = vld [vmem:[%s16720_s22 + $0x120] ss:$24 sps:$4 sm:$0xff]   ;;  %v12001_v41 = vld [vmem:[%s16720_s22 + $0x154] ss:$24 sps:$4 sm:$0xff]   ;;  %v12003_v44 = vld [vmem:[%s16720_s22 + $0x150] ss:$24 sps:$4 sm:$0xff]  }
 0x23d   :  { %v11974_v42 = vld [vmem:[%s16720_s22 + $0x68] ss:$24 sps:$4 sm:$0xff]   ;;  %v11982_v43 = vld [vmem:[%s16720_s22 + $0x9c] ss:$24 sps:$4 sm:$0xff]   ;;  %v11980_v46 = vld [vmem:[%s16720_s22 + $0x98] ss:$24 sps:$4 sm:$0xff]  }
 0x23e   :  { %1318 = vmatpush1.bf16.msra.mxu0 %v11973_v22  ;;  %v12007_v45 = vld [vmem:[%s16720_s22 + $0x184] ss:$24 sps:$4 sm:$0xff]   ;;  %v12009_v48 = vld [vmem:[%s16720_s22 + $0x180] ss:$24 sps:$4 sm:$0xff]   ;;  %v12013_v49 = vld [vmem:[%s16720_s22 + $0x1b4] ss:$24 sps:$4 sm:$0xff]  }
 0x23f   :  { %627 = vmatpush1.bf16.msra.mxu1 %v11953_v19  ;;  %1319 = vmatprep.subr.bf16.mxu0 %v11977_v24  ;;  %v11988_v47 = vld [vmem:[%s16720_s22 + $0xcc] ss:$24 sps:$4 sm:$0xff]   ;;  %v11986_v50 = vld [vmem:[%s16720_s22 + $0xc8] ss:$24 sps:$4 sm:$0xff]   ;;  %v11994_v51 = vld [vmem:[%s16720_s22 + $0xfc] ss:$24 sps:$4 sm:$0xff]  }
 0x240   :  { %628 = vmatprep.subr.bf16.mxu1 %v11958_v20  ;;  %v11992_v52 = vld [vmem:[%s16720_s22 + $0xf8] ss:$24 sps:$4 sm:$0xff]   ;;  %v12019_v54 = vld [vmem:[%s16720_s22 + $0x1e4] ss:$24 sps:$4 sm:$0xff]   ;;  %v12025_v57 = vld [vmem:[%s16720_s22 + $0x214] ss:$24 sps:$4 sm:$0xff]  }
 0x241   :  { %v12015_v53 = vld [vmem:[%s16720_s22 + $0x1b0] ss:$24 sps:$4 sm:$0xff]   ;;  %v12000_v55 = vld [vmem:[%s16720_s22 + $0x12c] ss:$24 sps:$4 sm:$0xff]   ;;  %v12021_v56 = vld [vmem:[%s16720_s22 + $0x1e0] ss:$24 sps:$4 sm:$0xff]  }
 0x242   :  { %10452 = vmatmul.mubr.msk.bf16.gmra.mrb[4].mxu1 %vm512_vm0, %v469_v23  ;;  %1320 = vmatpush1.bf16.msra.mxu0 %v11979_v28  ;;  %v11998_v58 = vld [vmem:[%s16720_s22 + $0x128] ss:$24 sps:$4 sm:$0xff]   ;;  %v12006_v59 = vld [vmem:[%s16720_s22 + $0x15c] ss:$24 sps:$4 sm:$0xff]   ;;  %v12004_v62 = vld [vmem:[%s16720_s22 + $0x158] ss:$24 sps:$4 sm:$0xff]   ;;  %v472_v23 = vlaneseq }
 0x243   :  { %629 = vmatpush1.bf16.msra.mxu1 %v11956_v25  ;;  %656 = vmatprep.mubr.bf16.mxu1 %v13545_v0  ;;  %v12027_v60 = vld [vmem:[%s16720_s22 + $0x210] ss:$24 sps:$4 sm:$0xff]   ;;  %v12031_v61 = vld [vmem:[%s16720_s22 + $0x244] ss:$24 sps:$4 sm:$0xff]   ;;  %v12033_v0 = vld [vmem:[%s16720_s22 + $0x240] ss:$24 sps:$4 sm:$0xff]  }
 0x244   :  { %1376 = vmatprep.subr.bf16.mxu1 %v11964_v26  ;;  %1321 = vmatprep.subr.bf16.mxu0 %v11983_v29  ;;  %v12012_v63 = vld [vmem:[%s16720_s22 + $0x18c] ss:$24 sps:$4 sm:$0xff]   ;;  %v12010_v2 = vld [vmem:[%s16720_s22 + $0x188] ss:$24 sps:$4 sm:$0xff]   ;;  %v12018_v3 = vld [vmem:[%s16720_s22 + $0x1bc] ss:$24 sps:$4 sm:$0xff]  }
 0x245   :  { %v12037_v1 = vld [vmem:[%s16720_s22 + $0x274] ss:$24 sps:$4 sm:$0xff]   ;;  %v12039_v4 = vld [vmem:[%s16720_s22 + $0x270] ss:$24 sps:$4 sm:$0xff]   ;;  %v12043_v14 = vld [vmem:[%s16720_s22 + $0x2a4] ss:$24 sps:$4 sm:$0xff]  }
 0x246   :  { %1322 = vmatpush1.bf16.msra.mxu0 %v11985_v31  ;;  %v12016_v5 = vld [vmem:[%s16720_s22 + $0x1b8] ss:$24 sps:$4 sm:$0xff]   ;;  %v12024_v6 = vld [vmem:[%s16720_s22 + $0x1ec] ss:$24 sps:$4 sm:$0xff]   ;;  %v12022_v7 = vld [vmem:[%s16720_s22 + $0x1e8] ss:$24 sps:$4 sm:$0xff]  }
 0x247   :  { %1323 = vmatprep.subr.bf16.mxu0 %v11989_v33  ;;  %v12030_v8 = vld [vmem:[%s16720_s22 + $0x21c] ss:$24 sps:$4 sm:$0xff]   ;;  %v12028_v9 = vld [vmem:[%s16720_s22 + $0x218] ss:$24 sps:$4 sm:$0xff]   ;;  %v12036_v10 = vld [vmem:[%s16720_s22 + $0x24c] ss:$24 sps:$4 sm:$0xff]  }
 0x248   :  { %v12034_v11 = vld [vmem:[%s16720_s22 + $0x248] ss:$24 sps:$4 sm:$0xff]   ;;  %v12042_v12 = vld [vmem:[%s16720_s22 + $0x27c] ss:$24 sps:$4 sm:$0xff]   ;;  %v12040_v13 = vld [vmem:[%s16720_s22 + $0x278] ss:$24 sps:$4 sm:$0xff]  }
 0x249   :  { %v12045_v15 = vld [vmem:[%s16720_s22 + $0x2a0] ss:$24 sps:$4 sm:$0xff]   ;;  %v12048_v16 = vld [vmem:[%s16720_s22 + $0x2ac] ss:$24 sps:$4 sm:$0xff]   ;;  %v12051_v19 = vld [vmem:[%s16720_s22 + $0x2d0] ss:$24 sps:$4 sm:$0xff]  }
 0x24a   :  { %10459 = vmatmul.mubr.msk.bf16.vlgmr.msra.gmra.mrb[8].mxu1 %vm512_vm0, %v578_v32  ;;  %1324 = vmatpush1.bf16.msra.mxu0 %v11991_v36  ;;  %v12046_v17 = vld [vmem:[%s16720_s22 + $0x2a8] ss:$24 sps:$4 sm:$0xff]   ;;  %v12049_v18 = vld [vmem:[%s16720_s22 + $0x2d4] ss:$24 sps:$4 sm:$0xff]   ;;  %v12052_v21 = vld [vmem:[%s16720_s22 + $0x2d8] ss:$24 sps:$4 sm:$0xff]  }
 0x24b   :  { %1377 = vmatpush1.bf16.msra.mxu1 %v11962_v34  ;;  %1325 = vmatprep.subr.bf16.mxu0 %v11995_v37  ;;  %v12054_v20 = vld [vmem:[%s16720_s22 + $0x2dc] ss:$24 sps:$4 sm:$0xff]   ;;  %v13965_v24 = vshrl.u32 %v472_v23, 7  ;;  %v470_v26 = vld [vmem:[#allocation5] sm:$0x3] }
 0x24c   :  { %1378 = vmatprep.subr.bf16.mxu1 %v11970_v35  ;;  %v12057_v22 = vld [vmem:[%s16720_s22 + $0x14] ss:$24 sps:$4 sm:$0xff]   ;;  %v12070_v23 = vld [vmem:[%s16720_s22 + $0x100] ss:$24 sps:$4 sm:$0xff]  }
 0x24d   :  { %16722 = vst [vmem:[#allocation76_spill] sm:$0xff] %v13965_v24  ;;  %v13968_v25 = vsub.s32 1, %v13965_v24  ;;  %v13971_v27 = vsub.s32 0, %v13965_v24 }
 0x24e   :  { %1326 = vmatpush1.bf16.msra.mxu0 %v11997_v40 }
 0x24f   :  { %1379 = vmatpush1.bf16.msra.mxu1 %v11968_v38  ;;  %1327 = vmatprep.subr.bf16.mxu0 %v12001_v41  ;;  %16723 = vst [vmem:[#allocation77_spill] sm:$0xff] %v13968_v25  ;;  %16724 = vst [vmem:[#allocation78_spill] sm:$0xff] %v13971_v27  ;;  %v479_v29 = vrot.slane %v470_v26, %v13968_v25  ;;  %v475_v30 = vrot.slane %v470_v26, %v13971_v27  ;;  %v12060_v41 = vld [vmem:[%s16720_s22 + $0x44] ss:$24 sps:$4 sm:$0xff]   ;;  %v12075_v26 = vld [vmem:[%s16720_s22 + $0x134] ss:$24 sps:$4 sm:$0xff]  }
 0x250   :  { %1380 = vmatprep.subr.bf16.mxu1 %v11976_v39  ;;  %v12055_v39 = vld [vmem:[%s16720_s22 + $0x10] ss:$24 sps:$4 sm:$0xff]  }
 0x252   :  { %1328 = vmatpush1.bf16.msra.mxu0 %v12003_v44 }
 0x253   :  { %1381 = vmatpush1.bf16.msra.mxu1 %v11974_v42  ;;  %1329 = vmatprep.subr.bf16.mxu0 %v12007_v45  ;;  %v12058_v45 = vld [vmem:[%s16720_s22 + $0x40] ss:$24 sps:$4 sm:$0xff]  }
 0x254   :  { %1382 = vmatprep.subr.bf16.mxu1 %v11982_v43 }
 0x256   :  { %1330 = vmatpush1.bf16.msra.mxu0 %v12009_v48  ;;  %v579_v48 = vld [vmem:[#allocation7] sm:$0x3] }
 0x257   :  { %1383 = vmatpush1.bf16.msra.mxu1 %v11980_v46  ;;  %1331 = vmatprep.subr.bf16.mxu0 %v12013_v49 }
 0x258   :  { %1384 = vmatprep.subr.bf16.mxu1 %v11988_v47 }
 0x25a   :  { %1332 = vmatpush1.bf16.msra.mxu0 %v12015_v53  ;;  %v667_v53 = vld [vmem:[#allocation8] sm:$0x3] }
 0x25b   :  { %1385 = vmatpush1.bf16.msra.mxu1 %v11986_v50  ;;  %1333 = vmatprep.subr.bf16.mxu0 %v12019_v54 }
 0x25c   :  { %1386 = vmatprep.subr.bf16.mxu1 %v11994_v51  ;;  %v12063_v51 = vld [vmem:[%s16720_s22 + $0x74] ss:$24 sps:$4 sm:$0xff]  }
 0x25e   :  { %1334 = vmatpush1.bf16.msra.mxu0 %v12021_v56 }
 0x25f   :  { %1387 = vmatpush1.bf16.msra.mxu1 %v11992_v52  ;;  %1335 = vmatprep.subr.bf16.mxu0 %v12025_v57  ;;  %v683_v57 = vld [vmem:[#allocation10] sm:$0x3] }
 0x260   :  { %1388 = vmatprep.subr.bf16.mxu1 %v12000_v55  ;;  %v584_v55 = vrot.slane %v579_v48, %v13971_v27 }
 0x262   :  { %1336 = vmatpush1.bf16.msra.mxu0 %v12027_v60  ;;  %v672_v60 = vrot.slane %v667_v53, %v13971_v27 }
 0x263   :  { %1389 = vmatpush1.bf16.msra.mxu1 %v11998_v58  ;;  %1337 = vmatprep.subr.bf16.mxu0 %v12031_v61  ;;  %v12061_v58 = vld [vmem:[%s16720_s22 + $0x70] ss:$24 sps:$4 sm:$0xff]   ;;  %v12066_v61 = vld [vmem:[%s16720_s22 + $0xa4] ss:$24 sps:$4 sm:$0xff]  }
 0x264   :  { %1390 = vmatprep.subr.bf16.mxu1 %v12006_v59  ;;  %v588_v59 = vrot.slane %v579_v48, %v13968_v25  ;;  %v12096_v48 = vld [vmem:[%s16720_s22 + $0x284] ss:$24 sps:$4 sm:$0xff]  }
 0x266   :  { %1338 = vmatpush1.bf16.msra.mxu0 %v12033_v0 }
 0x267   :  { %1391 = vmatpush1.bf16.msra.mxu1 %v12004_v62  ;;  %1339 = vmatprep.subr.bf16.mxu0 %v12037_v1  ;;  %v688_v1 = vrot.slane %v683_v57, %v13971_v27 }
 0x268   :  { %1392 = vmatprep.subr.bf16.mxu1 %v12012_v63  ;;  %v676_v63 = vrot.slane %v667_v53, %v13968_v25  ;;  %v12097_v53 = vld [vmem:[%s16720_s22 + $0x2b0] ss:$24 sps:$4 sm:$0xff]  }
 0x26a   :  { %1340 = vmatpush1.bf16.msra.mxu0 %v12039_v4  ;;  %v692_v4 = vrot.slane %v683_v57, %v13968_v25  ;;  %v12100_v57 = vld [vmem:[%s16720_s22 + $0x2e0] ss:$24 sps:$4 sm:$0xff]  }
 0x26b   :  { %1393 = vmatpush1.bf16.msra.mxu1 %v12010_v2  ;;  %1341 = vmatprep.subr.bf16.mxu0 %v12043_v14 }
 0x26c   :  { %1394 = vmatprep.subr.bf16.mxu1 %v12018_v3 }
 0x26e   :  { %1342 = vmatpush1.bf16.msra.mxu0 %v12045_v15 }
 0x26f   :  { %1395 = vmatpush1.bf16.msra.mxu1 %v12016_v5  ;;  %1343 = vmatprep.subr.bf16.mxu0 %v12049_v18 }
 0x270   :  { %1396 = vmatprep.subr.bf16.mxu1 %v12024_v6  ;;  %v12064_v6 = vld [vmem:[%s16720_s22 + $0xa0] ss:$24 sps:$4 sm:$0xff]  }
 0x272   :  { %1344 = vmatpush1.bf16.msra.mxu0 %v12051_v19  ;;  %v12072_v19 = vld [vmem:[%s16720_s22 + $0x104] ss:$24 sps:$4 sm:$0xff]  }
 0x273   :  { %1397 = vmatpush1.bf16.msra.mxu1 %v12022_v7  ;;  %1439 = vmatprep.subr.bf16.mxu0 %v12057_v22 }
 0x274   :  { %1398 = vmatprep.subr.bf16.mxu1 %v12030_v8 }
 0x277   :  { %1399 = vmatpush1.bf16.msra.mxu1 %v12028_v9 }
 0x278   :  { %1400 = vmatprep.subr.bf16.mxu1 %v12036_v10  ;;  %v12069_v10 = vld [vmem:[%s16720_s22 + $0xd4] ss:$24 sps:$4 sm:$0xff]  }
 0x27b   :  { %1401 = vmatpush1.bf16.msra.mxu1 %v12034_v11 }
 0x27c   :  { %1402 = vmatprep.subr.bf16.mxu1 %v12042_v12 }
 0x27f   :  { %1403 = vmatpush1.bf16.msra.mxu1 %v12040_v13 }
 0x280   :  { %1404 = vmatprep.subr.bf16.mxu1 %v12048_v16 }
 0x283   :  { %1405 = vmatpush1.bf16.msra.mxu1 %v12046_v17  ;;  %v12067_v17 = vld [vmem:[%s16720_s22 + $0xd0] ss:$24 sps:$4 sm:$0xff]  }
 0x284   :  { %1406 = vmatprep.subr.bf16.mxu1 %v12054_v20 }
 0x287   :  { %1407 = vmatpush1.bf16.msra.mxu1 %v12052_v21 }
 0x30d   :  { %v553_v28 = vpop.f32.mrb[0].mxu1 }
 0x30e   :  { %v555_v31 = vpop.f32.mrb[1].mxu1  ;;  %v13981_v37 = vadd.f32 %v553_v28, %v475_v30  ;;  %v12073_v28 = vld [vmem:[%s16720_s22 + $0x130] ss:$24 sps:$4 sm:$0xff]  }
 0x30f   :  { %v557_v32 = vpop.f32.mrb[2].mxu1  ;;  %v13977_v35 = vadd.f32 %v555_v31, %v479_v29  ;;  %v12081_v31 = vld [vmem:[%s16720_s22 + $0x194] ss:$24 sps:$4 sm:$0xff]  }
 0x310   :  { %v13975_v33 = vadd.f32 %v557_v32, %v475_v30  ;;  %v559_v34 = vpop.f32.mrb[3].mxu1  ;;  %16728 = vst [vmem:[#allocation82_spill] sm:$0xff] %v13981_v37  ;;  %v12079_v32 = vld [vmem:[%s16720_s22 + $0x190] ss:$24 sps:$4 sm:$0xff]  }
 0x311   :  { %16726 = vst [vmem:[#allocation80_spill] sm:$0xff] %v13977_v35  ;;  %v13979_v36 = vadd.f32 %v559_v34, %v479_v29  ;;  %v12084_v34 = vld [vmem:[%s16720_s22 + $0x1c4] ss:$24 sps:$4 sm:$0xff]  }
 0x312   :  { %16725 = vst [vmem:[#allocation79_spill] sm:$0xff] %v13975_v33  ;;  %v13990_v40 = vpack.c.bf16 %v13975_v33, %v13981_v37 }
 0x313   :  { %16727 = vst [vmem:[#allocation81_spill] sm:$0xff] %v13979_v36  ;;  %v13985_v38 = vpack.c.bf16 %v13979_v36, %v13977_v35 }
 0x315   :  { %1345 = vmatprep.mubr.bf16.mxu0 %v13985_v38  ;;  %1408 = vmatprep.mubr.bf16.mxu1 %v13985_v38  ;;  %v563_v42 = vpop.f32.mrb[4].mxu1 }
 0x316   :  { %1346 = vmatmul.mubr.bf16.vlgmr.msra.gmra.mrb[0].mxu0 %v13990_v40  ;;  %1409 = vmatmul.mubr.bf16.vlgmr.msra.gmra.mrb[12].mxu1 %v13990_v40  ;;  %v13997_v43 = vadd.f32 %v563_v42, %v475_v30  ;;  %v565_v44 = vpop.f32.mrb[5].mxu1  ;;  %v12090_v42 = vld [vmem:[%s16720_s22 + $0x224] ss:$24 sps:$4 sm:$0xff]  }
 0x317   :  { %1440 = vmatpush1.bf16.msra.mxu0 %v12055_v39  ;;  %v14000_v46 = vadd.f32 %v565_v44, %v479_v29  ;;  %v567_v47 = vpop.f32.mrb[6].mxu1  ;;  %v12082_v39 = vld [vmem:[%s16720_s22 + $0x1c0] ss:$24 sps:$4 sm:$0xff]  }
 0x318   :  { %16729 = vst [vmem:[#allocation83_spill] sm:$0xff] %v13997_v43  ;;  %1441 = vmatprep.subr.bf16.mxu0 %v12060_v41  ;;  %v14002_v49 = vadd.f32 %v567_v47, %v475_v30  ;;  %v569_v50 = vpop.f32.mrb[7].mxu1  ;;  %v12076_v30 = vld [vmem:[%s16720_s22 + $0x160] ss:$24 sps:$4 sm:$0xff]   ;;  %v12085_v41 = vld [vmem:[%s16720_s22 + $0x1f0] ss:$24 sps:$4 sm:$0xff]  }
 0x319   :  { %16730 = vst [vmem:[#allocation84_spill] sm:$0xff] %v14000_v46  ;;  %v14005_v52 = vadd.f32 %v569_v50, %v479_v29  ;;  %v12078_v29 = vld [vmem:[%s16720_s22 + $0x164] ss:$24 sps:$4 sm:$0xff]   ;;  %v12088_v44 = vld [vmem:[%s16720_s22 + $0x220] ss:$24 sps:$4 sm:$0xff]  }
 0x31a   :  { %16731 = vst [vmem:[#allocation85_spill] sm:$0xff] %v14002_v49  ;;  %v14009_v54 = vpack.c.bf16 %v14002_v49, %v13997_v43  ;;  %v12091_v47 = vld [vmem:[%s16720_s22 + $0x250] ss:$24 sps:$4 sm:$0xff]   ;;  %v12094_v50 = vld [vmem:[%s16720_s22 + $0x280] ss:$24 sps:$4 sm:$0xff]  }
 0x31b   :  { %16732 = vst [vmem:[#allocation86_spill] sm:$0xff] %v14005_v52  ;;  %1442 = vmatpush1.bf16.msra.mxu0 %v12058_v45  ;;  %v14014_v56 = vpack.c.bf16 %v14005_v52, %v14000_v46  ;;  %v12093_v45 = vld [vmem:[%s16720_s22 + $0x254] ss:$24 sps:$4 sm:$0xff]  }
 0x31c   :  { %1443 = vmatprep.subr.bf16.mxu0 %v12063_v51  ;;  %v12099_v51 = vld [vmem:[%s16720_s22 + $0x2b4] ss:$24 sps:$4 sm:$0xff]  }
 0x31d   :  { %v658_v62 = vpop.f32.mrb[8].mxu1  ;;  %1355 = vmatprep.mubr.bf16.mxu0 %v14014_v56  ;;  %1418 = vmatprep.mubr.bf16.mxu1 %v14014_v56 }
 0x31e   :  { %v659_v0 = vadd.f32 %v658_v62, %v584_v55  ;;  %v660_v2 = vpop.f32.mrb[9].mxu1  ;;  %1356 = vmatmul.mubr.bf16.gmra.mrb[4].mxu0 %v14009_v54  ;;  %1419 = vmatmul.mubr.bf16.gmra.mrb[16].mxu1 %v14009_v54 }
 0x31f   :  { %v661_v3 = vadd.f32 %v660_v2, %v588_v59  ;;  %1444 = vmatpush1.bf16.msra.mxu0 %v12061_v58  ;;  %v662_v5 = vpop.f32.mrb[10].mxu1  ;;  %v16645_v58 = vmov 0.0  }
 0x320   :  { %v679_v7 = vmul.f32 %v672_v60, %v659_v0  ;;  %v663_v8 = vadd.f32 %v662_v5, %v584_v55  ;;  %v664_v9 = vpop.f32.mrb[11].mxu1  ;;  %1445 = vmatprep.subr.bf16.mxu0 %v12066_v61  ;;  %v12102_v55 = vld [vmem:[%s16720_s22 + $0x2e4] ss:$24 sps:$4 sm:$0xff]   ;;  %11143 = vmatprep.subr.bf16.mxu1 %v16645_v58 }
 0x321   :  { %v680_v11 = vmul.f32 %v676_v63, %v661_v3  ;;  %v665_v12 = vadd.f32 %v664_v9, %v588_v59  ;;  %v14075_v59 = vld [vmem:[#allocation11] sm:$0x3f] }
 0x322   :  { %v14029_v13 = vadd.f32 %v688_v1, %v679_v7  ;;  %v681_v14 = vmul.f32 %v672_v60, %v663_v8 }
 0x323   :  { %v14031_v15 = vadd.f32 %v692_v4, %v680_v11  ;;  %v682_v16 = vmul.f32 %v676_v63, %v665_v12  ;;  %1446 = vmatpush1.bf16.msra.mxu0 %v12064_v6  ;;  %v14089_v63 = vrot.slane %v14075_v59, %v13968_v25 }
 0x324   :  { %16733 = vst [vmem:[#allocation87_spill] sm:$0xff] %v14029_v13  ;;  %v14034_v18 = vadd.f32 %v688_v1, %v681_v14  ;;  %1447 = vmatprep.subr.bf16.mxu0 %v12069_v10 }
 0x325   :  { %16734 = vst [vmem:[#allocation88_spill] sm:$0xff] %v14031_v15  ;;  %v14037_v20 = vadd.f32 %v692_v4, %v682_v16 }
 0x326   :  { %16735 = vst [vmem:[#allocation89_spill] sm:$0xff] %v14034_v18  ;;  %v799_v21 = vpack.c.bf16 %v14034_v18, %v14029_v13 }
 0x327   :  { %16736 = vst [vmem:[#allocation90_spill] sm:$0xff] %v14037_v20  ;;  %1448 = vmatpush1.bf16.msra.mxu0 %v12067_v17  ;;  %v800_v22 = vpack.c.bf16 %v14037_v20, %v14031_v15 }
 0x328   :  { %1449 = vmatprep.subr.bf16.mxu0 %v12072_v19 }
 0x329   :  { %1365 = vmatprep.mubr.bf16.mxu0 %v800_v22  ;;  %1428 = vmatprep.mubr.bf16.mxu1 %v800_v22 }
 0x32a   :  { %1366 = vmatmul.mubr.bf16.gmra.mrb[8].mxu0 %v799_v21  ;;  %1429 = vmatmul.mubr.bf16.gmra.mrb[20].mxu1 %v799_v21 }
 0x32b   :  { %1450 = vmatpush1.bf16.msra.mxu0 %v12070_v23  ;;  %1471 = vmatprep.mubr.bf16.mxu0 %v13985_v38  ;;  %v12087_v38 = vld [vmem:[%s16720_s22 + $0x1f4] ss:$24 sps:$4 sm:$0xff]  }
 0x32c   :  { %1451 = vmatprep.subr.bf16.mxu0 %v12075_v26  ;;  %11145 = vmatprep.mubr.msk.bf16.mxu1 %vm13547_vm1, %v16645_v58 }
 0x32f   :  { %1452 = vmatpush1.bf16.msra.mxu0 %v12073_v28 }
 0x330   :  { %1453 = vmatprep.subr.bf16.mxu0 %v12078_v29 }
 0x333   :  { %1454 = vmatpush1.bf16.msra.mxu0 %v12076_v30 }
 0x334   :  { %1455 = vmatprep.subr.bf16.mxu0 %v12081_v31 }
 0x337   :  { %1456 = vmatpush1.bf16.msra.mxu0 %v12079_v32 }
 0x338   :  { %1457 = vmatprep.subr.bf16.mxu0 %v12084_v34 }
 0x33b   :  { %1458 = vmatpush1.bf16.msra.mxu0 %v12082_v39 }
 0x33c   :  { %1459 = vmatprep.subr.bf16.mxu0 %v12087_v38 }
 0x33f   :  { %1460 = vmatpush1.bf16.msra.mxu0 %v12085_v41 }
 0x340   :  { %1461 = vmatprep.subr.bf16.mxu0 %v12090_v42 }
 0x343   :  { %1462 = vmatpush1.bf16.msra.mxu0 %v12088_v44 }
 0x344   :  { %1463 = vmatprep.subr.bf16.mxu0 %v12093_v45 }
 0x347   :  { %1464 = vmatpush1.bf16.msra.mxu0 %v12091_v47 }
 0x348   :  { %1465 = vmatprep.subr.bf16.mxu0 %v12096_v48 }
 0x34b   :  { %1466 = vmatpush1.bf16.msra.mxu0 %v12094_v50 }
 0x34c   :  { %1467 = vmatprep.subr.bf16.mxu0 %v12099_v51 }
 0x34f   :  { %1468 = vmatpush1.bf16.msra.mxu0 %v12097_v53 }
 0x350   :  { %1469 = vmatprep.subr.bf16.mxu0 %v12102_v55 }
 0x353   :  { %1470 = vmatpush1.bf16.msra.mxu0 %v12100_v57 }
 0x354   :  { %11191 = vmatprep.subr.bf16.mxu0 %v16645_v58 }
 0x356   :  { %1472 = vmatmul.mubr.bf16.vlgmr.msra.gmra.mrb[12].mxu0 %v13990_v40  ;;  %v16644_v40 = vsub.s32 2, %v13965_v24 }
 0x357   :  { %1481 = vmatprep.mubr.bf16.mxu0 %v14014_v56  ;;  %v14080_v56 = vrot.slane %v14075_v59, %v13971_v27 }
 0x358   :  { %v14085_v60 = vrot.slane %v14075_v59, %v16644_v40 }
 0x35e   :  { %1482 = vmatmul.mubr.bf16.gmra.mrb[16].mxu0 %v14009_v54  ;;  %v16643_v54 = vsub.s32 3, %v13965_v24 }
 0x35f   :  { %1491 = vmatprep.mubr.bf16.mxu0 %v800_v22 }
 0x360   :  { %v14094_v0 = vrot.slane %v14075_v59, %v16643_v54 }
 0x366   :  { %1492 = vmatmul.mubr.bf16.gmra.mrb[20].mxu0 %v799_v21 }
 0x367   :  { %11193 = vmatprep.mubr.msk.bf16.mxu0 %vm13547_vm1, %v16645_v58 }
 0x3e9   :  { %v1347_v61 = vpop.f32.mrb[0].mxu0  ;;  %v1410_v62 = vpop.f32.mrb[12].mxu1 }
 0x3ea   :  { %v1349_v1 = vpop.f32.mrb[1].mxu0  ;;  %v1412_v2 = vpop.f32.mrb[13].mxu1  ;;  %v1348_v5 = vadd.f32 %v1347_v61, %v14080_v56  ;;  %v1411_v6 = vadd.f32 %v1410_v62, %v14085_v60 }
 0x3eb   :  { %v1351_v3 = vpop.f32.mrb[2].mxu0  ;;  %v1414_v4 = vpop.f32.mrb[14].mxu1  ;;  %v1350_v11 = vadd.f32 %v1349_v1, %v14089_v63  ;;  %v1413_v12 = vadd.f32 %v1412_v2, %v14094_v0 }
 0x3ec   :  { %v1352_v7 = vadd.f32 %v1351_v3, %v14080_v56  ;;  %v1415_v8 = vadd.f32 %v1414_v4, %v14085_v60  ;;  %v1353_v9 = vpop.f32.mrb[3].mxu0  ;;  %v1416_v10 = vpop.f32.mrb[15].mxu1 }
 0x3ed   :  { %v1354_v14 = vadd.f32 %v1353_v9, %v14089_v63  ;;  %v1417_v16 = vadd.f32 %v1416_v10, %v14094_v0 }
 0x3ee   :  { %v14104_v17 = vpack.c.bf16 %v1352_v7, %v1348_v5  ;;  %v14106_v19 = vpack.c.bf16 %v1415_v8, %v1411_v6 }
 0x3ef   :  { %v14108_v21 = vpack.c.bf16 %v1354_v14, %v1350_v11  ;;  %v14110_v22 = vpack.c.bf16 %v1417_v16, %v1413_v12 }
 0x3f0   :  { %v1510_v23 = vsel %vm1505_vm2, %v14106_v19, 0 }
 0x3f1   :  { %11144 = vmatpush3.bf16.xpose.msra.mxu1 %v1510_v23  ;;  %v2002_v26 = vsel %vm1505_vm2, %v14110_v22, 0  ;;  %v1357_v28 = vpop.f32.mrb[4].mxu0  ;;  %v1420_v29 = vpop.f32.mrb[16].mxu1 }
 0x3f2   :  { %11192 = vmatpush3.bf16.xpose.msra.mxu0 %v2002_v26  ;;  %v1358_v30 = vadd.f32 %v1357_v28, %v14080_v56  ;;  %v1359_v31 = vpop.f32.mrb[5].mxu0  ;;  %11149 = vmatprep.subr.bf16.mxu1 %v16645_v58  ;;  %v1421_v32 = vadd.f32 %v1420_v29, %v14085_v60  ;;  %v1422_v34 = vpop.f32.mrb[17].mxu1  ;;  %v821_v26 = vsub.s32 4, %v13965_v24  ;;  %v825_v28 = vsub.s32 5, %v13965_v24 }
 0x3f3   :  { %v1360_v39 = vadd.f32 %v1359_v31, %v14089_v63  ;;  %v1361_v38 = vpop.f32.mrb[6].mxu0  ;;  %v1423_v41 = vadd.f32 %v1422_v34, %v14094_v0  ;;  %v1424_v42 = vpop.f32.mrb[18].mxu1  ;;  %11203 = vmatprep.subr.bf16.mxu0 %v16645_v58 }
 0x3f4   :  { %v1362_v44 = vadd.f32 %v1361_v38, %v14080_v56  ;;  %v1363_v45 = vpop.f32.mrb[7].mxu0  ;;  %v1425_v47 = vadd.f32 %v1424_v42, %v14085_v60  ;;  %v1426_v48 = vpop.f32.mrb[19].mxu1  ;;  %v822_v29 = vrot.slane %v14075_v59, %v821_v26 }
 0x3f5   :  { %v1364_v50 = vadd.f32 %v1363_v45, %v14089_v63  ;;  %v1427_v51 = vadd.f32 %v1426_v48, %v14094_v0 }
 0x3f6   :  { %v14126_v53 = vpack.c.bf16 %v1362_v44, %v1358_v30  ;;  %v14128_v55 = vpack.c.bf16 %v1425_v47, %v1421_v32 }
 0x3f7   :  { %v14130_v57 = vpack.c.bf16 %v1364_v50, %v1360_v39  ;;  %v14132_v61 = vpack.c.bf16 %v1427_v51, %v1423_v41 }
 0x3f8   :  { %11146 = vmatmul.mubr.msk.bf16.vlgmr.msra.gmra.mrb[24].mxu1 %vm1505_vm2, %v14104_v17 }
 0x3f9   :  { %11194 = vmatmul.mubr.msk.bf16.vlgmr.msra.gmra.mrb[24].mxu0 %vm1505_vm2, %v14108_v21  ;;  %11151 = vmatprep.mubr.msk.bf16.mxu1 %vm13547_vm1, %v16645_v58 }
 0x3fa   :  { %11205 = vmatprep.mubr.msk.bf16.mxu0 %vm13547_vm1, %v16645_v58 }
 0x3fd   :  { %v1367_v62 = vpop.f32.mrb[8].mxu0  ;;  %v1430_v1 = vpop.f32.mrb[20].mxu1 }
 0x3fe   :  { %v14143_v2 = vadd.f32 %v1367_v62, %v14080_v56  ;;  %v1369_v3 = vpop.f32.mrb[9].mxu0  ;;  %v14146_v4 = vadd.f32 %v1430_v1, %v14085_v60  ;;  %v1432_v5 = vpop.f32.mrb[21].mxu1 }
 0x3ff   :  { %v14149_v6 = vadd.f32 %v1369_v3, %v14089_v63  ;;  %v1371_v7 = vpop.f32.mrb[10].mxu0  ;;  %v14152_v8 = vadd.f32 %v1432_v5, %v14094_v0  ;;  %v1434_v9 = vpop.f32.mrb[22].mxu1 }
 0x400   :  { %v14155_v10 = vadd.f32 %v1371_v7, %v14080_v56  ;;  %v1373_v11 = vpop.f32.mrb[11].mxu0  ;;  %v14158_v12 = vadd.f32 %v1434_v9, %v14085_v60  ;;  %v1436_v14 = vpop.f32.mrb[23].mxu1  ;;  %v826_v56 = vrot.slane %v14075_v59, %v825_v28 }
 0x401   :  { %v14161_v16 = vadd.f32 %v1373_v11, %v14089_v63  ;;  %v14164_v23 = vadd.f32 %v1436_v14, %v14094_v0 }
 0x429   :  { %v1473_v30 = vpop.f32.mrb[12].mxu0 }
 0x42a   :  { %v1475_v31 = vpop.f32.mrb[13].mxu0  ;;  %v1474_v60 = vadd.f32 %v1473_v30, %v822_v29 }
 0x42b   :  { %v1477_v32 = vpop.f32.mrb[14].mxu0  ;;  %v1476_v38 = vadd.f32 %v1475_v31, %v826_v56 }
 0x42c   :  { %v1478_v34 = vadd.f32 %v1477_v32, %v822_v29  ;;  %v1479_v39 = vpop.f32.mrb[15].mxu0 }
 0x42d   :  { %v1480_v63 = vadd.f32 %v1479_v39, %v826_v56 }
 0x42e   :  { %v14170_v41 = vpack.c.bf16 %v1478_v34, %v1474_v60 }
 0x42f   :  { %v14172_v0 = vpack.c.bf16 %v1480_v63, %v1476_v38 }
 0x430   :  { %11150 = vmatpush3.bf16.msra.mxu1 %v14170_v41 }
 0x431   :  { %v1483_v42 = vpop.f32.mrb[16].mxu0  ;;  %11155 = vmatprep.subr.bf16.mxu1 %v16645_v58 }
 0x432   :  { %v1484_v44 = vadd.f32 %v1483_v42, %v822_v29  ;;  %v1485_v45 = vpop.f32.mrb[17].mxu0 }
 0x433   :  { %v1486_v47 = vadd.f32 %v1485_v45, %v826_v56  ;;  %v1487_v59 = vpop.f32.mrb[18].mxu0 }
 0x434   :  { %v1488_v48 = vadd.f32 %v1487_v59, %v822_v29  ;;  %v1489_v50 = vpop.f32.mrb[19].mxu0 }
 0x435   :  { %v1490_v51 = vadd.f32 %v1489_v50, %v826_v56 }
 0x436   :  { %v14176_v62 = vpack.c.bf16 %v1488_v48, %v1484_v44 }
 0x437   :  { %v14178_v1 = vpack.c.bf16 %v1490_v51, %v1486_v47 }
 0x439   :  { %v1493_v3 = vpop.f32.mrb[20].mxu0 }
 0x43a   :  { %v14180_v5 = vadd.f32 %v1493_v3, %v822_v29  ;;  %v1495_v7 = vpop.f32.mrb[21].mxu0 }
 0x43b   :  { %v14182_v9 = vadd.f32 %v1495_v7, %v826_v56  ;;  %v1497_v11 = vpop.f32.mrb[22].mxu0 }
 0x43c   :  { %v14184_v14 = vadd.f32 %v1497_v11, %v822_v29  ;;  %v1499_v26 = vpop.f32.mrb[23].mxu0 }
 0x43d   :  { %v14186_v28 = vadd.f32 %v1499_v26, %v826_v56 }
 0x43e   :  { %16737 = vst [vmem:[#allocation91_spill] sm:$0xff] %v14184_v14 }
 0x43f   :  { %16738 = vst [vmem:[#allocation92_spill] sm:$0xff] %v14186_v28 }
 0x4cb   :  { %v1546_v30 = vpop.f32.mrb[24].mxu1 }
 0x4cc   :  { %v1553_v31 = vmul.f32 0.17677669, %v1546_v30  ;;  %v11147_v32 = vpop.f32.mrb[25].mxu1  ;;  %v14188_v60 = vpop.f32.mrb[24].mxu0 }
 0x4cd   :  { %v1549_v34 = vpop.f32.mrb[26].mxu1  ;;  %v11195_v39 = vpop.f32.mrb[25].mxu0 }
 0x4ce   :  { %v1554_v38 = vmul.f32 0.17677669, %v1549_v34  ;;  %v11148_v63 = vpop.f32.mrb[27].mxu1  ;;  %v14190_v42 = vpop.f32.mrb[26].mxu0  ;;  %v1556_v44 = vsel %vm1555_vm3, %v1553_v31, -inf }
 0x4cf   :  { %v11196_v45 = vpop.f32.mrb[27].mxu0  ;;  %1557 = vmax.xlane.f32.xlu0 %v1556_v44 }
 0x4d0   :  { %v1559_v29 = vsel %vm1555_vm3, %v1554_v38, -inf }
 0x4d3   :  { %1560 = vmax.xlane.f32.xlu0 %v1559_v29 }
 0x4e9   :  { %1627 = vrot.lane.b32.xlu0 %v14106_v19, %s13548_s28 }
 0x55c   :  { %v1558_v56 = vpop.xlane.xlu0 %1557 }
 0x55d   :  { %v1562_v47 = vsub.f32 %v1553_v31, %v1558_v56 }
 0x55f   :  { %v1564_v59 = vmul.f32 1.442695, %v1562_v47 }
 0x560   :  { %v1561_v48 = vpop.xlane.xlu0 %1560 }
 0x561   :  { %12503 = vpow2.f32 %v1564_v59  ;;  %v1563_v50 = vsub.f32 %v1554_v38, %v1561_v48 }
 0x563   :  { %v1566_v51 = vmul.f32 1.442695, %v1563_v50 }
 0x564   :  { %v1628_v63 = vpop.permute.xlu0 %1627 }
 0x565   :  { %12505 = vpow2.f32 %v1566_v51  ;;  %v1633_v45 = vsel %vm1505_vm2, %v1628_v63, 0 }
 0x56b   :  { %v12504_v3 = vpop.eup %12503 }
 0x56c   :  { %v1568_v7 = vsel %vm1555_vm3, %v12504_v3, 0.0 }
 0x56d   :  { %1569 = vadd.xlane.f32.xlu1 %v1568_v7 }
 0x56f   :  { %v12506_v11 = vpop.eup %12505 }
 0x570   :  { %v1571_v26 = vsel %vm1555_vm3, %v12506_v11, 0.0 }
 0x571   :  { %1572 = vadd.xlane.f32.xlu1 %v1571_v26 }
 0x582   :  { %1624 = vrot.lane.b32.xlu1 %v14104_v17, %s13548_s28 }
 0x5fa   :  { %v1570_v30 = vpop.xlane.xlu1 %1569 }
 0x5fb   :  { %12507 = vrcp.f32 %v1570_v30 }
 0x5fe   :  { %v1573_v31 = vpop.xlane.xlu1 %1572 }
 0x5ff   :  { %12509 = vrcp.f32 %v1573_v31 }
 0x602   :  { %v1625_v29 = vpop.permute.xlu1 %1624 }
 0x605   :  { %v12508_v32 = vpop.eup %12507 }
 0x606   :  { %v1575_v39 = vmul.f32 %v12508_v32, %v12504_v3 }
 0x609   :  { %v12510_v34 = vpop.eup %12509 }
 0x60a   :  { %v1577_v38 = vmul.f32 %v12510_v34, %v12506_v11 }
 0x60c   :  { %v1578_v44 = vpack.c.bf16 %v1577_v38, %v1575_v39 }
 0x60e   :  { %11152 = vmatmul.mubr.msk.bf16.vlgmr.msra.gmra.mrb[28].mxu1 %vm1555_vm3, %v1578_v44 }
 0x60f   :  { %11156 = vmatpush3.bf16.xpose.msra.mxu1 %v1633_v45  ;;  %11157 = vmatprep.mubr.msk.bf16.mxu1 %vm13547_vm1, %v16645_v58 }
 0x610   :  { %11161 = vmatprep.subr.bf16.mxu1 %v16645_v58 }
 0x616   :  { %11158 = vmatmul.mubr.msk.bf16.vlgmr.msra.gmra.mrb[32].mxu1 %vm1505_vm2, %v1625_v29 }
 0x617   :  { %11163 = vmatprep.mubr.msk.bf16.mxu1 %vm13547_vm1, %v16645_v58 }
 0x6e1   :  { %v14208_v56 = vpop.f32.mrb[28].mxu1 }
 0x6e2   :  { %16739 = vst [vmem:[#allocation93_spill] sm:$0xff] %v14208_v56  ;;  %v11153_v47 = vpop.f32.mrb[29].mxu1 }
 0x6e3   :  { %v14210_v59 = vpop.f32.mrb[30].mxu1 }
 0x6e4   :  { %16740 = vst [vmem:[#allocation94_spill] sm:$0xff] %v14210_v59  ;;  %v11154_v48 = vpop.f32.mrb[31].mxu1 }
 0x6e9   :  { %v1669_v50 = vpop.f32.mrb[32].mxu1 }
 0x6ea   :  { %v1676_v51 = vmul.f32 0.17677669, %v1669_v50  ;;  %v11159_v3 = vpop.f32.mrb[33].mxu1 }
 0x6eb   :  { %v1672_v7 = vpop.f32.mrb[34].mxu1 }
 0x6ec   :  { %v1677_v11 = vmul.f32 0.17677669, %v1672_v7  ;;  %v11160_v26 = vpop.f32.mrb[35].mxu1  ;;  %v1678_v30 = vsel %vm1555_vm3, %v1676_v51, -inf }
 0x6ed   :  { %1679 = vmax.xlane.f32.xlu1 %v1678_v30 }
 0x6ee   :  { %v1681_v31 = vsel %vm1555_vm3, %v1677_v11, -inf }
 0x6ef   :  { %1682 = vmax.xlane.f32.xlu0 %v1681_v31 }
 0x77a   :  { %v1680_v32 = vpop.xlane.xlu1 %1679 }
 0x77b   :  { %v1684_v34 = vsub.f32 %v1676_v51, %v1680_v32 }
 0x77c   :  { %v1683_v39 = vpop.xlane.xlu0 %1682 }
 0x77d   :  { %v1686_v38 = vmul.f32 1.442695, %v1684_v34  ;;  %v1685_v63 = vsub.f32 %v1677_v11, %v1683_v39 }
 0x77f   :  { %12511 = vpow2.f32 %v1686_v38  ;;  %v1688_v44 = vmul.f32 1.442695, %v1685_v63 }
 0x781   :  { %12513 = vpow2.f32 %v1688_v44 }
 0x789   :  { %v12512_v45 = vpop.eup %12511 }
 0x78a   :  { %v1690_v29 = vsel %vm1555_vm3, %v12512_v45, 0.0 }
 0x78b   :  { %v12514_v47 = vpop.eup %12513  ;;  %1691 = vadd.xlane.f32.xlu0 %v1690_v29 }
 0x78c   :  { %v1693_v48 = vsel %vm1555_vm3, %v12514_v47, 0.0 }
 0x78d   :  { %1694 = vadd.xlane.f32.xlu1 %v1693_v48 }
 0x79e   :  { %1751 = vrot.lane.b32.xlu1 %v14106_v19, %s13549_s9 }
 0x7a1   :  { %1702 = vrot.lane.b32.xlu0 %v14170_v41, %s13548_s28 }
 0x7a2   :  { %1749 = vrot.lane.b32.xlu1 %v14104_v17, %s13549_s9 }
 0x818   :  { %v1692_v50 = vpop.xlane.xlu0 %1691 }
 0x819   :  { %12515 = vrcp.f32 %v1692_v50 }
 0x81a   :  { %v1695_v51 = vpop.xlane.xlu1 %1694 }
 0x81b   :  { %12517 = vrcp.f32 %v1695_v51 }
 0x81c   :  { %v1703_v3 = vpop.permute.xlu0 %1702 }
 0x81d   :  { %11162 = vmatpush3.bf16.msra.mxu1 %v1703_v3 }
 0x81e   :  { %11167 = vmatprep.subr.bf16.mxu1 %v16645_v58  ;;  %v1752_v31 = vpop.permute.xlu1 %1751 }
 0x81f   :  { %v1757_v34 = vsel %vm1505_vm2, %v1752_v31, 0 }
 0x822   :  { %v1750_v39 = vpop.permute.xlu1 %1749 }
 0x823   :  { %v12516_v7 = vpop.eup %12515 }
 0x824   :  { %v1697_v26 = vmul.f32 %v12516_v7, %v12512_v45 }
 0x825   :  { %v12518_v11 = vpop.eup %12517 }
 0x826   :  { %v1699_v30 = vmul.f32 %v12518_v11, %v12514_v47 }
 0x828   :  { %v1700_v32 = vpack.c.bf16 %v1699_v30, %v1697_v26 }
 0x82a   :  { %11164 = vmatmul.mubr.msk.bf16.vlgmr.msra.gmra.mrb[36].mxu1 %vm1555_vm3, %v1700_v32 }
 0x82b   :  { %11168 = vmatpush3.bf16.xpose.msra.mxu1 %v1757_v34  ;;  %11169 = vmatprep.mubr.msk.bf16.mxu1 %vm13547_vm1, %v16645_v58 }
 0x82c   :  { %11173 = vmatprep.subr.bf16.mxu1 %v16645_v58 }
 0x832   :  { %11170 = vmatmul.mubr.msk.bf16.vlgmr.msra.gmra.mrb[40].mxu1 %vm1505_vm2, %v1750_v39 }
 0x833   :  { %11175 = vmatprep.mubr.msk.bf16.mxu1 %vm13547_vm1, %v16645_v58 }
 0x8fd   :  { %v14231_v38 = vpop.f32.mrb[36].mxu1 }
 0x8fe   :  { %16741 = vst [vmem:[#allocation95_spill] sm:$0xff] %v14231_v38  ;;  %v11165_v63 = vpop.f32.mrb[37].mxu1 }
 0x8ff   :  { %v14233_v44 = vpop.f32.mrb[38].mxu1 }
 0x900   :  { %16742 = vst [vmem:[#allocation96_spill] sm:$0xff] %v14233_v44  ;;  %v11166_v29 = vpop.f32.mrb[39].mxu1 }
 0x905   :  { %v1793_v47 = vpop.f32.mrb[40].mxu1 }
 0x906   :  { %v1800_v48 = vmul.f32 0.17677669, %v1793_v47  ;;  %v11171_v50 = vpop.f32.mrb[41].mxu1 }
 0x907   :  { %v1796_v51 = vpop.f32.mrb[42].mxu1 }
 0x908   :  { %v1801_v3 = vmul.f32 0.17677669, %v1796_v51  ;;  %v11172_v7 = vpop.f32.mrb[43].mxu1  ;;  %v1802_v11 = vsel %vm1555_vm3, %v1800_v48, -inf }
 0x909   :  { %1803 = vmax.xlane.f32.xlu1 %v1802_v11 }
 0x90a   :  { %v1805_v26 = vsel %vm1555_vm3, %v1801_v3, -inf }
 0x90b   :  { %1806 = vmax.xlane.f32.xlu0 %v1805_v26 }
 0x91a   :  { %1825 = vrot.lane.b32.xlu1 %v14170_v41, %s13549_s9 }
 0x91e   :  { %1872 = vrot.lane.b32.xlu1 %v14104_v17, %s13550_s1  ;;  %v14283_v17 = vpack.c.bf16 %v14143_v2, %v14143_v2 }
 0x921   :  { %1874 = vrot.lane.b32.xlu0 %v14106_v19, %s13550_s1  ;;  %v14293_v19 = vpack.c.bf16 %v14149_v6, %v14149_v6 }
 0x922   :  { %2118 = vrot.lane.b32.xlu1 %v14110_v22, %s13548_s28 }
 0x925   :  { %2242 = vrot.lane.b32.xlu0 %v14110_v22, %s13549_s9 }
 0x926   :  { %2115 = vrot.lane.b32.xlu1 %v14108_v21, %s13548_s28 }
 0x929   :  { %2365 = vrot.lane.b32.xlu0 %v14110_v22, %s13550_s1  ;;  %v14313_v22 = vpack.c.bf16 %v14161_v16, %v14161_v16 }
 0x92a   :  { %2240 = vrot.lane.b32.xlu1 %v14108_v21, %s13549_s9 }
 0x92d   :  { %2671 = vrot.lane.b32.xlu0 %v14128_v55, %s13548_s28 }
 0x92e   :  { %2363 = vrot.lane.b32.xlu1 %v14108_v21, %s13550_s1  ;;  %v14303_v21 = vpack.c.bf16 %v14155_v10, %v14155_v10 }
 0x931   :  { %2795 = vrot.lane.b32.xlu0 %v14128_v55, %s13549_s9 }
 0x932   :  { %2668 = vrot.lane.b32.xlu1 %v14126_v53, %s13548_s28 }
 0x935   :  { %2918 = vrot.lane.b32.xlu0 %v14128_v55, %s13550_s1 }
 0x936   :  { %2793 = vrot.lane.b32.xlu1 %v14126_v53, %s13549_s9 }
 0x939   :  { %3162 = vrot.lane.b32.xlu0 %v14132_v61, %s13548_s28 }
 0x93a   :  { %2916 = vrot.lane.b32.xlu1 %v14126_v53, %s13550_s1 }
 0x93d   :  { %3286 = vrot.lane.b32.xlu0 %v14132_v61, %s13549_s9 }
 0x93e   :  { %3159 = vrot.lane.b32.xlu1 %v14130_v57, %s13548_s28 }
 0x941   :  { %3409 = vrot.lane.b32.xlu0 %v14132_v61, %s13550_s1 }
 0x942   :  { %3284 = vrot.lane.b32.xlu1 %v14130_v57, %s13549_s9 }
 0x946   :  { %3407 = vrot.lane.b32.xlu1 %v14130_v57, %s13550_s1 }
 0x94a   :  { %3701 = vrot.lane.b32.xlu1 %v14283_v17, %s13548_s28 }
 0x94e   :  { %3814 = vrot.lane.b32.xlu1 %v14283_v17, %s13549_s9 }
 0x952   :  { %3925 = vrot.lane.b32.xlu1 %v14283_v17, %s13550_s1 }
 0x956   :  { %4145 = vrot.lane.b32.xlu1 %v14293_v19, %s13548_s28 }
 0x95a   :  { %4258 = vrot.lane.b32.xlu1 %v14293_v19, %s13549_s9 }
 0x95e   :  { %4369 = vrot.lane.b32.xlu1 %v14293_v19, %s13550_s1 }
 0x962   :  { %4619 = vrot.lane.b32.xlu1 %v14303_v21, %s13548_s28 }
 0x966   :  { %4732 = vrot.lane.b32.xlu1 %v14303_v21, %s13549_s9 }
 0x96a   :  { %4843 = vrot.lane.b32.xlu1 %v14303_v21, %s13550_s1 }
 0x96e   :  { %5063 = vrot.lane.b32.xlu1 %v14313_v22, %s13548_s28 }
 0x972   :  { %5176 = vrot.lane.b32.xlu1 %v14313_v22, %s13549_s9 }
 0x976   :  { %5287 = vrot.lane.b32.xlu1 %v14313_v22, %s13550_s1 }
 0x996   :  { %v1804_v2 = vpop.xlane.xlu1 %1803 }
 0x997   :  { %v1808_v6 = vsub.f32 %v1800_v48, %v1804_v2 }
 0x998   :  { %v1807_v10 = vpop.xlane.xlu0 %1806 }
 0x999   :  { %v1810_v30 = vmul.f32 1.442695, %v1808_v6  ;;  %v1809_v31 = vsub.f32 %v1801_v3, %v1807_v10 }
 0x99a   :  { %v1826_v32 = vpop.permute.xlu1 %1825 }
 0x99b   :  { %12519 = vpow2.f32 %v1810_v30  ;;  %v1812_v34 = vmul.f32 1.442695, %v1809_v31  ;;  %11174 = vmatpush3.bf16.msra.mxu1 %v1826_v32  ;;  %v2555_v30 = vsel %vm1505_vm2, %v14128_v55, 0  ;;  %v14354_v31 = vpack.c.bf16 %v14146_v4, %v14146_v4 }
 0x99c   :  { %11179 = vmatprep.subr.bf16.mxu1 %v16645_v58  ;;  %v14324_v39 = vpop.permute.xlu0 %1874 }
 0x99d   :  { %12521 = vpow2.f32 %v1812_v34 }
 0x99e   :  { %v14322_v16 = vpop.permute.xlu1 %1872 }
 0x9a0   :  { %v2243_v51 = vpop.permute.xlu0 %2242 }
 0x9a1   :  { %v2248_v11 = vsel %vm1505_vm2, %v2243_v51, 0  ;;  %v14390_v51 = vpack.c.bf16 %v14158_v12, %v14158_v12 }
 0x9a2   :  { %v2119_v63 = vpop.permute.xlu1 %2118 }
 0x9a3   :  { %v2124_v29 = vsel %vm1505_vm2, %v2119_v63, 0  ;;  %v14370_v63 = vpack.c.bf16 %v14152_v8, %v14152_v8 }
 0x9a4   :  { %11204 = vmatpush3.bf16.xpose.msra.mxu0 %v2124_v29  ;;  %v2366_v26 = vpop.permute.xlu0 %2365 }
 0x9a5   :  { %v14327_v47 = vpop.eup %12519  ;;  %11215 = vmatprep.subr.bf16.mxu0 %v16645_v58  ;;  %v2371_v6 = vsel %vm1505_vm2, %v2366_v26, 0 }
 0x9a6   :  { %v1814_v48 = vsel %vm1555_vm3, %v14327_v47, 0.0  ;;  %v2116_v3 = vpop.permute.xlu1 %2115 }
 0x9a7   :  { %v14332_v50 = vpop.eup %12521  ;;  %1815 = vadd.xlane.f32.xlu0 %v1814_v48 }
 0x9a8   :  { %v1817_v7 = vsel %vm1555_vm3, %v14332_v50, 0.0  ;;  %v2672_v32 = vpop.permute.xlu0 %2671 }
 0x9a9   :  { %v2677_v34 = vsel %vm1505_vm2, %v2672_v32, 0  ;;  %v3597_v32 = vsel %vm1505_vm2, %v14354_v31, 0 }
 0x9aa   :  { %v2241_v2 = vpop.permute.xlu1 %2240 }
 0x9ab   :  { %11206 = vmatmul.mubr.msk.bf16.vlgmr.msra.gmra.mrb[28].mxu0 %vm1505_vm2, %v2116_v3  ;;  %1818 = vadd.xlane.f32.xlu0 %v1817_v7  ;;  %v3046_v7 = vsel %vm1505_vm2, %v14132_v61, 0 }
 0x9ac   :  { %11216 = vmatpush3.bf16.xpose.msra.mxu0 %v2248_v11  ;;  %11217 = vmatprep.mubr.msk.bf16.mxu0 %vm13547_vm1, %v16645_v58  ;;  %v2796_v55 = vpop.permute.xlu0 %2795  ;;  %v14406_v11 = vpack.c.bf16 %v14164_v23, %v14164_v23 }
 0x9ad   :  { %11227 = vmatprep.subr.bf16.mxu0 %v16645_v58 }
 0x9ae   :  { %v2364_v10 = vpop.permute.xlu1 %2363 }
 0x9b0   :  { %v2919_v29 = vpop.permute.xlu0 %2918 }
 0x9b1   :  { %v2924_v8 = vsel %vm1505_vm2, %v2919_v29, 0 }
 0x9b2   :  { %v2669_v4 = vpop.permute.xlu1 %2668 }
 0x9b3   :  { %11218 = vmatmul.mubr.msk.bf16.vlgmr.msra.gmra.mrb[32].mxu0 %vm1505_vm2, %v2241_v2 }
 0x9b4   :  { %11228 = vmatpush3.bf16.xpose.msra.mxu0 %v2371_v6  ;;  %11229 = vmatprep.mubr.msk.bf16.mxu0 %vm13547_vm1, %v16645_v58  ;;  %v3163_v12 = vpop.permute.xlu0 %3162 }
 0x9b5   :  { %11239 = vmatprep.subr.bf16.mxu0 %v16645_v58  ;;  %v3168_v26 = vsel %vm1505_vm2, %v3163_v12, 0 }
 0x9b6   :  { %v2794_v48 = vpop.permute.xlu1 %2793 }
 0x9b8   :  { %v3287_v61 = vpop.permute.xlu0 %3286 }
 0x9b9   :  { %v3292_v2 = vsel %vm1505_vm2, %v3287_v61, 0 }
 0x9ba   :  { %v2917_v3 = vpop.permute.xlu1 %2916 }
 0x9bb   :  { %11230 = vmatmul.mubr.msk.bf16.vlgmr.msra.gmra.mrb[36].mxu0 %vm1505_vm2, %v2364_v10 }
 0x9bc   :  { %11240 = vmatpush3.bf16.xpose.msra.mxu0 %v2555_v30  ;;  %11241 = vmatprep.mubr.msk.bf16.mxu0 %vm13547_vm1, %v16645_v58 }
 0x9bd   :  { %11251 = vmatprep.subr.bf16.mxu0 %v16645_v58 }
 0x9be   :  { %v3160_v23 = vpop.permute.xlu1 %3159 }
 0x9c1   :  { %3704 = vrot.lane.b32.xlu0 %v14354_v31, %s13548_s28 }
 0x9c2   :  { %v3285_v6 = vpop.permute.xlu1 %3284 }
 0x9c3   :  { %11242 = vmatmul.mubr.msk.bf16.vlgmr.msra.gmra.mrb[40].mxu0 %vm1505_vm2, %v14126_v53  ;;  %v2801_v53 = vsel %vm1505_vm2, %v2796_v55, 0  ;;  %v14444_v55 = vmul.f32 0.17677669, %v14190_v42 }
 0x9c4   :  { %11252 = vmatpush3.bf16.xpose.msra.mxu0 %v2677_v34  ;;  %11253 = vmatprep.mubr.msk.bf16.mxu0 %vm13547_vm1, %v16645_v58  ;;  %v14441_v34 = vmul.f32 0.17677669, %v14188_v60 }
 0x9c5   :  { %3816 = vrot.lane.b32.xlu0 %v14354_v31, %s13549_s9  ;;  %11263 = vmatprep.subr.bf16.mxu0 %v16645_v58 }
 0x9c6   :  { %v3408_v30 = vpop.permute.xlu1 %3407 }
 0x9c9   :  { %3927 = vrot.lane.b32.xlu0 %v14354_v31, %s13550_s1  ;;  %v2047_v31 = vsel %vm1555_vm3, %v14441_v34, -inf }
 0x9cb   :  { %11254 = vmatmul.mubr.msk.bf16.vlgmr.msra.gmra.mrb[44].mxu0 %vm1505_vm2, %v2669_v4  ;;  %v2050_v4 = vsel %vm1555_vm3, %v14444_v55, -inf }
 0x9cc   :  { %11264 = vmatpush3.bf16.xpose.msra.mxu0 %v2801_v53  ;;  %11265 = vmatprep.mubr.msk.bf16.mxu0 %vm13547_vm1, %v16645_v58 }
 0x9cd   :  { %4148 = vrot.lane.b32.xlu0 %v14370_v63, %s13548_s28  ;;  %11275 = vmatprep.subr.bf16.mxu0 %v16645_v58 }
 0x9d1   :  { %4260 = vrot.lane.b32.xlu0 %v14370_v63, %s13549_s9 }
 0x9d3   :  { %11266 = vmatmul.mubr.msk.bf16.vlgmr.msra.gmra.mrb[48].mxu0 %vm1505_vm2, %v2794_v48 }
 0x9d4   :  { %11276 = vmatpush3.bf16.xpose.msra.mxu0 %v2924_v8  ;;  %11277 = vmatprep.mubr.msk.bf16.mxu0 %vm13547_vm1, %v16645_v58 }
 0x9d5   :  { %4371 = vrot.lane.b32.xlu0 %v14370_v63, %s13550_s1  ;;  %11287 = vmatprep.subr.bf16.mxu0 %v16645_v58 }
 0x9d9   :  { %4622 = vrot.lane.b32.xlu0 %v14390_v51, %s13548_s28 }
 0x9db   :  { %11278 = vmatmul.mubr.msk.bf16.vlgmr.msra.gmra.mrb[52].mxu0 %vm1505_vm2, %v2917_v3  ;;  %v3702_v3 = vpop.permute.xlu1 %3701 }
 0x9dc   :  { %11288 = vmatpush3.bf16.xpose.msra.mxu0 %v3046_v7  ;;  %11289 = vmatprep.mubr.msk.bf16.mxu0 %vm13547_vm1, %v16645_v58 }
 0x9dd   :  { %4734 = vrot.lane.b32.xlu0 %v14390_v51, %s13549_s9  ;;  %11299 = vmatprep.subr.bf16.mxu0 %v16645_v58 }
 0x9e1   :  { %4845 = vrot.lane.b32.xlu0 %v14390_v51, %s13550_s1 }
 0x9e3   :  { %11290 = vmatmul.mubr.msk.bf16.vlgmr.msra.gmra.mrb[56].mxu0 %vm1505_vm2, %v14130_v57  ;;  %v3410_v57 = vpop.permute.xlu0 %3409 }
 0x9e4   :  { %11300 = vmatpush3.bf16.xpose.msra.mxu0 %v3168_v26  ;;  %11301 = vmatprep.mubr.msk.bf16.mxu0 %vm13547_vm1, %v16645_v58  ;;  %v3415_v10 = vsel %vm1505_vm2, %v3410_v57, 0  ;;  %v4043_v57 = vsel %vm1505_vm2, %v14370_v63, 0 }
 0x9e5   :  { %5066 = vrot.lane.b32.xlu0 %v14406_v11, %s13548_s28  ;;  %11311 = vmatprep.subr.bf16.mxu0 %v16645_v58 }
 0x9e9   :  { %5178 = vrot.lane.b32.xlu0 %v14406_v11, %s13549_s9 }
 0x9eb   :  { %11302 = vmatmul.mubr.msk.bf16.vlgmr.msra.gmra.mrb[60].mxu0 %vm1505_vm2, %v3160_v23  ;;  %v1880_v23 = vsel %vm1505_vm2, %v14324_v39, 0 }
 0x9ec   :  { %11312 = vmatpush3.bf16.xpose.msra.mxu0 %v3292_v2  ;;  %11313 = vmatprep.mubr.msk.bf16.mxu0 %vm13547_vm1, %v16645_v58 }
 0x9ed   :  { %5289 = vrot.lane.b32.xlu0 %v14406_v11, %s13550_s1  ;;  %11323 = vmatprep.subr.bf16.mxu0 %v16645_v58 }
 0x9f3   :  { %11314 = vmatmul.mubr.msk.bf16.vlgmr.msra.gmra.mrb[64].mxu0 %vm1505_vm2, %v3285_v6 }
 0x9f4   :  { %11324 = vmatpush3.bf16.xpose.msra.mxu0 %v3415_v10  ;;  %11325 = vmatprep.mubr.msk.bf16.mxu0 %vm13547_vm1, %v16645_v58 }
 0x9f5   :  { %11335 = vmatprep.subr.bf16.mxu0 %v16645_v58 }
 0x9fb   :  { %11326 = vmatmul.mubr.msk.bf16.vlgmr.msra.gmra.mrb[68].mxu0 %vm1505_vm2, %v3408_v30 }
 0x9fc   :  { %11336 = vmatpush3.bf16.xpose.msra.mxu0 %v3597_v32  ;;  %11337 = vmatprep.mubr.msk.bf16.mxu0 %vm13547_vm1, %v16645_v58 }
 0x9fd   :  { %11347 = vmatprep.subr.bf16.mxu0 %v16645_v58 }
 0xa03   :  { %11338 = vmatmul.mubr.msk.bf16.vlgmr.msra.gmra.mrb[72].mxu0 %vm1505_vm2, %v14283_v17 }
 0xa04   :  { %11349 = vmatprep.mubr.msk.bf16.mxu0 %vm13547_vm1, %v16645_v58 }
 0xa0c   :  { %2048 = vmax.xlane.f32.xlu0 %v2047_v31 }
 0xa10   :  { %2051 = vmax.xlane.f32.xlu0 %v2050_v4 }
 0xa34   :  { %v1816_v53 = vpop.xlane.xlu0 %1815 }
 0xa35   :  { %12523 = vrcp.f32 %v1816_v53  ;;  %v4517_v53 = vsel %vm1505_vm2, %v14390_v51, 0 }
 0xa38   :  { %v1819_v17 = vpop.xlane.xlu0 %1818 }
 0xa39   :  { %12525 = vrcp.f32 %v1819_v17 }
 0xa3c   :  { %v3705_v29 = vpop.permute.xlu0 %3704 }
 0xa3d   :  { %v3710_v48 = vsel %vm1505_vm2, %v3705_v29, 0 }
 0xa3e   :  { %11348 = vmatpush3.bf16.xpose.msra.mxu0 %v3710_v48 }
 0xa3f   :  { %11359 = vmatprep.subr.bf16.mxu0 %v16645_v58  ;;  %v12524_v60 = vpop.eup %12523 }
 0xa40   :  { %v3817_v42 = vpop.permute.xlu0 %3816  ;;  %v1821_v7 = vmul.f32 %v12524_v60, %v14327_v47 }
 0xa41   :  { %v3822_v26 = vsel %vm1505_vm2, %v3817_v42, 0 }
 0xa43   :  { %v12526_v8 = vpop.eup %12525 }
 0xa44   :  { %v1823_v12 = vmul.f32 %v12526_v8, %v14332_v50  ;;  %v3928_v47 = vpop.permute.xlu0 %3927  ;;  %v3815_v50 = vpop.permute.xlu1 %3814 }
 0xa45   :  { %11350 = vmatmul.mubr.msk.bf16.vlgmr.msra.gmra.mrb[76].mxu0 %vm1505_vm2, %v3702_v3  ;;  %v3933_v2 = vsel %vm1505_vm2, %v3928_v47, 0 }
 0xa46   :  { %11360 = vmatpush3.bf16.xpose.msra.mxu0 %v3822_v26  ;;  %v1824_v61 = vpack.c.bf16 %v1823_v12, %v1821_v7  ;;  %11361 = vmatprep.mubr.msk.bf16.mxu0 %vm13547_vm1, %v16645_v58 }
 0xa47   :  { %11371 = vmatprep.subr.bf16.mxu0 %v16645_v58 }
 0xa48   :  { %11176 = vmatmul.mubr.msk.bf16.vlgmr.msra.gmra.mrb[44].mxu1 %vm1555_vm3, %v1824_v61  ;;  %v3926_v39 = vpop.permute.xlu1 %3925  ;;  %v4149_v6 = vpop.permute.xlu0 %4148 }
 0xa49   :  { %11180 = vmatpush3.bf16.xpose.msra.mxu1 %v1880_v23  ;;  %11181 = vmatprep.mubr.msk.bf16.mxu1 %vm13547_vm1, %v16645_v58  ;;  %v4154_v10 = vsel %vm1505_vm2, %v4149_v6, 0 }
 0xa4a   :  { %11185 = vmatprep.subr.bf16.mxu1 %v16645_v58 }
 0xa4c   :  { %v4146_v63 = vpop.permute.xlu1 %4145 }
 0xa4d   :  { %11362 = vmatmul.mubr.msk.bf16.vlgmr.msra.gmra.mrb[80].mxu0 %vm1505_vm2, %v3815_v50 }
 0xa4e   :  { %11372 = vmatpush3.bf16.xpose.msra.mxu0 %v3933_v2  ;;  %11373 = vmatprep.mubr.msk.bf16.mxu0 %vm13547_vm1, %v16645_v58 }
 0xa4f   :  { %11383 = vmatprep.subr.bf16.mxu0 %v16645_v58 }
 0xa50   :  { %11182 = vmatmul.mubr.msk.bf16.vlgmr.msra.gmra.mrb[48].mxu1 %vm1505_vm2, %v14322_v16  ;;  %v4261_v16 = vpop.permute.xlu0 %4260 }
 0xa51   :  { %11187 = vmatprep.mubr.msk.bf16.mxu1 %vm13547_vm1, %v16645_v58  ;;  %v4266_v30 = vsel %vm1505_vm2, %v4261_v16, 0 }
 0xa54   :  { %v4372_v32 = vpop.permute.xlu0 %4371 }
 0xa55   :  { %11374 = vmatmul.mubr.msk.bf16.vlgmr.msra.gmra.mrb[84].mxu0 %vm1505_vm2, %v3926_v39  ;;  %v4377_v31 = vsel %vm1505_vm2, %v4372_v32, 0 }
 0xa56   :  { %11384 = vmatpush3.bf16.xpose.msra.mxu0 %v4043_v57  ;;  %11385 = vmatprep.mubr.msk.bf16.mxu0 %vm13547_vm1, %v16645_v58 }
 0xa57   :  { %11395 = vmatprep.subr.bf16.mxu0 %v16645_v58 }
 0xa58   :  { %v4623_v17 = vpop.permute.xlu0 %4622 }
 0xa59   :  { %v4628_v29 = vsel %vm1505_vm2, %v4623_v17, 0 }
 0xa5c   :  { %v4735_v12 = vpop.permute.xlu0 %4734 }
 0xa5d   :  { %11386 = vmatmul.mubr.msk.bf16.vlgmr.msra.gmra.mrb[88].mxu0 %vm1505_vm2, %v14293_v19  ;;  %v4259_v19 = vpop.permute.xlu1 %4258  ;;  %v4740_v61 = vsel %vm1505_vm2, %v4735_v12, 0 }
 0xa5e   :  { %11396 = vmatpush3.bf16.xpose.msra.mxu0 %v4154_v10  ;;  %11397 = vmatprep.mubr.msk.bf16.mxu0 %vm13547_vm1, %v16645_v58 }
 0xa5f   :  { %11407 = vmatprep.subr.bf16.mxu0 %v16645_v58 }
 0xa60   :  { %v4846_v10 = vpop.permute.xlu0 %4845 }
 0xa61   :  { %v4370_v4 = vpop.permute.xlu1 %4369 }
 0xa65   :  { %11398 = vmatmul.mubr.msk.bf16.vlgmr.msra.gmra.mrb[92].mxu0 %vm1505_vm2, %v4146_v63  ;;  %v4620_v26 = vpop.permute.xlu1 %4619 }
 0xa66   :  { %11408 = vmatpush3.bf16.xpose.msra.mxu0 %v4266_v30  ;;  %11409 = vmatprep.mubr.msk.bf16.mxu0 %vm13547_vm1, %v16645_v58  ;;  %v4851_v30 = vsel %vm1505_vm2, %v4846_v10, 0 }
 0xa67   :  { %11419 = vmatprep.subr.bf16.mxu0 %v16645_v58 }
 0xa69   :  { %v4733_v63 = vpop.permute.xlu1 %4732 }
 0xa6d   :  { %11410 = vmatmul.mubr.msk.bf16.vlgmr.msra.gmra.mrb[96].mxu0 %vm1505_vm2, %v4259_v19 }
 0xa6e   :  { %11420 = vmatpush3.bf16.xpose.msra.mxu0 %v4377_v31  ;;  %11421 = vmatprep.mubr.msk.bf16.mxu0 %vm13547_vm1, %v16645_v58 }
 0xa6f   :  { %11431 = vmatprep.subr.bf16.mxu0 %v16645_v58 }
 0xa75   :  { %11422 = vmatmul.mubr.msk.bf16.vlgmr.msra.gmra.mrb[100].mxu0 %vm1505_vm2, %v4370_v4 }
 0xa76   :  { %11432 = vmatpush3.bf16.xpose.msra.mxu0 %v4517_v53  ;;  %11433 = vmatprep.mubr.msk.bf16.mxu0 %vm13547_vm1, %v16645_v58 }
 0xa77   :  { %11443 = vmatprep.subr.bf16.mxu0 %v16645_v58 }
 0xa7d   :  { %11434 = vmatmul.mubr.msk.bf16.vlgmr.msra.gmra.mrb[104].mxu0 %vm1505_vm2, %v14303_v21 }
 0xa7e   :  { %v2160_v48 = vpop.f32.mrb[28].mxu0  ;;  %11444 = vmatpush3.bf16.xpose.msra.mxu0 %v4628_v29  ;;  %11445 = vmatprep.mubr.msk.bf16.mxu0 %vm13547_vm1, %v16645_v58 }
 0xa7f   :  { %v14507_v60 = vmul.f32 0.17677669, %v2160_v48  ;;  %v11207_v51 = vpop.f32.mrb[29].mxu0  ;;  %11455 = vmatprep.subr.bf16.mxu0 %v16645_v58 }
 0xa80   :  { %v2163_v42 = vpop.f32.mrb[30].mxu0  ;;  %v4844_v51 = vpop.permute.xlu1 %4843 }
 0xa81   :  { %v14510_v8 = vmul.f32 0.17677669, %v2163_v42  ;;  %v11208_v3 = vpop.f32.mrb[31].mxu0  ;;  %v2169_v7 = vsel %vm1555_vm3, %v14507_v60, -inf  ;;  %v4961_v42 = vsel %vm1505_vm2, %v14406_v11, 0 }
 0xa82   :  { %2170 = vmax.xlane.f32.xlu0 %v2169_v7 }
 0xa83   :  { %v2172_v21 = vsel %vm1555_vm3, %v14510_v8, -inf }
 0xa84   :  { %2173 = vmax.xlane.f32.xlu1 %v2172_v21 }
 0xa85   :  { %11446 = vmatmul.mubr.msk.bf16.vlgmr.msra.gmra.mrb[108].mxu0 %vm1505_vm2, %v4620_v26 }
 0xa86   :  { %v2284_v23 = vpop.f32.mrb[32].mxu0  ;;  %11456 = vmatpush3.bf16.xpose.msra.mxu0 %v4740_v61  ;;  %11457 = vmatprep.mubr.msk.bf16.mxu0 %vm13547_vm1, %v16645_v58 }
 0xa87   :  { %v14520_v47 = vmul.f32 0.17677669, %v2284_v23  ;;  %v11219_v50 = vpop.f32.mrb[33].mxu0  ;;  %11467 = vmatprep.subr.bf16.mxu0 %v16645_v58 }
 0xa88   :  { %v2287_v2 = vpop.f32.mrb[34].mxu0  ;;  %v5067_v50 = vpop.permute.xlu0 %5066 }
 0xa89   :  { %v14523_v39 = vmul.f32 0.17677669, %v2287_v2  ;;  %v11220_v57 = vpop.f32.mrb[35].mxu0  ;;  %v2293_v6 = vsel %vm1555_vm3, %v14520_v47, -inf  ;;  %v5072_v2 = vsel %vm1505_vm2, %v5067_v50, 0 }
 0xa8a   :  { %2294 = vmax.xlane.f32.xlu0 %v2293_v6 }
 0xa8b   :  { %v2296_v16 = vsel %vm1555_vm3, %v14523_v39, -inf }
 0xa8c   :  { %2297 = vmax.xlane.f32.xlu1 %v2296_v16 }
 0xa8d   :  { %11458 = vmatmul.mubr.msk.bf16.vlgmr.msra.gmra.mrb[112].mxu0 %vm1505_vm2, %v4733_v63 }
 0xa8e   :  { %v2407_v32 = vpop.f32.mrb[36].mxu0  ;;  %11468 = vmatpush3.bf16.xpose.msra.mxu0 %v4851_v30  ;;  %11469 = vmatprep.mubr.msk.bf16.mxu0 %vm13547_vm1, %v16645_v58 }
 0xa8f   :  { %v14533_v19 = vmul.f32 0.17677669, %v2407_v32  ;;  %v11231_v31 = vpop.f32.mrb[37].mxu0  ;;  %11479 = vmatprep.subr.bf16.mxu0 %v16645_v58 }
 0xa90   :  { %v2410_v4 = vpop.f32.mrb[38].mxu0  ;;  %v5179_v31 = vpop.permute.xlu0 %5178 }
 0xa91   :  { %v14536_v53 = vmul.f32 0.17677669, %v2410_v4  ;;  %v11232_v17 = vpop.f32.mrb[39].mxu0  ;;  %v2416_v29 = vsel %vm1555_vm3, %v14533_v19, -inf  ;;  %v5064_v4 = vpop.permute.xlu1 %5063 }
 0xa92   :  { %2417 = vmax.xlane.f32.xlu0 %v2416_v29  ;;  %v5184_v17 = vsel %vm1505_vm2, %v5179_v31, 0 }
 0xa93   :  { %v2419_v48 = vsel %vm1555_vm3, %v14536_v53, -inf }
 0xa94   :  { %2420 = vmax.xlane.f32.xlu1 %v2419_v48 }
 0xa95   :  { %11470 = vmatmul.mubr.msk.bf16.vlgmr.msra.gmra.mrb[116].mxu0 %vm1505_vm2, %v4844_v51  ;;  %v5177_v50 = vpop.permute.xlu1 %5176 }
 0xa96   :  { %v2591_v3 = vpop.f32.mrb[40].mxu0  ;;  %11480 = vmatpush3.bf16.xpose.msra.mxu0 %v4961_v42  ;;  %11481 = vmatprep.mubr.msk.bf16.mxu0 %vm13547_vm1, %v16645_v58 }
 0xa97   :  { %v14547_v7 = vmul.f32 0.17677669, %v2591_v3  ;;  %v11243_v12 = vpop.f32.mrb[41].mxu0  ;;  %11491 = vmatprep.subr.bf16.mxu0 %v16645_v58 }
 0xa98   :  { %v2594_v21 = vpop.f32.mrb[42].mxu0 }
 0xa99   :  { %v14550_v26 = vmul.f32 0.17677669, %v2594_v21  ;;  %v11244_v61 = vpop.f32.mrb[43].mxu0  ;;  %v2600_v23 = vsel %vm1555_vm3, %v14547_v7, -inf }
 0xa9a   :  { %2601 = vmax.xlane.f32.xlu0 %v2600_v23  ;;  %v5290_v61 = vpop.permute.xlu0 %5289 }
 0xa9b   :  { %v2603_v11 = vsel %vm1555_vm3, %v14550_v26, -inf }
 0xa9c   :  { %2604 = vmax.xlane.f32.xlu1 %v2603_v11  ;;  %v5295_v11 = vsel %vm1505_vm2, %v5290_v61, 0 }
 0xa9d   :  { %11482 = vmatmul.mubr.msk.bf16.vlgmr.msra.gmra.mrb[120].mxu0 %vm1505_vm2, %v14313_v22 }
 0xa9e   :  { %v2713_v57 = vpop.f32.mrb[44].mxu0  ;;  %11492 = vmatpush3.bf16.xpose.msra.mxu0 %v5072_v2  ;;  %11493 = vmatprep.mubr.msk.bf16.mxu0 %vm13547_vm1, %v16645_v58 }
 0xa9f   :  { %v14561_v6 = vmul.f32 0.17677669, %v2713_v57  ;;  %v11255_v10 = vpop.f32.mrb[45].mxu0  ;;  %11503 = vmatprep.subr.bf16.mxu0 %v16645_v58 }
 0xaa0   :  { %v2716_v16 = vpop.f32.mrb[46].mxu0 }
 0xaa1   :  { %v14564_v63 = vmul.f32 0.17677669, %v2716_v16  ;;  %v11256_v30 = vpop.f32.mrb[47].mxu0  ;;  %v2722_v32 = vsel %vm1555_vm3, %v14561_v6, -inf }
 0xaa2   :  { %2723 = vmax.xlane.f32.xlu0 %v2722_v32  ;;  %v2049_v30 = vpop.xlane.xlu0 %2048 }
 0xaa3   :  { %v2725_v22 = vsel %vm1555_vm3, %v14564_v63, -inf }
 0xaa4   :  { %2726 = vmax.xlane.f32.xlu1 %v2725_v22 }
 0xaa5   :  { %11494 = vmatmul.mubr.msk.bf16.vlgmr.msra.gmra.mrb[124].mxu0 %vm1505_vm2, %v5064_v4 }
 0xaa6   :  { %v2837_v29 = vpop.f32.mrb[48].mxu0  ;;  %11504 = vmatpush3.bf16.xpose.msra.mxu0 %v5184_v17  ;;  %11505 = vmatprep.mubr.msk.bf16.mxu0 %vm13547_vm1, %v16645_v58  ;;  %v5288_v17 = vpop.permute.xlu1 %5287 }
 0xaa7   :  { %v14574_v48 = vmul.f32 0.17677669, %v2837_v29  ;;  %v11267_v51 = vpop.f32.mrb[49].mxu0  ;;  %11515 = vmatprep.subr.bf16.mxu0 %v16645_v58 }
 0xaa8   :  { %v2840_v42 = vpop.f32.mrb[50].mxu0  ;;  %v2052_v51 = vpop.xlane.xlu0 %2051 }
 0xaa9   :  { %v14577_v3 = vmul.f32 0.17677669, %v2840_v42  ;;  %v11268_v12 = vpop.f32.mrb[51].mxu0  ;;  %v2846_v21 = vsel %vm1555_vm3, %v14574_v48, -inf }
 0xaaa   :  { %2847 = vmax.xlane.f32.xlu0 %v2846_v21  ;;  %v2053_v21 = vsub.f32 %v14441_v34, %v2049_v30 }
 0xaab   :  { %v2849_v23 = vsel %vm1555_vm3, %v14577_v3, -inf }
 0xaac   :  { %2850 = vmax.xlane.f32.xlu1 %v2849_v23 }
 0xaad   :  { %11506 = vmatmul.mubr.msk.bf16.vlgmr.msra.gmra.mrb[128].mxu0 %vm1505_vm2, %v5177_v50 }
 0xaae   :  { %v2960_v2 = vpop.f32.mrb[52].mxu0  ;;  %11516 = vmatpush3.bf16.xpose.msra.mxu0 %v5295_v11  ;;  %11517 = vmatprep.mubr.msk.bf16.mxu0 %vm13547_vm1, %v16645_v58 }
 0xaaf   :  { %v14587_v57 = vmul.f32 0.17677669, %v2960_v2  ;;  %v11279_v10 = vpop.f32.mrb[53].mxu0  ;;  %v2054_v2 = vsub.f32 %v14444_v55, %v2052_v51 }
 0xab0   :  { %v2963_v16 = vpop.f32.mrb[54].mxu0 }
 0xab1   :  { %v14589_v32 = vmul.f32 0.17677669, %v2963_v16  ;;  %v11280_v31 = vpop.f32.mrb[55].mxu0  ;;  %v2969_v22 = vsel %vm1555_vm3, %v14587_v57, -inf  ;;  %v2055_v16 = vmul.f32 1.442695, %v2053_v21 }
 0xab2   :  { %2970 = vmax.xlane.f32.xlu0 %v2969_v22  ;;  %v2057_v31 = vmul.f32 1.442695, %v2054_v2 }
 0xab3   :  { %v2972_v4 = vsel %vm1555_vm3, %v14589_v32, -inf  ;;  %12527 = vpow2.f32 %v2055_v16 }
 0xab4   :  { %2973 = vmax.xlane.f32.xlu1 %v2972_v4  ;;  %12529 = vpow2.f32 %v2057_v31 }
 0xab5   :  { %11518 = vmatmul.mubr.msk.bf16.vlgmr.msra.gmra.mrb[132].mxu0 %vm1505_vm2, %v5288_v17 }
 0xab6   :  { %v3082_v29 = vpop.f32.mrb[56].mxu0 }
 0xab7   :  { %v14596_v42 = vmul.f32 0.17677669, %v3082_v29  ;;  %v11291_v12 = vpop.f32.mrb[57].mxu0 }
 0xab8   :  { %v3085_v61 = vpop.f32.mrb[58].mxu0 }
 0xab9   :  { %v14599_v23 = vmul.f32 0.17677669, %v3085_v61  ;;  %v11292_v50 = vpop.f32.mrb[59].mxu0  ;;  %v3091_v11 = vsel %vm1555_vm3, %v14596_v42, -inf }
 0xaba   :  { %3092 = vmax.xlane.f32.xlu0 %v3091_v11 }
 0xabb   :  { %v3094_v10 = vsel %vm1555_vm3, %v14599_v23, -inf }
 0xabc   :  { %3095 = vmax.xlane.f32.xlu1 %v3094_v10 }
 0xabd   :  { %v14620_v16 = vpop.eup %12527 }
 0xabe   :  { %v3204_v22 = vpop.f32.mrb[60].mxu0 }
 0xabf   :  { %v14606_v4 = vmul.f32 0.17677669, %v3204_v22  ;;  %v11303_v34 = vpop.f32.mrb[61].mxu0  ;;  %v14624_v22 = vpop.eup %12529 }
 0xac0   :  { %v3207_v30 = vpop.f32.mrb[62].mxu0  ;;  %v2059_v34 = vsel %vm1555_vm3, %v14620_v16, 0.0 }
 0xac1   :  { %v14608_v17 = vmul.f32 0.17677669, %v3207_v30  ;;  %v11304_v29 = vpop.f32.mrb[63].mxu0  ;;  %v3213_v12 = vsel %vm1555_vm3, %v14606_v4, -inf }
 0xac2   :  { %3214 = vmax.xlane.f32.xlu0 %v3213_v12 }
 0xac3   :  { %v3216_v55 = vsel %vm1555_vm3, %v14608_v17, -inf }
 0xac4   :  { %3217 = vmax.xlane.f32.xlu1 %v3216_v55  ;;  %v2062_v55 = vsel %vm1555_vm3, %v14624_v22, 0.0 }
 0xac6   :  { %v3328_v51 = vpop.f32.mrb[64].mxu0 }
 0xac7   :  { %v14614_v21 = vmul.f32 0.17677669, %v3328_v51  ;;  %v11315_v61 = vpop.f32.mrb[65].mxu0 }
 0xac8   :  { %v3331_v50 = vpop.f32.mrb[66].mxu0 }
 0xac9   :  { %v14616_v11 = vmul.f32 0.17677669, %v3331_v50  ;;  %v11316_v2 = vpop.f32.mrb[67].mxu0  ;;  %v3337_v10 = vsel %vm1555_vm3, %v14614_v21, -inf }
 0xaca   :  { %3338 = vmax.xlane.f32.xlu0 %v3337_v10 }
 0xacb   :  { %v3340_v31 = vsel %vm1555_vm3, %v14616_v11, -inf }
 0xacc   :  { %3341 = vmax.xlane.f32.xlu1 %v3340_v31 }
 0xace   :  { %v3451_v30 = vpop.f32.mrb[68].mxu0  ;;  %2060 = vadd.xlane.f32.xlu0 %v2059_v34 }
 0xacf   :  { %v14628_v29 = vmul.f32 0.17677669, %v3451_v30  ;;  %v11327_v12 = vpop.f32.mrb[69].mxu0 }
 0xad0   :  { %v3454_v51 = vpop.f32.mrb[70].mxu0  ;;  %2063 = vadd.xlane.f32.xlu1 %v2062_v55 }
 0xad1   :  { %v14632_v61 = vmul.f32 0.17677669, %v3454_v51  ;;  %v11328_v50 = vpop.f32.mrb[71].mxu0  ;;  %v3460_v2 = vsel %vm1555_vm3, %v14628_v29, -inf }
 0xad2   :  { %3461 = vmax.xlane.f32.xlu0 %v3460_v2 }
 0xad3   :  { %v3463_v10 = vsel %vm1555_vm3, %v14632_v61, -inf }
 0xad4   :  { %3464 = vmax.xlane.f32.xlu1 %v3463_v10 }
 0xad6   :  { %v3633_v31 = vpop.f32.mrb[72].mxu0 }
 0xad7   :  { %v11339_v34 = vpop.f32.mrb[73].mxu0 }
 0xad8   :  { %v3636_v30 = vpop.f32.mrb[74].mxu0 }
 0xad9   :  { %v11340_v12 = vpop.f32.mrb[75].mxu0 }
 0xb0f   :  { %v2171_v54 = vpop.xlane.xlu0 %2170 }
 0xb10   :  { %v2175_v40 = vsub.f32 %v14507_v60, %v2171_v54 }
 0xb11   :  { %v2174_v45 = vpop.xlane.xlu1 %2173 }
 0xb12   :  { %v2177_v55 = vmul.f32 1.442695, %v2175_v40  ;;  %v2176_v51 = vsub.f32 %v14510_v8, %v2174_v45 }
 0xb14   :  { %12531 = vpow2.f32 %v2177_v55  ;;  %v2179_v50 = vmul.f32 1.442695, %v2176_v51  ;;  %v14650_v55 = vmul.f32 0.17677669, %v3633_v31 }
 0xb16   :  { %12533 = vpow2.f32 %v2179_v50 }
 0xb17   :  { %v2295_v58 = vpop.xlane.xlu0 %2294 }
 0xb18   :  { %v2299_v2 = vsub.f32 %v14520_v47, %v2295_v58  ;;  %v3746_v24 = vpop.f32.mrb[76].mxu0 }
 0xb19   :  { %v2298_v20 = vpop.xlane.xlu1 %2297  ;;  %v11351_v10 = vpop.f32.mrb[77].mxu0  ;;  %v14668_v58 = vmul.f32 0.17677669, %v3746_v24 }
 0xb1a   :  { %v2301_v18 = vmul.f32 1.442695, %v2299_v2  ;;  %v2300_v34 = vsub.f32 %v14523_v39, %v2298_v20  ;;  %v3749_v30 = vpop.f32.mrb[78].mxu0 }
 0xb1b   :  { %v14642_v12 = vpop.f32.mrb[44].mxu1  ;;  %v11352_v54 = vpop.f32.mrb[79].mxu0  ;;  %v3753_v15 = vsel %vm3640_vm4, %v14668_v58, -inf }
 0xb1c   :  { %16743 = vst [vmem:[#allocation97_spill] sm:$0xff] %v14642_v12  ;;  %12535 = vpow2.f32 %v2301_v18  ;;  %v2303_v40 = vmul.f32 1.442695, %v2300_v34  ;;  %v11177_v60 = vpop.f32.mrb[45].mxu1 }
 0xb1d   :  { %v14644_v45 = vpop.f32.mrb[46].mxu1 }
 0xb1e   :  { %16744 = vst [vmem:[#allocation98_spill] sm:$0xff] %v14644_v45  ;;  %v14646_v8 = vpop.eup %12531  ;;  %12537 = vpow2.f32 %v2303_v40  ;;  %v11178_v47 = vpop.f32.mrb[47].mxu1 }
 0xb1f   :  { %v2418_v51 = vpop.xlane.xlu0 %2417  ;;  %v2181_v20 = vsel %vm1555_vm3, %v14646_v8, 0.0  ;;  %v3641_v47 = vsel %vm3640_vm4, %v14650_v55, -inf }
 0xb20   :  { %v14654_v39 = vpop.eup %12533  ;;  %v2422_v18 = vsub.f32 %v14533_v19, %v2418_v51  ;;  %v3858_v50 = vpop.f32.mrb[80].mxu0  ;;  %2182 = vadd.xlane.f32.xlu0 %v2181_v20 }
 0xb21   :  { %v2421_v2 = vpop.xlane.xlu1 %2420  ;;  %v11363_v10 = vpop.f32.mrb[81].mxu0  ;;  %v2184_v34 = vsel %vm1555_vm3, %v14654_v39, 0.0 }
 0xb22   :  { %v2424_v30 = vmul.f32 1.442695, %v2422_v18  ;;  %v2423_v31 = vsub.f32 %v14536_v53, %v2421_v2  ;;  %v3861_v54 = vpop.f32.mrb[82].mxu0  ;;  %2185 = vadd.xlane.f32.xlu1 %v2184_v34 }
 0xb23   :  { %v14660_v40 = vpop.f32.mrb[48].mxu1  ;;  %v11364_v60 = vpop.f32.mrb[83].mxu0 }
 0xb24   :  { %12539 = vpow2.f32 %v2424_v30  ;;  %v2426_v19 = vmul.f32 1.442695, %v2423_v31  ;;  %3642 = vmax.xlane.f32.xlu0 %v3641_v47  ;;  %v11183_v51 = vpop.f32.mrb[49].mxu1 }
 0xb25   :  { %v14664_v20 = vpop.f32.mrb[50].mxu1 }
 0xb26   :  { %v14666_v10 = vpop.eup %12535  ;;  %12541 = vpow2.f32 %v2426_v19  ;;  %v11184_v18 = vpop.f32.mrb[51].mxu1 }
 0xb27   :  { %v2602_v53 = vpop.xlane.xlu0 %2601  ;;  %v2305_v2 = vsel %vm1555_vm3, %v14666_v10, 0.0 }
 0xb28   :  { %v14672_v34 = vpop.eup %12537  ;;  %v2606_v54 = vsub.f32 %v14547_v7, %v2602_v53  ;;  %v3969_v30 = vpop.f32.mrb[84].mxu0  ;;  %2306 = vadd.xlane.f32.xlu1 %v2305_v2 }
 0xb29   :  { %v2605_v31 = vpop.xlane.xlu1 %2604  ;;  %v11375_v60 = vpop.f32.mrb[85].mxu0  ;;  %v2308_v47 = vsel %vm1555_vm3, %v14672_v34, 0.0 }
 0xb2a   :  { %v2608_v51 = vmul.f32 1.442695, %v2606_v54  ;;  %v2607_v19 = vsub.f32 %v14550_v26, %v2605_v31  ;;  %v3972_v24 = vpop.f32.mrb[86].mxu0  ;;  %2309 = vadd.xlane.f32.xlu0 %v2308_v47 }
 0xb2b   :  { %v11376_v18 = vpop.f32.mrb[87].mxu0  ;;  %v14687_v24 = vmul.f32 0.17677669, %v3858_v50 }
 0xb2c   :  { %3754 = vmax.xlane.f32.xlu1 %v3753_v15  ;;  %12543 = vpow2.f32 %v2608_v51  ;;  %v2610_v7 = vmul.f32 1.442695, %v2607_v19 }
 0xb2d   :  { %v3865_v18 = vsel %vm3640_vm4, %v14687_v24, -inf }
 0xb2e   :  { %v14680_v13 = vpop.eup %12539  ;;  %12545 = vpow2.f32 %v2610_v7 }
 0xb2f   :  { %v2724_v53 = vpop.xlane.xlu0 %2723  ;;  %v2428_v2 = vsel %vm1555_vm3, %v14680_v13, 0.0 }
 0xb30   :  { %v14684_v60 = vpop.eup %12541  ;;  %v4079_v54 = vpop.f32.mrb[88].mxu0  ;;  %2429 = vadd.xlane.f32.xlu1 %v2428_v2  ;;  %v2728_v31 = vsub.f32 %v14561_v6, %v2724_v53 }
 0xb31   :  { %v11387_v26 = vpop.f32.mrb[89].mxu0  ;;  %v2431_v51 = vsel %vm1555_vm3, %v14684_v60, 0.0 }
 0xb32   :  { %v4082_v47 = vpop.f32.mrb[90].mxu0  ;;  %v2730_v19 = vmul.f32 1.442695, %v2728_v31  ;;  %v14699_v26 = vmul.f32 0.17677669, %v3969_v30 }
 0xb33   :  { %v11388_v15 = vpop.f32.mrb[91].mxu0  ;;  %v14713_v30 = vmul.f32 0.17677669, %v4079_v54 }
 0xb34   :  { %2432 = vadd.xlane.f32.xlu1 %v2431_v51  ;;  %12547 = vpow2.f32 %v2730_v19 }
 0xb36   :  { %v14693_v52 = vpop.eup %12543 }
 0xb37   :  { %16745 = vst [vmem:[#allocation99_spill] sm:$0xff] %v14693_v52  ;;  %v2612_v50 = vsel %vm1555_vm3, %v14693_v52, 0.0 }
 0xb38   :  { %v4190_v49 = vpop.f32.mrb[92].mxu0  ;;  %3866 = vmax.xlane.f32.xlu1 %v3865_v18  ;;  %v14697_v53 = vpop.eup %12545  ;;  %v3976_v18 = vsel %vm3640_vm4, %v14699_v26, -inf }
 0xb39   :  { %v11399_v2 = vpop.f32.mrb[93].mxu0  ;;  %v2615_v31 = vsel %vm1555_vm3, %v14697_v53, 0.0 }
 0xb3a   :  { %v4193_v7 = vpop.f32.mrb[94].mxu0 }
 0xb3b   :  { %v11400_v6 = vpop.f32.mrb[95].mxu0 }
 0xb3c   :  { %2613 = vadd.xlane.f32.xlu1 %v2612_v50  ;;  %v2727_v50 = vpop.xlane.xlu1 %2726 }
 0xb3e   :  { %v14709_v2 = vpop.eup %12547 }
 0xb3f   :  { %16746 = vst [vmem:[#allocation100_spill] sm:$0xff] %v14709_v2  ;;  %v2734_v7 = vsel %vm1555_vm3, %v14709_v2, 0.0 }
 0xb40   :  { %v14703_v47 = vpop.f32.mrb[96].mxu0  ;;  %1948 = vrot.lane.b32.xlu0 %v14170_v41, %s13550_s1  ;;  %2616 = vadd.xlane.f32.xlu1 %v2615_v31  ;;  %v2851_v46 = vpop.xlane.xlu1 %2850 }
 0xb41   :  { %v11411_v15 = vpop.f32.mrb[97].mxu0  ;;  %v2853_v43 = vsub.f32 %v14577_v3, %v2851_v46  ;;  %v2848_v3 = vpop.xlane.xlu0 %2847 }
 0xb42   :  { %v4305_v51 = vpop.f32.mrb[98].mxu0 }
 0xb43   :  { %v11412_v19 = vpop.f32.mrb[99].mxu0  ;;  %v4086_v51 = vsel %vm3640_vm4, %v14713_v30, -inf }
 0xb44   :  { %2193 = vrot.lane.b32.xlu0 %v14172_v0, %s13548_s28  ;;  %3977 = vmax.xlane.f32.xlu1 %v3976_v18  ;;  %v2729_v19 = vsub.f32 %v14564_v63, %v2727_v50 }
 0xb46   :  { %v2732_v54 = vmul.f32 1.442695, %v2729_v19 }
 0xb48   :  { %v14717_v6 = vpop.f32.mrb[100].mxu0  ;;  %2735 = vadd.xlane.f32.xlu1 %v2734_v7  ;;  %12549 = vpow2.f32 %v2732_v54  ;;  %v2856_v7 = vmul.f32 1.442695, %v2853_v43  ;;  %v14737_v43 = vmul.f32 0.17677669, %v4190_v49 }
 0xb49   :  { %v11423_v41 = vpop.f32.mrb[101].mxu0 }
 0xb4a   :  { %v4416_v31 = vpop.f32.mrb[102].mxu0  ;;  %12551 = vpow2.f32 %v2856_v7 }
 0xb4b   :  { %v11424_v15 = vpop.f32.mrb[103].mxu0 }
 0xb4c   :  { %4087 = vmax.xlane.f32.xlu1 %v4086_v51 }
 0xb50   :  { %v14722_v18 = vpop.f32.mrb[104].mxu0 }
 0xb51   :  { %v11435_v36 = vpop.f32.mrb[105].mxu0 }
 0xb52   :  { %v4556_v33 = vpop.f32.mrb[106].mxu0  ;;  %v14729_v63 = vpop.eup %12549 }
 0xb53   :  { %v11436_v35 = vpop.f32.mrb[107].mxu0  ;;  %16747 = vst [vmem:[#allocation101_spill] sm:$0xff] %v14729_v63  ;;  %v2737_v33 = vsel %vm1555_vm3, %v14729_v63, 0.0 }
 0xb54   :  { %v14735_v35 = vpop.eup %12551 }
 0xb55   :  { %16748 = vst [vmem:[#allocation102_spill] sm:$0xff] %v14735_v35 }
 0xb58   :  { %v14725_v41 = vpop.f32.mrb[108].mxu0 }
 0xb59   :  { %v11447_v31 = vpop.f32.mrb[109].mxu0 }
 0xb5a   :  { %v4667_v15 = vpop.f32.mrb[110].mxu0  ;;  %v4197_v31 = vsel %vm3640_vm4, %v14737_v43, -inf }
 0xb5b   :  { %v11448_v37 = vpop.f32.mrb[111].mxu0  ;;  %v2852_v15 = vsub.f32 %v14574_v48, %v2848_v3 }
 0xb5c   :  { %v2861_v37 = vsel %vm1555_vm3, %v14735_v35, 0.0 }
 0xb5d   :  { %2316 = vrot.lane.b32.xlu1 %v14172_v0, %s13549_s9 }
 0xb60   :  { %v14731_v50 = vpop.f32.mrb[112].mxu0 }
 0xb61   :  { %v11459_v51 = vpop.f32.mrb[113].mxu0 }
 0xb62   :  { %v4779_v46 = vpop.f32.mrb[114].mxu0 }
 0xb63   :  { %v11460_v36 = vpop.f32.mrb[115].mxu0  ;;  %2738 = vadd.xlane.f32.xlu0 %v2737_v33  ;;  %v2971_v46 = vpop.xlane.xlu0 %2970  ;;  %v2854_v33 = vmul.f32 1.442695, %v2852_v15 }
 0xb64   :  { %v2975_v49 = vsub.f32 %v14587_v57, %v2971_v46 }
 0xb65   :  { %12553 = vpow2.f32 %v2854_v33 }
 0xb66   :  { %v2977_v27 = vmul.f32 1.442695, %v2975_v49 }
 0xb67   :  { %2862 = vadd.xlane.f32.xlu0 %v2861_v37 }
 0xb68   :  { %v14741_v19 = vpop.f32.mrb[116].mxu0  ;;  %12555 = vpow2.f32 %v2977_v27 }
 0xb69   :  { %v11471_v54 = vpop.f32.mrb[117].mxu0 }
 0xb6a   :  { %v4890_v7 = vpop.f32.mrb[118].mxu0  ;;  %v2974_v54 = vpop.xlane.xlu1 %2973 }
 0xb6b   :  { %v11472_v51 = vpop.f32.mrb[119].mxu0  ;;  %4198 = vmax.xlane.f32.xlu0 %v4197_v31  ;;  %v3093_v7 = vpop.xlane.xlu0 %3092 }
 0xb6c   :  { %v3097_v59 = vsub.f32 %v14596_v42, %v3093_v7 }
 0xb6e   :  { %v3096_v12 = vpop.xlane.xlu1 %3095  ;;  %v3099_v15 = vmul.f32 1.442695, %v3097_v59 }
 0xb6f   :  { %v3098_v57 = vsub.f32 %v14599_v23, %v3096_v12  ;;  %v14753_v46 = vpop.eup %12553  ;;  %v14764_v12 = vmul.f32 0.17677669, %v14703_v47 }
 0xb70   :  { %v14747_v36 = vpop.f32.mrb[120].mxu0  ;;  %16749 = vst [vmem:[#allocation103_spill] sm:$0xff] %v14753_v46  ;;  %12557 = vpow2.f32 %v3099_v15  ;;  %v2858_v27 = vsel %vm1555_vm3, %v14753_v46, 0.0  ;;  %v2976_v15 = vsub.f32 %v14589_v32, %v2974_v54 }
 0xb71   :  { %v11483_v25 = vpop.f32.mrb[121].mxu0  ;;  %v4309_v7 = vsel %vm3640_vm4, %v14764_v12, -inf }
 0xb72   :  { %v5000_v37 = vpop.f32.mrb[122].mxu0  ;;  %v3101_v25 = vmul.f32 1.442695, %v3098_v57 }
 0xb73   :  { %v11484_v56 = vpop.f32.mrb[123].mxu0 }
 0xb74   :  { %v14759_v56 = vpop.eup %12555  ;;  %12559 = vpow2.f32 %v3101_v25 }
 0xb75   :  { %16750 = vst [vmem:[#allocation104_spill] sm:$0xff] %v14759_v56  ;;  %v2981_v49 = vsel %vm1555_vm3, %v14759_v56, 0.0 }
 0xb78   :  { %v14750_v48 = vpop.f32.mrb[124].mxu0 }
 0xb79   :  { %v11495_v3 = vpop.f32.mrb[125].mxu0 }
 0xb7a   :  { %v5111_v31 = vpop.f32.mrb[126].mxu0  ;;  %v14772_v3 = vpop.eup %12557 }
 0xb7b   :  { %v11496_v51 = vpop.f32.mrb[127].mxu0  ;;  %16751 = vst [vmem:[#allocation105_spill] sm:$0xff] %v14772_v3  ;;  %v3103_v47 = vsel %vm1555_vm3, %v14772_v3, 0.0 }
 0xb7c   :  { %v3215_v51 = vpop.xlane.xlu0 %3214 }
 0xb80   :  { %v14755_v33 = vpop.f32.mrb[128].mxu0 }
 0xb81   :  { %v11507_v42 = vpop.f32.mrb[129].mxu0  ;;  %2439 = vrot.lane.b32.xlu0 %v14172_v0, %s13550_s1  ;;  %2859 = vadd.xlane.f32.xlu1 %v2858_v27  ;;  %v14777_v27 = vpop.eup %12559 }
 0xb82   :  { %v5223_v59 = vpop.f32.mrb[130].mxu0  ;;  %16752 = vst [vmem:[#allocation106_spill] sm:$0xff] %v14777_v27  ;;  %v2979_v42 = vmul.f32 1.442695, %v2976_v15 }
 0xb83   :  { %v11508_v23 = vpop.f32.mrb[131].mxu0  ;;  %v3219_v59 = vsub.f32 %v14606_v4, %v3215_v51 }
 0xb84   :  { %v3218_v23 = vpop.xlane.xlu1 %3217  ;;  %12561 = vpow2.f32 %v2979_v42  ;;  %v14803_v42 = vmul.f32 0.17677669, %v14660_v40  ;;  %v16756_v40 = vmov 0.0  }
 0xb85   :  { %2982 = vadd.xlane.f32.xlu1 %v2981_v49  ;;  %v14781_v49 = vmul.f32 0.17677669, %v14717_v6  ;;  %v3221_v32 = vmul.f32 1.442695, %v3219_v59  ;;  %v3220_v54 = vsub.f32 %v14608_v17, %v3218_v23 }
 0xb87   :  { %12563 = vpow2.f32 %v3221_v32  ;;  %v3223_v15 = vmul.f32 1.442695, %v3220_v54 }
 0xb88   :  { %v14768_v37 = vpop.f32.mrb[132].mxu0 }
 0xb89   :  { %v11519_v31 = vpop.f32.mrb[133].mxu0  ;;  %4310 = vmax.xlane.f32.xlu1 %v4309_v7  ;;  %v3106_v7 = vsel %vm1555_vm3, %v14777_v27, 0.0  ;;  %12565 = vpow2.f32 %v3223_v15  ;;  %v3342_v15 = vpop.xlane.xlu1 %3341 }
 0xb8a   :  { %v5334_v57 = vpop.f32.mrb[134].mxu0  ;;  %v4420_v31 = vsel %vm3640_vm4, %v14781_v49, -inf }
 0xb8b   :  { %v11520_v25 = vpop.f32.mrb[135].mxu0  ;;  %v3339_v57 = vpop.xlane.xlu0 %3338 }
 0xb8d   :  { %3104 = vadd.xlane.f32.xlu1 %v3103_v47  ;;  %v14825_v3 = vpop.xlane.xlu1 %2063 }
 0xb8e   :  { %v14788_v4 = vpop.eup %12561 }
 0xb8f   :  { %16753 = vst [vmem:[#allocation107_spill] sm:$0xff] %v14788_v4  ;;  %v2984_v6 = vsel %vm1555_vm3, %v14788_v4, 0.0  ;;  %v14794_v25 = vpop.xlane.xlu0 %2060 }
 0xb91   :  { %3107 = vadd.xlane.f32.xlu1 %v3106_v7  ;;  %v14792_v51 = vpop.eup %12563  ;;  %v1925_v7 = vsel %vm1555_vm3, %v14803_v42, -inf }
 0xb92   :  { %16754 = vst [vmem:[#allocation108_spill] sm:$0xff] %v14792_v51  ;;  %v3225_v17 = vsel %vm1555_vm3, %v14792_v51, 0.0 }
 0xb93   :  { %v14798_v47 = vpop.eup %12565  ;;  %v3462_v23 = vpop.xlane.xlu0 %3461 }
 0xb94   :  { %16755 = vst [vmem:[#allocation109_spill] sm:$0xff] %v14798_v47  ;;  %v3228_v59 = vsel %vm1555_vm3, %v14798_v47, 0.0 }
 0xb95   :  { %4421 = vmax.xlane.f32.xlu1 %v4420_v31 }
 0xba0   :  { %2985 = vadd.xlane.f32.xlu0 %v2984_v6 }
 0xba4   :  { %3226 = vadd.xlane.f32.xlu0 %v3225_v17  ;;  %v3344_v17 = vsub.f32 %v14616_v11, %v3342_v15  ;;  %v3343_v11 = vsub.f32 %v14614_v21, %v3339_v57 }
 0xba6   :  { %2746 = vrot.lane.b32.xlu1 %v14176_v62, %s13548_s28  ;;  %v3347_v51 = vmul.f32 1.442695, %v3344_v17  ;;  %v3465_v17 = vpop.xlane.xlu1 %3464 }
 0xba7   :  { %v3467_v21 = vsub.f32 %v14632_v61, %v3465_v17  ;;  %v14861_v17 = vmul.f32 0.17677669, %v14741_v19 }
 0xba8   :  { %3229 = vadd.xlane.f32.xlu0 %v3228_v59  ;;  %12567 = vpow2.f32 %v3347_v51  ;;  %v14818_v59 = vmul.f32 0.17677669, %v14664_v20  ;;  %v3345_v51 = vmul.f32 1.442695, %v3343_v11  ;;  %v3466_v20 = vsub.f32 %v14628_v29, %v3462_v23 }
 0xba9   :  { %v3470_v11 = vmul.f32 1.442695, %v3467_v21 }
 0xbaa   :  { %v1928_v47 = vsel %vm1555_vm3, %v14818_v59, -inf  ;;  %12569 = vpow2.f32 %v3345_v51 }
 0xbac   :  { %1926 = vmax.xlane.f32.xlu0 %v1925_v7  ;;  %v14821_v7 = vmul.f32 0.17677669, %v14722_v18  ;;  %v14834_v18 = vmul.f32 0.17677669, %v14725_v41 }
 0xbad   :  { %v14809_v32 = vpop.xlane.xlu0 %2182 }
 0xbae   :  { %v4560_v15 = vsel %vm3640_vm4, %v14821_v7, -inf  ;;  %v4671_v57 = vsel %vm3640_vm4, %v14834_v18, -inf }
 0xbb1   :  { %v3643_v54 = vpop.xlane.xlu0 %3642 }
 0xbb2   :  { %v3644_v29 = vsub.f32 %v14650_v55, %v3643_v54 }
 0xbb4   :  { %v3645_v23 = vmul.f32 1.442695, %v3644_v29 }
 0xbb7   :  { %v14811_v31 = vpop.xlane.xlu0 %2309 }
 0xbbb   :  { %v1949_v6 = vpop.permute.xlu0 %1948 }
 0xbbc   :  { %11186 = vmatpush3.bf16.msra.mxu1 %v1949_v6  ;;  %v14830_v6 = vpop.eup %12567 }
 0xbbd   :  { %11197 = vmatprep.subr.bf16.mxu1 %v16756_v40  ;;  %16757 = vst [vmem:[#allocation110_spill] sm:$0xff] %v14830_v6  ;;  %v3352_v45 = vsel %vm1555_vm3, %v14830_v6, 0.0  ;;  %v14842_v41 = vpop.eup %12569 }
 0xbbe   :  { %16758 = vst [vmem:[#allocation111_spill] sm:$0xff] %v14842_v41 }
 0xbc2   :  { %2869 = vrot.lane.b32.xlu0 %v14176_v62, %s13549_s9 }
 0xbca   :  { %1929 = vmax.xlane.f32.xlu1 %v1928_v47  ;;  %v3468_v47 = vmul.f32 1.442695, %v3466_v20  ;;  %v14858_v20 = vpop.xlane.xlu1 %2185 }
 0xbcc   :  { %12571 = vpow2.f32 %v3468_v47 }
 0xbcd   :  { %12573 = vpow2.f32 %v3470_v11 }
 0xbce   :  { %4561 = vmax.xlane.f32.xlu1 %v4560_v15  ;;  %12575 = vpow2.f32 %v3645_v23  ;;  %v14865_v21 = vpop.xlane.xlu1 %2306 }
 0xbd2   :  { %3353 = vadd.xlane.f32.xlu1 %v3352_v45  ;;  %v3349_v45 = vsel %vm1555_vm3, %v14842_v41, 0.0  ;;  %v3755_v11 = vpop.xlane.xlu1 %3754 }
 0xbd6   :  { %4672 = vmax.xlane.f32.xlu1 %v4671_v57  ;;  %v14846_v15 = vpop.eup %12571  ;;  %v4894_v57 = vsel %vm3640_vm4, %v14861_v17, -inf  ;;  %v14869_v29 = vpop.xlane.xlu1 %2429 }
 0xbd7   :  { %16759 = vst [vmem:[#allocation112_spill] sm:$0xff] %v14846_v15  ;;  %v3472_v61 = vsel %vm1555_vm3, %v14846_v15, 0.0  ;;  %v14850_v51 = vpop.eup %12573 }
 0xbd8   :  { %16760 = vst [vmem:[#allocation113_spill] sm:$0xff] %v14850_v51  ;;  %v3475_v55 = vsel %vm1555_vm3, %v14850_v51, 0.0  ;;  %v14856_v54 = vpop.eup %12575 }
 0xbd9   :  { %16761 = vst [vmem:[#allocation114_spill] sm:$0xff] %v14856_v54  ;;  %v3647_v47 = vsel %vm3640_vm4, %v14856_v54, 0.0  ;;  %v14885_v54 = vpop.permute.xlu0 %2193 }
 0xbda   :  { %v14871_v23 = vpop.xlane.xlu1 %2432 }
 0xbde   :  { %v3867_v19 = vpop.xlane.xlu1 %3866 }
 0xbe1   :  { %3350 = vadd.xlane.f32.xlu0 %v3349_v45  ;;  %v14874_v45 = vmul.f32 0.17677669, %v14731_v50 }
 0xbe5   :  { %3473 = vadd.xlane.f32.xlu0 %v3472_v61  ;;  %v14877_v61 = vmul.f32 0.17677669, %v14747_v36 }
 0xbe7   :  { %2992 = vrot.lane.b32.xlu1 %v14176_v62, %s13550_s1 }
 0xbe9   :  { %3476 = vadd.xlane.f32.xlu0 %v3475_v55  ;;  %v4783_v55 = vsel %vm3640_vm4, %v14874_v45, -inf }
 0xbed   :  { %3648 = vadd.xlane.f32.xlu0 %v3647_v47  ;;  %v14881_v47 = vpop.xlane.xlu1 %2613 }
 0xbf0   :  { %v14889_v50 = vpop.xlane.xlu0 %2738 }
 0xbf1   :  { %4895 = vmax.xlane.f32.xlu0 %v4894_v57  ;;  %v5004_v57 = vsel %vm3640_vm4, %v14877_v61, -inf  ;;  %v14887_v15 = vpop.xlane.xlu1 %2616 }
 0xbf4   :  { %v14891_v6 = vpop.xlane.xlu0 %2862 }
 0xbf5   :  { %v3978_v51 = vpop.xlane.xlu1 %3977  ;;  %16762 = vst [vmem:[#allocation115_spill] sm:$0xff] %v14891_v6 }
 0xbf8   :  { %v4199_v41 = vpop.xlane.xlu0 %4198 }
 0xbf9   :  { %v14893_v36 = vpop.xlane.xlu1 %2735 }
 0xbfd   :  { %v4088_v27 = vpop.xlane.xlu1 %4087 }
 0xc01   :  { %v14897_v38 = vpop.permute.xlu1 %2316 }
 0xc0b   :  { %4784 = vmax.xlane.f32.xlu1 %v4783_v55  ;;  %v14895_v55 = vpop.permute.xlu0 %2439 }
 0xc0f   :  { %5005 = vmax.xlane.f32.xlu1 %v5004_v57  ;;  %v14901_v57 = vpop.xlane.xlu1 %2859 }
 0xc10   :  { %16764 = vst [vmem:[#allocation117_spill] sm:$0xff] %v14901_v57 }
 0xc13   :  { %v14905_v4 = vpop.xlane.xlu1 %2982 }
 0xc14   :  { %16766 = vst [vmem:[#allocation119_spill] sm:$0xff] %v14905_v4 }
 0xc17   :  { %v4311_v2 = vpop.xlane.xlu1 %4310 }
 0xc1b   :  { %v14910_v14 = vpop.xlane.xlu1 %3104 }
 0xc1c   :  { %16768 = vst [vmem:[#allocation121_spill] sm:$0xff] %v14910_v14 }
 0xc1f   :  { %v14912_v6 = vpop.xlane.xlu1 %3107 }
 0xc2d   :  { %v14899_v44 = vpop.xlane.xlu0 %2985 }
 0xc2e   :  { %16763 = vst [vmem:[#allocation116_spill] sm:$0xff] %v14899_v44 }
 0xc31   :  { %v14903_v56 = vpop.xlane.xlu0 %3226 }
 0xc32   :  { %16765 = vst [vmem:[#allocation118_spill] sm:$0xff] %v14903_v56  ;;  %v4422_v56 = vpop.xlane.xlu1 %4421 }
 0xc35   :  { %v14907_v28 = vpop.xlane.xlu0 %3229 }
 0xc36   :  { %16767 = vst [vmem:[#allocation120_spill] sm:$0xff] %v14907_v28  ;;  %v14918_v4 = vpop.permute.xlu1 %2746 }
 0xc39   :  { %v1927_v35 = vpop.xlane.xlu0 %1926 }
 0xc3a   :  { %v1931_v46 = vsub.f32 %v14803_v42, %v1927_v35  ;;  %v3756_v42 = vsub.f32 %v14668_v58, %v3755_v11  ;;  %v3868_v58 = vsub.f32 %v14687_v24, %v3867_v19 }
 0xc3c   :  { %v1933_v63 = vmul.f32 1.442695, %v1931_v46  ;;  %v3869_v11 = vmul.f32 1.442695, %v3868_v58 }
 0xc3e   :  { %12577 = vpow2.f32 %v1933_v63 }
 0xc48   :  { %v14914_v52 = vpop.eup %12577 }
 0xc49   :  { %v1937_v44 = vsel %vm1555_vm3, %v14914_v52, 0.0 }
 0xc4a   :  { %1938 = vadd.xlane.f32.xlu0 %v1937_v44  ;;  %v3757_v44 = vmul.f32 1.442695, %v3756_v42 }
 0xc57   :  { %v1930_v28 = vpop.xlane.xlu1 %1929 }
 0xc58   :  { %v1932_v57 = vsub.f32 %v14818_v59, %v1930_v28  ;;  %v14933_v28 = vmul.f32 0.17677669, %v14750_v48  ;;  %v14946_v48 = vmul.f32 0.17677669, %v14755_v33 }
 0xc5a   :  { %v1935_v35 = vmul.f32 1.442695, %v1932_v57  ;;  %v5115_v57 = vsel %vm3640_vm4, %v14933_v28, -inf  ;;  %v5227_v24 = vsel %vm3640_vm4, %v14946_v48, -inf }
 0xc5c   :  { %12579 = vpow2.f32 %v1935_v35  ;;  %v4089_v35 = vsub.f32 %v14713_v30, %v4088_v27  ;;  %v3979_v30 = vsub.f32 %v14699_v26, %v3978_v51  ;;  %v14956_v27 = vmul.f32 0.17677669, %v14768_v37 }
 0xc5d   :  { %12581 = vpow2.f32 %v3757_v44  ;;  %v4423_v37 = vsub.f32 %v14781_v49, %v4422_v56 }
 0xc5e   :  { %12583 = vpow2.f32 %v3869_v11  ;;  %v3980_v33 = vmul.f32 1.442695, %v3979_v30  ;;  %v5338_v58 = vsel %vm3640_vm4, %v14956_v27, -inf }
 0xc5f   :  { %v4424_v51 = vmul.f32 1.442695, %v4423_v37 }
 0xc60   :  { %3237 = vrot.lane.b32.xlu0 %v14178_v1, %s13548_s28 }
 0xc66   :  { %v14923_v63 = vpop.eup %12579 }
 0xc67   :  { %v1940_v46 = vsel %vm1555_vm3, %v14923_v63, 0.0  ;;  %v14930_v14 = vpop.eup %12581 }
 0xc68   :  { %1941 = vadd.xlane.f32.xlu1 %v1940_v46  ;;  %v3759_v59 = vsel %vm3640_vm4, %v14930_v14, 0.0  ;;  %v4090_v46 = vmul.f32 1.442695, %v4089_v35  ;;  %v14941_v42 = vpop.eup %12583  ;;  %v4312_v35 = vsub.f32 %v14764_v12, %v4311_v2 }
 0xc69   :  { %v3871_v44 = vsel %vm3640_vm4, %v14941_v42, 0.0 }
 0xc6a   :  { %12585 = vpow2.f32 %v4090_v46  ;;  %v4313_v26 = vmul.f32 1.442695, %v4312_v35 }
 0xc6b   :  { %12587 = vpow2.f32 %v3980_v33 }
 0xc74   :  { %v14952_v19 = vpop.eup %12585 }
 0xc75   :  { %v14965_v46 = vpop.eup %12587 }
 0xc79   :  { %3360 = vrot.lane.b32.xlu1 %v14178_v1, %s13549_s9 }
 0xc7f   :  { %3760 = vadd.xlane.f32.xlu0 %v3759_v59  ;;  %v4092_v59 = vsel %vm3640_vm4, %v14952_v19, 0.0 }
 0xc83   :  { %5116 = vmax.xlane.f32.xlu0 %v5115_v57  ;;  %v4200_v57 = vsub.f32 %v14737_v43, %v4199_v41  ;;  %v3982_v43 = vsel %vm3640_vm4, %v14965_v46, 0.0 }
 0xc85   :  { %v4201_v11 = vmul.f32 1.442695, %v4200_v57 }
 0xc87   :  { %12589 = vpow2.f32 %v4201_v11 }
 0xc88   :  { %12591 = vpow2.f32 %v4313_v26 }
 0xc89   :  { %12593 = vpow2.f32 %v4424_v51 }
 0xc91   :  { %v14969_v41 = vpop.eup %12589 }
 0xc92   :  { %v4203_v2 = vsel %vm3640_vm4, %v14969_v41, 0.0  ;;  %v14979_v56 = vpop.eup %12591 }
 0xc93   :  { %16769 = vst [vmem:[#allocation122_spill] sm:$0xff] %v14979_v56  ;;  %v4315_v12 = vsel %vm3640_vm4, %v14979_v56, 0.0  ;;  %v14985_v49 = vpop.eup %12593 }
 0xc94   :  { %16770 = vst [vmem:[#allocation123_spill] sm:$0xff] %v14985_v49 }
 0xc99   :  { %3483 = vrot.lane.b32.xlu0 %v14178_v1, %s13550_s1 }
 0xc9d   :  { %3872 = vadd.xlane.f32.xlu1 %v3871_v44  ;;  %v14973_v44 = vpack.c.bf16 %v14180_v5, %v14180_v5  ;;  %v4426_v5 = vsel %vm3640_vm4, %v14985_v49, 0.0 }
 0xca1   :  { %5228 = vmax.xlane.f32.xlu1 %v5227_v24  ;;  %v4562_v24 = vpop.xlane.xlu1 %4561 }
 0xca2   :  { %v4563_v30 = vsub.f32 %v14821_v7, %v4562_v24 }
 0xca4   :  { %v4564_v33 = vmul.f32 1.442695, %v4563_v30 }
 0xca5   :  { %4093 = vadd.xlane.f32.xlu1 %v4092_v59  ;;  %v14992_v59 = vpop.permute.xlu0 %2869  ;;  %v15000_v11 = vpop.xlane.xlu1 %3353 }
 0xca6   :  { %12595 = vpow2.f32 %v4564_v33 }
 0xca9   :  { %5339 = vmax.xlane.f32.xlu1 %v5338_v58  ;;  %v14994_v57 = vpop.xlane.xlu0 %3350  ;;  %v14998_v58 = vpack.c.bf16 %v14182_v9, %v14182_v9  ;;  %v4673_v26 = vpop.xlane.xlu1 %4672 }
 0xcaa   :  { %v4674_v51 = vsub.f32 %v14834_v18, %v4673_v26 }
 0xcac   :  { %v4675_v9 = vmul.f32 1.442695, %v4674_v51 }
 0xcad   :  { %v15004_v35 = vpop.xlane.xlu0 %3473 }
 0xcae   :  { %12597 = vpow2.f32 %v4675_v9 }
 0xcb0   :  { %v15008_v7 = vpop.eup %12595 }
 0xcb1   :  { %v15006_v37 = vpop.xlane.xlu0 %3476  ;;  %16771 = vst [vmem:[#allocation124_spill] sm:$0xff] %v15008_v7 }
 0xcb8   :  { %3983 = vadd.xlane.f32.xlu0 %v3982_v43  ;;  %v4566_v43 = vsel %vm3640_vm4, %v15008_v7, 0.0  ;;  %v15019_v49 = vpop.eup %12597 }
 0xcb9   :  { %v4677_v18 = vsel %vm3640_vm4, %v15019_v49, 0.0 }
 0xcba   :  { %3766 = vrot.lane.b32.xlu1 %v14973_v44, %s13548_s28 }
 0xcbc   :  { %4204 = vadd.xlane.f32.xlu0 %v4203_v2  ;;  %v15013_v2 = vpop.permute.xlu1 %2992 }
 0xcbe   :  { %3877 = vrot.lane.b32.xlu1 %v14973_v44, %s13549_s9 }
 0xcc0   :  { %4316 = vadd.xlane.f32.xlu0 %v4315_v12  ;;  %v15015_v12 = vpop.xlane.xlu0 %3648 }
 0xcc2   :  { %3988 = vrot.lane.b32.xlu1 %v14973_v44, %s13550_s1 }
 0xcc4   :  { %4427 = vadd.xlane.f32.xlu0 %v4426_v5  ;;  %v4785_v5 = vpop.xlane.xlu1 %4784  ;;  %v15017_v24 = vpop.xlane.xlu0 %4895 }
 0xcc5   :  { %v4786_v7 = vsub.f32 %v14874_v45, %v4785_v5 }
 0xcc8   :  { %v5006_v30 = vpop.xlane.xlu1 %5005 }
 0xcd7   :  { %v1939_v33 = vpop.xlane.xlu0 %1938 }
 0xcd8   :  { %12599 = vrcp.f32 %v1939_v33 }
 0xcda   :  { %4210 = vrot.lane.b32.xlu0 %v14998_v58, %s13548_s28 }
 0xce2   :  { %v12600_v26 = vpop.eup %12599 }
 0xce6   :  { %4567 = vadd.xlane.f32.xlu1 %v4566_v43  ;;  %v1944_v43 = vmul.f32 %v12600_v26, %v14914_v52 }
 0xcf5   :  { %v1942_v56 = vpop.xlane.xlu1 %1941 }
 0xcf6   :  { %12601 = vrcp.f32 %v1942_v56 }
 0xcf7   :  { %4321 = vrot.lane.b32.xlu1 %v14998_v58, %s13549_s9  ;;  %12603 = vrcp.f32 %v14825_v3 }
 0xcf8   :  { %12605 = vrcp.f32 %v14794_v25  ;;  %v4787_v25 = vmul.f32 1.442695, %v4786_v7 }
 0xcf9   :  { %4678 = vadd.xlane.f32.xlu0 %v4677_v18  ;;  %12607 = vrcp.f32 %v14858_v20  ;;  %v5007_v20 = vsub.f32 %v14877_v61, %v5006_v30 }
 0xcfa   :  { %12609 = vrcp.f32 %v14809_v32 }
 0xcfb   :  { %12611 = vrcp.f32 %v14811_v31 }
 0xcfc   :  { %12613 = vrcp.f32 %v14865_v21 }
 0xcfd   :  { %12615 = vpow2.f32 %v4787_v25  ;;  %v16774_v25 = vld [vmem:[#allocation115_spill] sm:$0xff] }
 0xd00   :  { %v12602_v51 = vpop.eup %12601 }
 0xd01   :  { %v1946_v9 = vmul.f32 %v12602_v51, %v14923_v63  ;;  %v12604_v33 = vpop.eup %12603 }
 0xd02   :  { %v12606_v18 = vpop.eup %12605  ;;  %v2068_v52 = vmul.f32 %v12604_v33, %v14624_v22  ;;  %v15047_v22 = vpop.permute.xlu0 %3237  ;;  %v16773_v33 = vld [vmem:[#allocation117_spill] sm:$0xff] }
 0xd03   :  { %v1947_v56 = vpack.c.bf16 %v1946_v9, %v1944_v43  ;;  %v2066_v3 = vmul.f32 %v12606_v18, %v14620_v16  ;;  %v12608_v45 = vpop.eup %12607 }
 0xd04   :  { %v12610_v63 = vpop.eup %12609  ;;  %v2190_v16 = vmul.f32 %v12608_v45, %v14654_v39 }
 0xd05   :  { %11188 = vmatmul.mubr.msk.bf16.vlgmr.msra.gmra.mrb[52].mxu1 %vm1555_vm3, %v1947_v56  ;;  %v2069_v32 = vpack.c.bf16 %v2068_v52, %v2066_v3  ;;  %v2188_v31 = vmul.f32 %v12610_v63, %v14646_v8  ;;  %v12612_v61 = vpop.eup %12611  ;;  %v15087_v56 = vpop.permute.xlu1 %3360  ;;  %v16776_v63 = vld [vmem:[#allocation101_spill] sm:$0xff] }
 0xd06   :  { %11198 = vmatpush3.bf16.msra.mxu1 %v14172_v0  ;;  %11199 = vmatprep.mubr.msk.bf16.mxu1 %vm13547_vm1, %v16756_v40  ;;  %v5008_v0 = vmul.f32 1.442695, %v5007_v20  ;;  %v12614_v39 = vpop.eup %12613  ;;  %v2314_v8 = vmul.f32 %v12612_v61, %v14672_v34 }
 0xd07   :  { %11209 = vmatprep.subr.bf16.mxu1 %v16756_v40  ;;  %v15061_v7 = vpop.eup %12615  ;;  %v2312_v5 = vmul.f32 %v12614_v39, %v14666_v10 }
 0xd08   :  { %12617 = vpow2.f32 %v5008_v0 }
 0xd09   :  { %12619 = vrcp.f32 %v14871_v23  ;;  %v4897_v23 = vsub.f32 %v14861_v17, %v15017_v24  ;;  %v2315_v26 = vpack.c.bf16 %v2314_v8, %v2312_v5  ;;  %v16778_v8 = vld [vmem:[#allocation116_spill] sm:$0xff] }
 0xd0a   :  { %12621 = vrcp.f32 %v14869_v29 }
 0xd0b   :  { %12623 = vrcp.f32 %v14887_v15  ;;  %v4898_v34 = vmul.f32 1.442695, %v4897_v23 }
 0xd0c   :  { %v15054_v21 = vpop.xlane.xlu0 %3760  ;;  %12625 = vrcp.f32 %v14881_v47 }
 0xd0d   :  { %11200 = vmatmul.mubr.msk.bf16.vlgmr.msra.gmra.mrb[56].mxu1 %vm1555_vm3, %v2069_v32  ;;  %12627 = vpow2.f32 %v4898_v34  ;;  %v16775_v32 = vld [vmem:[#allocation91_spill] sm:$0xff] }
 0xd0e   :  { %11210 = vmatpush3.bf16.msra.mxu1 %v14885_v54  ;;  %11211 = vmatprep.mubr.msk.bf16.mxu1 %vm13547_vm1, %v16756_v40  ;;  %v2191_v54 = vpack.c.bf16 %v2190_v16, %v2188_v31  ;;  %12629 = vrcp.f32 %v14889_v50  ;;  %v15108_v45 = vpack.c.bf16 %v16775_v32, %v16775_v32 }
 0xd0f   :  { %4432 = vrot.lane.b32.xlu0 %v14998_v58, %s13550_s1  ;;  %11221 = vmatprep.subr.bf16.mxu1 %v16756_v40  ;;  %12631 = vrcp.f32 %v14893_v36 }
 0xd10   :  { %v5117_v29 = vpop.xlane.xlu0 %5116 }
 0xd11   :  { %v5118_v43 = vsub.f32 %v14933_v28, %v5117_v29  ;;  %v16779_v29 = vld [vmem:[#allocation119_spill] sm:$0xff] }
 0xd12   :  { %v15071_v30 = vpop.eup %12617 }
 0xd13   :  { %v12620_v51 = vpop.eup %12619  ;;  %v5010_v10 = vsel %vm3640_vm4, %v15071_v30, 0.0  ;;  %v5119_v47 = vmul.f32 1.442695, %v5118_v43 }
 0xd14   :  { %v12622_v17 = vpop.eup %12621  ;;  %v2437_v15 = vmul.f32 %v12620_v51, %v14684_v60  ;;  %v16780_v51 = vld [vmem:[#allocation103_spill] sm:$0xff] }
 0xd15   :  { %11212 = vmatmul.mubr.msk.bf16.vlgmr.msra.gmra.mrb[60].mxu1 %vm1555_vm3, %v2191_v54  ;;  %v2435_v28 = vmul.f32 %v12622_v17, %v14680_v13  ;;  %v12624_v24 = vpop.eup %12623  ;;  %12633 = vpow2.f32 %v5119_v47  ;;  %v16772_v13 = vld [vmem:[#allocation99_spill] sm:$0xff]  ;;  %v16777_v54 = vld [vmem:[#allocation100_spill] sm:$0xff]  ;;  %v16781_v17 = vld [vmem:[#allocation102_spill] sm:$0xff] }
 0xd16   :  { %11222 = vmatpush3.bf16.msra.mxu1 %v14897_v38  ;;  %11223 = vmatprep.mubr.msk.bf16.mxu1 %vm13547_vm1, %v16756_v40  ;;  %v4789_v38 = vsel %vm3640_vm4, %v15061_v7, 0.0  ;;  %v12626_v9 = vpop.eup %12625  ;;  %v2621_v60 = vmul.f32 %v12624_v24, %v14697_v53  ;;  %12635 = vrcp.f32 %v16773_v33  ;;  %v16782_v47 = vld [vmem:[#allocation92_spill] sm:$0xff]  ;;  %v16783_v24 = vld [vmem:[#allocation121_spill] sm:$0xff] }
 0xd17   :  { %11233 = vmatprep.subr.bf16.mxu1 %v16756_v40  ;;  %v2619_v50 = vmul.f32 %v12626_v9, %v16772_v13  ;;  %v15095_v36 = vpop.eup %12627  ;;  %12637 = vrcp.f32 %v16774_v25  ;;  %v16787_v25 = vld [vmem:[#allocation118_spill] sm:$0xff] }
 0xd18   :  { %v12630_v3 = vpop.eup %12629  ;;  %v4900_v53 = vsel %vm3640_vm4, %v15095_v36, 0.0  ;;  %12639 = vrcp.f32 %v16778_v8  ;;  %v16795_v8 = vld [vmem:[#allocation105_spill] sm:$0xff] }
 0xd19   :  { %v2622_v52 = vpack.c.bf16 %v2621_v60, %v2619_v50  ;;  %v2743_v16 = vmul.f32 %v12630_v3, %v16776_v63  ;;  %v16785_v50 = vld [vmem:[#allocation104_spill] sm:$0xff] }
 0xd1b   :  { %4790 = vadd.xlane.f32.xlu1 %v4789_v38 }
 0xd1d   :  { %11224 = vmatmul.mubr.msk.bf16.vlgmr.msra.gmra.mrb[64].mxu1 %vm1555_vm3, %v2315_v26 }
 0xd1e   :  { %11234 = vmatpush3.bf16.msra.mxu1 %v14895_v55  ;;  %11235 = vmatprep.mubr.msk.bf16.mxu1 %vm13547_vm1, %v16756_v40  ;;  %v2438_v55 = vpack.c.bf16 %v2437_v15, %v2435_v28  ;;  %v15139_v28 = vpack.c.bf16 %v16782_v47, %v16782_v47 }
 0xd1f   :  { %5011 = vadd.xlane.f32.xlu1 %v5010_v10  ;;  %11245 = vmatprep.subr.bf16.mxu1 %v16756_v40 }
 0xd25   :  { %11236 = vmatmul.mubr.msk.bf16.vlgmr.msra.gmra.mrb[68].mxu1 %vm1555_vm3, %v2438_v55 }
 0xd26   :  { %11246 = vmatpush3.bf16.msra.mxu1 %v14176_v62  ;;  %11247 = vmatprep.mubr.msk.bf16.mxu1 %vm13547_vm1, %v16756_v40  ;;  %v12632_v62 = vpop.eup %12631 }
 0xd27   :  { %11257 = vmatprep.subr.bf16.mxu1 %v16756_v40  ;;  %v15104_v20 = vpop.eup %12633  ;;  %v2741_v61 = vmul.f32 %v12632_v62, %v16777_v54  ;;  %v16788_v62 = vld [vmem:[#allocation96_spill] sm:$0xff] }
 0xd28   :  { %v12636_v5 = vpop.eup %12635 }
 0xd29   :  { %v12638_v38 = vpop.eup %12637  ;;  %v2865_v34 = vmul.f32 %v12636_v5, %v16780_v51  ;;  %v16797_v51 = vld [vmem:[#allocation108_spill] sm:$0xff] }
 0xd2a   :  { %v15098_v18 = vpop.xlane.xlu1 %3872  ;;  %v2867_v10 = vmul.f32 %v12638_v38, %v16781_v17  ;;  %v12640_v55 = vpop.eup %12639  ;;  %v16796_v38 = vld [vmem:[#allocation109_spill] sm:$0xff] }
 0xd2d   :  { %11248 = vmatmul.mubr.msk.bf16.vlgmr.msra.gmra.mrb[72].mxu1 %vm1555_vm3, %v2622_v52  ;;  %v16786_v52 = vld [vmem:[#allocation120_spill] sm:$0xff] }
 0xd2e   :  { %11258 = vmatpush3.bf16.msra.mxu1 %v14918_v4  ;;  %4901 = vadd.xlane.f32.xlu0 %v4900_v53  ;;  %v5229_v0 = vpop.xlane.xlu1 %5228  ;;  %v5121_v4 = vsel %vm3640_vm4, %v15104_v20, 0.0  ;;  %v16789_v53 = vld [vmem:[#allocation95_spill] sm:$0xff] }
 0xd2f   :  { %v5230_v31 = vsub.f32 %v14946_v48, %v5229_v0  ;;  %11259 = vmatprep.mubr.msk.bf16.mxu1 %vm13547_vm1, %v16756_v40  ;;  %11269 = vmatprep.subr.bf16.mxu1 %v16756_v40  ;;  %v2744_v48 = vpack.c.bf16 %v2743_v16, %v2741_v61  ;;  %v16790_v32 = vpack.i.bf16 %v16788_v62, %v16789_v53  ;;  %v16792_v61 = vld [vmem:[#allocation98_spill] sm:$0xff] }
 0xd30   :  { %4684 = vrot.lane.b32.xlu1 %v15108_v45, %s13548_s28 }
 0xd31   :  { %v5231_v39 = vmul.f32 1.442695, %v5230_v31  ;;  %v16791_v31 = vld [vmem:[#allocation106_spill] sm:$0xff] }
 0xd32   :  { %5122 = vadd.xlane.f32.xlu0 %v5121_v4  ;;  %v15122_v23 = vpop.xlane.xlu1 %4093 }
 0xd33   :  { %12641 = vpow2.f32 %v5231_v39  ;;  %v16793_v39 = vld [vmem:[#allocation97_spill] sm:$0xff] }
 0xd34   :  { %12643 = vrcp.f32 %v16779_v29  ;;  %4795 = vrot.lane.b32.xlu1 %v15108_v45, %s13549_s9  ;;  %v16794_v4 = vpack.i.bf16 %v16792_v61, %v16793_v39 }
 0xd35   :  { %11260 = vmatmul.mubr.msk.bf16.vlgmr.msra.gmra.mrb[76].mxu1 %vm1555_vm3, %v2744_v48  ;;  %12645 = vrcp.f32 %v14912_v6  ;;  %v16784_v6 = vld [vmem:[#allocation107_spill] sm:$0xff] }
 0xd36   :  { %11270 = vmatpush3.bf16.msra.mxu1 %v14992_v59  ;;  %v5340_v26 = vpop.xlane.xlu1 %5339  ;;  %11271 = vmatprep.mubr.msk.bf16.mxu1 %vm13547_vm1, %v16756_v40  ;;  %v2868_v59 = vpack.c.bf16 %v2867_v10, %v2865_v34  ;;  %v2990_v13 = vmul.f32 %v12640_v55, %v16784_v6  ;;  %v16799_v10 = vld [vmem:[#allocation110_spill] sm:$0xff]  ;;  %v3658_v6 = vsel %vm3656_vm5, %v14973_v44, 0 }
 0xd37   :  { %v5341_v43 = vsub.f32 %v14956_v27, %v5340_v26  ;;  %11281 = vmatprep.subr.bf16.mxu1 %v16756_v40 }
 0xd38   :  { %4906 = vrot.lane.b32.xlu1 %v15108_v45, %s13550_s1 }
 0xd39   :  { %v5342_v15 = vmul.f32 1.442695, %v5341_v43 }
 0xd3b   :  { %12647 = vpow2.f32 %v5342_v15 }
 0xd3c   :  { %12649 = vrcp.f32 %v16783_v24  ;;  %5128 = vrot.lane.b32.xlu1 %v15139_v28, %s13548_s28  ;;  %v16801_v24 = vld [vmem:[#allocation112_spill] sm:$0xff] }
 0xd3d   :  { %v15145_v27 = vpop.eup %12641  ;;  %11272 = vmatmul.mubr.msk.bf16.vlgmr.msra.gmra.mrb[80].mxu1 %vm1555_vm3, %v2868_v59  ;;  %12651 = vrcp.f32 %v16786_v52  ;;  %v3484_v59 = vpop.permute.xlu0 %3483 }
 0xd3e   :  { %v12644_v9 = vpop.eup %12643  ;;  %11282 = vmatpush3.bf16.msra.mxu1 %v15013_v2  ;;  %v5233_v60 = vsel %vm3640_vm4, %v15145_v27, 0.0  ;;  %11283 = vmatprep.mubr.msk.bf16.mxu1 %vm13547_vm1, %v16756_v40  ;;  %12653 = vrcp.f32 %v16787_v25 }
 0xd3f   :  { %5234 = vadd.xlane.f32.xlu0 %v5233_v60  ;;  %11293 = vmatprep.subr.bf16.mxu1 %v16756_v40  ;;  %v2988_v33 = vmul.f32 %v12644_v9, %v16785_v50  ;;  %v12646_v2 = vpop.eup %12645  ;;  %12655 = vrcp.f32 %v14994_v57 }
 0xd40   :  { %5350 = vrot.lane.b32.xlu1 %v15139_v28, %s13550_s1  ;;  %v3112_v54 = vmul.f32 %v12646_v2, %v16791_v31  ;;  %12657 = vrcp.f32 %v15000_v11 }
 0xd41   :  { %v2991_v3 = vpack.c.bf16 %v2990_v13, %v2988_v33  ;;  %12659 = vrcp.f32 %v15006_v37  ;;  %v16802_v13 = vld [vmem:[#allocation114_spill] sm:$0xff]  ;;  %v3767_v33 = vpop.permute.xlu1 %3766 }
 0xd42   :  { %12661 = vrcp.f32 %v15004_v35 }
 0xd43   :  { %12663 = vrcp.f32 %v15015_v12 }
 0xd44   :  { %11792 = vrot.lane.b32.xlu1 %v16790_v32, %s13550_s1  ;;  %12665 = vrcp.f32 %v15054_v21 }
 0xd45   :  { %v15164_v0 = vpop.eup %12647  ;;  %11284 = vmatmul.mubr.msk.bf16.vlgmr.msra.gmra.mrb[84].mxu1 %vm1555_vm3, %v2991_v3  ;;  %12667 = vrcp.f32 %v15098_v18  ;;  %v3772_v3 = vsel %vm3656_vm5, %v3767_v33, 0  ;;  %v3984_v44 = vpop.xlane.xlu0 %3983 }
 0xd46   :  { %v12650_v63 = vpop.eup %12649  ;;  %11294 = vmatpush3.bf16.msra.mxu1 %v14178_v1  ;;  %v5344_v16 = vsel %vm3640_vm4, %v15164_v0, 0.0  ;;  %11295 = vmatprep.mubr.msk.bf16.mxu1 %vm13547_vm1, %v16756_v40  ;;  %v3878_v25 = vpop.permute.xlu1 %3877  ;;  %12669 = vrcp.f32 %v3984_v44  ;;  %v12105_v44 = vld [vmem:[%s16806_s12 + $0x4] ss:$8 sps:$4 sm:$0xff]  }
 0xd47   :  { %5345 = vadd.xlane.f32.xlu0 %v5344_v16  ;;  %11305 = vmatprep.subr.bf16.mxu1 %v16756_v40  ;;  %v3110_v48 = vmul.f32 %v12650_v63, %v16795_v8  ;;  %v12652_v5 = vpop.eup %12651  ;;  %v3883_v53 = vsel %vm3656_vm5, %v3878_v25, 0  ;;  %12671 = vrcp.f32 %v15122_v23  ;;  %v4102_v8 = vsel %vm3656_vm5, %v14998_v58, 0 }
 0xd48   :  { %11797 = vrot.lane.b32.xlu1 %v16794_v4, %s13549_s9  ;;  %v12654_v29 = vpop.eup %12653  ;;  %v3234_v26 = vmul.f32 %v12652_v5, %v16796_v38  ;;  %5626 = vmatprep.subr.bf16.mxu0 %v12105_v44  ;;  %v12139_v44 = vld [vmem:[%s16806_s12 + $0xc0] ss:$8 sps:$4 sm:$0xff]  }
 0xd49   :  { %v3113_v1 = vpack.c.bf16 %v3112_v54, %v3110_v48  ;;  %v3232_v34 = vmul.f32 %v12654_v29, %v16797_v51  ;;  %v12656_v43 = vpop.eup %12655  ;;  %v4205_v63 = vpop.xlane.xlu0 %4204 }
 0xd4a   :  { %v12658_v11 = vpop.eup %12657  ;;  %12673 = vrcp.f32 %v4205_v63  ;;  %v12109_v63 = vld [vmem:[%s16806_s12 + $0x20] ss:$8 sps:$4 sm:$0xff]  }
 0xd4b   :  { %v3235_v57 = vpack.c.bf16 %v3234_v26, %v3232_v34  ;;  %v3358_v15 = vmul.f32 %v12658_v11, %v16799_v10  ;;  %v12660_v47 = vpop.eup %12659 }
 0xd4c   :  { %v12662_v35 = vpop.eup %12661 }
 0xd4d   :  { %11296 = vmatmul.mubr.msk.bf16.vlgmr.msra.gmra.mrb[88].mxu1 %vm1555_vm3, %v3113_v1  ;;  %v3479_v9 = vmul.f32 %v12662_v35, %v16801_v24  ;;  %v12664_v60 = vpop.eup %12663  ;;  %v4317_v61 = vpop.xlane.xlu0 %4316  ;;  %v4576_v35 = vsel %vm3656_vm5, %v15108_v45, 0 }
 0xd4e   :  { %11306 = vmatpush3.bf16.msra.mxu1 %v15047_v22  ;;  %11307 = vmatprep.mubr.msk.bf16.mxu1 %vm13547_vm1, %v16756_v40  ;;  %v16798_v22 = vld [vmem:[#allocation111_spill] sm:$0xff]  ;;  %v3651_v50 = vmul.f32 %v12664_v60, %v16802_v13  ;;  %v12666_v52 = vpop.eup %12665  ;;  %12675 = vrcp.f32 %v4317_v61 }
 0xd4f   :  { %11317 = vmatprep.subr.bf16.mxu1 %v16756_v40  ;;  %v3356_v17 = vmul.f32 %v12656_v43, %v16798_v22  ;;  %v3763_v2 = vmul.f32 %v12666_v52, %v14930_v14  ;;  %v12668_v18 = vpop.eup %12667  ;;  %v3989_v14 = vpop.permute.xlu1 %3988  ;;  %v16803_v43 = vld [vmem:[#allocation122_spill] sm:$0xff] }
 0xd50   :  { %v3652_v21 = vpack.c.bf16 %v3651_v50, %v3651_v50  ;;  %v3875_v32 = vmul.f32 %v12668_v18, %v14941_v42  ;;  %v12670_v31 = vpop.eup %12669  ;;  %v3994_v54 = vsel %vm3656_vm5, %v3989_v14, 0  ;;  %v12114_v14 = vld [vmem:[%s16806_s12 + $0x34] ss:$8 sps:$4 sm:$0xff]  }
 0xd51   :  { %v3359_v37 = vpack.c.bf16 %v3358_v15, %v3356_v17  ;;  %v3764_v62 = vpack.c.bf16 %v3763_v2, %v3763_v2  ;;  %v3986_v39 = vmul.f32 %v12670_v31, %v14965_v46  ;;  %v12672_v4 = vpop.eup %12671  ;;  %v4428_v23 = vpop.xlane.xlu0 %4427  ;;  %v16804_v15 = vld [vmem:[#allocation123_spill] sm:$0xff]  ;;  %v12117_v31 = vld [vmem:[%s16806_s12 + $0x44] ss:$8 sps:$4 sm:$0xff]  }
 0xd52   :  { %v3876_v16 = vpack.c.bf16 %v3875_v32, %v3875_v32  ;;  %v4096_v48 = vmul.f32 %v12672_v4, %v14952_v19  ;;  %12677 = vrcp.f32 %v4428_v23  ;;  %v12108_v2 = vld [vmem:[%s16806_s12 + $0x14] ss:$8 sps:$4 sm:$0xff]  }
 0xd53   :  { %v3987_v42 = vpack.c.bf16 %v3986_v39, %v3986_v39  ;;  %v12120_v23 = vld [vmem:[%s16806_s12 + $0x54] ss:$8 sps:$4 sm:$0xff]  }
 0xd54   :  { %v4097_v46 = vpack.c.bf16 %v4096_v48, %v4096_v48  ;;  %v12674_v5 = vpop.eup %12673  ;;  %v12118_v48 = vld [vmem:[%s16806_s12 + $0x50] ss:$8 sps:$4 sm:$0xff]  }
 0xd55   :  { %11308 = vmatmul.mubr.msk.bf16.vlgmr.msra.gmra.mrb[92].mxu1 %vm1555_vm3, %v3235_v57  ;;  %v4211_v1 = vpop.permute.xlu0 %4210  ;;  %v4207_v58 = vmul.f32 %v12674_v5, %v14969_v41 }
 0xd56   :  { %11318 = vmatpush3.bf16.msra.mxu1 %v15087_v56  ;;  %11319 = vmatprep.mubr.msk.bf16.mxu1 %vm13547_vm1, %v16756_v40  ;;  %v16800_v56 = vld [vmem:[#allocation113_spill] sm:$0xff]  ;;  %v4216_v38 = vsel %vm3656_vm5, %v4211_v1, 0  ;;  %v5020_v1 = vsel %vm3656_vm5, %v15139_v28, 0 }
 0xd57   :  { %11329 = vmatprep.subr.bf16.mxu1 %v16756_v40  ;;  %v3481_v55 = vmul.f32 %v12660_v47, %v16800_v56  ;;  %v4208_v19 = vpack.c.bf16 %v4207_v58, %v4207_v58  ;;  %v16805_v56 = vld [vmem:[#allocation124_spill] sm:$0xff]  ;;  %v12126_v58 = vld [vmem:[%s16806_s12 + $0x74] ss:$8 sps:$4 sm:$0xff]  }
 0xd58   :  { %v12676_v51 = vpop.eup %12675 }
 0xd59   :  { %v3482_v12 = vpack.c.bf16 %v3481_v55, %v3479_v9  ;;  %v4319_v11 = vmul.f32 %v12676_v51, %v16803_v43  ;;  %v12127_v43 = vld [vmem:[%s16806_s12 + $0x80] ss:$8 sps:$4 sm:$0xff]  }
 0xd5b   :  { %v4320_v41 = vpack.c.bf16 %v4319_v11, %v4319_v11 }
 0xd5c   :  { %v12678_v17 = vpop.eup %12677 }
 0xd5d   :  { %11320 = vmatmul.mubr.msk.bf16.vlgmr.msra.gmra.mrb[96].mxu1 %vm1555_vm3, %v3359_v37  ;;  %5239 = vrot.lane.b32.xlu0 %v15139_v28, %s13549_s9  ;;  %v4430_v37 = vmul.f32 %v12678_v17, %v16804_v15  ;;  %v12132_v15 = vld [vmem:[%s16806_s12 + $0x94] ss:$8 sps:$4 sm:$0xff]  }
 0xd5e   :  { %11330 = vmatpush3.bf16.msra.mxu1 %v3484_v59  ;;  %11331 = vmatprep.mubr.msk.bf16.mxu1 %vm13547_vm1, %v16756_v40 }
 0xd5f   :  { %11341 = vmatprep.subr.bf16.mxu1 %v16756_v40  ;;  %v4431_v47 = vpack.c.bf16 %v4430_v37, %v4430_v37 }
 0xd65   :  { %11332 = vmatmul.mubr.msk.bf16.vlgmr.msra.gmra.mrb[100].mxu1 %vm1555_vm3, %v3482_v12 }
 0xd66   :  { %11342 = vmatpush3.bf16.msra.mxu1 %v3658_v6  ;;  %11343 = vmatprep.mubr.msk.bf16.mxu1 %vm13547_vm1, %v16756_v40 }
 0xd67   :  { %11353 = vmatprep.subr.bf16.mxu1 %v16756_v40 }
 0xd6d   :  { %11344 = vmatmul.mubr.msk.bf16.vlgmr.msra.gmra.mrb[104].mxu1 %vm3640_vm4, %v3652_v21 }
 0xd6e   :  { %11354 = vmatpush3.bf16.msra.mxu1 %v3772_v3  ;;  %11355 = vmatprep.mubr.msk.bf16.mxu1 %vm13547_vm1, %v16756_v40  ;;  %v12103_v3 = vld [vmem:[%s16806_s12] ss:$8 sps:$4 sm:$0xff]  }
 0xd6f   :  { %11365 = vmatprep.subr.bf16.mxu1 %v16756_v40  ;;  %5627 = vmatpush1.bf16.msra.mxu0 %v12103_v3 }
 0xd70   :  { %5628 = vmatprep.subr.bf16.mxu0 %v12108_v2 }
 0xd73   :  { %v4568_v29 = vpop.xlane.xlu1 %4567 }
 0xd74   :  { %12679 = vrcp.f32 %v4568_v29  ;;  %v12121_v29 = vld [vmem:[%s16806_s12 + $0x60] ss:$8 sps:$4 sm:$0xff]  }
 0xd75   :  { %11356 = vmatmul.mubr.msk.bf16.vlgmr.msra.gmra.mrb[108].mxu1 %vm3640_vm4, %v3764_v62  ;;  %v12106_v62 = vld [vmem:[%s16806_s12 + $0x10] ss:$8 sps:$4 sm:$0xff]  }
 0xd76   :  { %11366 = vmatpush3.bf16.msra.mxu1 %v3883_v53  ;;  %11367 = vmatprep.mubr.msk.bf16.mxu1 %vm13547_vm1, %v16756_v40 }
 0xd77   :  { %11377 = vmatprep.subr.bf16.mxu1 %v16756_v40  ;;  %v4322_v26 = vpop.permute.xlu1 %4321  ;;  %5629 = vmatpush1.bf16.msra.mxu0 %v12106_v62  ;;  %v12144_v62 = vld [vmem:[%s16806_s12 + $0xd4] ss:$8 sps:$4 sm:$0xff]  }
 0xd78   :  { %v4327_v57 = vsel %vm3656_vm5, %v4322_v26, 0 }
 0xd7d   :  { %11368 = vmatmul.mubr.msk.bf16.vlgmr.msra.gmra.mrb[112].mxu1 %vm3640_vm4, %v3876_v16  ;;  %v12112_v16 = vld [vmem:[%s16806_s12 + $0x30] ss:$8 sps:$4 sm:$0xff]  }
 0xd7e   :  { %11378 = vmatpush3.bf16.msra.mxu1 %v3994_v54  ;;  %11379 = vmatprep.mubr.msk.bf16.mxu1 %vm13547_vm1, %v16756_v40  ;;  %v12680_v59 = vpop.eup %12679  ;;  %v12115_v54 = vld [vmem:[%s16806_s12 + $0x40] ss:$8 sps:$4 sm:$0xff]  }
 0xd7f   :  { %11389 = vmatprep.subr.bf16.mxu1 %v16756_v40  ;;  %v4570_v55 = vmul.f32 %v12680_v59, %v16805_v56  ;;  %v12130_v59 = vld [vmem:[%s16806_s12 + $0x90] ss:$8 sps:$4 sm:$0xff]  }
 0xd81   :  { %v4571_v9 = vpack.c.bf16 %v4570_v55, %v4570_v55 }
 0xd85   :  { %11380 = vmatmul.mubr.msk.bf16.vlgmr.msra.gmra.mrb[116].mxu1 %vm3640_vm4, %v3987_v42 }
 0xd86   :  { %11390 = vmatpush3.bf16.msra.mxu1 %v4102_v8  ;;  %11391 = vmatprep.mubr.msk.bf16.mxu1 %vm13547_vm1, %v16756_v40  ;;  %v4679_v34 = vpop.xlane.xlu0 %4678 }
 0xd87   :  { %11401 = vmatprep.subr.bf16.mxu1 %v16756_v40  ;;  %12681 = vrcp.f32 %v4679_v34  ;;  %v12129_v34 = vld [vmem:[%s16806_s12 + $0x84] ss:$8 sps:$4 sm:$0xff]  }
 0xd8a   :  { %v4433_v22 = vpop.permute.xlu0 %4432 }
 0xd8b   :  { %v4438_v10 = vsel %vm3656_vm5, %v4433_v22, 0 }
 0xd8d   :  { %11392 = vmatmul.mubr.msk.bf16.vlgmr.msra.gmra.mrb[120].mxu1 %vm3640_vm4, %v4097_v46  ;;  %v12123_v46 = vld [vmem:[%s16806_s12 + $0x64] ss:$8 sps:$4 sm:$0xff]  }
 0xd8e   :  { %11402 = vmatpush3.bf16.msra.mxu1 %v4216_v38  ;;  %11403 = vmatprep.mubr.msk.bf16.mxu1 %vm13547_vm1, %v16756_v40 }
 0xd8f   :  { %11413 = vmatprep.subr.bf16.mxu1 %v16756_v40 }
 0xd91   :  { %v12682_v12 = vpop.eup %12681 }
 0xd92   :  { %v4681_v45 = vmul.f32 %v12682_v12, %v15019_v49 }
 0xd94   :  { %v4682_v50 = vpack.c.bf16 %v4681_v45, %v4681_v45 }
 0xd95   :  { %11404 = vmatmul.mubr.msk.bf16.vlgmr.msra.gmra.mrb[124].mxu1 %vm3640_vm4, %v4208_v19  ;;  %v12124_v19 = vld [vmem:[%s16806_s12 + $0x70] ss:$8 sps:$4 sm:$0xff]  }
 0xd96   :  { %11414 = vmatpush3.bf16.msra.mxu1 %v4327_v57  ;;  %11415 = vmatprep.mubr.msk.bf16.mxu1 %vm13547_vm1, %v16756_v40 }
 0xd97   :  { %11425 = vmatprep.subr.bf16.mxu1 %v16756_v40 }
 0xd9d   :  { %11416 = vmatmul.mubr.msk.bf16.vlgmr.msra.gmra.mrb[128].mxu1 %vm3640_vm4, %v4320_v41 }
 0xd9e   :  { %11426 = vmatpush3.bf16.msra.mxu1 %v4438_v10  ;;  %11427 = vmatprep.mubr.msk.bf16.mxu1 %vm13547_vm1, %v16756_v40 }
 0xd9f   :  { %11437 = vmatprep.subr.bf16.mxu1 %v16756_v40 }
 0xda5   :  { %11428 = vmatmul.mubr.msk.bf16.vlgmr.msra.gmra.mrb[132].mxu1 %vm3640_vm4, %v4431_v47 }
 0xda6   :  { %11438 = vmatpush3.bf16.msra.mxu1 %v4576_v35  ;;  %11439 = vmatprep.mubr.msk.bf16.mxu1 %vm13547_vm1, %v16756_v40 }
 0xda7   :  { %11449 = vmatprep.subr.bf16.mxu1 %v16756_v40 }
 0xda8   :  { %v4791_v24 = vpop.xlane.xlu1 %4790 }
 0xda9   :  { %12683 = vrcp.f32 %v4791_v24  ;;  %v12133_v24 = vld [vmem:[%s16806_s12 + $0xa0] ss:$8 sps:$4 sm:$0xff]  }
 0xdac   :  { %v5012_v60 = vpop.xlane.xlu1 %5011 }
 0xdad   :  { %11440 = vmatmul.mubr.msk.bf16.vlgmr.msra.gmra.mrb[136].mxu1 %vm3640_vm4, %v4571_v9 }
 0xdae   :  { %11451 = vmatprep.mubr.msk.bf16.mxu1 %vm13547_vm1, %v16756_v40 }
 0xdb0   :  { %v4685_v6 = vpop.permute.xlu1 %4684 }
 0xdb1   :  { %v4690_v13 = vsel %vm3656_vm5, %v4685_v6, 0  ;;  %v12138_v6 = vld [vmem:[%s16806_s12 + $0xb4] ss:$8 sps:$4 sm:$0xff]  }
 0xdb2   :  { %11450 = vmatpush3.bf16.msra.mxu1 %v4690_v13 }
 0xdb3   :  { %11461 = vmatprep.subr.bf16.mxu1 %v16756_v40  ;;  %v12684_v33 = vpop.eup %12683 }
 0xdb4   :  { %v4796_v21 = vpop.permute.xlu1 %4795  ;;  %v4793_v49 = vmul.f32 %v12684_v33, %v15061_v7  ;;  %v12111_v7 = vld [vmem:[%s16806_s12 + $0x24] ss:$8 sps:$4 sm:$0xff]   ;;  %v12136_v33 = vld [vmem:[%s16806_s12 + $0xb0] ss:$8 sps:$4 sm:$0xff]  }
 0xdb5   :  { %v4801_v52 = vsel %vm3656_vm5, %v4796_v21, 0  ;;  %11452 = vmatmul.mubr.msk.bf16.vlgmr.msra.gmra.mrb[140].mxu1 %vm3640_vm4, %v4682_v50  ;;  %5630 = vmatprep.subr.bf16.mxu0 %v12111_v7  ;;  %v12147_v7 = vld [vmem:[%s16806_s12 + $0xe4] ss:$8 sps:$4 sm:$0xff]  }
 0xdb6   :  { %11462 = vmatpush3.bf16.msra.mxu1 %v4801_v52  ;;  %11463 = vmatprep.mubr.msk.bf16.mxu1 %vm13547_vm1, %v16756_v40  ;;  %v4794_v53 = vpack.c.bf16 %v4793_v49, %v4793_v49  ;;  %v12141_v52 = vld [vmem:[%s16806_s12 + $0xc4] ss:$8 sps:$4 sm:$0xff]  }
 0xdb7   :  { %11473 = vmatprep.subr.bf16.mxu1 %v16756_v40  ;;  %5631 = vmatpush1.bf16.msra.mxu0 %v12109_v63 }
 0xdb8   :  { %v4907_v25 = vpop.permute.xlu1 %4906  ;;  %5632 = vmatprep.subr.bf16.mxu0 %v12114_v14 }
 0xdb9   :  { %v4912_v32 = vsel %vm3656_vm5, %v4907_v25, 0 }
 0xdbb   :  { %v4902_v18 = vpop.xlane.xlu0 %4901  ;;  %5633 = vmatpush1.bf16.msra.mxu0 %v12112_v16 }
 0xdbc   :  { %12685 = vrcp.f32 %v4902_v18  ;;  %5634 = vmatprep.subr.bf16.mxu0 %v12117_v31  ;;  %v5129_v38 = vpop.permute.xlu1 %5128  ;;  %v12150_v31 = vld [vmem:[%s16806_s12 + $0xf4] ss:$8 sps:$4 sm:$0xff]  }
 0xdbd   :  { %11464 = vmatmul.mubr.msk.bf16.vlgmr.msra.gmra.mrb[144].mxu1 %vm3640_vm4, %v4794_v53  ;;  %12687 = vrcp.f32 %v5012_v60  ;;  %v5134_v51 = vsel %vm3656_vm5, %v5129_v38, 0  ;;  %v12142_v53 = vld [vmem:[%s16806_s12 + $0xd0] ss:$8 sps:$4 sm:$0xff]  }
 0xdbe   :  { %11474 = vmatpush3.bf16.msra.mxu1 %v4912_v32  ;;  %11475 = vmatprep.mubr.msk.bf16.mxu1 %vm13547_vm1, %v16756_v40 }
 0xdbf   :  { %11485 = vmatprep.subr.bf16.mxu1 %v16756_v40  ;;  %v5123_v61 = vpop.xlane.xlu0 %5122  ;;  %5635 = vmatpush1.bf16.msra.mxu0 %v12115_v54 }
 0xdc0   :  { %12689 = vrcp.f32 %v5123_v61  ;;  %5636 = vmatprep.subr.bf16.mxu0 %v12120_v23  ;;  %v5351_v9 = vpop.permute.xlu1 %5350  ;;  %v12148_v61 = vld [vmem:[%s16806_s12 + $0xf0] ss:$8 sps:$4 sm:$0xff]  }
 0xdc1   :  { %v5356_v21 = vsel %vm3656_vm5, %v5351_v9, 0 }
 0xdc3   :  { %5637 = vmatpush1.bf16.msra.mxu0 %v12118_v48 }
 0xdc4   :  { %5638 = vmatprep.subr.bf16.mxu0 %v12123_v46 }
 0xdc6   :  { %v12686_v39 = vpop.eup %12685 }
 0xdc7   :  { %v4904_v42 = vmul.f32 %v12686_v39, %v15095_v36  ;;  %v12688_v8 = vpop.eup %12687  ;;  %5639 = vmatpush1.bf16.msra.mxu0 %v12121_v29 }
 0xdc8   :  { %v5014_v5 = vmul.f32 %v12688_v8, %v15071_v30  ;;  %5640 = vmatprep.subr.bf16.mxu0 %v12126_v58 }
 0xdc9   :  { %v4905_v4 = vpack.c.bf16 %v4904_v42, %v4904_v42 }
 0xdca   :  { %v5015_v28 = vpack.c.bf16 %v5014_v5, %v5014_v5  ;;  %v12690_v26 = vpop.eup %12689 }
 0xdcb   :  { %11476 = vmatmul.mubr.msk.bf16.vlgmr.msra.gmra.mrb[148].mxu1 %vm3640_vm4, %v4905_v4  ;;  %v5125_v57 = vmul.f32 %v12690_v26, %v15104_v20  ;;  %5641 = vmatpush1.bf16.msra.mxu0 %v12124_v19  ;;  %v12135_v20 = vld [vmem:[%s16806_s12 + $0xa4] ss:$8 sps:$4 sm:$0xff]  }
 0xdcc   :  { %11486 = vmatpush3.bf16.msra.mxu1 %v5020_v1  ;;  %11487 = vmatprep.mubr.msk.bf16.mxu1 %vm13547_vm1, %v16756_v40  ;;  %v5235_v36 = vpop.xlane.xlu0 %5234 }
 0xdcd   :  { %11497 = vmatprep.subr.bf16.mxu1 %v16756_v40  ;;  %12691 = vrcp.f32 %v5235_v36  ;;  %5642 = vmatprep.subr.bf16.mxu0 %v12129_v34  ;;  %v5126_v10 = vpack.c.bf16 %v5125_v57, %v5125_v57 }
 0xdcf   :  { %5643 = vmatpush1.bf16.msra.mxu0 %v12127_v43 }
 0xdd0   :  { %5644 = vmatprep.subr.bf16.mxu0 %v12132_v15 }
 0xdd3   :  { %11488 = vmatmul.mubr.msk.bf16.vlgmr.msra.gmra.mrb[152].mxu1 %vm3640_vm4, %v5015_v28  ;;  %5645 = vmatpush1.bf16.msra.mxu0 %v12130_v59 }
 0xdd4   :  { %11498 = vmatpush3.bf16.msra.mxu1 %v5134_v51  ;;  %v5346_v30 = vpop.xlane.xlu0 %5345  ;;  %11499 = vmatprep.mubr.msk.bf16.mxu1 %vm13547_vm1, %v16756_v40 }
 0xdd5   :  { %11509 = vmatprep.subr.bf16.mxu1 %v16756_v40  ;;  %12693 = vrcp.f32 %v5346_v30  ;;  %5646 = vmatprep.subr.bf16.mxu0 %v12135_v20 }
 0xdd7   :  { %v12692_v37 = vpop.eup %12691  ;;  %5647 = vmatpush1.bf16.msra.mxu0 %v12133_v24 }
 0xdd8   :  { %v5240_v11 = vpop.permute.xlu0 %5239  ;;  %v1988_v22 = vpop.f32.mrb[52].mxu1  ;;  %v5237_v55 = vmul.f32 %v12692_v37, %v15145_v27  ;;  %5648 = vmatprep.subr.bf16.mxu0 %v12138_v6 }
 0xdd9   :  { %v5245_v41 = vsel %vm3656_vm5, %v5240_v11, 0  ;;  %v11189_v17 = vpop.f32.mrb[53].mxu1 }
 0xdda   :  { %v1991_v47 = vpop.f32.mrb[54].mxu1  ;;  %v5238_v45 = vpack.c.bf16 %v5237_v55, %v5237_v55 }
 0xddb   :  { %v11801_v35 = vpack.i.bf16 %v1991_v47, %v1988_v22  ;;  %v11190_v56 = vpop.f32.mrb[55].mxu1  ;;  %11500 = vmatmul.mubr.msk.bf16.vlgmr.msra.gmra.mrb[156].mxu1 %vm3640_vm4, %v5126_v10  ;;  %5649 = vmatpush1.bf16.msra.mxu0 %v12136_v33 }
 0xddc   :  { %11510 = vmatpush3.bf16.msra.mxu1 %v5245_v41  ;;  %11511 = vmatprep.mubr.msk.bf16.mxu1 %vm13547_vm1, %v16756_v40 }
 0xddd   :  { %11802 = vrot.lane.b32.xlu0 %v11801_v35, %s13548_s28  ;;  %11521 = vmatprep.subr.bf16.mxu1 %v16756_v40 }
 0xdde   :  { %5650 = vmatprep.subr.bf16.mxu0 %v12141_v52 }
 0xddf   :  { %v12694_v13 = vpop.eup %12693  ;;  %5651 = vmatpush1.bf16.msra.mxu0 %v12139_v44 }
 0xde0   :  { %v15326_v12 = vpop.f32.mrb[56].mxu1  ;;  %v5348_v3 = vmul.f32 %v12694_v13, %v15164_v0  ;;  %5652 = vmatprep.subr.bf16.mxu0 %v12144_v62  ;;  %v12145_v0 = vld [vmem:[%s16806_s12 + $0xe0] ss:$8 sps:$4 sm:$0xff]   ;;  %v11793_v62 = vpop.permute.xlu1 %11792 }
 0xde1   :  { %v11201_v60 = vpop.f32.mrb[57].mxu1 }
 0xde2   :  { %v15329_v50 = vpop.f32.mrb[58].mxu1  ;;  %v5349_v25 = vpack.c.bf16 %v5348_v3, %v5348_v3 }
 0xde3   :  { %v11202_v27 = vpop.f32.mrb[59].mxu1  ;;  %11512 = vmatmul.mubr.msk.bf16.vlgmr.msra.gmra.mrb[160].mxu1 %vm3640_vm4, %v5238_v45  ;;  %5653 = vmatpush1.bf16.msra.mxu0 %v12142_v53 }
 0xde4   :  { %11522 = vmatpush3.bf16.msra.mxu1 %v5356_v21  ;;  %11523 = vmatprep.mubr.msk.bf16.mxu1 %vm13547_vm1, %v16756_v40 }
 0xde5   :  { %5654 = vmatprep.subr.bf16.mxu0 %v12147_v7 }
 0xde7   :  { %5655 = vmatpush1.bf16.msra.mxu0 %v12145_v0  ;;  %v11795_v0 = vunpack.i.h.bf16 %v11793_v62 }
 0xde8   :  { %v2233_v49 = vpop.f32.mrb[60].mxu1  ;;  %5656 = vmatprep.subr.bf16.mxu0 %v12150_v31 }
 0xde9   :  { %v11213_v2 = vpop.f32.mrb[61].mxu1 }
 0xdea   :  { %v2236_v18 = vpop.f32.mrb[62].mxu1 }
 0xdeb   :  { %v11806_v32 = vpack.i.bf16 %v2236_v18, %v2233_v49  ;;  %v11214_v63 = vpop.f32.mrb[63].mxu1  ;;  %11524 = vmatmul.mubr.msk.bf16.vlgmr.msra.gmra.mrb[164].mxu1 %vm3640_vm4, %v5349_v25  ;;  %5657 = vmatpush1.bf16.msra.mxu0 %v12148_v61  ;;  %v16807_v61 = vld [vmem:[#allocation94_spill] sm:$0xff] }
 0xded   :  { %11807 = vrot.lane.b32.xlu1 %v11806_v32, %s13550_s1  ;;  %v11798_v32 = vpop.permute.xlu1 %11797 }
 0xdee   :  { %v11799_v31 = vunpack.i.l.bf16 %v11798_v32 }
 0xdf0   :  { %v2356_v14 = vpop.f32.mrb[64].mxu1 }
 0xdf1   :  { %v11225_v16 = vpop.f32.mrb[65].mxu1 }
 0xdf2   :  { %v2359_v54 = vpop.f32.mrb[66].mxu1  ;;  %v11800_v16 = vunpack.i.h.bf16 %v11798_v32 }
 0xdf3   :  { %v11811_v39 = vpack.i.bf16 %v2359_v54, %v2356_v14  ;;  %v11226_v42 = vpop.f32.mrb[67].mxu1  ;;  %v11794_v14 = vunpack.i.l.bf16 %v11793_v62 }
 0xdf4   :  { %v16808_v42 = vld [vmem:[#allocation93_spill] sm:$0xff] }
 0xdf5   :  { %11812 = vrot.lane.b32.xlu1 %v11811_v39, %s13549_s9  ;;  %v2535_v39 = vsel %vm1505_vm2, %v16807_v61, %v11795_v0 }
 0xdf8   :  { %v2479_v4 = vpop.f32.mrb[68].mxu1 }
 0xdf9   :  { %v11237_v23 = vpop.f32.mrb[69].mxu1 }
 0xdfa   :  { %v2482_v8 = vpop.f32.mrb[70].mxu1 }
 0xdfb   :  { %v11816_v48 = vpack.i.bf16 %v2482_v8, %v2479_v4  ;;  %v11238_v1 = vpop.f32.mrb[71].mxu1  ;;  %v2534_v4 = vsel %vm1505_vm2, %v16808_v42, %v11794_v14 }
 0xdfc   :  { %v2537_v1 = vsel %vm2536_vm6, %v2534_v4, %v11799_v31 }
 0xdfd   :  { %11817 = vrot.lane.b32.xlu1 %v11816_v48, %s13548_s28 }
 0xe00   :  { %v15349_v46 = vpop.f32.mrb[72].mxu1 }
 0xe01   :  { %v11249_v36 = vpop.f32.mrb[73].mxu1 }
 0xe02   :  { %v15351_v5 = vpop.f32.mrb[74].mxu1  ;;  %v2538_v36 = vsel %vm2536_vm6, %v2535_v39, %v11800_v16 }
 0xe03   :  { %v11250_v29 = vpop.f32.mrb[75].mxu1 }
 0xe08   :  { %v2786_v38 = vpop.f32.mrb[76].mxu1 }
 0xe09   :  { %v11261_v28 = vpop.f32.mrb[77].mxu1 }
 0xe0a   :  { %v2789_v58 = vpop.f32.mrb[78].mxu1 }
 0xe0b   :  { %v11821_v26 = vpack.i.bf16 %v2789_v58, %v2786_v38  ;;  %v11262_v19 = vpop.f32.mrb[79].mxu1 }
 0xe0d   :  { %11822 = vrot.lane.b32.xlu0 %v11821_v26, %s13550_s1 }
 0xe10   :  { %v2909_v51 = vpop.f32.mrb[80].mxu1 }
 0xe11   :  { %v11273_v34 = vpop.f32.mrb[81].mxu1 }
 0xe12   :  { %v2912_v30 = vpop.f32.mrb[82].mxu1 }
 0xe13   :  { %v11826_v57 = vpack.i.bf16 %v2912_v30, %v2909_v51  ;;  %v11274_v43 = vpop.f32.mrb[83].mxu1 }
 0xe15   :  { %11827 = vrot.lane.b32.xlu0 %v11826_v57, %s13549_s9 }
 0xe18   :  { %v3032_v11 = vpop.f32.mrb[84].mxu1 }
 0xe19   :  { %v11285_v22 = vpop.f32.mrb[85].mxu1 }
 0xe1a   :  { %v3035_v41 = vpop.f32.mrb[86].mxu1 }
 0xe1b   :  { %v11831_v17 = vpack.i.bf16 %v3035_v41, %v3032_v11  ;;  %v11286_v10 = vpop.f32.mrb[87].mxu1 }
 0xe1d   :  { %11832 = vrot.lane.b32.xlu0 %v11831_v17, %s13548_s28 }
 0xe20   :  { %v15356_v15 = vpop.f32.mrb[88].mxu1 }
 0xe21   :  { %v11297_v37 = vpop.f32.mrb[89].mxu1 }
 0xe22   :  { %v15358_v47 = vpop.f32.mrb[90].mxu1 }
 0xe23   :  { %v11298_v59 = vpop.f32.mrb[91].mxu1 }
 0xe28   :  { %v3277_v35 = vpop.f32.mrb[92].mxu1 }
 0xe29   :  { %v11309_v56 = vpop.f32.mrb[93].mxu1 }
 0xe2a   :  { %v3280_v20 = vpop.f32.mrb[94].mxu1 }
 0xe2b   :  { %v11836_v55 = vpack.i.bf16 %v3280_v20, %v3277_v35  ;;  %v11310_v24 = vpop.f32.mrb[95].mxu1 }
 0xe2d   :  { %11837 = vrot.lane.b32.xlu1 %v11836_v55, %s13550_s1 }
 0xe30   :  { %v3400_v9 = vpop.f32.mrb[96].mxu1 }
 0xe31   :  { %v11321_v60 = vpop.f32.mrb[97].mxu1 }
 0xe32   :  { %v3403_v45 = vpop.f32.mrb[98].mxu1 }
 0xe33   :  { %v11841_v6 = vpack.i.bf16 %v3403_v45, %v3400_v9  ;;  %v11322_v13 = vpop.f32.mrb[99].mxu1 }
 0xe35   :  { %11842 = vrot.lane.b32.xlu1 %v11841_v6, %s13549_s9 }
 0xe38   :  { %v3523_v33 = vpop.f32.mrb[100].mxu1 }
 0xe39   :  { %v11333_v21 = vpop.f32.mrb[101].mxu1 }
 0xe3a   :  { %v3526_v27 = vpop.f32.mrb[102].mxu1 }
 0xe3b   :  { %v11846_v52 = vpack.i.bf16 %v3526_v27, %v3523_v33  ;;  %v11334_v3 = vpop.f32.mrb[103].mxu1 }
 0xe3d   :  { %11847 = vrot.lane.b32.xlu1 %v11846_v52, %s13548_s28 }
 0xe40   :  { %v15363_v44 = vpop.f32.mrb[104].mxu1 }
 0xe41   :  { %v11345_v49 = vpop.f32.mrb[105].mxu1 }
 0xe42   :  { %v3697_v2 = vpop.f32.mrb[106].mxu1 }
 0xe43   :  { %v11346_v25 = vpop.f32.mrb[107].mxu1 }
 0xe48   :  { %v15365_v18 = vpop.f32.mrb[108].mxu1 }
 0xe49   :  { %v11357_v53 = vpop.f32.mrb[109].mxu1 }
 0xe4a   :  { %v3811_v63 = vpop.f32.mrb[110].mxu1 }
 0xe4b   :  { %v11358_v7 = vpop.f32.mrb[111].mxu1 }
 0xe4f   :  { %v11803_v54 = vpop.permute.xlu0 %11802 }
 0xe50   :  { %v11805_v23 = vunpack.i.h.bf16 %v11803_v54  ;;  %v11804_v8 = vunpack.i.l.bf16 %v11803_v54  ;;  %v15371_v48 = vpop.f32.mrb[112].mxu1 }
 0xe51   :  { %v11369_v29 = vpop.f32.mrb[113].mxu1 }
 0xe52   :  { %v2541_v38 = vsel %vm2539_vm7, %v2538_v36, %v11805_v23  ;;  %v2540_v28 = vsel %vm2539_vm7, %v2537_v1, %v11804_v8  ;;  %v3922_v58 = vpop.f32.mrb[114].mxu1 }
 0xe53   :  { %v11370_v26 = vpop.f32.mrb[115].mxu1  ;;  %v5460_v19 = vpack.c.bf16 %v2541_v38, %v2540_v28 }
 0xe58   :  { %v15377_v51 = vpop.f32.mrb[116].mxu1 }
 0xe59   :  { %v11381_v34 = vpop.f32.mrb[117].mxu1 }
 0xe5a   :  { %v4033_v30 = vpop.f32.mrb[118].mxu1 }
 0xe5b   :  { %v11382_v57 = vpop.f32.mrb[119].mxu1 }
 0xe5f   :  { %v11808_v17 = vpop.permute.xlu1 %11807 }
 0xe60   :  { %v15379_v43 = vpop.f32.mrb[120].mxu1  ;;  %v11810_v20 = vunpack.i.h.bf16 %v11808_v17  ;;  %v11809_v55 = vunpack.i.l.bf16 %v11808_v17 }
 0xe61   :  { %v11393_v11 = vpop.f32.mrb[121].mxu1 }
 0xe62   :  { %v4141_v22 = vpop.f32.mrb[122].mxu1  ;;  %v2543_v45 = vsel %vm1505_vm2, %v15329_v50, %v11810_v20  ;;  %v2542_v6 = vsel %vm1505_vm2, %v15326_v12, %v11809_v55 }
 0xe63   :  { %v11394_v41 = vpop.f32.mrb[123].mxu1 }
 0xe67   :  { %v11813_v59 = vpop.permute.xlu1 %11812 }
 0xe68   :  { %v15381_v10 = vpop.f32.mrb[124].mxu1  ;;  %v11815_v24 = vunpack.i.h.bf16 %v11813_v59  ;;  %v11814_v9 = vunpack.i.l.bf16 %v11813_v59 }
 0xe69   :  { %v11405_v37 = vpop.f32.mrb[125].mxu1 }
 0xe6a   :  { %v4255_v35 = vpop.f32.mrb[126].mxu1  ;;  %v2544_v52 = vsel %vm2536_vm6, %v2542_v6, %v11814_v9  ;;  %v2545_v3 = vsel %vm2536_vm6, %v2543_v45, %v11815_v24 }
 0xe6b   :  { %v11406_v56 = vpop.f32.mrb[127].mxu1 }
 0xe6f   :  { %v11818_v60 = vpop.permute.xlu1 %11817 }
 0xe70   :  { %v11820_v13 = vunpack.i.h.bf16 %v11818_v60  ;;  %v11819_v33 = vunpack.i.l.bf16 %v11818_v60  ;;  %v15387_v21 = vpop.f32.mrb[128].mxu1 }
 0xe71   :  { %v11417_v27 = vpop.f32.mrb[129].mxu1 }
 0xe72   :  { %v4366_v49 = vpop.f32.mrb[130].mxu1  ;;  %v2546_v2 = vsel %vm2539_vm7, %v2544_v52, %v11819_v33  ;;  %v2547_v25 = vsel %vm2539_vm7, %v2545_v3, %v11820_v13 }
 0xe73   :  { %v11418_v62 = vpop.f32.mrb[131].mxu1  ;;  %v5461_v53 = vpack.c.bf16 %v2547_v25, %v2546_v2 }
 0xe75   :  { %5658 = vmatprep.mubr.bf16.mxu0 %v5461_v53 }
 0xe76   :  { %5659 = vmatmul.mubr.bf16.vlgmr.msra.gmra.mrb[136].mxu0 %v5460_v19 }
 0xe78   :  { %v15393_v50 = vpop.f32.mrb[132].mxu1 }
 0xe79   :  { %v11429_v12 = vpop.f32.mrb[133].mxu1 }
 0xe7a   :  { %v4477_v32 = vpop.f32.mrb[134].mxu1 }
 0xe7b   :  { %v11430_v63 = vpop.f32.mrb[135].mxu1 }
 0xe7f   :  { %v11823_v31 = vpop.permute.xlu0 %11822 }
 0xe80   :  { %v15395_v7 = vpop.f32.mrb[136].mxu1  ;;  %v11825_v8 = vunpack.i.h.bf16 %v11823_v31  ;;  %v11824_v1 = vunpack.i.l.bf16 %v11823_v31 }
 0xe81   :  { %v11441_v0 = vpop.f32.mrb[137].mxu1 }
 0xe82   :  { %v4615_v14 = vpop.f32.mrb[138].mxu1  ;;  %v3579_v28 = vsel %vm1505_vm2, %v15351_v5, %v11825_v8  ;;  %v3578_v58 = vsel %vm1505_vm2, %v15349_v46, %v11824_v1 }
 0xe83   :  { %v11442_v16 = vpop.f32.mrb[139].mxu1 }
 0xe87   :  { %v11828_v42 = vpop.permute.xlu0 %11827 }
 0xe88   :  { %v4726_v54 = vpop.f32.mrb[140].mxu1  ;;  %v11830_v36 = vunpack.i.h.bf16 %v11828_v42  ;;  %v11829_v29 = vunpack.i.l.bf16 %v11828_v42 }
 0xe89   :  { %v11851_v61 = vpack.i.bf16 %v4726_v54, %v15365_v18  ;;  %v11453_v39 = vpop.f32.mrb[141].mxu1 }
 0xe8a   :  { %v4729_v4 = vpop.f32.mrb[142].mxu1  ;;  %v3580_v57 = vsel %vm2536_vm6, %v3578_v58, %v11829_v29  ;;  %v3581_v11 = vsel %vm2536_vm6, %v3579_v28, %v11830_v36 }
 0xe8b   :  { %11852 = vrot.lane.b32.xlu0 %v11851_v61, %s13550_s1  ;;  %v11454_v23 = vpop.f32.mrb[143].mxu1 }
 0xe8f   :  { %v11833_v38 = vpop.permute.xlu0 %11832 }
 0xe90   :  { %v11835_v26 = vunpack.i.h.bf16 %v11833_v38  ;;  %v11834_v19 = vunpack.i.l.bf16 %v11833_v38  ;;  %v4837_v18 = vpop.f32.mrb[144].mxu1 }
 0xe91   :  { %v11856_v34 = vpack.i.bf16 %v4837_v18, %v15371_v48  ;;  %v11465_v30 = vpop.f32.mrb[145].mxu1 }
 0xe92   :  { %v4840_v22 = vpop.f32.mrb[146].mxu1  ;;  %v3582_v41 = vsel %vm2539_vm7, %v3580_v57, %v11834_v19  ;;  %v3583_v17 = vsel %vm2539_vm7, %v3581_v11, %v11835_v26 }
 0xe93   :  { %11857 = vrot.lane.b32.xlu0 %v11856_v34, %s13549_s9  ;;  %v11466_v5 = vpop.f32.mrb[147].mxu1  ;;  %v5462_v37 = vpack.c.bf16 %v3583_v17, %v3582_v41 }
 0xe9e   :  { %v4948_v46 = vpop.f32.mrb[148].mxu1 }
 0xe9f   :  { %v11876_v59 = vpack.i.bf16 %v4948_v46, %v15377_v51  ;;  %v11477_v35 = vpop.f32.mrb[149].mxu1  ;;  %v11838_v20 = vpop.permute.xlu1 %11837 }
 0xea0   :  { %v4951_v56 = vpop.f32.mrb[150].mxu1  ;;  %v11840_v6 = vunpack.i.h.bf16 %v11838_v20  ;;  %v11839_v13 = vunpack.i.l.bf16 %v11838_v20 }
 0xea1   :  { %11877 = vrot.lane.b32.xlu0 %v11876_v59, %s13548_s28  ;;  %v11478_v48 = vpop.f32.mrb[151].mxu1 }
 0xea2   :  { %v3585_v2 = vsel %vm1505_vm2, %v15358_v47, %v11840_v6  ;;  %v3584_v25 = vsel %vm1505_vm2, %v15356_v15, %v11839_v13  ;;  %v5701_v6 = vld [vmem:[#allocation13] sm:$0x3]  ;;  %v16809_v13 = vld [vmem:[#allocation78_spill] sm:$0xff] }
 0xea6   :  { %v15411_v55 = vpop.f32.mrb[152].mxu1 }
 0xea7   :  { %v11489_v24 = vpop.f32.mrb[153].mxu1  ;;  %v11843_v45 = vpop.permute.xlu1 %11842 }
 0xea8   :  { %v5059_v9 = vpop.f32.mrb[154].mxu1  ;;  %v11845_v33 = vunpack.i.h.bf16 %v11843_v45  ;;  %v11844_v27 = vunpack.i.l.bf16 %v11843_v45 }
 0xea9   :  { %v11490_v60 = vpop.f32.mrb[155].mxu1 }
 0xeaa   :  { %v3586_v63 = vsel %vm2536_vm6, %v3584_v25, %v11844_v27  ;;  %v3587_v0 = vsel %vm2536_vm6, %v3585_v2, %v11845_v33  ;;  %v15444_v33 = vrot.slane %v5701_v6, %v16809_v13  ;;  %v16810_v27 = vld [vmem:[#allocation77_spill] sm:$0xff] }
 0xeae   :  { %v5170_v52 = vpop.f32.mrb[156].mxu1 }
 0xeaf   :  { %v11861_v3 = vpack.i.bf16 %v5170_v52, %v15381_v10  ;;  %v11848_v51 = vpop.permute.xlu1 %11847  ;;  %v11501_v49 = vpop.f32.mrb[157].mxu1  ;;  %v16811_v52 = vld [vmem:[#allocation82_spill] sm:$0xff] }
 0xeb0   :  { %v11850_v62 = vunpack.i.h.bf16 %v11848_v51  ;;  %v11849_v53 = vunpack.i.l.bf16 %v11848_v51  ;;  %v5173_v12 = vpop.f32.mrb[158].mxu1  ;;  %v16812_v49 = vld [vmem:[#allocation80_spill] sm:$0xff] }
 0xeb1   :  { %11862 = vrot.lane.b32.xlu1 %v11861_v3, %s13550_s1  ;;  %v11502_v32 = vpop.f32.mrb[159].mxu1 }
 0xeb2   :  { %v3588_v10 = vsel %vm2539_vm7, %v3586_v63, %v11849_v53  ;;  %v3589_v14 = vsel %vm2539_vm7, %v3587_v0, %v11850_v62  ;;  %v16813_v53 = vld [vmem:[#allocation79_spill] sm:$0xff]  ;;  %v16814_v0 = vld [vmem:[#allocation81_spill] sm:$0xff] }
 0xeb3   :  { %v5463_v16 = vpack.c.bf16 %v3589_v14, %v3588_v10 }
 0xeb5   :  { %5668 = vmatprep.mubr.bf16.mxu0 %v5463_v16 }
 0xeb6   :  { %v5281_v47 = vpop.f32.mrb[160].mxu1  ;;  %5669 = vmatmul.mubr.bf16.gmra.mrb[140].mxu0 %v5462_v37 }
 0xeb7   :  { %v11866_v15 = vpack.i.bf16 %v5281_v47, %v15387_v21  ;;  %v11513_v31 = vpop.f32.mrb[161].mxu1 }
 0xeb8   :  { %v5284_v54 = vpop.f32.mrb[162].mxu1 }
 0xeb9   :  { %11867 = vrot.lane.b32.xlu1 %v11866_v15, %s13549_s9  ;;  %v11514_v61 = vpop.f32.mrb[163].mxu1  ;;  %v16815_v54 = vld [vmem:[#allocation83_spill] sm:$0xff] }
 0xebe   :  { %v5392_v39 = vpop.f32.mrb[164].mxu1 }
 0xebf   :  { %v11871_v42 = vpack.i.bf16 %v5392_v39, %v15393_v50  ;;  %v11525_v4 = vpop.f32.mrb[165].mxu1 }
 0xec0   :  { %v5395_v23 = vpop.f32.mrb[166].mxu1 }
 0xec1   :  { %11872 = vrot.lane.b32.xlu1 %v11871_v42, %s13548_s28  ;;  %v11526_v8 = vpop.f32.mrb[167].mxu1  ;;  %v16816_v42 = vld [vmem:[#allocation84_spill] sm:$0xff] }
 0xefd   :  { %v11853_v1 = vpop.permute.xlu0 %11852 }
 0xefe   :  { %v11855_v29 = vunpack.i.h.bf16 %v11853_v1  ;;  %v11854_v38 = vunpack.i.l.bf16 %v11853_v1  ;;  %v16817_v1 = vld [vmem:[#allocation85_spill] sm:$0xff] }
 0xf00   :  { %v5422_v26 = vsel %vm1505_vm2, %v15395_v7, %v11855_v29  ;;  %v4504_v19 = vsel %vm1505_vm2, %v15363_v44, %v11854_v38 }
 0xf05   :  { %v11858_v36 = vpop.permute.xlu0 %11857 }
 0xf06   :  { %v11860_v28 = vunpack.i.h.bf16 %v11858_v36  ;;  %v11859_v58 = vunpack.i.l.bf16 %v11858_v36 }
 0xf08   :  { %v4505_v34 = vsel %vm2536_vm6, %v4504_v19, %v11859_v58  ;;  %v5423_v30 = vsel %vm2536_vm6, %v5422_v26, %v11860_v28  ;;  %v16818_v28 = vld [vmem:[#allocation86_spill] sm:$0xff] }
 0xf13   :  { %v11878_v21 = vpop.permute.xlu0 %11877 }
 0xf14   :  { %v11880_v18 = vunpack.i.h.bf16 %v11878_v21  ;;  %v11879_v50 = vunpack.i.l.bf16 %v11878_v21 }
 0xf16   :  { %v4506_v57 = vsel %vm2539_vm7, %v4505_v34, %v11879_v50  ;;  %v5424_v11 = vsel %vm2539_vm7, %v5423_v30, %v11880_v18  ;;  %v12151_v50 = vld [vmem:[#allocation17] ss:$8 sps:$4 sm:$0xff]   ;;  %v12153_v34 = vld [vmem:[#allocation17 + $0x4] ss:$8 sps:$4 sm:$0xff]   ;;  %v12156_v30 = vld [vmem:[#allocation17 + $0x14] ss:$8 sps:$4 sm:$0xff]  }
 0xf17   :  { %v5464_v22 = vpack.c.bf16 %v5424_v11, %v4506_v57  ;;  %6080 = vmatprep.subr.bf16.mxu1 %v12153_v34  ;;  %v12154_v57 = vld [vmem:[#allocation17 + $0x10] ss:$8 sps:$4 sm:$0xff]   ;;  %v12159_v11 = vld [vmem:[#allocation17 + $0x24] ss:$8 sps:$4 sm:$0xff]  }
 0xf18   :  { %6081 = vmatpush1.bf16.msra.mxu1 %v12151_v50 }
 0xf19   :  { %6082 = vmatprep.subr.bf16.mxu1 %v12156_v30 }
 0xf1c   :  { %6083 = vmatpush1.bf16.msra.mxu1 %v12154_v57  ;;  %v12180_v57 = vld [vmem:[#allocation17 + $0x94] ss:$8 sps:$4 sm:$0xff]  }
 0xf1d   :  { %6084 = vmatprep.subr.bf16.mxu1 %v12159_v11 }
 0xf23   :  { %v11863_v41 = vpop.permute.xlu1 %11862 }
 0xf24   :  { %v11865_v5 = vunpack.i.h.bf16 %v11863_v41  ;;  %v11864_v37 = vunpack.i.l.bf16 %v11863_v41  ;;  %v12162_v41 = vld [vmem:[#allocation17 + $0x34] ss:$8 sps:$4 sm:$0xff]  }
 0xf26   :  { %v5425_v44 = vsel %vm1505_vm2, %v15411_v55, %v11865_v5  ;;  %v4507_v35 = vsel %vm1505_vm2, %v15379_v43, %v11864_v37  ;;  %v15447_v43 = vrot.slane %v5701_v6, %v16810_v27  ;;  %v12165_v5 = vld [vmem:[#allocation17 + $0x44] ss:$8 sps:$4 sm:$0xff]   ;;  %v12163_v37 = vld [vmem:[#allocation17 + $0x40] ss:$8 sps:$4 sm:$0xff]  }
 0xf2b   :  { %v11868_v17 = vpop.permute.xlu1 %11867 }
 0xf2c   :  { %v11870_v46 = vunpack.i.h.bf16 %v11868_v17  ;;  %v11869_v7 = vunpack.i.l.bf16 %v11868_v17  ;;  %v12160_v17 = vld [vmem:[#allocation17 + $0x30] ss:$8 sps:$4 sm:$0xff]  }
 0xf2e   :  { %v4508_v20 = vsel %vm2536_vm6, %v4507_v35, %v11869_v7  ;;  %v5426_v24 = vsel %vm2536_vm6, %v5425_v44, %v11870_v46  ;;  %v12168_v46 = vld [vmem:[#allocation17 + $0x54] ss:$8 sps:$4 sm:$0xff]   ;;  %v12166_v7 = vld [vmem:[#allocation17 + $0x50] ss:$8 sps:$4 sm:$0xff]   ;;  %v12169_v44 = vld [vmem:[#allocation17 + $0x60] ss:$8 sps:$4 sm:$0xff]  }
 0xf2f   :  { %v12174_v35 = vld [vmem:[#allocation17 + $0x74] ss:$8 sps:$4 sm:$0xff]  }
 0xf33   :  { %v11873_v59 = vpop.permute.xlu1 %11872 }
 0xf34   :  { %v11875_v56 = vunpack.i.h.bf16 %v11873_v59  ;;  %v11874_v48 = vunpack.i.l.bf16 %v11873_v59  ;;  %v12171_v59 = vld [vmem:[#allocation17 + $0x64] ss:$8 sps:$4 sm:$0xff]  }
 0xf36   :  { %v4509_v9 = vsel %vm2539_vm7, %v4508_v20, %v11874_v48  ;;  %v5427_v60 = vsel %vm2539_vm7, %v5426_v24, %v11875_v56  ;;  %v12172_v56 = vld [vmem:[#allocation17 + $0x70] ss:$8 sps:$4 sm:$0xff]   ;;  %v12177_v48 = vld [vmem:[#allocation17 + $0x84] ss:$8 sps:$4 sm:$0xff]   ;;  %v12175_v20 = vld [vmem:[#allocation17 + $0x80] ss:$8 sps:$4 sm:$0xff]  }
 0xf37   :  { %v5465_v45 = vpack.c.bf16 %v5427_v60, %v4509_v9 }
 0xf39   :  { %5678 = vmatprep.mubr.bf16.mxu0 %v5465_v45 }
 0xf3a   :  { %5679 = vmatmul.mubr.bf16.gmra.mrb[144].mxu0 %v5464_v22  ;;  %v12157_v22 = vld [vmem:[#allocation17 + $0x20] ss:$8 sps:$4 sm:$0xff]  }
 0xf3b   :  { %6085 = vmatpush1.bf16.msra.mxu1 %v12157_v22  ;;  %v12178_v22 = vld [vmem:[#allocation17 + $0x90] ss:$8 sps:$4 sm:$0xff]  }
 0xf3c   :  { %6086 = vmatprep.subr.bf16.mxu1 %v12162_v41 }
 0xf3f   :  { %6087 = vmatpush1.bf16.msra.mxu1 %v12160_v17  ;;  %v12183_v17 = vld [vmem:[#allocation17 + $0xa4] ss:$8 sps:$4 sm:$0xff]  }
 0xf40   :  { %6088 = vmatprep.subr.bf16.mxu1 %v12165_v5  ;;  %v12184_v5 = vld [vmem:[#allocation17 + $0xb0] ss:$8 sps:$4 sm:$0xff]  }
 0xf43   :  { %6089 = vmatpush1.bf16.msra.mxu1 %v12163_v37  ;;  %v12189_v37 = vld [vmem:[#allocation17 + $0xc4] ss:$8 sps:$4 sm:$0xff]  }
 0xf44   :  { %6090 = vmatprep.subr.bf16.mxu1 %v12168_v46  ;;  %v12187_v46 = vld [vmem:[#allocation17 + $0xc0] ss:$8 sps:$4 sm:$0xff]  }
 0xf47   :  { %6091 = vmatpush1.bf16.msra.mxu1 %v12166_v7  ;;  %v12192_v7 = vld [vmem:[#allocation17 + $0xd4] ss:$8 sps:$4 sm:$0xff]  }
 0xf48   :  { %6092 = vmatprep.subr.bf16.mxu1 %v12171_v59  ;;  %v12190_v59 = vld [vmem:[#allocation17 + $0xd0] ss:$8 sps:$4 sm:$0xff]  }
 0xf49   :  { %v5660_v55 = vpop.f32.mrb[136].mxu0 }
 0xf4a   :  { %v5689_v3 = vadd.f32 %v5660_v55, %v16811_v52  ;;  %v5662_v51 = vpop.f32.mrb[137].mxu0  ;;  %v16819_v55 = vld [vmem:[#allocation87_spill] sm:$0xff] }
 0xf4b   :  { %v5690_v2 = vadd.f32 %v5662_v51, %v16812_v49  ;;  %v5664_v25 = vpop.f32.mrb[138].mxu0  ;;  %6093 = vmatpush1.bf16.msra.mxu1 %v12169_v44  ;;  %v12195_v44 = vld [vmem:[#allocation17 + $0xe4] ss:$8 sps:$4 sm:$0xff]  }
 0xf4c   :  { %v15452_v62 = vadd.f32 %v15444_v33, %v5689_v3  ;;  %v5691_v12 = vadd.f32 %v5664_v25, %v16813_v53  ;;  %v5666_v32 = vpop.f32.mrb[139].mxu0  ;;  %6094 = vmatprep.subr.bf16.mxu1 %v12174_v35  ;;  %v12193_v35 = vld [vmem:[#allocation17 + $0xe0] ss:$8 sps:$4 sm:$0xff]  }
 0xf4d   :  { %v15456_v63 = vadd.f32 %v15447_v43, %v5690_v2  ;;  %v5692_v10 = vadd.f32 %v5666_v32, %v16814_v0  ;;  %v16820_v2 = vld [vmem:[#allocation88_spill] sm:$0xff]  ;;  %v16821_v32 = vld [vmem:[#allocation89_spill] sm:$0xff] }
 0xf4e   :  { %v15460_v14 = vadd.f32 %v15444_v33, %v5691_v12 }
 0xf4f   :  { %v15463_v16 = vadd.f32 %v15447_v43, %v5692_v10  ;;  %v5727_v47 = vadd.f32 %v15456_v63, %v15452_v62  ;;  %6095 = vmatpush1.bf16.msra.mxu1 %v12172_v56  ;;  %v12196_v56 = vld [vmem:[#allocation17 + $0xf0] ss:$8 sps:$4 sm:$0xff]  }
 0xf50   :  { %6096 = vmatprep.subr.bf16.mxu1 %v12177_v48  ;;  %v12198_v48 = vld [vmem:[#allocation17 + $0xf4] ss:$8 sps:$4 sm:$0xff]  }
 0xf51   :  { %5728 = vadd.xlane.f32.xlu1 %v5727_v47  ;;  %v5730_v15 = vadd.f32 %v15463_v16, %v15460_v14 }
 0xf53   :  { %5731 = vadd.xlane.f32.xlu0 %v5730_v15  ;;  %6097 = vmatpush1.bf16.msra.mxu1 %v12175_v20 }
 0xf54   :  { %6098 = vmatprep.subr.bf16.mxu1 %v12180_v57 }
 0xf57   :  { %6099 = vmatpush1.bf16.msra.mxu1 %v12178_v22 }
 0xf58   :  { %6100 = vmatprep.subr.bf16.mxu1 %v12183_v17 }
 0xf89   :  { %v5670_v31 = vpop.f32.mrb[140].mxu0 }
 0xf8a   :  { %v5693_v61 = vadd.f32 %v5670_v31, %v16815_v54  ;;  %v5672_v39 = vpop.f32.mrb[141].mxu0 }
 0xf8b   :  { %v5694_v4 = vadd.f32 %v5672_v39, %v16816_v42  ;;  %v5674_v23 = vpop.f32.mrb[142].mxu0 }
 0xf8c   :  { %v15472_v8 = vadd.f32 %v15444_v33, %v5693_v61  ;;  %v5695_v36 = vadd.f32 %v5674_v23, %v16817_v1  ;;  %v5676_v29 = vpop.f32.mrb[143].mxu0 }
 0xf8d   :  { %v15476_v38 = vadd.f32 %v15447_v43, %v5694_v4  ;;  %v5696_v58 = vadd.f32 %v5676_v29, %v16818_v28 }
 0xf8e   :  { %v15480_v21 = vadd.f32 %v15444_v33, %v5695_v36 }
 0xf8f   :  { %v15483_v26 = vadd.f32 %v15447_v43, %v5696_v58  ;;  %v5733_v19 = vadd.f32 %v15476_v38, %v15472_v8 }
 0xf91   :  { %5734 = vadd.xlane.f32.xlu0 %v5733_v19  ;;  %v5736_v18 = vadd.f32 %v15483_v26, %v15480_v21 }
 0xf93   :  { %5737 = vadd.xlane.f32.xlu1 %v5736_v18 }
 0xfde   :  { %v5729_v24 = vpop.xlane.xlu1 %5728 }
 0xfdf   :  { %v5746_v60 = vmul.f32 0.00390625, %v5729_v24 }
 0xfe0   :  { %v5732_v9 = vpop.xlane.xlu0 %5731 }
 0xfe1   :  { %v5747_v45 = vmul.f32 0.00390625, %v5732_v9  ;;  %v15491_v51 = vsub.f32 %v15452_v62, %v5746_v60  ;;  %v15494_v49 = vsub.f32 %v15456_v63, %v5746_v60  ;;  %v16822_v63 = vld [vmem:[#allocation90_spill] sm:$0xff] }
 0xfe3   :  { %v15502_v47 = vsub.f32 %v15460_v14, %v5747_v45  ;;  %v15505_v15 = vsub.f32 %v15463_v16, %v5747_v45  ;;  %v5764_v61 = vmul.f32 %v15491_v51, %v15491_v51  ;;  %v5765_v39 = vmul.f32 %v15494_v49, %v15494_v49 }
 0xfe5   :  { %v5766_v42 = vmul.f32 %v15502_v47, %v15502_v47  ;;  %v5767_v4 = vmul.f32 %v15505_v15, %v15505_v15  ;;  %v5776_v23 = vadd.f32 %v5765_v39, %v5764_v61 }
 0xfe7   :  { %v5779_v1 = vadd.f32 %v5767_v4, %v5766_v42 }
0x100d   :  { %v5680_v6 = vpop.f32.mrb[144].mxu0 }
0x100e   :  { %v5697_v52 = vadd.f32 %v5680_v6, %v16819_v55  ;;  %v5682_v3 = vpop.f32.mrb[145].mxu0 }
0x100f   :  { %v5698_v25 = vadd.f32 %v5682_v3, %v16820_v2  ;;  %v5684_v53 = vpop.f32.mrb[146].mxu0 }
0x1010   :  { %v15498_v12 = vadd.f32 %v15444_v33, %v5697_v52  ;;  %v5699_v0 = vadd.f32 %v5684_v53, %v16821_v32  ;;  %v5686_v10 = vpop.f32.mrb[147].mxu0 }
0x1011   :  { %v15508_v62 = vadd.f32 %v15447_v43, %v5698_v25  ;;  %v5700_v31 = vadd.f32 %v5686_v10, %v16822_v63 }
0x1012   :  { %v15512_v54 = vadd.f32 %v15444_v33, %v5699_v0 }
0x1013   :  { %v15519_v14 = vadd.f32 %v15447_v43, %v5700_v31  ;;  %v5739_v16 = vadd.f32 %v15508_v62, %v15498_v12 }
0x1015   :  { %5740 = vadd.xlane.f32.xlu0 %v5739_v16  ;;  %v5742_v33 = vadd.f32 %v15519_v14, %v15512_v54  ;;  %v5726_v16 = vld [vmem:[#allocation16] sm:$0x3] }
0x1016   :  { %v15582_v57 = vrot.slane %v5726_v16, %v16810_v27 }
0x1017   :  { %5743 = vadd.xlane.f32.xlu1 %v5742_v33 }
0x1019   :  { %5777 = vadd.xlane.f32.xlu0 %v5776_v23 }
0x101b   :  { %5780 = vadd.xlane.f32.xlu1 %v5779_v1 }
0x101e   :  { %v5735_v43 = vpop.xlane.xlu0 %5734 }
0x101f   :  { %v5748_v36 = vmul.f32 0.00390625, %v5735_v43 }
0x1020   :  { %v5738_v29 = vpop.xlane.xlu1 %5737 }
0x1021   :  { %v15530_v28 = vsub.f32 %v15472_v8, %v5748_v36  ;;  %v15533_v58 = vsub.f32 %v15476_v38, %v5748_v36  ;;  %v5749_v19 = vmul.f32 0.00390625, %v5738_v29 }
0x1023   :  { %v5768_v18 = vmul.f32 %v15530_v28, %v15530_v28  ;;  %v5769_v50 = vmul.f32 %v15533_v58, %v15533_v58  ;;  %v15540_v34 = vsub.f32 %v15480_v21, %v5749_v19  ;;  %v15543_v30 = vsub.f32 %v15483_v26, %v5749_v19  ;;  %v12181_v21 = vld [vmem:[#allocation17 + $0xa0] ss:$8 sps:$4 sm:$0xff]   ;;  %v12186_v26 = vld [vmem:[#allocation17 + $0xb4] ss:$8 sps:$4 sm:$0xff]  }
0x1024   :  { %6101 = vmatpush1.bf16.msra.mxu1 %v12181_v21 }
0x1025   :  { %v5770_v8 = vmul.f32 %v15540_v34, %v15540_v34  ;;  %v5771_v38 = vmul.f32 %v15543_v30, %v15543_v30  ;;  %v5782_v11 = vadd.f32 %v5769_v50, %v5768_v18  ;;  %6102 = vmatprep.subr.bf16.mxu1 %v12186_v26  ;;  %v15579_v50 = vrot.slane %v5726_v16, %v16809_v13  ;;  %v12225_v16 = vld [vmem:[#allocation20 + $0x84] ss:$8 sps:$4 sm:$0xff]  }
0x1027   :  { %5783 = vadd.xlane.f32.xlu0 %v5782_v11  ;;  %v5785_v41 = vadd.f32 %v5771_v38, %v5770_v8 }
0x1028   :  { %6103 = vmatpush1.bf16.msra.mxu1 %v12184_v5 }
0x1029   :  { %5786 = vadd.xlane.f32.xlu1 %v5785_v41  ;;  %6104 = vmatprep.subr.bf16.mxu1 %v12189_v37 }
0x102c   :  { %6105 = vmatpush1.bf16.msra.mxu1 %v12187_v46 }
0x102d   :  { %6106 = vmatprep.subr.bf16.mxu1 %v12192_v7 }
0x1030   :  { %6107 = vmatpush1.bf16.msra.mxu1 %v12190_v59 }
0x1031   :  { %6108 = vmatprep.subr.bf16.mxu1 %v12195_v44 }
0x1034   :  { %6109 = vmatpush1.bf16.msra.mxu1 %v12193_v35 }
0x1035   :  { %6110 = vmatprep.subr.bf16.mxu1 %v12198_v48 }
0x1038   :  { %6111 = vmatpush1.bf16.msra.mxu1 %v12196_v56 }
0x10a2   :  { %v5741_v20 = vpop.xlane.xlu0 %5740 }
0x10a3   :  { %v5750_v24 = vmul.f32 0.00390625, %v5741_v20 }
0x10a4   :  { %v5744_v9 = vpop.xlane.xlu1 %5743 }
0x10a5   :  { %v15550_v60 = vsub.f32 %v15498_v12, %v5750_v24  ;;  %v15553_v45 = vsub.f32 %v15508_v62, %v5750_v24  ;;  %v5751_v6 = vmul.f32 0.00390625, %v5744_v9 }
0x10a6   :  { %v5778_v55 = vpop.xlane.xlu0 %5777 }
0x10a7   :  { %v5772_v52 = vmul.f32 %v15550_v60, %v15550_v60  ;;  %v5773_v3 = vmul.f32 %v15553_v45, %v15553_v45  ;;  %v15560_v2 = vsub.f32 %v15512_v54, %v5751_v6  ;;  %v15563_v25 = vsub.f32 %v15519_v14, %v5751_v6  ;;  %v5725_v54 = vld [vmem:[#allocation14] sm:$0x3]  ;;  %v12199_v6 = vld [vmem:[#allocation20] ss:$8 sps:$4 sm:$0xff]  }
0x10a8   :  { %v5794_v53 = vmul.f32 0.00390625, %v5778_v55  ;;  %v5781_v12 = vpop.xlane.xlu1 %5780  ;;  %v15570_v42 = vrot.slane %v5725_v54, %v16809_v13  ;;  %v15573_v4 = vrot.slane %v5725_v54, %v16810_v27  ;;  %v12201_v55 = vld [vmem:[#allocation20 + $0x4] ss:$8 sps:$4 sm:$0xff]   ;;  %v12217_v54 = vld [vmem:[#allocation20 + $0x60] ss:$8 sps:$4 sm:$0xff]  }
0x10a9   :  { %v5774_v32 = vmul.f32 %v15560_v2, %v15560_v2  ;;  %v5775_v0 = vmul.f32 %v15563_v25, %v15563_v25  ;;  %v5795_v10 = vmul.f32 0.00390625, %v5781_v12  ;;  %v5788_v62 = vadd.f32 %v5773_v3, %v5772_v52  ;;  %v12204_v52 = vld [vmem:[#allocation20 + $0x14] ss:$8 sps:$4 sm:$0xff]   ;;  %6353 = vmatprep.subr.bf16.mxu0 %v12201_v55  ;;  %v12202_v3 = vld [vmem:[#allocation20 + $0x10] ss:$8 sps:$4 sm:$0xff]  }
0x10aa   :  { %v5800_v63 = vadd.f32 1e-05, %v5794_v53  ;;  %6354 = vmatpush1.bf16.msra.mxu0 %v12199_v6  ;;  %v12207_v53 = vld [vmem:[#allocation20 + $0x24] ss:$8 sps:$4 sm:$0xff]   ;;  %v12205_v12 = vld [vmem:[#allocation20 + $0x20] ss:$8 sps:$4 sm:$0xff]  }
0x10ab   :  { %v5801_v31 = vadd.f32 1e-05, %v5795_v10  ;;  %5789 = vadd.xlane.f32.xlu0 %v5788_v62  ;;  %v5791_v61 = vadd.f32 %v5775_v0, %v5774_v32  ;;  %6355 = vmatprep.subr.bf16.mxu0 %v12204_v52  ;;  %v12210_v32 = vld [vmem:[#allocation20 + $0x34] ss:$8 sps:$4 sm:$0xff]   ;;  %v12208_v0 = vld [vmem:[#allocation20 + $0x30] ss:$8 sps:$4 sm:$0xff]  }
0x10ac   :  { %12695 = vrsqrt.f32 %v5800_v63  ;;  %v12213_v10 = vld [vmem:[#allocation20 + $0x44] ss:$8 sps:$4 sm:$0xff]   ;;  %v12211_v62 = vld [vmem:[#allocation20 + $0x40] ss:$8 sps:$4 sm:$0xff]   ;;  %v12216_v63 = vld [vmem:[#allocation20 + $0x54] ss:$8 sps:$4 sm:$0xff]  }
0x10ad   :  { %12697 = vrsqrt.f32 %v5801_v31  ;;  %5792 = vadd.xlane.f32.xlu1 %v5791_v61  ;;  %v12214_v31 = vld [vmem:[#allocation20 + $0x50] ss:$8 sps:$4 sm:$0xff]   ;;  %v12219_v61 = vld [vmem:[#allocation20 + $0x64] ss:$8 sps:$4 sm:$0xff]  }
0x10ae   :  { %6356 = vmatpush1.bf16.msra.mxu0 %v12202_v3 }
0x10af   :  { %6357 = vmatprep.subr.bf16.mxu0 %v12207_v53 }
0x10b2   :  { %6358 = vmatpush1.bf16.msra.mxu0 %v12205_v12 }
0x10b3   :  { %6359 = vmatprep.subr.bf16.mxu0 %v12210_v32 }
0x10b4   :  { %v5784_v39 = vpop.xlane.xlu0 %5783 }
0x10b5   :  { %v5796_v14 = vmul.f32 0.00390625, %v5784_v39  ;;  %v12222_v39 = vld [vmem:[#allocation20 + $0x74] ss:$8 sps:$4 sm:$0xff]  }
0x10b6   :  { %v12696_v33 = vpop.eup %12695  ;;  %v5787_v23 = vpop.xlane.xlu1 %5786  ;;  %6360 = vmatpush1.bf16.msra.mxu0 %v12208_v0 }
0x10b7   :  { %v12698_v1 = vpop.eup %12697  ;;  %v5802_v43 = vadd.f32 1e-05, %v5796_v14  ;;  %v5797_v36 = vmul.f32 0.00390625, %v5787_v23  ;;  %v5813_v29 = vmul.f32 %v12696_v33, %v15494_v49  ;;  %v5812_v19 = vmul.f32 %v12696_v33, %v15491_v51  ;;  %6361 = vmatprep.subr.bf16.mxu0 %v12213_v10  ;;  %v12220_v14 = vld [vmem:[#allocation20 + $0x70] ss:$8 sps:$4 sm:$0xff]  }
0x10b8   :  { %v5815_v18 = vmul.f32 %v12698_v1, %v15505_v15  ;;  %v5814_v8 = vmul.f32 %v12698_v1, %v15502_v47  ;;  %v12223_v33 = vld [vmem:[#allocation20 + $0x80] ss:$8 sps:$4 sm:$0xff]   ;;  %v12228_v23 = vld [vmem:[#allocation20 + $0x94] ss:$8 sps:$4 sm:$0xff]   ;;  %v12226_v1 = vld [vmem:[#allocation20 + $0x90] ss:$8 sps:$4 sm:$0xff]  }
0x10b9   :  { %12699 = vrsqrt.f32 %v5802_v43  ;;  %v5803_v38 = vadd.f32 1e-05, %v5797_v36  ;;  %v5836_v11 = vmul.f32 %v15573_v4, %v5813_v29  ;;  %v5835_v22 = vmul.f32 %v15570_v42, %v5812_v19  ;;  %v12231_v43 = vld [vmem:[#allocation20 + $0xa4] ss:$8 sps:$4 sm:$0xff]   ;;  %v12229_v36 = vld [vmem:[#allocation20 + $0xa0] ss:$8 sps:$4 sm:$0xff]  }
0x10ba   :  { %v5838_v49 = vmul.f32 %v15573_v4, %v5815_v18  ;;  %v5837_v51 = vmul.f32 %v15570_v42, %v5814_v8  ;;  %6362 = vmatpush1.bf16.msra.mxu0 %v12211_v62  ;;  %v12234_v29 = vld [vmem:[#allocation20 + $0xb4] ss:$8 sps:$4 sm:$0xff]   ;;  %v12232_v19 = vld [vmem:[#allocation20 + $0xb0] ss:$8 sps:$4 sm:$0xff]   ;;  %v12237_v18 = vld [vmem:[#allocation20 + $0xc4] ss:$8 sps:$4 sm:$0xff]  }
0x10bb   :  { %12701 = vrsqrt.f32 %v5803_v38  ;;  %v15590_v15 = vadd.f32 %v15582_v57, %v5836_v11  ;;  %v15596_v17 = vadd.f32 %v15579_v50, %v5835_v22  ;;  %6363 = vmatprep.subr.bf16.mxu0 %v12216_v63  ;;  %v12235_v8 = vld [vmem:[#allocation20 + $0xc0] ss:$8 sps:$4 sm:$0xff]   ;;  %v12240_v38 = vld [vmem:[#allocation20 + $0xd4] ss:$8 sps:$4 sm:$0xff]   ;;  %v12238_v11 = vld [vmem:[#allocation20 + $0xd0] ss:$8 sps:$4 sm:$0xff]  }
0x10bc   :  { %v15593_v41 = vadd.f32 %v15582_v57, %v5838_v49  ;;  %v15599_v47 = vadd.f32 %v15579_v50, %v5837_v51  ;;  %v12243_v22 = vld [vmem:[#allocation20 + $0xe4] ss:$8 sps:$4 sm:$0xff]   ;;  %v12241_v49 = vld [vmem:[#allocation20 + $0xe0] ss:$8 sps:$4 sm:$0xff]   ;;  %v12246_v51 = vld [vmem:[#allocation20 + $0xf4] ss:$8 sps:$4 sm:$0xff]  }
0x10be   :  { %v5903_v21 = vpack.c.bf16 %v15593_v41, %v15590_v15  ;;  %v5902_v26 = vpack.c.bf16 %v15599_v47, %v15596_v17  ;;  %6364 = vmatpush1.bf16.msra.mxu0 %v12214_v31 }
0x10bf   :  { %6365 = vmatprep.subr.bf16.mxu0 %v12219_v61 }
0x10c0   :  { %6112 = vmatprep.mubr.bf16.mxu1 %v5903_v21  ;;  %v12244_v21 = vld [vmem:[#allocation20 + $0xf0] ss:$8 sps:$4 sm:$0xff]  }
0x10c1   :  { %6113 = vmatmul.mubr.bf16.vlgmr.msra.gmra.mrb[168].mxu1 %v5902_v26 }
0x10c2   :  { %6366 = vmatpush1.bf16.msra.mxu0 %v12217_v54 }
0x10c3   :  { %v12700_v5 = vpop.eup %12699  ;;  %6367 = vmatprep.subr.bf16.mxu0 %v12222_v39 }
0x10c4   :  { %v5817_v37 = vmul.f32 %v12700_v5, %v15533_v58  ;;  %v5816_v46 = vmul.f32 %v12700_v5, %v15530_v28 }
0x10c5   :  { %v12702_v7 = vpop.eup %12701 }
0x10c6   :  { %v5819_v59 = vmul.f32 %v12702_v7, %v15543_v30  ;;  %v5840_v44 = vmul.f32 %v15573_v4, %v5817_v37  ;;  %v5818_v35 = vmul.f32 %v12702_v7, %v15540_v34  ;;  %v5839_v56 = vmul.f32 %v15570_v42, %v5816_v46  ;;  %6368 = vmatpush1.bf16.msra.mxu0 %v12220_v14 }
0x10c7   :  { %6369 = vmatprep.subr.bf16.mxu0 %v12225_v16 }
0x10c8   :  { %v5842_v48 = vmul.f32 %v15573_v4, %v5819_v59  ;;  %v5841_v20 = vmul.f32 %v15570_v42, %v5818_v35  ;;  %v15614_v24 = vadd.f32 %v15582_v57, %v5840_v44  ;;  %v15620_v28 = vadd.f32 %v15579_v50, %v5839_v56 }
0x10ca   :  { %v15617_v58 = vadd.f32 %v15582_v57, %v5842_v48  ;;  %v15623_v30 = vadd.f32 %v15579_v50, %v5841_v20  ;;  %6370 = vmatpush1.bf16.msra.mxu0 %v12223_v33 }
0x10cb   :  { %6371 = vmatprep.subr.bf16.mxu0 %v12228_v23 }
0x10cc   :  { %v5905_v34 = vpack.c.bf16 %v15617_v58, %v15614_v24  ;;  %v5904_v9 = vpack.c.bf16 %v15623_v30, %v15620_v28 }
0x10ce   :  { %6122 = vmatprep.mubr.bf16.mxu1 %v5905_v34  ;;  %6372 = vmatpush1.bf16.msra.mxu0 %v12226_v1 }
0x10cf   :  { %6123 = vmatmul.mubr.bf16.gmra.mrb[172].mxu1 %v5904_v9  ;;  %6373 = vmatprep.subr.bf16.mxu0 %v12231_v43 }
0x10d2   :  { %6374 = vmatpush1.bf16.msra.mxu0 %v12229_v36 }
0x10d3   :  { %6375 = vmatprep.subr.bf16.mxu0 %v12234_v29 }
0x10d6   :  { %6376 = vmatpush1.bf16.msra.mxu0 %v12232_v19 }
0x10d7   :  { %6377 = vmatprep.subr.bf16.mxu0 %v12237_v18 }
0x10da   :  { %6378 = vmatpush1.bf16.msra.mxu0 %v12235_v8 }
0x10db   :  { %6379 = vmatprep.subr.bf16.mxu0 %v12240_v38 }
0x10de   :  { %6380 = vmatpush1.bf16.msra.mxu0 %v12238_v11 }
0x10df   :  { %6381 = vmatprep.subr.bf16.mxu0 %v12243_v22 }
0x10e2   :  { %6382 = vmatpush1.bf16.msra.mxu0 %v12241_v49 }
0x10e3   :  { %6383 = vmatprep.subr.bf16.mxu0 %v12246_v51 }
0x10e6   :  { %6384 = vmatpush1.bf16.msra.mxu0 %v12244_v21 }
0x1138   :  { %v5790_v26 = vpop.xlane.xlu0 %5789 }
0x1139   :  { %v5798_v5 = vmul.f32 0.00390625, %v5790_v26 }
0x113a   :  { %v5793_v37 = vpop.xlane.xlu1 %5792 }
0x113b   :  { %v5804_v46 = vadd.f32 1e-05, %v5798_v5  ;;  %v5799_v7 = vmul.f32 0.00390625, %v5793_v37 }
0x113d   :  { %12703 = vrsqrt.f32 %v5804_v46  ;;  %v5805_v59 = vadd.f32 1e-05, %v5799_v7 }
0x113f   :  { %12705 = vrsqrt.f32 %v5805_v59 }
0x1147   :  { %v12704_v44 = vpop.eup %12703 }
0x1148   :  { %v5821_v35 = vmul.f32 %v12704_v44, %v15553_v45  ;;  %v5820_v56 = vmul.f32 %v12704_v44, %v15550_v60 }
0x1149   :  { %v12706_v48 = vpop.eup %12705 }
0x114a   :  { %v5823_v20 = vmul.f32 %v12706_v48, %v15563_v25  ;;  %v5844_v34 = vmul.f32 %v15573_v4, %v5821_v35  ;;  %v5822_v9 = vmul.f32 %v12706_v48, %v15560_v2  ;;  %v5843_v6 = vmul.f32 %v15570_v42, %v5820_v56 }
0x114c   :  { %v5846_v55 = vmul.f32 %v15573_v4, %v5823_v20  ;;  %v5845_v52 = vmul.f32 %v15570_v42, %v5822_v9  ;;  %v15638_v3 = vadd.f32 %v15582_v57, %v5844_v34  ;;  %v15644_v60 = vadd.f32 %v15579_v50, %v5843_v6  ;;  %v5908_v42 = vld [vmem:[#allocation19] sm:$0x3] }
0x114d   :  { %v5913_v53 = vrot.slane %v5908_v42, %v16809_v13 }
0x114e   :  { %v15641_v45 = vadd.f32 %v15582_v57, %v5846_v55  ;;  %v15647_v25 = vadd.f32 %v15579_v50, %v5845_v52  ;;  %v5917_v57 = vrot.slane %v5908_v42, %v16810_v27 }
0x1150   :  { %v5907_v2 = vpack.c.bf16 %v15641_v45, %v15638_v3  ;;  %v5906_v4 = vpack.c.bf16 %v15647_v25, %v15644_v60 }
0x1152   :  { %6132 = vmatprep.mubr.bf16.mxu1 %v5907_v2 }
0x1153   :  { %6133 = vmatmul.mubr.bf16.gmra.mrb[176].mxu1 %v5906_v4 }
0x1194   :  { %v6114_v12 = vpop.f32.mrb[168].mxu1 }
0x1195   :  { %v6115_v32 = vadd.f32 %v6114_v12, %v5913_v53  ;;  %v6116_v0 = vpop.f32.mrb[169].mxu1 }
0x1196   :  { %v6117_v10 = vadd.f32 %v6116_v0, %v5917_v57  ;;  %v6118_v62 = vpop.f32.mrb[170].mxu1 }
0x1197   :  { %v6119_v50 = vadd.f32 %v6118_v62, %v5913_v53  ;;  %v6120_v63 = vpop.f32.mrb[171].mxu1  ;;  %v6143_v61 = vmax.f32 %v6115_v32, 0.0 }
0x1198   :  { %v6121_v31 = vadd.f32 %v6120_v63, %v5917_v57  ;;  %v6144_v39 = vmax.f32 %v6117_v10, 0.0  ;;  %v6428_v10 = vld [vmem:[#allocation22] sm:$0x3] }
0x1199   :  { %v6145_v54 = vmax.f32 %v6119_v50, 0.0  ;;  %v6437_v63 = vrot.slane %v6428_v10, %v16810_v27 }
0x119a   :  { %v6146_v14 = vmax.f32 %v6121_v31, 0.0 }
0x119b   :  { %v6187_v16 = vpack.c.bf16 %v6145_v54, %v6143_v61 }
0x119c   :  { %v6188_v33 = vpack.c.bf16 %v6146_v14, %v6144_v39 }
0x119e   :  { %6385 = vmatprep.mubr.bf16.mxu0 %v6188_v33 }
0x119f   :  { %6386 = vmatmul.mubr.bf16.vlgmr.msra.gmra.mrb[148].mxu0 %v6187_v16 }
0x11a2   :  { %v6124_v23 = vpop.f32.mrb[172].mxu1 }
0x11a3   :  { %v6125_v1 = vadd.f32 %v6124_v23, %v5913_v53  ;;  %v6126_v43 = vpop.f32.mrb[173].mxu1 }
0x11a4   :  { %v6127_v36 = vadd.f32 %v6126_v43, %v5917_v57  ;;  %v6128_v29 = vpop.f32.mrb[174].mxu1 }
0x11a5   :  { %v6129_v19 = vadd.f32 %v6128_v29, %v5913_v53  ;;  %v6130_v18 = vpop.f32.mrb[175].mxu1  ;;  %v6147_v38 = vmax.f32 %v6125_v1, 0.0 }
0x11a6   :  { %v6131_v8 = vadd.f32 %v6130_v18, %v5917_v57  ;;  %v6148_v22 = vmax.f32 %v6127_v36, 0.0 }
0x11a7   :  { %v6149_v11 = vmax.f32 %v6129_v19, 0.0 }
0x11a8   :  { %v6150_v49 = vmax.f32 %v6131_v8, 0.0 }
0x11a9   :  { %v6189_v51 = vpack.c.bf16 %v6149_v11, %v6147_v38 }
0x11aa   :  { %v6190_v21 = vpack.c.bf16 %v6150_v49, %v6148_v22 }
0x11ac   :  { %6395 = vmatprep.mubr.bf16.mxu0 %v6190_v21  ;;  %v12249_v21 = vld [vmem:[%s16823_s2 + $0x4] ss:$16 sps:$4 sm:$0xff]  }
0x11ad   :  { %6396 = vmatmul.mubr.bf16.gmra.mrb[152].mxu0 %v6189_v51  ;;  %v12247_v51 = vld [vmem:[%s16823_s2] ss:$16 sps:$4 sm:$0xff]   ;;  %7265 = vmatprep.subr.bf16.mxu0 %v12249_v21 }
0x11ae   :  { %7266 = vmatpush1.bf16.msra.mxu0 %v12247_v51 }
0x1226   :  { %v6134_v26 = vpop.f32.mrb[176].mxu1 }
0x1227   :  { %v6135_v5 = vadd.f32 %v6134_v26, %v5913_v53  ;;  %v6136_v37 = vpop.f32.mrb[177].mxu1  ;;  %v12250_v26 = vld [vmem:[#allocation26] ss:$8 sps:$4 sm:$0xff]  }
0x1228   :  { %v6137_v46 = vadd.f32 %v6136_v37, %v5917_v57  ;;  %v6138_v7 = vpop.f32.mrb[178].mxu1  ;;  %v12255_v37 = vld [vmem:[%s16823_s2 + $0x24] ss:$16 sps:$4 sm:$0xff]  }
0x1229   :  { %v6139_v59 = vadd.f32 %v6138_v7, %v5913_v53  ;;  %v6140_v44 = vpop.f32.mrb[179].mxu1  ;;  %v6151_v56 = vmax.f32 %v6135_v5, 0.0  ;;  %v6433_v53 = vrot.slane %v6428_v10, %v16809_v13  ;;  %v12252_v5 = vld [vmem:[#allocation26 + $0x4] ss:$8 sps:$4 sm:$0xff]   ;;  %7267 = vmatprep.subr.bf16.mxu0 %v12255_v37  ;;  %v12285_v10 = vld [vmem:[%s16823_s2 + $0xc4] ss:$16 sps:$4 sm:$0xff]  }
0x122a   :  { %v6141_v35 = vadd.f32 %v6140_v44, %v5917_v57  ;;  %v6152_v20 = vmax.f32 %v6137_v46, 0.0  ;;  %v12258_v46 = vld [vmem:[#allocation26 + $0x14] ss:$8 sps:$4 sm:$0xff]   ;;  %6804 = vmatprep.subr.bf16.mxu1 %v12252_v5  ;;  %v12261_v44 = vld [vmem:[%s16823_s2 + $0x44] ss:$16 sps:$4 sm:$0xff]  }
0x122b   :  { %v6153_v48 = vmax.f32 %v6139_v59, 0.0  ;;  %v12253_v7 = vld [vmem:[%s16823_s2 + $0x20] ss:$16 sps:$4 sm:$0xff]   ;;  %6805 = vmatpush1.bf16.msra.mxu1 %v12250_v26  ;;  %v12256_v59 = vld [vmem:[#allocation26 + $0x10] ss:$8 sps:$4 sm:$0xff]  }
0x122c   :  { %v6154_v34 = vmax.f32 %v6141_v35, 0.0  ;;  %6806 = vmatprep.subr.bf16.mxu1 %v12258_v46  ;;  %v12264_v35 = vld [vmem:[#allocation26 + $0x24] ss:$8 sps:$4 sm:$0xff]   ;;  %7268 = vmatpush1.bf16.msra.mxu0 %v12253_v7 }
0x122d   :  { %v6191_v9 = vpack.c.bf16 %v6153_v48, %v6151_v56  ;;  %v12259_v56 = vld [vmem:[%s16823_s2 + $0x40] ss:$16 sps:$4 sm:$0xff]   ;;  %7269 = vmatprep.subr.bf16.mxu0 %v12261_v44  ;;  %v12262_v48 = vld [vmem:[#allocation26 + $0x20] ss:$8 sps:$4 sm:$0xff]  }
0x122e   :  { %v6192_v6 = vpack.c.bf16 %v6154_v34, %v6152_v20  ;;  %v12267_v20 = vld [vmem:[%s16823_s2 + $0x64] ss:$16 sps:$4 sm:$0xff]   ;;  %v12270_v34 = vld [vmem:[#allocation26 + $0x34] ss:$8 sps:$4 sm:$0xff]  }
0x122f   :  { %6807 = vmatpush1.bf16.msra.mxu1 %v12256_v59 }
0x1230   :  { %6405 = vmatprep.mubr.bf16.mxu0 %v6192_v6  ;;  %6808 = vmatprep.subr.bf16.mxu1 %v12264_v35  ;;  %v12268_v6 = vld [vmem:[#allocation26 + $0x30] ss:$8 sps:$4 sm:$0xff]  }
0x1231   :  { %6406 = vmatmul.mubr.bf16.gmra.mrb[156].mxu0 %v6191_v9  ;;  %v12265_v9 = vld [vmem:[%s16823_s2 + $0x60] ss:$16 sps:$4 sm:$0xff]  }
0x1232   :  { %7270 = vmatpush1.bf16.msra.mxu0 %v12259_v56 }
0x1233   :  { %6809 = vmatpush1.bf16.msra.mxu1 %v12262_v48  ;;  %7271 = vmatprep.subr.bf16.mxu0 %v12267_v20 }
0x1234   :  { %6810 = vmatprep.subr.bf16.mxu1 %v12270_v34 }
0x1236   :  { %7272 = vmatpush1.bf16.msra.mxu0 %v12265_v9 }
0x1237   :  { %6811 = vmatpush1.bf16.msra.mxu1 %v12268_v6 }
0x1272   :  { %v6387_v55 = vpop.f32.mrb[148].mxu0 }
0x1273   :  { %v6389_v52 = vpop.f32.mrb[149].mxu0  ;;  %v6416_v62 = vadd.f32 %v6387_v55, %v15596_v17  ;;  %v12273_v55 = vld [vmem:[%s16823_s2 + $0x84] ss:$16 sps:$4 sm:$0xff]  }
0x1274   :  { %v6391_v2 = vpop.f32.mrb[150].mxu0  ;;  %v6417_v50 = vadd.f32 %v6389_v52, %v15590_v15  ;;  %v12276_v52 = vld [vmem:[#allocation26 + $0x44] ss:$8 sps:$4 sm:$0xff]   ;;  %7273 = vmatprep.subr.bf16.mxu0 %v12273_v55 }
0x1275   :  { %v6393_v4 = vpop.f32.mrb[151].mxu0  ;;  %v6418_v14 = vadd.f32 %v6391_v2, %v15599_v47  ;;  %v15669_v43 = vadd.f32 %v6433_v53, %v6416_v62  ;;  %v12271_v2 = vld [vmem:[%s16823_s2 + $0x80] ss:$16 sps:$4 sm:$0xff]   ;;  %6812 = vmatprep.subr.bf16.mxu1 %v12276_v52  ;;  %v12286_v62 = vld [vmem:[#allocation26 + $0x60] ss:$8 sps:$4 sm:$0xff]  }
0x1276   :  { %v6419_v1 = vadd.f32 %v6393_v4, %v15593_v41  ;;  %v12274_v4 = vld [vmem:[#allocation26 + $0x40] ss:$8 sps:$4 sm:$0xff]   ;;  %7274 = vmatpush1.bf16.msra.mxu0 %v12271_v2 }
0x1277   :  { %v15681_v41 = vadd.f32 %v6433_v53, %v6418_v14  ;;  %6813 = vmatpush1.bf16.msra.mxu1 %v12274_v4  ;;  %v12295_v14 = vld [vmem:[%s16823_s2 + $0x100] ss:$16 sps:$4 sm:$0xff]  }
0x1278   :  { %v15683_v19 = vadd.f32 %v6437_v63, %v6419_v1  ;;  %v12301_v1 = vld [vmem:[%s16823_s2 + $0x120] ss:$16 sps:$4 sm:$0xff]  }
0x1280   :  { %v6397_v42 = vpop.f32.mrb[152].mxu0 }
0x1281   :  { %v6399_v12 = vpop.f32.mrb[153].mxu0 }
0x1282   :  { %v6401_v32 = vpop.f32.mrb[154].mxu0  ;;  %v6421_v47 = vadd.f32 %v6399_v12, %v15614_v24  ;;  %v12282_v12 = vld [vmem:[#allocation26 + $0x54] ss:$8 sps:$4 sm:$0xff]  }
0x1283   :  { %v6403_v0 = vpop.f32.mrb[155].mxu0  ;;  %6814 = vmatprep.subr.bf16.mxu1 %v12282_v12  ;;  %v12306_v12 = vld [vmem:[#allocation26 + $0x94] ss:$8 sps:$4 sm:$0xff]  }
0x1284   :  { %v6423_v18 = vadd.f32 %v6403_v0, %v15617_v58  ;;  %v15691_v8 = vadd.f32 %v6437_v63, %v6421_v47  ;;  %v6457_v58 = vadd.f32 %v15683_v19, %v15681_v41  ;;  %v12280_v0 = vld [vmem:[#allocation26 + $0x50] ss:$8 sps:$4 sm:$0xff]  }
0x1285   :  { %6815 = vmatpush1.bf16.msra.mxu1 %v12280_v0  ;;  %v12312_v0 = vld [vmem:[#allocation26 + $0xa4] ss:$8 sps:$4 sm:$0xff]  }
0x1304   :  { %v6407_v57 = vpop.f32.mrb[156].mxu0 }
0x1305   :  { %v6424_v31 = vadd.f32 %v6407_v57, %v15644_v60  ;;  %v6409_v61 = vpop.f32.mrb[157].mxu0  ;;  %v15671_v60 = vadd.f32 %v6437_v63, %v6417_v50  ;;  %v12283_v57 = vld [vmem:[%s16823_s2 + $0xc0] ss:$16 sps:$4 sm:$0xff]   ;;  %v12291_v50 = vld [vmem:[%s16823_s2 + $0xe4] ss:$16 sps:$4 sm:$0xff]  }
0x1306   :  { %v6425_v54 = vadd.f32 %v6409_v61, %v15638_v3  ;;  %v6411_v39 = vpop.f32.mrb[158].mxu0  ;;  %v6420_v3 = vadd.f32 %v6397_v42, %v15620_v28  ;;  %v12279_v42 = vld [vmem:[%s16823_s2 + $0xa4] ss:$16 sps:$4 sm:$0xff]  }
0x1307   :  { %v15662_v16 = vadd.f32 %v6433_v53, %v6424_v31  ;;  %v6426_v33 = vadd.f32 %v6411_v39, %v15647_v25  ;;  %v6413_v23 = vpop.f32.mrb[159].mxu0  ;;  %v6454_v38 = vadd.f32 %v15671_v60, %v15669_v43  ;;  %7275 = vmatprep.subr.bf16.mxu0 %v12279_v42  ;;  %v12289_v31 = vld [vmem:[%s16823_s2 + $0xe0] ss:$16 sps:$4 sm:$0xff]   ;;  %v12292_v61 = vld [vmem:[#allocation26 + $0x70] ss:$8 sps:$4 sm:$0xff]  }
0x1308   :  { %v15666_v17 = vadd.f32 %v6437_v63, %v6425_v54  ;;  %v6427_v15 = vadd.f32 %v6413_v23, %v15641_v45  ;;  %v6422_v45 = vadd.f32 %v6401_v32, %v15623_v30  ;;  %v15689_v24 = vadd.f32 %v6433_v53, %v6420_v3  ;;  %v12277_v32 = vld [vmem:[%s16823_s2 + $0xa0] ss:$16 sps:$4 sm:$0xff]   ;;  %v12297_v54 = vld [vmem:[%s16823_s2 + $0x104] ss:$16 sps:$4 sm:$0xff]  }
0x1309   :  { %v15673_v36 = vadd.f32 %v6433_v53, %v6426_v33  ;;  %v15697_v30 = vadd.f32 %v6437_v63, %v6423_v18  ;;  %7276 = vmatpush1.bf16.msra.mxu0 %v12277_v32  ;;  %v12300_v39 = vld [vmem:[#allocation26 + $0x84] ss:$8 sps:$4 sm:$0xff]   ;;  %v12298_v33 = vld [vmem:[#allocation26 + $0x80] ss:$8 sps:$4 sm:$0xff]  }
0x130a   :  { %v15677_v29 = vadd.f32 %v6437_v63, %v6427_v15  ;;  %v6466_v25 = vadd.f32 %v15666_v17, %v15662_v16  ;;  %v15695_v11 = vadd.f32 %v6433_v53, %v6422_v45  ;;  %v6460_v22 = vadd.f32 %v15691_v8, %v15689_v24  ;;  %v12288_v53 = vld [vmem:[#allocation26 + $0x64] ss:$8 sps:$4 sm:$0xff]   ;;  %7277 = vmatprep.subr.bf16.mxu0 %v12285_v10  ;;  %v12294_v63 = vld [vmem:[#allocation26 + $0x74] ss:$8 sps:$4 sm:$0xff]   ;;  %v12303_v23 = vld [vmem:[%s16823_s2 + $0x124] ss:$16 sps:$4 sm:$0xff]  }
0x130b   :  { %6816 = vmatprep.subr.bf16.mxu1 %v12288_v53  ;;  %v12309_v32 = vld [vmem:[%s16823_s2 + $0x144] ss:$16 sps:$4 sm:$0xff]  }
0x130c   :  { %6467 = vadd.xlane.f32.xlu0 %v6466_v25  ;;  %v6469_v28 = vadd.f32 %v15677_v29, %v15673_v36  ;;  %v6463_v49 = vadd.f32 %v15697_v30, %v15695_v11  ;;  %6817 = vmatpush1.bf16.msra.mxu1 %v12286_v62  ;;  %v12310_v10 = vld [vmem:[#allocation26 + $0xa0] ss:$8 sps:$4 sm:$0xff]   ;;  %v12318_v62 = vld [vmem:[#allocation26 + $0xb4] ss:$8 sps:$4 sm:$0xff]  }
0x130d   :  { %7278 = vmatpush1.bf16.msra.mxu0 %v12283_v57  ;;  %6818 = vmatprep.subr.bf16.mxu1 %v12294_v63  ;;  %v12315_v53 = vld [vmem:[%s16823_s2 + $0x164] ss:$16 sps:$4 sm:$0xff]   ;;  %v12313_v57 = vld [vmem:[%s16823_s2 + $0x160] ss:$16 sps:$4 sm:$0xff]  }
0x130e   :  { %6470 = vadd.xlane.f32.xlu1 %v6469_v28  ;;  %7279 = vmatprep.subr.bf16.mxu0 %v12291_v50  ;;  %v12316_v50 = vld [vmem:[#allocation26 + $0xb0] ss:$8 sps:$4 sm:$0xff]  }
0x130f   :  { %v12321_v63 = vld [vmem:[%s16823_s2 + $0x184] ss:$16 sps:$4 sm:$0xff]  }
0x1310   :  { %6455 = vadd.xlane.f32.xlu0 %v6454_v38  ;;  %6819 = vmatpush1.bf16.msra.mxu1 %v12292_v61  ;;  %v12324_v61 = vld [vmem:[#allocation26 + $0xc4] ss:$8 sps:$4 sm:$0xff]  }
0x1311   :  { %7280 = vmatpush1.bf16.msra.mxu0 %v12289_v31  ;;  %6820 = vmatprep.subr.bf16.mxu1 %v12300_v39  ;;  %v12319_v31 = vld [vmem:[%s16823_s2 + $0x180] ss:$16 sps:$4 sm:$0xff]   ;;  %v12327_v39 = vld [vmem:[%s16823_s2 + $0x1a4] ss:$16 sps:$4 sm:$0xff]  }
0x1312   :  { %6458 = vadd.xlane.f32.xlu1 %v6457_v58  ;;  %7281 = vmatprep.subr.bf16.mxu0 %v12297_v54  ;;  %v12322_v54 = vld [vmem:[#allocation26 + $0xc0] ss:$8 sps:$4 sm:$0xff]  }
0x1314   :  { %6461 = vadd.xlane.f32.xlu0 %v6460_v22  ;;  %6821 = vmatpush1.bf16.msra.mxu1 %v12298_v33  ;;  %v12330_v33 = vld [vmem:[#allocation26 + $0xd4] ss:$8 sps:$4 sm:$0xff]  }
0x1315   :  { %7282 = vmatpush1.bf16.msra.mxu0 %v12295_v14  ;;  %6822 = vmatprep.subr.bf16.mxu1 %v12306_v12  ;;  %v12325_v14 = vld [vmem:[%s16823_s2 + $0x1a0] ss:$16 sps:$4 sm:$0xff]  }
0x1316   :  { %6464 = vadd.xlane.f32.xlu1 %v6463_v49  ;;  %7283 = vmatprep.subr.bf16.mxu0 %v12303_v23  ;;  %v12328_v23 = vld [vmem:[#allocation26 + $0xd0] ss:$8 sps:$4 sm:$0xff]  }
0x1319   :  { %7284 = vmatpush1.bf16.msra.mxu0 %v12301_v1  ;;  %v12333_v1 = vld [vmem:[%s16823_s2 + $0x1c4] ss:$16 sps:$4 sm:$0xff]  }
0x131a   :  { %7285 = vmatprep.subr.bf16.mxu0 %v12309_v32 }
0x1399   :  { %v6468_v15 = vpop.xlane.xlu0 %6467 }
0x139a   :  { %v6476_v3 = vmul.f32 0.00390625, %v6468_v15  ;;  %v12331_v15 = vld [vmem:[%s16823_s2 + $0x1c0] ss:$16 sps:$4 sm:$0xff]  }
0x139b   :  { %v6471_v47 = vpop.xlane.xlu1 %6470 }
0x139c   :  { %v15726_v25 = vsub.f32 %v15662_v16, %v6476_v3  ;;  %v15729_v45 = vsub.f32 %v15666_v17, %v6476_v3  ;;  %v6477_v18 = vmul.f32 0.00390625, %v6471_v47  ;;  %v12336_v3 = vld [vmem:[#allocation26 + $0xe4] ss:$8 sps:$4 sm:$0xff]   ;;  %v12334_v47 = vld [vmem:[#allocation26 + $0xe0] ss:$8 sps:$4 sm:$0xff]  }
0x139d   :  { %v6456_v28 = vpop.xlane.xlu0 %6455 }
0x139e   :  { %v6498_v38 = vmul.f32 %v15726_v25, %v15726_v25  ;;  %v6499_v58 = vmul.f32 %v15729_v45, %v15729_v45  ;;  %v15736_v22 = vsub.f32 %v15673_v36, %v6477_v18  ;;  %v15739_v49 = vsub.f32 %v15677_v29, %v6477_v18  ;;  %v12339_v18 = vld [vmem:[%s16823_s2 + $0x1e4] ss:$16 sps:$4 sm:$0xff]  }
0x139f   :  { %v6472_v51 = vmul.f32 0.00390625, %v6456_v28  ;;  %v6459_v16 = vpop.xlane.xlu1 %6458  ;;  %v12337_v28 = vld [vmem:[%s16823_s2 + $0x1e0] ss:$16 sps:$4 sm:$0xff]  }
0x13a0   :  { %v6500_v17 = vmul.f32 %v15736_v22, %v15736_v22  ;;  %v6501_v21 = vmul.f32 %v15739_v49, %v15739_v49  ;;  %v6473_v26 = vmul.f32 0.00390625, %v6459_v16  ;;  %v6514_v5 = vadd.f32 %v6499_v58, %v6498_v38  ;;  %v12340_v38 = vld [vmem:[#allocation26 + $0xf0] ss:$8 sps:$4 sm:$0xff]   ;;  %v12342_v58 = vld [vmem:[#allocation26 + $0xf4] ss:$8 sps:$4 sm:$0xff]  }
0x13a1   :  { %v15746_v37 = vsub.f32 %v15669_v43, %v6472_v51  ;;  %v15749_v46 = vsub.f32 %v15671_v60, %v6472_v51  ;;  %v6462_v36 = vpop.xlane.xlu0 %6461  ;;  %v12345_v51 = vld [vmem:[%s16823_s2 + $0xc] ss:$16 sps:$4 sm:$0xff]  }
0x13a2   :  { %v15752_v29 = vsub.f32 %v15681_v41, %v6473_v26  ;;  %v15755_v7 = vsub.f32 %v15683_v19, %v6473_v26  ;;  %v6474_v59 = vmul.f32 0.00390625, %v6462_v36  ;;  %6515 = vadd.xlane.f32.xlu0 %v6514_v5  ;;  %v6517_v44 = vadd.f32 %v6501_v21, %v6500_v17 }
0x13a3   :  { %v6490_v35 = vmul.f32 %v15746_v37, %v15746_v37  ;;  %v6491_v43 = vmul.f32 %v15749_v46, %v15749_v46  ;;  %v6465_v56 = vpop.xlane.xlu1 %6464 }
0x13a4   :  { %v6492_v60 = vmul.f32 %v15752_v29, %v15752_v29  ;;  %v6493_v41 = vmul.f32 %v15755_v7, %v15755_v7  ;;  %v15766_v48 = vsub.f32 %v15689_v24, %v6474_v59  ;;  %v15769_v19 = vsub.f32 %v15691_v8, %v6474_v59  ;;  %6518 = vadd.xlane.f32.xlu1 %v6517_v44 }
0x13a5   :  { %v6475_v20 = vmul.f32 0.00390625, %v6465_v56  ;;  %v6502_v34 = vadd.f32 %v6491_v43, %v6490_v35 }
0x13a6   :  { %v6494_v9 = vmul.f32 %v15766_v48, %v15766_v48  ;;  %v6495_v6 = vmul.f32 %v15769_v19, %v15769_v19  ;;  %v6505_v55 = vadd.f32 %v6493_v41, %v6492_v60 }
0x13a7   :  { %v15776_v52 = vsub.f32 %v15695_v11, %v6475_v20  ;;  %v15779_v24 = vsub.f32 %v15697_v30, %v6475_v20  ;;  %6503 = vadd.xlane.f32.xlu0 %v6502_v34  ;;  %v12304_v11 = vld [vmem:[#allocation26 + $0x90] ss:$8 sps:$4 sm:$0xff]   ;;  %v12307_v30 = vld [vmem:[%s16823_s2 + $0x140] ss:$16 sps:$4 sm:$0xff]   ;;  %v6452_v34 = vld [vmem:[#allocation23] sm:$0x3] }
0x13a8   :  { %6506 = vadd.xlane.f32.xlu1 %v6505_v55  ;;  %v6508_v8 = vadd.f32 %v6495_v6, %v6494_v9  ;;  %6823 = vmatpush1.bf16.msra.mxu1 %v12304_v11 }
0x13a9   :  { %v6496_v2 = vmul.f32 %v15776_v52, %v15776_v52  ;;  %v6497_v4 = vmul.f32 %v15779_v24, %v15779_v24  ;;  %7286 = vmatpush1.bf16.msra.mxu0 %v12307_v30  ;;  %6824 = vmatprep.subr.bf16.mxu1 %v12312_v0 }
0x13aa   :  { %7287 = vmatprep.subr.bf16.mxu0 %v12315_v53 }
0x13ab   :  { %6509 = vadd.xlane.f32.xlu0 %v6508_v8  ;;  %v6511_v42 = vadd.f32 %v6497_v4, %v6496_v2  ;;  %v6554_v8 = vrot.slane %v6452_v34, %v16809_v13  ;;  %v6453_v4 = vld [vmem:[#allocation25] sm:$0x3] }
0x13ac   :  { %6825 = vmatpush1.bf16.msra.mxu1 %v12310_v10  ;;  %v6577_v0 = vrot.slane %v6453_v4, %v16809_v13  ;;  %v6581_v10 = vrot.slane %v6453_v4, %v16810_v27  ;;  %v12360_v4 = vld [vmem:[%s16823_s2 + $0xac] ss:$16 sps:$4 sm:$0xff]  }
0x13ad   :  { %6512 = vadd.xlane.f32.xlu1 %v6511_v42  ;;  %7288 = vmatpush1.bf16.msra.mxu0 %v12313_v57  ;;  %v6558_v42 = vrot.slane %v6452_v34, %v16810_v27  ;;  %v12349_v34 = vld [vmem:[%s16823_s2 + $0x48] ss:$16 sps:$4 sm:$0xff]  }
0x13ae   :  { %6826 = vmatprep.subr.bf16.mxu1 %v12318_v62  ;;  %7289 = vmatprep.subr.bf16.mxu0 %v12321_v63 }
0x13b0   :  { %6827 = vmatpush1.bf16.msra.mxu1 %v12316_v50 }
0x13b1   :  { %7290 = vmatpush1.bf16.msra.mxu0 %v12319_v31  ;;  %6828 = vmatprep.subr.bf16.mxu1 %v12324_v61 }
0x13b2   :  { %7291 = vmatprep.subr.bf16.mxu0 %v12327_v39 }
0x13b4   :  { %6829 = vmatpush1.bf16.msra.mxu1 %v12322_v54 }
0x13b5   :  { %7292 = vmatpush1.bf16.msra.mxu0 %v12325_v14  ;;  %6830 = vmatprep.subr.bf16.mxu1 %v12330_v33 }
0x13b6   :  { %7293 = vmatprep.subr.bf16.mxu0 %v12333_v1 }
0x13b8   :  { %6831 = vmatpush1.bf16.msra.mxu1 %v12328_v23 }
0x13b9   :  { %7294 = vmatpush1.bf16.msra.mxu0 %v12331_v15  ;;  %6832 = vmatprep.subr.bf16.mxu1 %v12336_v3 }
0x13ba   :  { %7295 = vmatprep.subr.bf16.mxu0 %v12339_v18 }
0x13bc   :  { %6833 = vmatpush1.bf16.msra.mxu1 %v12334_v47 }
0x13bd   :  { %7296 = vmatpush1.bf16.msra.mxu0 %v12337_v28  ;;  %6834 = vmatprep.subr.bf16.mxu1 %v12342_v58 }
0x13be   :  { %11527 = vmatprep.subr.bf16.mxu0 %v16756_v40 }
0x13c0   :  { %6835 = vmatpush1.bf16.msra.mxu1 %v12340_v38 }
0x13c1   :  { %7308 = vmatprep.subr.bf16.mxu1 %v12345_v51 }
0x142f   :  { %v6516_v16 = vpop.xlane.xlu0 %6515 }
0x1430   :  { %v6524_v17 = vmul.f32 0.00390625, %v6516_v16 }
0x1431   :  { %v6519_v21 = vpop.xlane.xlu1 %6518 }
0x1432   :  { %v6530_v26 = vadd.f32 1e-05, %v6524_v17  ;;  %v6525_v5 = vmul.f32 0.00390625, %v6519_v21 }
0x1434   :  { %12707 = vrsqrt.f32 %v6530_v26  ;;  %v6531_v36 = vadd.f32 1e-05, %v6525_v5  ;;  %v6504_v59 = vpop.xlane.xlu0 %6503  ;;  %v12343_v5 = vld [vmem:[%s16823_s2 + $0x8] ss:$16 sps:$4 sm:$0xff]  }
0x1435   :  { %v6520_v44 = vmul.f32 0.00390625, %v6504_v59  ;;  %v6507_v35 = vpop.xlane.xlu1 %6506 }
0x1436   :  { %12709 = vrsqrt.f32 %v6531_v36  ;;  %v6521_v43 = vmul.f32 0.00390625, %v6507_v35 }
0x1437   :  { %v6526_v56 = vadd.f32 1e-05, %v6520_v44  ;;  %v12348_v44 = vld [vmem:[%s16823_s2 + $0x2c] ss:$16 sps:$4 sm:$0xff]  }
0x1438   :  { %v6527_v60 = vadd.f32 1e-05, %v6521_v43  ;;  %v6510_v41 = vpop.xlane.xlu0 %6509  ;;  %v12346_v43 = vld [vmem:[%s16823_s2 + $0x28] ss:$16 sps:$4 sm:$0xff]  }
0x1439   :  { %12711 = vrsqrt.f32 %v6526_v56  ;;  %v6522_v20 = vmul.f32 0.00390625, %v6510_v41 }
0x143a   :  { %12713 = vrsqrt.f32 %v6527_v60  ;;  %v6513_v9 = vpop.xlane.xlu1 %6512  ;;  %v12351_v60 = vld [vmem:[%s16823_s2 + $0x4c] ss:$16 sps:$4 sm:$0xff]  }
0x143b   :  { %v6528_v6 = vadd.f32 1e-05, %v6522_v20  ;;  %v6523_v55 = vmul.f32 0.00390625, %v6513_v9 }
0x143d   :  { %12715 = vrsqrt.f32 %v6528_v6  ;;  %v6529_v2 = vadd.f32 1e-05, %v6523_v55  ;;  %v12354_v6 = vld [vmem:[%s16823_s2 + $0x6c] ss:$16 sps:$4 sm:$0xff]   ;;  %v12352_v55 = vld [vmem:[%s16823_s2 + $0x68] ss:$16 sps:$4 sm:$0xff]  }
0x143e   :  { %v12708_v12 = vpop.eup %12707 }
0x143f   :  { %v6546_v11 = vmul.f32 %v12708_v12, %v15726_v25  ;;  %12717 = vrsqrt.f32 %v6529_v2  ;;  %v6547_v32 = vmul.f32 %v12708_v12, %v15729_v45  ;;  %v12355_v2 = vld [vmem:[%s16823_s2 + $0x88] ss:$16 sps:$4 sm:$0xff]   ;;  %v12363_v12 = vld [vmem:[%s16823_s2 + $0xcc] ss:$16 sps:$4 sm:$0xff]  }
0x1440   :  { %v12710_v30 = vpop.eup %12709 }
0x1441   :  { %v6569_v53 = vmul.f32 %v6554_v8, %v6546_v11  ;;  %v6548_v57 = vmul.f32 %v12710_v30, %v15736_v22  ;;  %v6549_v62 = vmul.f32 %v12710_v30, %v15739_v49  ;;  %v6570_v50 = vmul.f32 %v6558_v42, %v6547_v32  ;;  %v12361_v11 = vld [vmem:[%s16823_s2 + $0xc8] ss:$16 sps:$4 sm:$0xff]   ;;  %v12366_v32 = vld [vmem:[%s16823_s2 + $0xec] ss:$16 sps:$4 sm:$0xff]  }
0x1442   :  { %v12364_v30 = vld [vmem:[%s16823_s2 + $0xe8] ss:$16 sps:$4 sm:$0xff]  }
0x1443   :  { %v12712_v63 = vpop.eup %12711  ;;  %v6571_v31 = vmul.f32 %v6554_v8, %v6548_v57  ;;  %v6572_v61 = vmul.f32 %v6558_v42, %v6549_v62  ;;  %v6593_v39 = vadd.f32 %v6581_v10, %v6570_v50  ;;  %v6592_v14 = vadd.f32 %v6577_v0, %v6569_v53  ;;  %v12372_v53 = vld [vmem:[%s16823_s2 + $0x12c] ss:$16 sps:$4 sm:$0xff]   ;;  %v12370_v57 = vld [vmem:[%s16823_s2 + $0x128] ss:$16 sps:$4 sm:$0xff]  }
0x1444   :  { %v12714_v54 = vpop.eup %12713  ;;  %v6538_v25 = vmul.f32 %v12712_v63, %v15746_v37  ;;  %v6539_v45 = vmul.f32 %v12712_v63, %v15749_v46  ;;  %v12375_v62 = vld [vmem:[%s16823_s2 + $0x14c] ss:$16 sps:$4 sm:$0xff]   ;;  %v12373_v50 = vld [vmem:[%s16823_s2 + $0x148] ss:$16 sps:$4 sm:$0xff]  }
0x1445   :  { %v6540_v33 = vmul.f32 %v12714_v54, %v15752_v29  ;;  %v6595_v23 = vadd.f32 %v6581_v10, %v6572_v61  ;;  %v6594_v1 = vadd.f32 %v6577_v0, %v6571_v31  ;;  %v6541_v15 = vmul.f32 %v12714_v54, %v15755_v7  ;;  %v12378_v63 = vld [vmem:[%s16823_s2 + $0x16c] ss:$16 sps:$4 sm:$0xff]   ;;  %v12376_v31 = vld [vmem:[%s16823_s2 + $0x168] ss:$16 sps:$4 sm:$0xff]  }
0x1446   :  { %v6561_v22 = vmul.f32 %v6554_v8, %v6538_v25  ;;  %v6562_v3 = vmul.f32 %v6558_v42, %v6539_v45  ;;  %v12381_v61 = vld [vmem:[%s16823_s2 + $0x18c] ss:$16 sps:$4 sm:$0xff]   ;;  %v12379_v54 = vld [vmem:[%s16823_s2 + $0x188] ss:$16 sps:$4 sm:$0xff]  }
0x1447   :  { %v12716_v49 = vpop.eup %12715  ;;  %v6563_v47 = vmul.f32 %v6554_v8, %v6540_v33  ;;  %v6922_v18 = vpack.c.bf16 %v6595_v23, %v6593_v39  ;;  %v15811_v28 = vpack.c.bf16 %v6594_v1, %v6592_v14  ;;  %v6564_v38 = vmul.f32 %v6558_v42, %v6541_v15  ;;  %v12384_v25 = vld [vmem:[%s16823_s2 + $0x1ac] ss:$16 sps:$4 sm:$0xff]   ;;  %v12382_v39 = vld [vmem:[%s16823_s2 + $0x1a8] ss:$16 sps:$4 sm:$0xff]  }
0x1448   :  { %v6543_v37 = vmul.f32 %v12716_v49, %v15769_v19  ;;  %v15814_v46 = vadd.f32 %v6581_v10, %v6562_v3  ;;  %v15818_v51 = vadd.f32 %v6577_v0, %v6561_v22  ;;  %v6542_v21 = vmul.f32 %v12716_v49, %v15766_v48  ;;  %v12387_v14 = vld [vmem:[%s16823_s2 + $0x1cc] ss:$16 sps:$4 sm:$0xff]   ;;  %v12385_v45 = vld [vmem:[%s16823_s2 + $0x1c8] ss:$16 sps:$4 sm:$0xff]  }
0x1449   :  { %v12718_v58 = vpop.eup %12717  ;;  %7297 = vmatprep.mubr.bf16.mxu0 %v6922_v18  ;;  %v15816_v29 = vadd.f32 %v6581_v10, %v6564_v38  ;;  %v15820_v7 = vadd.f32 %v6577_v0, %v6563_v47  ;;  %v12390_v33 = vld [vmem:[%s16823_s2 + $0x1ec] ss:$16 sps:$4 sm:$0xff]   ;;  %v12388_v23 = vld [vmem:[%s16823_s2 + $0x1e8] ss:$16 sps:$4 sm:$0xff]  }
0x144a   :  { %7298 = vmatmul.mubr.bf16.vlgmr.msra.gmra.mrb[160].mxu0 %v15811_v28  ;;  %v6545_v16 = vmul.f32 %v12718_v58, %v15779_v24  ;;  %v6566_v17 = vmul.f32 %v6558_v42, %v6543_v37  ;;  %v6544_v19 = vmul.f32 %v12718_v58, %v15776_v52  ;;  %v6565_v35 = vmul.f32 %v6554_v8, %v6542_v21  ;;  %v15879_v1 = vld [vmem:[#allocation29] sm:$0xf]  ;;  %v6632_v3 = vld [vmem:[#allocation28] sm:$0x3] }
0x144b   :  { %v6629_v26 = vpack.c.bf16 %v15816_v29, %v15814_v46  ;;  %v6628_v36 = vpack.c.bf16 %v15820_v7, %v15818_v51  ;;  %11529 = vmatprep.mubr.msk.bf16.mxu0 %vm13547_vm1, %v16756_v40  ;;  %v6928_v15 = vrot.slane %v15879_v1, %v16809_v13  ;;  %v6637_v58 = vrot.slane %v6632_v3, %v16809_v13 }
0x144c   :  { %v6568_v59 = vmul.f32 %v6558_v42, %v6545_v16  ;;  %v6567_v24 = vmul.f32 %v6554_v8, %v6544_v19  ;;  %v15834_v48 = vadd.f32 %v6581_v10, %v6566_v17  ;;  %v15844_v20 = vadd.f32 %v6577_v0, %v6565_v35  ;;  %v12357_v8 = vld [vmem:[%s16823_s2 + $0x8c] ss:$16 sps:$4 sm:$0xff]   ;;  %v12358_v42 = vld [vmem:[%s16823_s2 + $0xa8] ss:$16 sps:$4 sm:$0xff]  }
0x144d   :  { %6836 = vmatprep.mubr.bf16.mxu1 %v6629_v26 }
0x144e   :  { %6837 = vmatmul.mubr.bf16.vlgmr.msra.gmra.mrb[180].mxu1 %v6628_v36  ;;  %v15836_v52 = vadd.f32 %v6581_v10, %v6568_v59  ;;  %v15842_v41 = vadd.f32 %v6577_v0, %v6567_v24  ;;  %v12369_v0 = vld [vmem:[%s16823_s2 + $0x10c] ss:$16 sps:$4 sm:$0xff]   ;;  %v12367_v10 = vld [vmem:[%s16823_s2 + $0x108] ss:$16 sps:$4 sm:$0xff]  }
0x144f   :  { %7309 = vmatpush1.bf16.msra.mxu1 %v12343_v5 }
0x1450   :  { %16824 = vst [vmem:[#allocation99_spill] sm:$0xff] %v15836_v52  ;;  %v6631_v56 = vpack.c.bf16 %v15836_v52, %v15834_v48  ;;  %7310 = vmatprep.subr.bf16.mxu1 %v12348_v44  ;;  %v6630_v9 = vpack.c.bf16 %v15842_v41, %v15844_v20 }
0x1452   :  { %6846 = vmatprep.mubr.bf16.mxu1 %v6631_v56  ;;  %v6932_v56 = vrot.slane %v15879_v1, %v16810_v27 }
0x1453   :  { %7311 = vmatpush1.bf16.msra.mxu1 %v12346_v43 }
0x1454   :  { %7312 = vmatprep.subr.bf16.mxu1 %v12351_v60 }
0x1456   :  { %6847 = vmatmul.mubr.bf16.gmra.mrb[184].mxu1 %v6630_v9 }
0x1457   :  { %7313 = vmatpush1.bf16.msra.mxu1 %v12349_v34  ;;  %7340 = vmatprep.mubr.bf16.mxu1 %v6922_v18 }
0x1458   :  { %7314 = vmatprep.subr.bf16.mxu1 %v12354_v6 }
0x145b   :  { %7315 = vmatpush1.bf16.msra.mxu1 %v12352_v55 }
0x145c   :  { %7316 = vmatprep.subr.bf16.mxu1 %v12357_v8 }
0x145f   :  { %7317 = vmatpush1.bf16.msra.mxu1 %v12355_v2 }
0x1460   :  { %7318 = vmatprep.subr.bf16.mxu1 %v12360_v4 }
0x1463   :  { %7319 = vmatpush1.bf16.msra.mxu1 %v12358_v42 }
0x1464   :  { %7320 = vmatprep.subr.bf16.mxu1 %v12363_v12 }
0x1467   :  { %7321 = vmatpush1.bf16.msra.mxu1 %v12361_v11 }
0x1468   :  { %7322 = vmatprep.subr.bf16.mxu1 %v12366_v32 }
0x146b   :  { %7323 = vmatpush1.bf16.msra.mxu1 %v12364_v30 }
0x146c   :  { %7324 = vmatprep.subr.bf16.mxu1 %v12369_v0 }
0x146f   :  { %7325 = vmatpush1.bf16.msra.mxu1 %v12367_v10 }
0x1470   :  { %7326 = vmatprep.subr.bf16.mxu1 %v12372_v53  ;;  %v16825_v53 = vld [vmem:[#allocation76_spill] sm:$0xff] }
0x1473   :  { %7327 = vmatpush1.bf16.msra.mxu1 %v12370_v57  ;;  %v16826_v57 = vsub.s32 2, %v16825_v53 }
0x1474   :  { %7328 = vmatprep.subr.bf16.mxu1 %v12375_v62 }
0x1475   :  { %v6936_v62 = vrot.slane %v15879_v1, %v16826_v57 }
0x1477   :  { %7329 = vmatpush1.bf16.msra.mxu1 %v12373_v50  ;;  %v16827_v50 = vsub.s32 3, %v16825_v53 }
0x1478   :  { %7330 = vmatprep.subr.bf16.mxu1 %v12378_v63 }
0x1479   :  { %v6940_v63 = vrot.slane %v15879_v1, %v16827_v50 }
0x147b   :  { %7331 = vmatpush1.bf16.msra.mxu1 %v12376_v31 }
0x147c   :  { %7332 = vmatprep.subr.bf16.mxu1 %v12381_v61 }
0x147f   :  { %7333 = vmatpush1.bf16.msra.mxu1 %v12379_v54 }
0x1480   :  { %7334 = vmatprep.subr.bf16.mxu1 %v12384_v25 }
0x1483   :  { %7335 = vmatpush1.bf16.msra.mxu1 %v12382_v39 }
0x1484   :  { %7336 = vmatprep.subr.bf16.mxu1 %v12387_v14 }
0x1487   :  { %7337 = vmatpush1.bf16.msra.mxu1 %v12385_v45 }
0x1488   :  { %7338 = vmatprep.subr.bf16.mxu1 %v12390_v33 }
0x148b   :  { %7339 = vmatpush1.bf16.msra.mxu1 %v12388_v23 }
0x148c   :  { %11533 = vmatprep.subr.bf16.mxu1 %v16756_v40 }
0x148e   :  { %7341 = vmatmul.mubr.bf16.vlgmr.msra.gmra.mrb[188].mxu1 %v15811_v28  ;;  %v6641_v28 = vrot.slane %v6632_v3, %v16810_v27 }
0x148f   :  { %11535 = vmatprep.mubr.msk.bf16.mxu1 %vm13547_vm1, %v16756_v40 }
0x151d   :  { %v7299_v22 = vpop.f32.mrb[160].mxu0 }
0x151e   :  { %v7300_v49 = vadd.f32 %v7299_v22, %v6928_v15  ;;  %v7301_v47 = vpop.f32.mrb[161].mxu0 }
0x151f   :  { %v7303_v18 = vpop.f32.mrb[162].mxu0  ;;  %v7302_v4 = vadd.f32 %v7301_v47, %v6932_v56 }
0x1520   :  { %v7352_v38 = vpack.c.bf16 %v7300_v49, %v7300_v49  ;;  %v7305_v37 = vpop.f32.mrb[163].mxu0  ;;  %v7304_v32 = vadd.f32 %v7303_v18, %v6928_v15 }
0x1521   :  { %v6838_v16 = vpop.f32.mrb[180].mxu1  ;;  %v15906_v11 = vpack.c.bf16 %v7302_v4, %v7302_v4  ;;  %v7306_v0 = vadd.f32 %v7305_v37, %v6932_v56 }
0x1522   :  { %7477 = vrot.lane.b32.xlu0 %v7352_v38, %s13548_s28  ;;  %v6840_v17 = vpop.f32.mrb[181].mxu1  ;;  %v7358_v21 = vsel %vm1505_vm2, %v7352_v38, 0  ;;  %v6839_v26 = vadd.f32 %v6838_v16, %v6637_v58  ;;  %v15920_v30 = vpack.c.bf16 %v7304_v32, %v7304_v32 }
0x1523   :  { %v6842_v19 = vpop.f32.mrb[182].mxu1  ;;  %11528 = vmatpush3.bf16.xpose.msra.mxu0 %v7358_v21  ;;  %v6841_v59 = vadd.f32 %v6840_v17, %v6641_v28  ;;  %v15934_v10 = vpack.c.bf16 %v7306_v0, %v7306_v0 }
0x1524   :  { %v6843_v5 = vadd.f32 %v6842_v19, %v6637_v58  ;;  %v6844_v36 = vpop.f32.mrb[183].mxu1  ;;  %11539 = vmatprep.subr.bf16.mxu0 %v16756_v40 }
0x1525   :  { %v6845_v44 = vadd.f32 %v6844_v36, %v6641_v28  ;;  %v8918_v4 = vsel %vm1505_vm2, %v15934_v10, 0 }
0x1526   :  { %v7351_v24 = vpack.c.bf16 %v6843_v5, %v6839_v26 }
0x1527   :  { %v15888_v35 = vpack.c.bf16 %v6845_v44, %v6841_v59 }
0x1528   :  { %7601 = vrot.lane.b32.xlu0 %v7351_v24, %s13549_s9  ;;  %7474 = vrot.lane.b32.xlu1 %v7351_v24, %s13548_s28 }
0x1529   :  { %v6848_v43 = vpop.f32.mrb[184].mxu1 }
0x152a   :  { %v6850_v60 = vpop.f32.mrb[185].mxu1  ;;  %11530 = vmatmul.mubr.msk.bf16.vlgmr.msra.gmra.mrb[164].mxu0 %vm1505_vm2, %v7351_v24  ;;  %v6849_v9 = vadd.f32 %v6848_v43, %v6637_v58 }
0x152b   :  { %v6852_v34 = vpop.f32.mrb[186].mxu1  ;;  %11541 = vmatprep.mubr.msk.bf16.mxu0 %vm13547_vm1, %v16756_v40  ;;  %v6851_v8 = vadd.f32 %v6850_v60, %v6641_v28 }
0x152c   :  { %v6853_v6 = vadd.f32 %v6852_v34, %v6637_v58  ;;  %7726 = vrot.lane.b32.xlu0 %v7351_v24, %s13550_s1  ;;  %7603 = vrot.lane.b32.xlu1 %v7352_v38, %s13549_s9  ;;  %v6854_v55 = vpop.f32.mrb[187].mxu1 }
0x152d   :  { %v6855_v2 = vadd.f32 %v6854_v55, %v6641_v28  ;;  %v7858_v28 = vsel %vm1505_vm2, %v15906_v11, 0 }
0x152e   :  { %v15899_v42 = vpack.c.bf16 %v6853_v6, %v6849_v9 }
0x152f   :  { %v15901_v12 = vpack.c.bf16 %v6855_v2, %v6851_v8 }
0x1530   :  { %7974 = vrot.lane.b32.xlu0 %v15888_v35, %s13548_s28  ;;  %7728 = vrot.lane.b32.xlu1 %v7352_v38, %s13550_s1 }
0x1534   :  { %8101 = vrot.lane.b32.xlu0 %v15888_v35, %s13549_s9  ;;  %7977 = vrot.lane.b32.xlu1 %v15906_v11, %s13548_s28 }
0x1538   :  { %8226 = vrot.lane.b32.xlu0 %v15888_v35, %s13550_s1  ;;  %8103 = vrot.lane.b32.xlu1 %v15906_v11, %s13549_s9 }
0x153c   :  { %8228 = vrot.lane.b32.xlu1 %v15906_v11, %s13550_s1  ;;  %8534 = vrot.lane.b32.xlu0 %v15899_v42, %s13548_s28 }
0x1540   :  { %8537 = vrot.lane.b32.xlu1 %v15920_v30, %s13548_s28  ;;  %8661 = vrot.lane.b32.xlu0 %v15899_v42, %s13549_s9 }
0x1544   :  { %8663 = vrot.lane.b32.xlu1 %v15920_v30, %s13549_s9  ;;  %8786 = vrot.lane.b32.xlu0 %v15899_v42, %s13550_s1 }
0x1548   :  { %8788 = vrot.lane.b32.xlu1 %v15920_v30, %s13550_s1  ;;  %9034 = vrot.lane.b32.xlu0 %v15901_v12, %s13548_s28 }
0x154c   :  { %9037 = vrot.lane.b32.xlu1 %v15934_v10, %s13548_s28  ;;  %9161 = vrot.lane.b32.xlu0 %v15901_v12, %s13549_s9 }
0x1550   :  { %9163 = vrot.lane.b32.xlu1 %v15934_v10, %s13549_s9  ;;  %9286 = vrot.lane.b32.xlu0 %v15901_v12, %s13550_s1 }
0x1554   :  { %9288 = vrot.lane.b32.xlu1 %v15934_v10, %s13550_s1 }
0x1561   :  { %v7342_v31 = vpop.f32.mrb[188].mxu1 }
0x1562   :  { %v7343_v61 = vadd.f32 %v7342_v31, %v6936_v62  ;;  %v7344_v54 = vpop.f32.mrb[189].mxu1 }
0x1563   :  { %v7346_v25 = vpop.f32.mrb[190].mxu1  ;;  %v7345_v14 = vadd.f32 %v7344_v54, %v6940_v63 }
0x1564   :  { %v7353_v39 = vpack.c.bf16 %v7343_v61, %v7343_v61  ;;  %v15952_v45 = vadd.f32 %v7346_v25, %v6936_v62  ;;  %v7348_v33 = vpop.f32.mrb[191].mxu1 }
0x1565   :  { %v15954_v23 = vadd.f32 %v7348_v33, %v6940_v63  ;;  %v15959_v22 = vpack.c.bf16 %v7345_v14, %v7345_v14 }
0x1566   :  { %7677 = vrot.lane.b32.xlu1 %v7353_v39, %s13549_s9  ;;  %7552 = vrot.lane.b32.xlu0 %v7353_v39, %s13548_s28  ;;  %v7430_v15 = vsel %vm3656_vm5, %v7353_v39, 0 }
0x1567   :  { %11534 = vmatpush3.bf16.msra.mxu1 %v7430_v15 }
0x1568   :  { %11545 = vmatprep.subr.bf16.mxu1 %v16756_v40 }
0x156a   :  { %8052 = vrot.lane.b32.xlu1 %v15959_v22, %s13548_s28  ;;  %7802 = vrot.lane.b32.xlu0 %v7353_v39, %s13550_s1 }
0x156e   :  { %8302 = vrot.lane.b32.xlu1 %v15959_v22, %s13550_s1  ;;  %8177 = vrot.lane.b32.xlu0 %v15959_v22, %s13549_s9 }
0x1594   :  { %v7478_v1 = vpop.permute.xlu0 %7477 }
0x1595   :  { %v7483_v3 = vsel %vm1505_vm2, %v7478_v1, 0 }
0x1596   :  { %11540 = vmatpush3.bf16.xpose.msra.mxu0 %v7483_v3 }
0x1597   :  { %11551 = vmatprep.subr.bf16.mxu0 %v16756_v40 }
0x159a   :  { %v7475_v49 = vpop.permute.xlu1 %7474  ;;  %v7602_v37 = vpop.permute.xlu0 %7601 }
0x159d   :  { %11542 = vmatmul.mubr.msk.bf16.vlgmr.msra.gmra.mrb[168].mxu0 %vm1505_vm2, %v7475_v49 }
0x159e   :  { %v7604_v47 = vpop.permute.xlu1 %7603  ;;  %11553 = vmatprep.mubr.msk.bf16.mxu0 %vm13547_vm1, %v16756_v40  ;;  %v7727_v16 = vpop.permute.xlu0 %7726 }
0x159f   :  { %v7609_v18 = vsel %vm1505_vm2, %v7604_v47, 0 }
0x15a0   :  { %11552 = vmatpush3.bf16.xpose.msra.mxu0 %v7609_v18 }
0x15a1   :  { %11563 = vmatprep.subr.bf16.mxu0 %v16756_v40 }
0x15a2   :  { %v7729_v38 = vpop.permute.xlu1 %7728  ;;  %v7975_v26 = vpop.permute.xlu0 %7974 }
0x15a3   :  { %v7734_v58 = vsel %vm1505_vm2, %v7729_v38, 0 }
0x15a6   :  { %v7978_v17 = vpop.permute.xlu1 %7977  ;;  %v8102_v59 = vpop.permute.xlu0 %8101 }
0x15a7   :  { %11554 = vmatmul.mubr.msk.bf16.vlgmr.msra.gmra.mrb[172].mxu0 %vm1505_vm2, %v7602_v37  ;;  %v7983_v21 = vsel %vm1505_vm2, %v7978_v17, 0 }
0x15a8   :  { %11564 = vmatpush3.bf16.xpose.msra.mxu0 %v7734_v58  ;;  %11565 = vmatprep.mubr.msk.bf16.mxu0 %vm13547_vm1, %v16756_v40 }
0x15a9   :  { %11575 = vmatprep.subr.bf16.mxu0 %v16756_v40 }
0x15aa   :  { %v8104_v19 = vpop.permute.xlu1 %8103  ;;  %v8227_v24 = vpop.permute.xlu0 %8226 }
0x15ab   :  { %v8109_v5 = vsel %vm1505_vm2, %v8104_v19, 0 }
0x15ae   :  { %v8229_v36 = vpop.permute.xlu1 %8228  ;;  %v8535_v34 = vpop.permute.xlu0 %8534 }
0x15af   :  { %11566 = vmatmul.mubr.msk.bf16.vlgmr.msra.gmra.mrb[176].mxu0 %vm1505_vm2, %v7727_v16  ;;  %v8234_v44 = vsel %vm1505_vm2, %v8229_v36, 0 }
0x15b0   :  { %11576 = vmatpush3.bf16.xpose.msra.mxu0 %v7858_v28  ;;  %11577 = vmatprep.mubr.msk.bf16.mxu0 %vm13547_vm1, %v16756_v40 }
0x15b1   :  { %11587 = vmatprep.subr.bf16.mxu0 %v16756_v40 }
0x15b2   :  { %v8538_v43 = vpop.permute.xlu1 %8537  ;;  %v8662_v55 = vpop.permute.xlu0 %8661 }
0x15b3   :  { %v8543_v56 = vsel %vm1505_vm2, %v8538_v43, 0 }
0x15b6   :  { %v8664_v60 = vpop.permute.xlu1 %8663  ;;  %v8787_v2 = vpop.permute.xlu0 %8786 }
0x15b7   :  { %11578 = vmatmul.mubr.msk.bf16.vlgmr.msra.gmra.mrb[180].mxu0 %vm1505_vm2, %v15888_v35  ;;  %v8418_v35 = vsel %vm1505_vm2, %v15920_v30, 0  ;;  %v8669_v9 = vsel %vm1505_vm2, %v8664_v60, 0 }
0x15b8   :  { %11588 = vmatpush3.bf16.xpose.msra.mxu0 %v7983_v21  ;;  %11589 = vmatprep.mubr.msk.bf16.mxu0 %vm13547_vm1, %v16756_v40 }
0x15b9   :  { %11599 = vmatprep.subr.bf16.mxu0 %v16756_v40 }
0x15ba   :  { %v8789_v6 = vpop.permute.xlu1 %8788  ;;  %v9035_v0 = vpop.permute.xlu0 %9034 }
0x15bb   :  { %v8794_v8 = vsel %vm1505_vm2, %v8789_v6, 0 }
0x15be   :  { %v9162_v25 = vpop.permute.xlu0 %9161 }
0x15bf   :  { %11590 = vmatmul.mubr.msk.bf16.vlgmr.msra.gmra.mrb[184].mxu0 %vm1505_vm2, %v7975_v26 }
0x15c0   :  { %11600 = vmatpush3.bf16.xpose.msra.mxu0 %v8109_v5  ;;  %11601 = vmatprep.mubr.msk.bf16.mxu0 %vm13547_vm1, %v16756_v40 }
0x15c1   :  { %11611 = vmatprep.subr.bf16.mxu0 %v16756_v40 }
0x15c2   :  { %v9287_v14 = vpop.permute.xlu0 %9286 }
0x15c7   :  { %11602 = vmatmul.mubr.msk.bf16.vlgmr.msra.gmra.mrb[188].mxu0 %vm1505_vm2, %v8102_v59 }
0x15c8   :  { %11612 = vmatpush3.bf16.xpose.msra.mxu0 %v8234_v44  ;;  %11613 = vmatprep.mubr.msk.bf16.mxu0 %vm13547_vm1, %v16756_v40 }
0x15c9   :  { %11623 = vmatprep.subr.bf16.mxu0 %v16756_v40 }
0x15cf   :  { %11614 = vmatmul.mubr.msk.bf16.vlgmr.msra.gmra.mrb[192].mxu0 %vm1505_vm2, %v8227_v24 }
0x15d0   :  { %11624 = vmatpush3.bf16.xpose.msra.mxu0 %v8418_v35  ;;  %11625 = vmatprep.mubr.msk.bf16.mxu0 %vm13547_vm1, %v16756_v40 }
0x15d1   :  { %11635 = vmatprep.subr.bf16.mxu0 %v16756_v40 }
0x15d7   :  { %11626 = vmatmul.mubr.msk.bf16.vlgmr.msra.gmra.mrb[196].mxu0 %vm1505_vm2, %v15899_v42  ;;  %v9038_v42 = vpop.permute.xlu1 %9037 }
0x15d8   :  { %11636 = vmatpush3.bf16.xpose.msra.mxu0 %v8543_v56  ;;  %11637 = vmatprep.mubr.msk.bf16.mxu0 %vm13547_vm1, %v16756_v40  ;;  %v9043_v11 = vsel %vm1505_vm2, %v9038_v42, 0  ;;  %v16073_v36 = vpop.permute.xlu0 %7552 }
0x15d9   :  { %11647 = vmatprep.subr.bf16.mxu0 %v16756_v40 }
0x15db   :  { %v9164_v32 = vpop.permute.xlu1 %9163 }
0x15dc   :  { %v9169_v62 = vsel %vm1505_vm2, %v9164_v32, 0 }
0x15df   :  { %11638 = vmatmul.mubr.msk.bf16.vlgmr.msra.gmra.mrb[200].mxu0 %vm1505_vm2, %v8535_v34  ;;  %v9289_v54 = vpop.permute.xlu1 %9288 }
0x15e0   :  { %11648 = vmatpush3.bf16.xpose.msra.mxu0 %v8669_v9  ;;  %11649 = vmatprep.mubr.msk.bf16.mxu0 %vm13547_vm1, %v16756_v40  ;;  %v9294_v39 = vsel %vm1505_vm2, %v9289_v54, 0  ;;  %v16083_v9 = vpop.permute.xlu0 %7802 }
0x15e1   :  { %11659 = vmatprep.subr.bf16.mxu0 %v16756_v40 }
0x15e3   :  { %v16069_v26 = vpop.permute.xlu1 %7677 }
0x15e4   :  { %v16091_v42 = vpop.permute.xlu0 %8177 }
0x15e7   :  { %11650 = vmatmul.mubr.msk.bf16.vlgmr.msra.gmra.mrb[204].mxu0 %vm1505_vm2, %v8662_v55  ;;  %v16077_v35 = vpop.permute.xlu1 %8052 }
0x15e8   :  { %11660 = vmatpush3.bf16.xpose.msra.mxu0 %v8794_v8  ;;  %11661 = vmatprep.mubr.msk.bf16.mxu0 %vm13547_vm1, %v16756_v40 }
0x15e9   :  { %11671 = vmatprep.subr.bf16.mxu0 %v16756_v40 }
0x15eb   :  { %v16087_v55 = vpop.permute.xlu1 %8302 }
0x15ef   :  { %11662 = vmatmul.mubr.msk.bf16.vlgmr.msra.gmra.mrb[208].mxu0 %vm1505_vm2, %v8787_v2 }
0x15f0   :  { %11672 = vmatpush3.bf16.xpose.msra.mxu0 %v8918_v4  ;;  %11673 = vmatprep.mubr.msk.bf16.mxu0 %vm13547_vm1, %v16756_v40 }
0x15f1   :  { %11683 = vmatprep.subr.bf16.mxu0 %v16756_v40 }
0x15f7   :  { %11674 = vmatmul.mubr.msk.bf16.vlgmr.msra.gmra.mrb[212].mxu0 %vm1505_vm2, %v15901_v12 }
0x15f8   :  { %11684 = vmatpush3.bf16.xpose.msra.mxu0 %v9043_v11  ;;  %11685 = vmatprep.mubr.msk.bf16.mxu0 %vm13547_vm1, %v16756_v40 }
0x15f9   :  { %11695 = vmatprep.subr.bf16.mxu0 %v16756_v40 }
0x15fd   :  { %v7394_v30 = vpop.f32.mrb[164].mxu0 }
0x15fe   :  { %v16037_v10 = vmul.f32 0.17677669, %v7394_v30  ;;  %v11531_v57 = vpop.f32.mrb[165].mxu0 }
0x15ff   :  { %v7397_v50 = vpop.f32.mrb[166].mxu0  ;;  %11686 = vmatmul.mubr.msk.bf16.vlgmr.msra.gmra.mrb[216].mxu0 %vm1505_vm2, %v9035_v0 }
0x1600   :  { %v16041_v63 = vmul.f32 0.17677669, %v7397_v50  ;;  %v11532_v12 = vpop.f32.mrb[167].mxu0  ;;  %11696 = vmatpush3.bf16.xpose.msra.mxu0 %v9169_v62  ;;  %v7403_v31 = vsel %vm3640_vm4, %v16037_v10, -inf  ;;  %11697 = vmatprep.mubr.msk.bf16.mxu0 %vm13547_vm1, %v16756_v40 }
0x1601   :  { %7404 = vmax.xlane.f32.xlu1 %v7403_v31  ;;  %11707 = vmatprep.subr.bf16.mxu0 %v16756_v40 }
0x1602   :  { %v7406_v61 = vsel %vm3640_vm4, %v16041_v63, -inf }
0x1603   :  { %7407 = vmax.xlane.f32.xlu0 %v7406_v61 }
0x1607   :  { %11698 = vmatmul.mubr.msk.bf16.vlgmr.msra.gmra.mrb[220].mxu0 %vm1505_vm2, %v9162_v25 }
0x1608   :  { %11708 = vmatpush3.bf16.xpose.msra.mxu0 %v9294_v39  ;;  %11709 = vmatprep.mubr.msk.bf16.mxu0 %vm13547_vm1, %v16756_v40 }
0x160f   :  { %11710 = vmatmul.mubr.msk.bf16.vlgmr.msra.gmra.mrb[224].mxu0 %vm1505_vm2, %v9287_v14 }
0x1670   :  { %v7519_v33 = vpop.f32.mrb[168].mxu0 }
0x1671   :  { %v16055_v15 = vmul.f32 0.17677669, %v7519_v33  ;;  %v11543_v1 = vpop.f32.mrb[169].mxu0 }
0x1672   :  { %v7522_v3 = vpop.f32.mrb[170].mxu0 }
0x1673   :  { %v16057_v49 = vmul.f32 0.17677669, %v7522_v3  ;;  %v11544_v47 = vpop.f32.mrb[171].mxu0  ;;  %v7528_v18 = vsel %vm3640_vm4, %v16055_v15, -inf }
0x1674   :  { %7529 = vmax.xlane.f32.xlu0 %v7528_v18 }
0x1675   :  { %v7531_v38 = vsel %vm3640_vm4, %v16057_v49, -inf }
0x1676   :  { %7532 = vmax.xlane.f32.xlu1 %v7531_v38 }
0x167a   :  { %v7645_v37 = vpop.f32.mrb[172].mxu0 }
0x167b   :  { %v16063_v58 = vmul.f32 0.17677669, %v7645_v37  ;;  %v11555_v16 = vpop.f32.mrb[173].mxu0 }
0x167c   :  { %v7648_v28 = vpop.f32.mrb[174].mxu0 }
0x167d   :  { %v16065_v17 = vmul.f32 0.17677669, %v7648_v28  ;;  %v11556_v21 = vpop.f32.mrb[175].mxu0  ;;  %v7654_v19 = vsel %vm3640_vm4, %v16063_v58, -inf }
0x167e   :  { %7655 = vmax.xlane.f32.xlu0 %v7654_v19 }
0x167f   :  { %v7657_v5 = vsel %vm3640_vm4, %v16065_v17, -inf }
0x1680   :  { %7658 = vmax.xlane.f32.xlu1 %v7657_v5 }
0x1682   :  { %v7770_v59 = vpop.f32.mrb[176].mxu0 }
0x1683   :  { %v16075_v44 = vmul.f32 0.17677669, %v7770_v59  ;;  %v11567_v24 = vpop.f32.mrb[177].mxu0 }
0x1684   :  { %v7773_v43 = vpop.f32.mrb[178].mxu0 }
0x1685   :  { %v16079_v56 = vmul.f32 0.17677669, %v7773_v43  ;;  %v11568_v60 = vpop.f32.mrb[179].mxu0  ;;  %v7779_v34 = vsel %vm3640_vm4, %v16075_v44, -inf }
0x1686   :  { %7780 = vmax.xlane.f32.xlu0 %v7779_v34 }
0x1687   :  { %v7782_v6 = vsel %vm3640_vm4, %v16079_v56, -inf }
0x1688   :  { %7783 = vmax.xlane.f32.xlu1 %v7782_v6 }
0x168a   :  { %v7894_v8 = vpop.f32.mrb[180].mxu0 }
0x168b   :  { %v16089_v2 = vmul.f32 0.17677669, %v7894_v8  ;;  %v11579_v4 = vpop.f32.mrb[181].mxu0 }
0x168c   :  { %v7897_v11 = vpop.f32.mrb[182].mxu0 }
0x168d   :  { %v16093_v32 = vmul.f32 0.17677669, %v7897_v11  ;;  %v11580_v30 = vpop.f32.mrb[183].mxu0  ;;  %v7903_v0 = vsel %vm3640_vm4, %v16089_v2, -inf }
0x168e   :  { %7904 = vmax.xlane.f32.xlu0 %v7903_v0  ;;  %v7405_v57 = vpop.xlane.xlu1 %7404 }
0x168f   :  { %v7409_v62 = vsub.f32 %v16037_v10, %v7405_v57  ;;  %v7906_v50 = vsel %vm3640_vm4, %v16093_v32, -inf }
0x1690   :  { %v7408_v12 = vpop.xlane.xlu0 %7407  ;;  %7907 = vmax.xlane.f32.xlu1 %v7906_v50 }
0x1691   :  { %v7411_v31 = vmul.f32 1.442695, %v7409_v62  ;;  %v7410_v61 = vsub.f32 %v16041_v63, %v7408_v12 }
0x1692   :  { %v8019_v54 = vpop.f32.mrb[184].mxu0 }
0x1693   :  { %v7413_v25 = vmul.f32 1.442695, %v7410_v61  ;;  %v16101_v39 = vmul.f32 0.17677669, %v8019_v54  ;;  %v11591_v14 = vpop.f32.mrb[185].mxu0  ;;  %12719 = vpow2.f32 %v7411_v31 }
0x1694   :  { %v8022_v33 = vpop.f32.mrb[186].mxu0 }
0x1695   :  { %v16103_v1 = vmul.f32 0.17677669, %v8022_v33  ;;  %v11592_v3 = vpop.f32.mrb[187].mxu0  ;;  %v8028_v10 = vsel %vm3640_vm4, %v16101_v39, -inf  ;;  %12721 = vpow2.f32 %v7413_v25 }
0x1696   :  { %8029 = vmax.xlane.f32.xlu0 %v8028_v10 }
0x1697   :  { %v8031_v47 = vsel %vm3640_vm4, %v16103_v1, -inf }
0x1698   :  { %8032 = vmax.xlane.f32.xlu1 %v8031_v47 }
0x169a   :  { %v8145_v63 = vpop.f32.mrb[188].mxu0 }
0x169b   :  { %v16109_v18 = vmul.f32 0.17677669, %v8145_v63  ;;  %v11603_v38 = vpop.f32.mrb[189].mxu0 }
0x169c   :  { %v8148_v37 = vpop.f32.mrb[190].mxu0 }
0x169d   :  { %v16111_v16 = vmul.f32 0.17677669, %v8148_v37  ;;  %v11604_v28 = vpop.f32.mrb[191].mxu0  ;;  %v8154_v21 = vsel %vm3640_vm4, %v16109_v18, -inf  ;;  %v16115_v19 = vpop.eup %12719 }
0x169e   :  { %8155 = vmax.xlane.f32.xlu0 %v8154_v21  ;;  %v7415_v24 = vsel %vm3640_vm4, %v16115_v19, 0.0 }
0x169f   :  { %v8157_v5 = vsel %vm3640_vm4, %v16111_v16, -inf  ;;  %v16119_v59 = vpop.eup %12721 }
0x16a0   :  { %8158 = vmax.xlane.f32.xlu1 %v8157_v5  ;;  %v7418_v6 = vsel %vm3640_vm4, %v16119_v59, 0.0 }
0x16a2   :  { %v8270_v43 = vpop.f32.mrb[192].mxu0  ;;  %7416 = vadd.xlane.f32.xlu0 %v7415_v24 }
0x16a3   :  { %v16123_v60 = vmul.f32 0.17677669, %v8270_v43  ;;  %v11615_v34 = vpop.f32.mrb[193].mxu0 }
0x16a4   :  { %7419 = vadd.xlane.f32.xlu1 %v7418_v6  ;;  %v8273_v8 = vpop.f32.mrb[194].mxu0 }
0x16a5   :  { %v16127_v4 = vmul.f32 0.17677669, %v8273_v8  ;;  %v11616_v11 = vpop.f32.mrb[195].mxu0  ;;  %v8279_v30 = vsel %vm3640_vm4, %v16123_v60, -inf }
0x16a6   :  { %8280 = vmax.xlane.f32.xlu0 %v8279_v30 }
0x16a7   :  { %v8282_v0 = vsel %vm3640_vm4, %v16127_v4, -inf }
0x16a8   :  { %8283 = vmax.xlane.f32.xlu1 %v8282_v0 }
0x16aa   :  { %v8454_v57 = vpop.f32.mrb[196].mxu0 }
0x16ab   :  { %v16133_v62 = vmul.f32 0.17677669, %v8454_v57  ;;  %v11627_v50 = vpop.f32.mrb[197].mxu0 }
0x16ac   :  { %v8457_v12 = vpop.f32.mrb[198].mxu0 }
0x16ad   :  { %v16135_v31 = vmul.f32 0.17677669, %v8457_v12  ;;  %v11628_v61 = vpop.f32.mrb[199].mxu0  ;;  %v8463_v54 = vsel %vm3640_vm4, %v16133_v62, -inf }
0x16ae   :  { %8464 = vmax.xlane.f32.xlu0 %v8463_v54 }
0x16af   :  { %v8466_v25 = vsel %vm3640_vm4, %v16135_v31, -inf }
0x16b0   :  { %8467 = vmax.xlane.f32.xlu1 %v8466_v25 }
0x16b2   :  { %v8579_v14 = vpop.f32.mrb[200].mxu0 }
0x16b3   :  { %v16141_v33 = vmul.f32 0.17677669, %v8579_v14  ;;  %v11639_v3 = vpop.f32.mrb[201].mxu0 }
0x16b4   :  { %v8582_v10 = vpop.f32.mrb[202].mxu0 }
0x16b5   :  { %v16143_v47 = vmul.f32 0.17677669, %v8582_v10  ;;  %v11640_v63 = vpop.f32.mrb[203].mxu0  ;;  %v8588_v38 = vsel %vm3640_vm4, %v16141_v33, -inf }
0x16b6   :  { %8589 = vmax.xlane.f32.xlu0 %v8588_v38 }
0x16b7   :  { %v8591_v37 = vsel %vm3640_vm4, %v16143_v47, -inf }
0x16b8   :  { %8592 = vmax.xlane.f32.xlu1 %v8591_v37 }
0x16ba   :  { %v8705_v28 = vpop.f32.mrb[204].mxu0 }
0x16bb   :  { %v16149_v21 = vmul.f32 0.17677669, %v8705_v28  ;;  %v11651_v5 = vpop.f32.mrb[205].mxu0 }
0x16bc   :  { %v8708_v24 = vpop.f32.mrb[206].mxu0 }
0x16bd   :  { %v16151_v43 = vmul.f32 0.17677669, %v8708_v24  ;;  %v11652_v34 = vpop.f32.mrb[207].mxu0  ;;  %v8714_v6 = vsel %vm3640_vm4, %v16149_v21, -inf }
0x16be   :  { %8715 = vmax.xlane.f32.xlu0 %v8714_v6 }
0x16bf   :  { %v8717_v8 = vsel %vm3640_vm4, %v16151_v43, -inf }
0x16c0   :  { %8718 = vmax.xlane.f32.xlu1 %v8717_v8 }
0x16c2   :  { %v8830_v11 = vpop.f32.mrb[208].mxu0 }
0x16c3   :  { %v16157_v30 = vmul.f32 0.17677669, %v8830_v11  ;;  %v11663_v0 = vpop.f32.mrb[209].mxu0 }
0x16c4   :  { %v8833_v57 = vpop.f32.mrb[210].mxu0 }
0x16c5   :  { %v16159_v50 = vmul.f32 0.17677669, %v8833_v57  ;;  %v11664_v12 = vpop.f32.mrb[211].mxu0  ;;  %v8839_v61 = vsel %vm3640_vm4, %v16157_v30, -inf }
0x16c6   :  { %8840 = vmax.xlane.f32.xlu0 %v8839_v61 }
0x16c7   :  { %v8842_v54 = vsel %vm3640_vm4, %v16159_v50, -inf }
0x16c8   :  { %8843 = vmax.xlane.f32.xlu1 %v8842_v54 }
0x16ca   :  { %v8954_v25 = vpop.f32.mrb[212].mxu0 }
0x16cb   :  { %v16165_v14 = vmul.f32 0.17677669, %v8954_v25  ;;  %v11675_v3 = vpop.f32.mrb[213].mxu0 }
0x16cc   :  { %v8957_v10 = vpop.f32.mrb[214].mxu0 }
0x16cd   :  { %v16167_v63 = vmul.f32 0.17677669, %v8957_v10  ;;  %v11676_v38 = vpop.f32.mrb[215].mxu0  ;;  %v8963_v37 = vsel %vm3640_vm4, %v16165_v14, -inf }
0x16ce   :  { %8964 = vmax.xlane.f32.xlu0 %v8963_v37 }
0x16cf   :  { %v8966_v28 = vsel %vm3640_vm4, %v16167_v63, -inf }
0x16d0   :  { %8967 = vmax.xlane.f32.xlu1 %v8966_v28 }
0x16d2   :  { %v9079_v5 = vpop.f32.mrb[216].mxu0 }
0x16d3   :  { %v16173_v24 = vmul.f32 0.17677669, %v9079_v5  ;;  %v11687_v34 = vpop.f32.mrb[217].mxu0 }
0x16d4   :  { %v9082_v6 = vpop.f32.mrb[218].mxu0 }
0x16d5   :  { %v16175_v8 = vmul.f32 0.17677669, %v9082_v6  ;;  %v11688_v11 = vpop.f32.mrb[219].mxu0  ;;  %v9088_v0 = vsel %vm3640_vm4, %v16173_v24, -inf }
0x16d6   :  { %9089 = vmax.xlane.f32.xlu0 %v9088_v0 }
0x16d7   :  { %v9091_v57 = vsel %vm3640_vm4, %v16175_v8, -inf }
0x16d8   :  { %9092 = vmax.xlane.f32.xlu1 %v9091_v57 }
0x16da   :  { %v9205_v12 = vpop.f32.mrb[220].mxu0 }
0x16db   :  { %v16181_v61 = vmul.f32 0.17677669, %v9205_v12  ;;  %v11699_v54 = vpop.f32.mrb[221].mxu0 }
0x16dc   :  { %v9208_v25 = vpop.f32.mrb[222].mxu0 }
0x16dd   :  { %v16183_v3 = vmul.f32 0.17677669, %v9208_v25  ;;  %v11700_v10 = vpop.f32.mrb[223].mxu0  ;;  %v9214_v38 = vsel %vm3640_vm4, %v16181_v61, -inf }
0x16de   :  { %9215 = vmax.xlane.f32.xlu0 %v9214_v38 }
0x16df   :  { %v9217_v37 = vsel %vm3640_vm4, %v16183_v3, -inf }
0x16e0   :  { %9218 = vmax.xlane.f32.xlu1 %v9217_v37 }
0x16e2   :  { %v9330_v28 = vpop.f32.mrb[224].mxu0 }
0x16e3   :  { %v16189_v5 = vmul.f32 0.17677669, %v9330_v28  ;;  %v11711_v34 = vpop.f32.mrb[225].mxu0 }
0x16e4   :  { %v9333_v6 = vpop.f32.mrb[226].mxu0 }
0x16e5   :  { %v16191_v11 = vmul.f32 0.17677669, %v9333_v6  ;;  %v11712_v0 = vpop.f32.mrb[227].mxu0  ;;  %v9339_v57 = vsel %vm3640_vm4, %v16189_v5, -inf }
0x16e6   :  { %9340 = vmax.xlane.f32.xlu0 %v9339_v57 }
0x16e7   :  { %v9342_v12 = vsel %vm3640_vm4, %v16191_v11, -inf }
0x16e8   :  { %9343 = vmax.xlane.f32.xlu1 %v9342_v12 }
0x1701   :  { %v7530_v54 = vpop.xlane.xlu0 %7529 }
0x1702   :  { %v7534_v25 = vsub.f32 %v16055_v15, %v7530_v54 }
0x1703   :  { %v7533_v10 = vpop.xlane.xlu1 %7532 }
0x1704   :  { %v7536_v38 = vmul.f32 1.442695, %v7534_v25  ;;  %v7535_v37 = vsub.f32 %v16057_v49, %v7533_v10 }
0x1706   :  { %12723 = vpow2.f32 %v7536_v38  ;;  %v7538_v28 = vmul.f32 1.442695, %v7535_v37 }
0x1708   :  { %12725 = vpow2.f32 %v7538_v28 }
0x170b   :  { %v7656_v34 = vpop.xlane.xlu0 %7655 }
0x170c   :  { %v7660_v6 = vsub.f32 %v16063_v58, %v7656_v34 }
0x170d   :  { %v7659_v0 = vpop.xlane.xlu1 %7658 }
0x170e   :  { %v7662_v53 = vmul.f32 1.442695, %v7660_v6  ;;  %v7661_v57 = vsub.f32 %v16065_v17, %v7659_v0 }
0x1710   :  { %v16201_v52 = vpop.eup %12723  ;;  %12727 = vpow2.f32 %v7662_v53  ;;  %v7664_v12 = vmul.f32 1.442695, %v7661_v57 }
0x1711   :  { %v7540_v15 = vsel %vm3640_vm4, %v16201_v52, 0.0 }
0x1712   :  { %v16205_v54 = vpop.eup %12725  ;;  %12729 = vpow2.f32 %v7664_v12  ;;  %7541 = vadd.xlane.f32.xlu0 %v7540_v15 }
0x1713   :  { %v7781_v49 = vpop.xlane.xlu0 %7780  ;;  %v7543_v25 = vsel %vm3640_vm4, %v16205_v54, 0.0 }
0x1714   :  { %v7785_v58 = vsub.f32 %v16075_v44, %v7781_v49  ;;  %7544 = vadd.xlane.f32.xlu1 %v7543_v25 }
0x1715   :  { %v7784_v10 = vpop.xlane.xlu1 %7783 }
0x1716   :  { %v7787_v17 = vmul.f32 1.442695, %v7785_v58  ;;  %v7786_v38 = vsub.f32 %v16079_v56, %v7784_v10 }
0x1718   :  { %12731 = vpow2.f32 %v7787_v17  ;;  %v7789_v53 = vmul.f32 1.442695, %v7786_v38 }
0x171a   :  { %v16211_v37 = vpop.eup %12727  ;;  %12733 = vpow2.f32 %v7789_v53 }
0x171b   :  { %v7905_v28 = vpop.xlane.xlu0 %7904  ;;  %v7666_v34 = vsel %vm3640_vm4, %v16211_v37, 0.0 }
0x171c   :  { %v16215_v6 = vpop.eup %12729  ;;  %v7909_v0 = vsub.f32 %v16089_v2, %v7905_v28  ;;  %7667 = vadd.xlane.f32.xlu0 %v7666_v34 }
0x171d   :  { %v7908_v44 = vpop.xlane.xlu1 %7907  ;;  %v7669_v57 = vsel %vm3640_vm4, %v16215_v6, 0.0 }
0x171e   :  { %v7911_v12 = vmul.f32 1.442695, %v7909_v0  ;;  %v7910_v56 = vsub.f32 %v16093_v32, %v7908_v44  ;;  %7670 = vadd.xlane.f32.xlu1 %v7669_v57 }
0x1720   :  { %12735 = vpow2.f32 %v7911_v12  ;;  %v7913_v15 = vmul.f32 1.442695, %v7910_v56 }
0x1722   :  { %v16221_v49 = vpop.eup %12731  ;;  %12737 = vpow2.f32 %v7913_v15 }
0x1723   :  { %v8030_v25 = vpop.xlane.xlu0 %8029  ;;  %v7791_v58 = vsel %vm3640_vm4, %v16221_v49, 0.0 }
0x1724   :  { %v16225_v10 = vpop.eup %12733  ;;  %v8034_v2 = vsub.f32 %v16101_v39, %v8030_v25  ;;  %7792 = vadd.xlane.f32.xlu0 %v7791_v58 }
0x1725   :  { %v8033_v17 = vpop.xlane.xlu1 %8032  ;;  %v7794_v38 = vsel %vm3640_vm4, %v16225_v10, 0.0 }
0x1726   :  { %v8036_v32 = vmul.f32 1.442695, %v8034_v2  ;;  %v8035_v53 = vsub.f32 %v16103_v1, %v8033_v17  ;;  %7795 = vadd.xlane.f32.xlu1 %v7794_v38 }
0x1728   :  { %12739 = vpow2.f32 %v8036_v32  ;;  %v8038_v28 = vmul.f32 1.442695, %v8035_v53 }
0x172a   :  { %v16231_v34 = vpop.eup %12735  ;;  %12741 = vpow2.f32 %v8038_v28 }
0x172b   :  { %v8156_v0 = vpop.xlane.xlu0 %8155  ;;  %v7915_v44 = vsel %vm3640_vm4, %v16231_v34, 0.0 }
0x172c   :  { %v16235_v57 = vpop.eup %12737  ;;  %7916 = vadd.xlane.f32.xlu0 %v7915_v44 }
0x172d   :  { %v8159_v39 = vpop.xlane.xlu1 %8158  ;;  %v7918_v12 = vsel %vm3640_vm4, %v16235_v57, 0.0 }
0x172e   :  { %v8161_v56 = vsub.f32 %v16111_v16, %v8159_v39  ;;  %7919 = vadd.xlane.f32.xlu1 %v7918_v12 }
0x172f   :  { %v7417_v1 = vpop.xlane.xlu0 %7416 }
0x1730   :  { %v8164_v15 = vmul.f32 1.442695, %v8161_v56  ;;  %12743 = vrcp.f32 %v7417_v1 }
0x1731   :  { %v7420_v25 = vpop.xlane.xlu1 %7419 }
0x1732   :  { %v16240_v58 = vpop.eup %12739  ;;  %12745 = vpow2.f32 %v8164_v15 }
0x1733   :  { %12747 = vrcp.f32 %v7420_v25  ;;  %v8281_v2 = vpop.xlane.xlu0 %8280  ;;  %v8040_v17 = vsel %vm3640_vm4, %v16240_v58, 0.0 }
0x1734   :  { %v16244_v38 = vpop.eup %12741  ;;  %v8285_v32 = vsub.f32 %v16123_v60, %v8281_v2  ;;  %8041 = vadd.xlane.f32.xlu1 %v8040_v17 }
0x1735   :  { %v8284_v53 = vpop.xlane.xlu1 %8283  ;;  %v8043_v44 = vsel %vm3640_vm4, %v16244_v38, 0.0 }
0x1736   :  { %v8287_v16 = vmul.f32 1.442695, %v8285_v32  ;;  %v8286_v28 = vsub.f32 %v16127_v4, %v8284_v53  ;;  %v16259_v32 = vpack.c.bf16 %v15952_v45, %v15952_v45 }
0x1738   :  { %12749 = vpow2.f32 %v8287_v16  ;;  %v8289_v39 = vmul.f32 1.442695, %v8286_v28  ;;  %8044 = vadd.xlane.f32.xlu1 %v8043_v44  ;;  %v8160_v28 = vsub.f32 %v16109_v18, %v8156_v0 }
0x173a   :  { %12751 = vpow2.f32 %v8289_v39  ;;  %v12744_v12 = vpop.eup %12743 }
0x173b   :  { %v8465_v56 = vpop.xlane.xlu0 %8464  ;;  %v7422_v2 = vmul.f32 %v12744_v12, %v16115_v19  ;;  %v8162_v12 = vmul.f32 1.442695, %v8160_v28 }
0x173c   :  { %v16250_v1 = vpop.eup %12745  ;;  %v8469_v15 = vsub.f32 %v16133_v62, %v8465_v56  ;;  %v7558_v62 = vsel %vm3656_vm5, %v16073_v36, 0 }
0x173d   :  { %v12748_v25 = vpop.eup %12747  ;;  %v8169_v60 = vsel %vm3640_vm4, %v16250_v1, 0.0  ;;  %v8468_v39 = vpop.xlane.xlu1 %8467 }
0x173e   :  { %v7424_v4 = vmul.f32 %v12748_v25, %v16119_v59  ;;  %v8471_v17 = vmul.f32 1.442695, %v8469_v15  ;;  %8170 = vadd.xlane.f32.xlu1 %v8169_v60  ;;  %v8470_v56 = vsub.f32 %v16135_v31, %v8468_v39 }
0x1740   :  { %12753 = vpow2.f32 %v8471_v17  ;;  %v7425_v53 = vpack.c.bf16 %v7424_v4, %v7422_v2  ;;  %v8473_v60 = vmul.f32 1.442695, %v8470_v56 }
0x1741   :  { %12755 = vpow2.f32 %v8162_v12 }
0x1742   :  { %v16261_v16 = vpop.eup %12749  ;;  %11536 = vmatmul.mubr.msk.bf16.vlgmr.msra.gmra.mrb[192].mxu1 %vm3640_vm4, %v7425_v53  ;;  %8612 = vrot.lane.b32.xlu0 %v16259_v32, %s13548_s28  ;;  %12757 = vpow2.f32 %v8473_v60 }
0x1743   :  { %11546 = vmatpush3.bf16.msra.mxu1 %v7558_v62  ;;  %v8291_v19 = vsel %vm3640_vm4, %v16261_v16, 0.0  ;;  %11547 = vmatprep.mubr.msk.bf16.mxu1 %vm13547_vm1, %v16756_v40  ;;  %v8590_v15 = vpop.xlane.xlu0 %8589 }
0x1744   :  { %v16272_v45 = vpop.eup %12751  ;;  %8292 = vadd.xlane.f32.xlu1 %v8291_v19  ;;  %11557 = vmatprep.subr.bf16.mxu1 %v16756_v40 }
0x1745   :  { %v8294_v36 = vsel %vm3640_vm4, %v16272_v45, 0.0  ;;  %v8593_v25 = vpop.xlane.xlu1 %8592 }
0x1746   :  { %v8595_v2 = vsub.f32 %v16143_v47, %v8593_v25 }
0x1748   :  { %8295 = vadd.xlane.f32.xlu1 %v8294_v36  ;;  %v8598_v53 = vmul.f32 1.442695, %v8595_v2 }
0x174a   :  { %v16277_v59 = vpop.eup %12753  ;;  %12759 = vpow2.f32 %v8598_v53 }
0x174b   :  { %v8475_v44 = vsel %vm3640_vm4, %v16277_v59, 0.0  ;;  %v8716_v4 = vpop.xlane.xlu0 %8715  ;;  %v16286_v31 = vpop.eup %12755 }
0x174c   :  { %8476 = vadd.xlane.f32.xlu1 %v8475_v44  ;;  %v16293_v12 = vpop.eup %12757 }
0x174d   :  { %v8719_v17 = vpop.xlane.xlu1 %8718  ;;  %v8478_v25 = vsel %vm3640_vm4, %v16293_v12, 0.0 }
0x174e   :  { %v8721_v18 = vsub.f32 %v16151_v43, %v8719_v17  ;;  %v8166_v43 = vsel %vm3640_vm4, %v16286_v31, 0.0 }
0x1750   :  { %v8724_v19 = vmul.f32 1.442695, %v8721_v18  ;;  %v8594_v18 = vsub.f32 %v16141_v33, %v8590_v15 }
0x1752   :  { %12761 = vpow2.f32 %v8724_v19 }
0x1753   :  { %v8841_v0 = vpop.xlane.xlu0 %8840 }
0x1754   :  { %v16298_v60 = vpop.eup %12759 }
0x1755   :  { %v8844_v62 = vpop.xlane.xlu1 %8843  ;;  %v8603_v17 = vsel %vm3640_vm4, %v16298_v60, 0.0 }
0x1756   :  { %v8846_v36 = vsub.f32 %v16159_v50, %v8844_v62 }
0x1758   :  { %v8849_v47 = vmul.f32 1.442695, %v8846_v36 }
0x175a   :  { %12763 = vpow2.f32 %v8849_v47  ;;  %v8596_v47 = vmul.f32 1.442695, %v8594_v18 }
0x175b   :  { %v8965_v28 = vpop.xlane.xlu0 %8964 }
0x175c   :  { %v8969_v44 = vsub.f32 %v16165_v14, %v8965_v28  ;;  %v16302_v53 = vpop.eup %12761 }
0x175d   :  { %8737 = vrot.lane.b32.xlu1 %v16259_v32, %s13549_s9  ;;  %v8968_v39 = vpop.xlane.xlu1 %8967  ;;  %v8729_v19 = vsel %vm3640_vm4, %v16302_v53, 0.0 }
0x175e   :  { %v8971_v56 = vmul.f32 1.442695, %v8969_v44  ;;  %v8970_v50 = vsub.f32 %v16167_v63, %v8968_v39  ;;  %v8720_v44 = vsub.f32 %v16149_v21, %v8716_v4 }
0x1760   :  { %12765 = vpow2.f32 %v8971_v56  ;;  %v8973_v2 = vmul.f32 1.442695, %v8970_v50  ;;  %v8722_v33 = vmul.f32 1.442695, %v8720_v44 }
0x1761   :  { %8167 = vadd.xlane.f32.xlu0 %v8166_v43 }
0x1762   :  { %12767 = vpow2.f32 %v8973_v2 }
0x1763   :  { %v9090_v14 = vpop.xlane.xlu0 %9089 }
0x1764   :  { %v16308_v36 = vpop.eup %12763  ;;  %v9094_v21 = vsub.f32 %v16173_v24, %v9090_v14 }
0x1765   :  { %8479 = vadd.xlane.f32.xlu0 %v8478_v25  ;;  %v8854_v39 = vsel %vm3640_vm4, %v16308_v36, 0.0  ;;  %v9093_v4 = vpop.xlane.xlu1 %9092 }
0x1769   :  { %8604 = vadd.xlane.f32.xlu0 %v8603_v17  ;;  %v9096_v17 = vmul.f32 1.442695, %v9094_v21 }
0x176a   :  { %v16313_v43 = vpop.eup %12765 }
0x176b   :  { %v9216_v62 = vpop.xlane.xlu0 %9215  ;;  %v8975_v15 = vsel %vm3640_vm4, %v16313_v43, 0.0 }
0x176c   :  { %v9220_v63 = vsub.f32 %v16181_v61, %v9216_v62  ;;  %v8845_v61 = vsub.f32 %v16157_v30, %v8841_v0  ;;  %v16318_v56 = vpop.eup %12767  ;;  %v9095_v30 = vsub.f32 %v16175_v8, %v9093_v4 }
0x176d   :  { %8730 = vadd.xlane.f32.xlu0 %v8729_v19  ;;  %v8978_v25 = vsel %vm3640_vm4, %v16318_v56, 0.0  ;;  %v9219_v18 = vpop.xlane.xlu1 %9218 }
0x176e   :  { %v9222_v28 = vmul.f32 1.442695, %v9220_v63  ;;  %v8847_v50 = vmul.f32 1.442695, %v8845_v61  ;;  %v9098_v24 = vmul.f32 1.442695, %v9095_v30  ;;  %v9221_v14 = vsub.f32 %v16183_v3, %v9219_v18 }
0x1770   :  { %12769 = vpow2.f32 %v9222_v28  ;;  %v9224_v8 = vmul.f32 1.442695, %v9221_v14 }
0x1771   :  { %8855 = vadd.xlane.f32.xlu0 %v8854_v39  ;;  %12771 = vpow2.f32 %v8596_v47 }
0x1772   :  { %12773 = vpow2.f32 %v8722_v33 }
0x1773   :  { %12775 = vpow2.f32 %v8847_v50  ;;  %v9341_v63 = vpop.xlane.xlu0 %9340 }
0x1774   :  { %12777 = vpow2.f32 %v9096_v17  ;;  %v9345_v47 = vsub.f32 %v16189_v5, %v9341_v63  ;;  %v16363_v63 = vpack.c.bf16 %v15954_v23, %v15954_v23 }
0x1775   :  { %8976 = vadd.xlane.f32.xlu0 %v8975_v15  ;;  %12779 = vpow2.f32 %v9098_v24  ;;  %v9344_v30 = vpop.xlane.xlu1 %9343 }
0x1776   :  { %12781 = vpow2.f32 %v9224_v8  ;;  %v9347_v33 = vmul.f32 1.442695, %v9345_v47 }
0x1778   :  { %12783 = vpow2.f32 %v9347_v33 }
0x1779   :  { %8979 = vadd.xlane.f32.xlu0 %v8978_v25 }
0x177a   :  { %v16323_v2 = vpop.eup %12769 }
0x177b   :  { %v9226_v0 = vsel %vm3640_vm4, %v16323_v2, 0.0  ;;  %v16328_v62 = vpop.eup %12771 }
0x177c   :  { %v8600_v19 = vsel %vm3640_vm4, %v16328_v62, 0.0  ;;  %v16333_v28 = vpop.eup %12773 }
0x177d   :  { %9227 = vadd.xlane.f32.xlu0 %v9226_v0  ;;  %v8726_v44 = vsel %vm3640_vm4, %v16333_v28, 0.0  ;;  %v16338_v39 = vpop.eup %12775  ;;  %v9346_v0 = vsub.f32 %v16191_v11, %v9344_v30 }
0x177e   :  { %v8851_v3 = vsel %vm3640_vm4, %v16338_v39, 0.0  ;;  %v16342_v61 = vpop.eup %12777 }
0x177f   :  { %v9100_v15 = vsel %vm3640_vm4, %v16342_v61, 0.0  ;;  %v16346_v50 = vpop.eup %12779  ;;  %v9349_v24 = vmul.f32 1.442695, %v9346_v0 }
0x1780   :  { %v9103_v5 = vsel %vm3640_vm4, %v16346_v50, 0.0  ;;  %v16350_v21 = vpop.eup %12781 }
0x1781   :  { %8601 = vadd.xlane.f32.xlu1 %v8600_v19  ;;  %v9229_v4 = vsel %vm3640_vm4, %v16350_v21, 0.0 }
0x1782   :  { %v16356_v25 = vpop.eup %12783 }
0x1783   :  { %v9351_v17 = vsel %vm3640_vm4, %v16356_v25, 0.0 }
0x1785   :  { %8727 = vadd.xlane.f32.xlu1 %v8726_v44 }
0x1789   :  { %8852 = vadd.xlane.f32.xlu1 %v8851_v3 }
0x178d   :  { %9101 = vadd.xlane.f32.xlu1 %v9100_v15  ;;  %v7683_v15 = vsel %vm3656_vm5, %v16069_v26, 0 }
0x1791   :  { %9104 = vadd.xlane.f32.xlu1 %v9103_v5 }
0x1793   :  { %8862 = vrot.lane.b32.xlu0 %v16259_v32, %s13550_s1 }
0x1795   :  { %9230 = vadd.xlane.f32.xlu1 %v9229_v4 }
0x1799   :  { %9352 = vadd.xlane.f32.xlu1 %v9351_v17 }
0x179f   :  { %v7542_v18 = vpop.xlane.xlu0 %7541 }
0x17a0   :  { %12785 = vrcp.f32 %v7542_v18 }
0x17a1   :  { %v7545_v14 = vpop.xlane.xlu1 %7544 }
0x17a2   :  { %12787 = vrcp.f32 %v7545_v14 }
0x17a3   :  { %12789 = vpow2.f32 %v9349_v24  ;;  %v7808_v24 = vsel %vm3656_vm5, %v16083_v9, 0  ;;  %v7930_v9 = vsel %vm3656_vm5, %v15959_v22, 0 }
0x17a9   :  { %v7668_v19 = vpop.xlane.xlu0 %7667 }
0x17aa   :  { %v12786_v8 = vpop.eup %12785  ;;  %12791 = vrcp.f32 %v7668_v19  ;;  %9112 = vrot.lane.b32.xlu1 %v16363_v63, %s13548_s28 }
0x17ab   :  { %v7671_v47 = vpop.xlane.xlu1 %7670  ;;  %v7547_v11 = vmul.f32 %v12786_v8, %v16201_v52 }
0x17ac   :  { %v12788_v44 = vpop.eup %12787  ;;  %12793 = vrcp.f32 %v7671_v47 }
0x17ad   :  { %v7549_v33 = vmul.f32 %v12788_v44, %v16205_v54  ;;  %v16371_v3 = vpop.eup %12789 }
0x17ae   :  { %9237 = vrot.lane.b32.xlu1 %v16363_v63, %s13549_s9  ;;  %v9354_v52 = vsel %vm3640_vm4, %v16371_v3, 0.0 }
0x17af   :  { %v7550_v23 = vpack.c.bf16 %v7549_v33, %v7547_v11 }
0x17b1   :  { %v7793_v5 = vpop.xlane.xlu0 %7792  ;;  %11548 = vmatmul.mubr.msk.bf16.vlgmr.msra.gmra.mrb[196].mxu1 %vm3640_vm4, %v7550_v23 }
0x17b2   :  { %12795 = vrcp.f32 %v7793_v5  ;;  %11558 = vmatpush3.bf16.msra.mxu1 %v7683_v15  ;;  %9362 = vrot.lane.b32.xlu1 %v16363_v63, %s13550_s1  ;;  %v8058_v5 = vsel %vm3656_vm5, %v16077_v35, 0 }
0x17b3   :  { %9355 = vadd.xlane.f32.xlu0 %v9354_v52  ;;  %v7796_v54 = vpop.xlane.xlu1 %7795  ;;  %11559 = vmatprep.mubr.msk.bf16.mxu1 %vm13547_vm1, %v16756_v40 }
0x17b4   :  { %v12792_v4 = vpop.eup %12791  ;;  %12797 = vrcp.f32 %v7796_v54  ;;  %11569 = vmatprep.subr.bf16.mxu1 %v16756_v40 }
0x17b5   :  { %v7673_v17 = vmul.f32 %v12792_v4, %v16211_v37 }
0x17b6   :  { %v12794_v26 = vpop.eup %12793 }
0x17b7   :  { %v7675_v30 = vmul.f32 %v12794_v26, %v16215_v6 }
0x17b9   :  { %v7917_v0 = vpop.xlane.xlu0 %7916  ;;  %v7676_v18 = vpack.c.bf16 %v7675_v30, %v7673_v17 }
0x17ba   :  { %12799 = vrcp.f32 %v7917_v0 }
0x17bb   :  { %11560 = vmatmul.mubr.msk.bf16.vlgmr.msra.gmra.mrb[200].mxu1 %vm3640_vm4, %v7676_v18  ;;  %v7920_v14 = vpop.xlane.xlu1 %7919 }
0x17bc   :  { %v12796_v19 = vpop.eup %12795  ;;  %11570 = vmatpush3.bf16.msra.mxu1 %v7808_v24  ;;  %12801 = vrcp.f32 %v7920_v14  ;;  %11571 = vmatprep.mubr.msk.bf16.mxu1 %vm13547_vm1, %v16756_v40 }
0x17bd   :  { %11581 = vmatprep.subr.bf16.mxu1 %v16756_v40  ;;  %v7798_v6 = vmul.f32 %v12796_v19, %v16221_v49  ;;  %v8613_v26 = vpop.permute.xlu0 %8612 }
0x17be   :  { %v12798_v37 = vpop.eup %12797 }
0x17bf   :  { %v7800_v8 = vmul.f32 %v12798_v37, %v16225_v10 }
0x17c1   :  { %v8042_v47 = vpop.xlane.xlu1 %8041  ;;  %v7801_v44 = vpack.c.bf16 %v7800_v8, %v7798_v6  ;;  %v8308_v6 = vsel %vm3656_vm5, %v16087_v55, 0  ;;  %v8490_v55 = vsel %vm3656_vm5, %v16259_v32, 0 }
0x17c2   :  { %12803 = vrcp.f32 %v8042_v47 }
0x17c3   :  { %11572 = vmatmul.mubr.msk.bf16.vlgmr.msra.gmra.mrb[204].mxu1 %vm3640_vm4, %v7801_v44 }
0x17c4   :  { %v12800_v11 = vpop.eup %12799  ;;  %11582 = vmatpush3.bf16.msra.mxu1 %v7930_v9  ;;  %11583 = vmatprep.mubr.msk.bf16.mxu1 %vm13547_vm1, %v16756_v40 }
0x17c5   :  { %v8045_v33 = vpop.xlane.xlu1 %8044  ;;  %11593 = vmatprep.subr.bf16.mxu1 %v16756_v40  ;;  %v7922_v49 = vmul.f32 %v12800_v11, %v16231_v34 }
0x17c6   :  { %v12802_v23 = vpop.eup %12801  ;;  %12805 = vrcp.f32 %v8045_v33 }
0x17c7   :  { %v7924_v10 = vmul.f32 %v12802_v23, %v16235_v57  ;;  %v8183_v57 = vsel %vm3656_vm5, %v16091_v42, 0 }
0x17c9   :  { %v7925_v15 = vpack.c.bf16 %v7924_v10, %v7922_v49 }
0x17cb   :  { %11584 = vmatmul.mubr.msk.bf16.vlgmr.msra.gmra.mrb[208].mxu1 %vm3640_vm4, %v7925_v15  ;;  %v8171_v35 = vpop.xlane.xlu1 %8170  ;;  %v8618_v15 = vsel %vm3656_vm5, %v8613_v26, 0 }
0x17cc   :  { %11594 = vmatpush3.bf16.msra.mxu1 %v8058_v5  ;;  %11595 = vmatprep.mubr.msk.bf16.mxu1 %vm13547_vm1, %v16756_v40  ;;  %v12804_v22 = vpop.eup %12803  ;;  %12807 = vrcp.f32 %v8171_v35 }
0x17cd   :  { %11605 = vmatprep.subr.bf16.mxu1 %v16756_v40  ;;  %v8047_v54 = vmul.f32 %v12804_v22, %v16240_v58 }
0x17d0   :  { %v12806_v52 = vpop.eup %12805 }
0x17d1   :  { %v8049_v34 = vmul.f32 %v12806_v52, %v16244_v38  ;;  %v8293_v17 = vpop.xlane.xlu1 %8292 }
0x17d3   :  { %v8050_v4 = vpack.c.bf16 %v8049_v34, %v8047_v54 }
0x17d5   :  { %11596 = vmatmul.mubr.msk.bf16.vlgmr.msra.gmra.mrb[212].mxu1 %vm3640_vm4, %v8050_v4  ;;  %v8296_v58 = vpop.xlane.xlu1 %8295 }
0x17d6   :  { %11606 = vmatpush3.bf16.msra.mxu1 %v8183_v57  ;;  %11607 = vmatprep.mubr.msk.bf16.mxu1 %vm13547_vm1, %v16756_v40  ;;  %v12808_v38 = vpop.eup %12807 }
0x17d7   :  { %11617 = vmatprep.subr.bf16.mxu1 %v16756_v40  ;;  %v8175_v18 = vmul.f32 %v12808_v38, %v16250_v1 }
0x17d9   :  { %v8477_v24 = vpop.xlane.xlu1 %8476 }
0x17ee   :  { %v8168_v30 = vpop.xlane.xlu0 %8167 }
0x17ef   :  { %12809 = vrcp.f32 %v8168_v30 }
0x17f0   :  { %12811 = vrcp.f32 %v8296_v58 }
0x17f1   :  { %12813 = vrcp.f32 %v8293_v17 }
0x17f2   :  { %v8480_v0 = vpop.xlane.xlu0 %8479 }
0x17f3   :  { %12815 = vrcp.f32 %v8480_v0 }
0x17f4   :  { %12817 = vrcp.f32 %v8477_v24 }
0x17f6   :  { %v8605_v47 = vpop.xlane.xlu0 %8604 }
0x17f7   :  { %12819 = vrcp.f32 %v8605_v47 }
0x17f9   :  { %v12810_v42 = vpop.eup %12809 }
0x17fa   :  { %v8173_v14 = vmul.f32 %v12810_v42, %v16286_v31  ;;  %v12812_v37 = vpop.eup %12811  ;;  %v8731_v11 = vpop.xlane.xlu0 %8730 }
0x17fb   :  { %v12814_v8 = vpop.eup %12813  ;;  %v8300_v1 = vmul.f32 %v12812_v37, %v16272_v45 }
0x17fc   :  { %v8176_v19 = vpack.c.bf16 %v8175_v18, %v8173_v14  ;;  %v8298_v31 = vmul.f32 %v12814_v8, %v16261_v16  ;;  %v8738_v16 = vpop.permute.xlu1 %8737 }
0x17fd   :  { %v12816_v9 = vpop.eup %12815  ;;  %v8743_v42 = vsel %vm3656_vm5, %v8738_v16, 0 }
0x17fe   :  { %11608 = vmatmul.mubr.msk.bf16.vlgmr.msra.gmra.mrb[216].mxu1 %vm3640_vm4, %v8176_v19  ;;  %v8301_v44 = vpack.c.bf16 %v8300_v1, %v8298_v31  ;;  %v12818_v33 = vpop.eup %12817  ;;  %v8484_v23 = vmul.f32 %v12816_v9, %v16293_v12  ;;  %v8856_v49 = vpop.xlane.xlu0 %8855  ;;  %v8990_v9 = vsel %vm3656_vm5, %v16363_v63, 0 }
0x17ff   :  { %11618 = vmatpush3.bf16.msra.mxu1 %v8308_v6  ;;  %11619 = vmatprep.mubr.msk.bf16.mxu1 %vm13547_vm1, %v16756_v40  ;;  %v8482_v45 = vmul.f32 %v12818_v33, %v16277_v59 }
0x1800   :  { %11629 = vmatprep.subr.bf16.mxu1 %v16756_v40 }
0x1801   :  { %v8485_v10 = vpack.c.bf16 %v8484_v23, %v8482_v45  ;;  %v12820_v54 = vpop.eup %12819 }
0x1802   :  { %v8977_v12 = vpop.xlane.xlu0 %8976  ;;  %v8609_v26 = vmul.f32 %v12820_v54, %v16298_v60 }
0x1806   :  { %11620 = vmatmul.mubr.msk.bf16.vlgmr.msra.gmra.mrb[220].mxu1 %vm3640_vm4, %v8301_v44  ;;  %v8980_v34 = vpop.xlane.xlu0 %8979 }
0x1807   :  { %11630 = vmatpush3.bf16.msra.mxu1 %v8490_v55  ;;  %11631 = vmatprep.mubr.msk.bf16.mxu1 %vm13547_vm1, %v16756_v40 }
0x1808   :  { %11641 = vmatprep.subr.bf16.mxu1 %v16756_v40 }
0x180a   :  { %v9228_v0 = vpop.xlane.xlu0 %9227 }
0x180e   :  { %11632 = vmatmul.mubr.msk.bf16.vlgmr.msra.gmra.mrb[224].mxu1 %vm3640_vm4, %v8485_v10  ;;  %v8602_v32 = vpop.xlane.xlu1 %8601  ;;  %v8863_v14 = vpop.permute.xlu0 %8862 }
0x180f   :  { %11642 = vmatpush3.bf16.msra.mxu1 %v8618_v15  ;;  %12821 = vrcp.f32 %v8602_v32  ;;  %11643 = vmatprep.mubr.msk.bf16.mxu1 %vm13547_vm1, %v16756_v40  ;;  %v8868_v6 = vsel %vm3656_vm5, %v8863_v14, 0 }
0x1810   :  { %11653 = vmatprep.subr.bf16.mxu1 %v16756_v40 }
0x1812   :  { %v8728_v5 = vpop.xlane.xlu1 %8727 }
0x1813   :  { %12823 = vrcp.f32 %v8728_v5 }
0x1814   :  { %12825 = vrcp.f32 %v8731_v11 }
0x1815   :  { %v16438_v59 = vpop.f32.mrb[192].mxu1 }
0x1816   :  { %v11537_v22 = vpop.f32.mrb[193].mxu1  ;;  %v8853_v52 = vpop.xlane.xlu1 %8852 }
0x1817   :  { %v16440_v4 = vpop.f32.mrb[194].mxu1  ;;  %12827 = vrcp.f32 %v8853_v52 }
0x1818   :  { %v11538_v57 = vpop.f32.mrb[195].mxu1  ;;  %12829 = vrcp.f32 %v8856_v49 }
0x1819   :  { %v12822_v35 = vpop.eup %12821  ;;  %12831 = vrcp.f32 %v8980_v34 }
0x181a   :  { %v8607_v17 = vmul.f32 %v12822_v35, %v16328_v62  ;;  %v9102_v30 = vpop.xlane.xlu1 %9101  ;;  %12833 = vrcp.f32 %v8977_v12 }
0x181c   :  { %v8610_v58 = vpack.c.bf16 %v8609_v26, %v8607_v17 }
0x181d   :  { %v12824_v38 = vpop.eup %12823 }
0x181e   :  { %11644 = vmatmul.mubr.msk.bf16.vlgmr.msra.gmra.mrb[228].mxu1 %vm3640_vm4, %v8610_v58  ;;  %v12826_v18 = vpop.eup %12825  ;;  %v8733_v24 = vmul.f32 %v12824_v38, %v16333_v28  ;;  %v9105_v60 = vpop.xlane.xlu1 %9104 }
0x181f   :  { %11654 = vmatpush3.bf16.msra.mxu1 %v8743_v42  ;;  %11655 = vmatprep.mubr.msk.bf16.mxu1 %vm13547_vm1, %v16756_v40  ;;  %v8735_v62 = vmul.f32 %v12826_v18, %v16302_v53  ;;  %12835 = vrcp.f32 %v9105_v60  ;;  %v12391_v60 = vld [vmem:[#allocation31] ss:$8 sps:$4 sm:$0xff]  }
0x1820   :  { %11665 = vmatprep.subr.bf16.mxu1 %v16756_v40  ;;  %12837 = vrcp.f32 %v9102_v30 }
0x1821   :  { %v8736_v19 = vpack.c.bf16 %v8735_v62, %v8733_v24  ;;  %v12828_v37 = vpop.eup %12827 }
0x1822   :  { %v12830_v8 = vpop.eup %12829  ;;  %v9231_v47 = vpop.xlane.xlu1 %9230  ;;  %v8858_v28 = vmul.f32 %v12828_v37, %v16338_v39  ;;  %v12396_v37 = vld [vmem:[#allocation31 + $0x14] ss:$8 sps:$4 sm:$0xff]  }
0x1823   :  { %v8860_v53 = vmul.f32 %v12830_v8, %v16308_v36  ;;  %v12832_v31 = vpop.eup %12831  ;;  %12839 = vrcp.f32 %v9231_v47  ;;  %v12397_v47 = vld [vmem:[#allocation31 + $0x20] ss:$8 sps:$4 sm:$0xff]  }
0x1824   :  { %v12834_v11 = vpop.eup %12833  ;;  %v8984_v39 = vmul.f32 %v12832_v31, %v16318_v56  ;;  %12841 = vrcp.f32 %v9228_v0 }
0x1825   :  { %v8861_v1 = vpack.c.bf16 %v8860_v53, %v8858_v28  ;;  %v8982_v36 = vmul.f32 %v12834_v11, %v16313_v43  ;;  %v12399_v28 = vld [vmem:[#allocation31 + $0x24] ss:$8 sps:$4 sm:$0xff]   ;;  %v12403_v11 = vld [vmem:[#allocation31 + $0x40] ss:$8 sps:$4 sm:$0xff]  }
0x1826   :  { %11656 = vmatmul.mubr.msk.bf16.vlgmr.msra.gmra.mrb[232].mxu1 %vm3640_vm4, %v8736_v19  ;;  %v9353_v44 = vpop.xlane.xlu1 %9352 }
0x1827   :  { %11666 = vmatpush3.bf16.msra.mxu1 %v8868_v6  ;;  %11667 = vmatprep.mubr.msk.bf16.mxu1 %vm13547_vm1, %v16756_v40  ;;  %v8985_v33 = vpack.c.bf16 %v8984_v39, %v8982_v36  ;;  %12843 = vrcp.f32 %v9353_v44  ;;  %v12394_v6 = vld [vmem:[#allocation31 + $0x10] ss:$8 sps:$4 sm:$0xff]   ;;  %v12402_v44 = vld [vmem:[#allocation31 + $0x34] ss:$8 sps:$4 sm:$0xff]   ;;  %v12405_v39 = vld [vmem:[#allocation31 + $0x44] ss:$8 sps:$4 sm:$0xff]  }
0x1828   :  { %11677 = vmatprep.subr.bf16.mxu1 %v16756_v40 }
0x1829   :  { %v12836_v23 = vpop.eup %12835 }
0x182a   :  { %v9113_v55 = vpop.permute.xlu1 %9112  ;;  %v12838_v63 = vpop.eup %12837  ;;  %v9109_v56 = vmul.f32 %v12836_v23, %v16346_v50 }
0x182b   :  { %v9118_v45 = vsel %vm3656_vm5, %v9113_v55, 0  ;;  %v9107_v43 = vmul.f32 %v12838_v63, %v16342_v61  ;;  %v12406_v63 = vld [vmem:[#allocation31 + $0x50] ss:$8 sps:$4 sm:$0xff]  }
0x182d   :  { %v9110_v49 = vpack.c.bf16 %v9109_v56, %v9107_v43  ;;  %v12840_v10 = vpop.eup %12839  ;;  %v12408_v56 = vld [vmem:[#allocation31 + $0x54] ss:$8 sps:$4 sm:$0xff]   ;;  %v12411_v43 = vld [vmem:[#allocation31 + $0x64] ss:$8 sps:$4 sm:$0xff]  }
0x182e   :  { %11668 = vmatmul.mubr.msk.bf16.vlgmr.msra.gmra.mrb[236].mxu1 %vm3640_vm4, %v8861_v1  ;;  %v9238_v16 = vpop.permute.xlu1 %9237  ;;  %v12842_v32 = vpop.eup %12841  ;;  %v9235_v12 = vmul.f32 %v12840_v10, %v16350_v21  ;;  %v12412_v10 = vld [vmem:[#allocation31 + $0x70] ss:$8 sps:$4 sm:$0xff]  }
0x182f   :  { %11678 = vmatpush3.bf16.msra.mxu1 %v8990_v9  ;;  %11679 = vmatprep.mubr.msk.bf16.mxu1 %vm13547_vm1, %v16756_v40  ;;  %v9243_v15 = vsel %vm3656_vm5, %v9238_v16, 0  ;;  %v9233_v61 = vmul.f32 %v12842_v32, %v16323_v2  ;;  %v12400_v9 = vld [vmem:[#allocation31 + $0x30] ss:$8 sps:$4 sm:$0xff]   ;;  %v12409_v16 = vld [vmem:[#allocation31 + $0x60] ss:$8 sps:$4 sm:$0xff]  }
0x1830   :  { %11689 = vmatprep.subr.bf16.mxu1 %v16756_v40  ;;  %v12415_v32 = vld [vmem:[#allocation31 + $0x80] ss:$8 sps:$4 sm:$0xff]  }
0x1831   :  { %v9236_v22 = vpack.c.bf16 %v9235_v12, %v9233_v61  ;;  %v12844_v54 = vpop.eup %12843  ;;  %v12420_v12 = vld [vmem:[#allocation31 + $0x94] ss:$8 sps:$4 sm:$0xff]   ;;  %v12423_v61 = vld [vmem:[#allocation31 + $0xa4] ss:$8 sps:$4 sm:$0xff]  }
0x1832   :  { %v9363_v5 = vpop.permute.xlu1 %9362  ;;  %v9358_v21 = vmul.f32 %v12844_v54, %v16356_v25  ;;  %v12393_v25 = vld [vmem:[#allocation31 + $0x4] ss:$8 sps:$4 sm:$0xff]  }
0x1833   :  { %v9368_v52 = vsel %vm3656_vm5, %v9363_v5, 0  ;;  %9667 = vmatprep.subr.bf16.mxu0 %v12393_v25  ;;  %v12421_v5 = vld [vmem:[#allocation31 + $0xa0] ss:$8 sps:$4 sm:$0xff]   ;;  %v12429_v54 = vld [vmem:[#allocation31 + $0xc4] ss:$8 sps:$4 sm:$0xff]  }
0x1834   :  { %9668 = vmatpush1.bf16.msra.mxu0 %v12391_v60 }
0x1835   :  { %9669 = vmatprep.subr.bf16.mxu0 %v12396_v37 }
0x1836   :  { %11680 = vmatmul.mubr.msk.bf16.vlgmr.msra.gmra.mrb[240].mxu1 %vm3640_vm4, %v8985_v33 }
0x1837   :  { %11690 = vmatpush3.bf16.msra.mxu1 %v9118_v45  ;;  %11691 = vmatprep.mubr.msk.bf16.mxu1 %vm13547_vm1, %v16756_v40 }
0x1838   :  { %11701 = vmatprep.subr.bf16.mxu1 %v16756_v40  ;;  %9670 = vmatpush1.bf16.msra.mxu0 %v12394_v6 }
0x1839   :  { %9671 = vmatprep.subr.bf16.mxu0 %v12399_v28 }
0x183c   :  { %9672 = vmatpush1.bf16.msra.mxu0 %v12397_v47 }
0x183d   :  { %9673 = vmatprep.subr.bf16.mxu0 %v12402_v44 }
0x183e   :  { %11692 = vmatmul.mubr.msk.bf16.vlgmr.msra.gmra.mrb[244].mxu1 %vm3640_vm4, %v9110_v49  ;;  %v12414_v49 = vld [vmem:[#allocation31 + $0x74] ss:$8 sps:$4 sm:$0xff]  }
0x183f   :  { %11702 = vmatpush3.bf16.msra.mxu1 %v9243_v15  ;;  %11703 = vmatprep.mubr.msk.bf16.mxu1 %vm13547_vm1, %v16756_v40  ;;  %v12417_v15 = vld [vmem:[#allocation31 + $0x84] ss:$8 sps:$4 sm:$0xff]  }
0x1840   :  { %v9356_v50 = vpop.xlane.xlu0 %9355  ;;  %11713 = vmatprep.subr.bf16.mxu1 %v16756_v40  ;;  %9674 = vmatpush1.bf16.msra.mxu0 %v12400_v9 }
0x1841   :  { %12845 = vrcp.f32 %v9356_v50  ;;  %9675 = vmatprep.subr.bf16.mxu0 %v12405_v39  ;;  %v12418_v50 = vld [vmem:[#allocation31 + $0x90] ss:$8 sps:$4 sm:$0xff]  }
0x1844   :  { %9676 = vmatpush1.bf16.msra.mxu0 %v12403_v11 }
0x1845   :  { %9677 = vmatprep.subr.bf16.mxu0 %v12408_v56 }
0x1846   :  { %11704 = vmatmul.mubr.msk.bf16.vlgmr.msra.gmra.mrb[248].mxu1 %vm3640_vm4, %v9236_v22  ;;  %v12426_v22 = vld [vmem:[#allocation31 + $0xb4] ss:$8 sps:$4 sm:$0xff]  }
0x1847   :  { %11714 = vmatpush3.bf16.msra.mxu1 %v9368_v52  ;;  %11715 = vmatprep.mubr.msk.bf16.mxu1 %vm13547_vm1, %v16756_v40  ;;  %v12424_v52 = vld [vmem:[#allocation31 + $0xb0] ss:$8 sps:$4 sm:$0xff]  }
0x1848   :  { %9678 = vmatpush1.bf16.msra.mxu0 %v12406_v63 }
0x1849   :  { %9679 = vmatprep.subr.bf16.mxu0 %v12411_v43 }
0x184b   :  { %v12846_v34 = vpop.eup %12845 }
0x184c   :  { %v9360_v57 = vmul.f32 %v12846_v34, %v16371_v3  ;;  %9680 = vmatpush1.bf16.msra.mxu0 %v12409_v16  ;;  %v12427_v34 = vld [vmem:[#allocation31 + $0xc0] ss:$8 sps:$4 sm:$0xff]  }
0x184d   :  { %9681 = vmatprep.subr.bf16.mxu0 %v12414_v49 }
0x184e   :  { %v9361_v35 = vpack.c.bf16 %v9360_v57, %v9358_v21  ;;  %v12430_v21 = vld [vmem:[#allocation31 + $0xd0] ss:$8 sps:$4 sm:$0xff]   ;;  %v12432_v57 = vld [vmem:[#allocation31 + $0xd4] ss:$8 sps:$4 sm:$0xff]  }
0x1850   :  { %11716 = vmatmul.mubr.msk.bf16.vlgmr.msra.gmra.mrb[252].mxu1 %vm3640_vm4, %v9361_v35  ;;  %9682 = vmatpush1.bf16.msra.mxu0 %v12412_v10  ;;  %v12435_v35 = vld [vmem:[#allocation31 + $0xe4] ss:$8 sps:$4 sm:$0xff]  }
0x1851   :  { %9683 = vmatprep.subr.bf16.mxu0 %v12417_v15 }
0x1854   :  { %9684 = vmatpush1.bf16.msra.mxu0 %v12415_v32 }
0x1855   :  { %9685 = vmatprep.subr.bf16.mxu0 %v12420_v12 }
0x1858   :  { %9686 = vmatpush1.bf16.msra.mxu0 %v12418_v50 }
0x1859   :  { %9687 = vmatprep.subr.bf16.mxu0 %v12423_v61 }
0x185c   :  { %9688 = vmatpush1.bf16.msra.mxu0 %v12421_v5 }
0x185d   :  { %9689 = vmatprep.subr.bf16.mxu0 %v12426_v22 }
0x1860   :  { %9690 = vmatpush1.bf16.msra.mxu0 %v12424_v52 }
0x1861   :  { %9691 = vmatprep.subr.bf16.mxu0 %v12429_v54 }
0x1864   :  { %9692 = vmatpush1.bf16.msra.mxu0 %v12427_v34 }
0x1865   :  { %9693 = vmatprep.subr.bf16.mxu0 %v12432_v57 }
0x1868   :  { %9694 = vmatpush1.bf16.msra.mxu0 %v12430_v21 }
0x1869   :  { %9695 = vmatprep.subr.bf16.mxu0 %v12435_v35 }
0x1884   :  { %v7594_v2 = vpop.f32.mrb[196].mxu1 }
0x1885   :  { %v11549_v26 = vpop.f32.mrb[197].mxu1 }
0x1886   :  { %v7597_v17 = vpop.f32.mrb[198].mxu1 }
0x1887   :  { %v11881_v30 = vpack.i.bf16 %v7597_v17, %v7594_v2  ;;  %v11550_v58 = vpop.f32.mrb[199].mxu1  ;;  %v12433_v2 = vld [vmem:[#allocation31 + $0xe0] ss:$8 sps:$4 sm:$0xff]   ;;  %v12438_v17 = vld [vmem:[#allocation31 + $0xf4] ss:$8 sps:$4 sm:$0xff]  }
0x1888   :  { %9696 = vmatpush1.bf16.msra.mxu0 %v12433_v2  ;;  %v12436_v58 = vld [vmem:[#allocation31 + $0xf0] ss:$8 sps:$4 sm:$0xff]  }
0x1889   :  { %11882 = vrot.lane.b32.xlu1 %v11881_v30, %s13550_s1  ;;  %9697 = vmatprep.subr.bf16.mxu0 %v12438_v17 }
0x188c   :  { %9698 = vmatpush1.bf16.msra.mxu0 %v12436_v58 }
0x188e   :  { %v7719_v38 = vpop.f32.mrb[200].mxu1 }
0x188f   :  { %v11561_v0 = vpop.f32.mrb[201].mxu1 }
0x1890   :  { %v7722_v42 = vpop.f32.mrb[202].mxu1 }
0x1891   :  { %v11896_v40 = vpack.i.bf16 %v7722_v42, %v7719_v38  ;;  %v11562_v18 = vpop.f32.mrb[203].mxu1 }
0x1896   :  { %v7844_v24 = vpop.f32.mrb[204].mxu1 }
0x1897   :  { %v11573_v62 = vpop.f32.mrb[205].mxu1 }
0x1898   :  { %v7847_v3 = vpop.f32.mrb[206].mxu1 }
0x1899   :  { %v11901_v14 = vpack.i.bf16 %v7847_v3, %v7844_v24  ;;  %v11574_v19 = vpop.f32.mrb[207].mxu1 }
0x189e   :  { %v16488_v8 = vpop.f32.mrb[208].mxu1 }
0x189f   :  { %v11585_v53 = vpop.f32.mrb[209].mxu1 }
0x18a0   :  { %v16490_v1 = vpop.f32.mrb[210].mxu1 }
0x18a1   :  { %v11586_v31 = vpop.f32.mrb[211].mxu1 }
0x18a8   :  { %v8094_v36 = vpop.f32.mrb[212].mxu1 }
0x18a9   :  { %v11597_v55 = vpop.f32.mrb[213].mxu1 }
0x18aa   :  { %v8097_v33 = vpop.f32.mrb[214].mxu1 }
0x18ab   :  { %v11886_v23 = vpack.i.bf16 %v8097_v33, %v8094_v36  ;;  %v11598_v45 = vpop.f32.mrb[215].mxu1 }
0x18ad   :  { %11887 = vrot.lane.b32.xlu1 %v11886_v23, %s13550_s1 }
0x18b1   :  { %11897 = vrot.lane.b32.xlu1 %v11896_v40, %s13549_s9 }
0x18b5   :  { %11902 = vrot.lane.b32.xlu1 %v11901_v14, %s13548_s28 }
0x18d1   :  { %v8219_v26 = vpop.f32.mrb[216].mxu1 }
0x18d2   :  { %v11609_v30 = vpop.f32.mrb[217].mxu1 }
0x18d3   :  { %v8222_v38 = vpop.f32.mrb[218].mxu1 }
0x18d4   :  { %v11891_v0 = vpack.i.bf16 %v8222_v38, %v8219_v26  ;;  %v11610_v42 = vpop.f32.mrb[219].mxu1 }
0x18d6   :  { %11892 = vrot.lane.b32.xlu0 %v11891_v0, %s13549_s9 }
0x18d9   :  { %v8344_v40 = vpop.f32.mrb[220].mxu1 }
0x18da   :  { %v11621_v18 = vpop.f32.mrb[221].mxu1 }
0x18db   :  { %v8347_v24 = vpop.f32.mrb[222].mxu1 }
0x18dc   :  { %v11906_v60 = vpack.i.bf16 %v8347_v24, %v8344_v40  ;;  %v11622_v25 = vpop.f32.mrb[223].mxu1 }
0x18de   :  { %11907 = vrot.lane.b32.xlu1 %v11906_v60, %s13548_s28 }
0x18e1   :  { %v16497_v62 = vpop.f32.mrb[224].mxu1 }
0x18e2   :  { %v11633_v3 = vpop.f32.mrb[225].mxu1 }
0x18e3   :  { %v16499_v14 = vpop.f32.mrb[226].mxu1 }
0x18e4   :  { %v11634_v19 = vpop.f32.mrb[227].mxu1 }
0x18f1   :  { %v8654_v37 = vpop.f32.mrb[228].mxu1 }
0x18f2   :  { %v11645_v6 = vpop.f32.mrb[229].mxu1 }
0x18f3   :  { %v8657_v47 = vpop.f32.mrb[230].mxu1 }
0x18f4   :  { %v11911_v28 = vpack.i.bf16 %v8657_v47, %v8654_v37  ;;  %v11646_v53 = vpop.f32.mrb[231].mxu1 }
0x18f6   :  { %11912 = vrot.lane.b32.xlu1 %v11911_v28, %s13550_s1 }
0x18f9   :  { %v8779_v31 = vpop.f32.mrb[232].mxu1 }
0x18fa   :  { %v11657_v44 = vpop.f32.mrb[233].mxu1 }
0x18fb   :  { %v8782_v9 = vpop.f32.mrb[234].mxu1  ;;  %v11883_v5 = vpop.permute.xlu1 %11882 }
0x18fc   :  { %v11916_v11 = vpack.i.bf16 %v8782_v9, %v8779_v31  ;;  %v11658_v39 = vpop.f32.mrb[235].mxu1  ;;  %v11885_v35 = vunpack.i.h.bf16 %v11883_v5  ;;  %v11884_v2 = vunpack.i.l.bf16 %v11883_v5 }
0x18fe   :  { %11917 = vrot.lane.b32.xlu1 %v11916_v11, %s13549_s9  ;;  %v8400_v40 = vsel %vm1505_vm2, %v16440_v4, %v11885_v35  ;;  %v8399_v18 = vsel %vm1505_vm2, %v16438_v59, %v11884_v2 }
0x1901   :  { %v8904_v36 = vpop.f32.mrb[236].mxu1 }
0x1902   :  { %v11669_v55 = vpop.f32.mrb[237].mxu1 }
0x1903   :  { %v8907_v33 = vpop.f32.mrb[238].mxu1 }
0x1904   :  { %v11936_v23 = vpack.i.bf16 %v8907_v33, %v8904_v36  ;;  %v11670_v45 = vpop.f32.mrb[239].mxu1 }
0x1909   :  { %v16503_v63 = vpop.f32.mrb[240].mxu1 }
0x190a   :  { %v11681_v56 = vpop.f32.mrb[241].mxu1 }
0x190b   :  { %v16505_v43 = vpop.f32.mrb[242].mxu1 }
0x190c   :  { %v11682_v16 = vpop.f32.mrb[243].mxu1 }
0x1911   :  { %v9154_v49 = vpop.f32.mrb[244].mxu1 }
0x1912   :  { %v11693_v10 = vpop.f32.mrb[245].mxu1 }
0x1913   :  { %v9157_v15 = vpop.f32.mrb[246].mxu1 }
0x1914   :  { %v11921_v32 = vpack.i.bf16 %v9157_v15, %v9154_v49  ;;  %v11694_v12 = vpop.f32.mrb[247].mxu1 }
0x1916   :  { %11922 = vrot.lane.b32.xlu1 %v11921_v32, %s13550_s1 }
0x1919   :  { %v9279_v50 = vpop.f32.mrb[248].mxu1 }
0x191a   :  { %11937 = vrot.lane.b32.xlu1 %v11936_v23, %s13548_s28  ;;  %v11705_v61 = vpop.f32.mrb[249].mxu1 }
0x191b   :  { %v9282_v22 = vpop.f32.mrb[250].mxu1 }
0x191c   :  { %v11926_v52 = vpack.i.bf16 %v9282_v22, %v9279_v50  ;;  %v11706_v54 = vpop.f32.mrb[251].mxu1 }
0x191e   :  { %11927 = vrot.lane.b32.xlu0 %v11926_v52, %s13549_s9 }
0x191f   :  { %v11888_v34 = vpop.permute.xlu1 %11887 }
0x1920   :  { %v11890_v28 = vunpack.i.h.bf16 %v11888_v34  ;;  %v11889_v53 = vunpack.i.l.bf16 %v11888_v34 }
0x1922   :  { %v8406_v59 = vsel %vm1505_vm2, %v16490_v1, %v11890_v28  ;;  %v8405_v9 = vsel %vm1505_vm2, %v16488_v8, %v11889_v53 }
0x1923   :  { %v9404_v21 = vpop.f32.mrb[252].mxu1  ;;  %v11898_v57 = vpop.permute.xlu1 %11897 }
0x1924   :  { %v11717_v26 = vpop.f32.mrb[253].mxu1  ;;  %v11900_v17 = vunpack.i.h.bf16 %v11898_v57  ;;  %v11899_v30 = vunpack.i.l.bf16 %v11898_v57 }
0x1925   :  { %v9407_v58 = vpop.f32.mrb[254].mxu1 }
0x1926   :  { %v11931_v38 = vpack.i.bf16 %v9407_v58, %v9404_v21  ;;  %v11718_v0 = vpop.f32.mrb[255].mxu1  ;;  %v8401_v25 = vsel %vm2536_vm6, %v8399_v18, %v11899_v30  ;;  %v8402_v3 = vsel %vm2536_vm6, %v8400_v40, %v11900_v17 }
0x1927   :  { %v11903_v42 = vpop.permute.xlu1 %11902 }
0x1928   :  { %11932 = vrot.lane.b32.xlu0 %v11931_v38, %s13548_s28  ;;  %v11905_v24 = vunpack.i.h.bf16 %v11903_v42  ;;  %v11904_v60 = vunpack.i.l.bf16 %v11903_v42 }
0x192a   :  { %v8403_v19 = vsel %vm2539_vm7, %v8401_v25, %v11904_v60  ;;  %v8404_v37 = vsel %vm2539_vm7, %v8402_v3, %v11905_v24  ;;  %v9728_v60 = vld [vmem:[#allocation32] sm:$0x3] }
0x192b   :  { %v9503_v6 = vpack.c.bf16 %v8404_v37, %v8403_v19  ;;  %v9733_v25 = vrot.slane %v9728_v60, %v16809_v13  ;;  %v9737_v3 = vrot.slane %v9728_v60, %v16810_v27 }
0x1948   :  { %v11893_v47 = vpop.permute.xlu0 %11892 }
0x1949   :  { %v11895_v4 = vunpack.i.h.bf16 %v11893_v47  ;;  %v11894_v31 = vunpack.i.l.bf16 %v11893_v47 }
0x194b   :  { %v8407_v36 = vsel %vm2536_vm6, %v8405_v9, %v11894_v31  ;;  %v8408_v55 = vsel %vm2536_vm6, %v8406_v59, %v11895_v4 }
0x1950   :  { %v11908_v44 = vpop.permute.xlu1 %11907 }
0x1951   :  { %v11910_v11 = vunpack.i.h.bf16 %v11908_v44  ;;  %v11909_v39 = vunpack.i.l.bf16 %v11908_v44 }
0x1953   :  { %v8409_v33 = vsel %vm2539_vm7, %v8407_v36, %v11909_v39  ;;  %v8410_v23 = vsel %vm2539_vm7, %v8408_v55, %v11910_v11 }
0x1954   :  { %v9504_v45 = vpack.c.bf16 %v8410_v23, %v8409_v33 }
0x1956   :  { %9699 = vmatprep.mubr.bf16.mxu0 %v9504_v45 }
0x1957   :  { %9700 = vmatmul.mubr.bf16.vlgmr.msra.gmra.mrb[228].mxu0 %v9503_v6 }
0x1968   :  { %v11913_v56 = vpop.permute.xlu1 %11912 }
0x1969   :  { %v11915_v1 = vunpack.i.h.bf16 %v11913_v56  ;;  %v11914_v10 = vunpack.i.l.bf16 %v11913_v56  ;;  %v16828_v56 = vld [vmem:[#allocation99_spill] sm:$0xff] }
0x196b   :  { %v9460_v12 = vsel %vm1505_vm2, %v16499_v14, %v11915_v1  ;;  %v9459_v50 = vsel %vm1505_vm2, %v16497_v62, %v11914_v10 }
0x1970   :  { %v11918_v16 = vpop.permute.xlu1 %11917 }
0x1971   :  { %v11920_v15 = vunpack.i.h.bf16 %v11918_v16  ;;  %v11919_v8 = vunpack.i.l.bf16 %v11918_v16 }
0x1973   :  { %v9461_v22 = vsel %vm2536_vm6, %v9459_v50, %v11919_v8  ;;  %v9462_v52 = vsel %vm2536_vm6, %v9460_v12, %v11920_v15 }
0x1988   :  { %v11923_v49 = vpop.permute.xlu1 %11922 }
0x1989   :  { %v11925_v35 = vunpack.i.h.bf16 %v11923_v49  ;;  %v11924_v2 = vunpack.i.l.bf16 %v11923_v49 }
0x198b   :  { %v9466_v62 = vsel %vm1505_vm2, %v16505_v43, %v11925_v35  ;;  %v9465_v30 = vsel %vm1505_vm2, %v16503_v63, %v11924_v2  ;;  %v12444_v35 = vld [vmem:[#allocation37 + $0x14] ss:$8 sps:$4 sm:$0xff]   ;;  %v12442_v2 = vld [vmem:[#allocation37 + $0x10] ss:$8 sps:$4 sm:$0xff]  }
0x198c   :  { %v11938_v32 = vpop.permute.xlu1 %11937 }
0x198d   :  { %v11940_v61 = vunpack.i.h.bf16 %v11938_v32  ;;  %v11939_v5 = vunpack.i.l.bf16 %v11938_v32 }
0x198f   :  { %v9463_v54 = vsel %vm2539_vm7, %v9461_v22, %v11939_v5  ;;  %v9464_v34 = vsel %vm2539_vm7, %v9462_v52, %v11940_v61 }
0x1990   :  { %v9505_v21 = vpack.c.bf16 %v9464_v34, %v9463_v54  ;;  %v11928_v57 = vpop.permute.xlu0 %11927 }
0x1991   :  { %v11930_v26 = vunpack.i.h.bf16 %v11928_v57  ;;  %v11929_v17 = vunpack.i.l.bf16 %v11928_v57  ;;  %v12441_v57 = vld [vmem:[#allocation37 + $0x4] ss:$8 sps:$4 sm:$0xff]  }
0x1992   :  { %10094 = vmatprep.subr.bf16.mxu1 %v12441_v57 }
0x1993   :  { %v9467_v0 = vsel %vm2536_vm6, %v9465_v30, %v11929_v17  ;;  %v9468_v42 = vsel %vm2536_vm6, %v9466_v62, %v11930_v26  ;;  %v12447_v26 = vld [vmem:[#allocation37 + $0x24] ss:$8 sps:$4 sm:$0xff]   ;;  %v12445_v17 = vld [vmem:[#allocation37 + $0x20] ss:$8 sps:$4 sm:$0xff]   ;;  %v12448_v62 = vld [vmem:[#allocation37 + $0x30] ss:$8 sps:$4 sm:$0xff]  }
0x1994   :  { %v12453_v30 = vld [vmem:[#allocation37 + $0x44] ss:$8 sps:$4 sm:$0xff]  }
0x199a   :  { %v11933_v14 = vpop.permute.xlu0 %11932 }
0x199b   :  { %v11935_v58 = vunpack.i.h.bf16 %v11933_v14  ;;  %v11934_v38 = vunpack.i.l.bf16 %v11933_v14  ;;  %v12450_v14 = vld [vmem:[#allocation37 + $0x34] ss:$8 sps:$4 sm:$0xff]  }
0x199d   :  { %v9469_v40 = vsel %vm2539_vm7, %v9467_v0, %v11934_v38  ;;  %v9470_v18 = vsel %vm2539_vm7, %v9468_v42, %v11935_v58  ;;  %v12451_v58 = vld [vmem:[#allocation37 + $0x40] ss:$8 sps:$4 sm:$0xff]  }
0x199e   :  { %v9506_v24 = vpack.c.bf16 %v9470_v18, %v9469_v40 }
0x19a0   :  { %9709 = vmatprep.mubr.bf16.mxu0 %v9506_v24 }
0x19a1   :  { %9710 = vmatmul.mubr.bf16.gmra.mrb[232].mxu0 %v9505_v21  ;;  %v12439_v21 = vld [vmem:[#allocation37] ss:$8 sps:$4 sm:$0xff]  }
0x19a2   :  { %10095 = vmatpush1.bf16.msra.mxu1 %v12439_v21 }
0x19a3   :  { %10096 = vmatprep.subr.bf16.mxu1 %v12444_v35  ;;  %v9749_v35 = vld [vmem:[#allocation35] sm:$0x3] }
0x19a6   :  { %10097 = vmatpush1.bf16.msra.mxu1 %v12442_v2 }
0x19a7   :  { %10098 = vmatprep.subr.bf16.mxu1 %v12447_v26 }
0x19aa   :  { %10099 = vmatpush1.bf16.msra.mxu1 %v12445_v17 }
0x19ab   :  { %10100 = vmatprep.subr.bf16.mxu1 %v12450_v14 }
0x19ae   :  { %10101 = vmatpush1.bf16.msra.mxu1 %v12448_v62 }
0x19af   :  { %10102 = vmatprep.subr.bf16.mxu1 %v12453_v30 }
0x19b2   :  { %10103 = vmatpush1.bf16.msra.mxu1 %v12451_v58 }
0x1a2a   :  { %v9701_v43 = vpop.f32.mrb[228].mxu0 }
0x1a2b   :  { %v9720_v63 = vadd.f32 %v9701_v43, %v15818_v51  ;;  %v9703_v19 = vpop.f32.mrb[229].mxu0 }
0x1a2c   :  { %v9721_v37 = vadd.f32 %v9703_v19, %v15814_v46  ;;  %v9705_v6 = vpop.f32.mrb[230].mxu0 }
0x1a2d   :  { %v9740_v47 = vadd.f32 %v9733_v25, %v9720_v63  ;;  %v9722_v28 = vadd.f32 %v9705_v6, %v15820_v7  ;;  %v9707_v53 = vpop.f32.mrb[231].mxu0 }
0x1a2e   :  { %v9741_v4 = vadd.f32 %v9737_v3, %v9721_v37  ;;  %v9723_v31 = vadd.f32 %v9707_v53, %v15816_v29  ;;  %v12459_v53 = vld [vmem:[#allocation37 + $0x64] ss:$8 sps:$4 sm:$0xff]  }
0x1a2f   :  { %v9742_v44 = vadd.f32 %v9733_v25, %v9722_v28  ;;  %v12454_v28 = vld [vmem:[#allocation37 + $0x50] ss:$8 sps:$4 sm:$0xff]  }
0x1a30   :  { %v9743_v59 = vadd.f32 %v9737_v3, %v9723_v31  ;;  %v9750_v9 = vadd.f32 %v9741_v4, %v9740_v47  ;;  %v12462_v31 = vld [vmem:[#allocation37 + $0x74] ss:$8 sps:$4 sm:$0xff]  }
0x1a32   :  { %9751 = vadd.xlane.f32.xlu0 %v9750_v9  ;;  %v9753_v11 = vadd.f32 %v9743_v59, %v9742_v44  ;;  %v12463_v9 = vld [vmem:[#allocation37 + $0x80] ss:$8 sps:$4 sm:$0xff]  }
0x1a34   :  { %9754 = vadd.xlane.f32.xlu1 %v9753_v11  ;;  %v12468_v11 = vld [vmem:[#allocation37 + $0x94] ss:$8 sps:$4 sm:$0xff]  }
0x1a74   :  { %v9711_v39 = vpop.f32.mrb[232].mxu0 }
0x1a75   :  { %v9724_v51 = vadd.f32 %v9711_v39, %v15844_v20  ;;  %v9713_v36 = vpop.f32.mrb[233].mxu0  ;;  %v12466_v39 = vld [vmem:[#allocation37 + $0x90] ss:$8 sps:$4 sm:$0xff]  }
0x1a76   :  { %v9725_v46 = vadd.f32 %v9713_v36, %v15834_v48  ;;  %v9715_v55 = vpop.f32.mrb[234].mxu0  ;;  %v12469_v36 = vld [vmem:[#allocation37 + $0xa0] ss:$8 sps:$4 sm:$0xff]  }
0x1a77   :  { %v9744_v33 = vadd.f32 %v9733_v25, %v9724_v51  ;;  %v9726_v7 = vadd.f32 %v9715_v55, %v15842_v41  ;;  %v9717_v23 = vpop.f32.mrb[235].mxu0  ;;  %v12471_v51 = vld [vmem:[#allocation37 + $0xa4] ss:$8 sps:$4 sm:$0xff]   ;;  %v12472_v55 = vld [vmem:[#allocation37 + $0xb0] ss:$8 sps:$4 sm:$0xff]  }
0x1a78   :  { %v9745_v45 = vadd.f32 %v9737_v3, %v9725_v46  ;;  %v9727_v29 = vadd.f32 %v9717_v23, %v16828_v56  ;;  %v12474_v46 = vld [vmem:[#allocation37 + $0xb4] ss:$8 sps:$4 sm:$0xff]   ;;  %v12483_v56 = vld [vmem:[#allocation37 + $0xe4] ss:$8 sps:$4 sm:$0xff]  }
0x1a79   :  { %v9746_v16 = vadd.f32 %v9733_v25, %v9726_v7  ;;  %v12475_v7 = vld [vmem:[#allocation37 + $0xc0] ss:$8 sps:$4 sm:$0xff]   ;;  %v12480_v23 = vld [vmem:[#allocation37 + $0xd4] ss:$8 sps:$4 sm:$0xff]  }
0x1a7a   :  { %v9747_v49 = vadd.f32 %v9737_v3, %v9727_v29  ;;  %v9756_v1 = vadd.f32 %v9745_v45, %v9744_v33  ;;  %v12481_v29 = vld [vmem:[#allocation37 + $0xe0] ss:$8 sps:$4 sm:$0xff]  }
0x1a7c   :  { %9757 = vadd.xlane.f32.xlu0 %v9756_v1  ;;  %v9759_v10 = vadd.f32 %v9747_v49, %v9746_v16  ;;  %v12487_v1 = vld [vmem:[%s13723_s4 + $0x40] sm:$0xff]  }
0x1a7d   :  { %11121 = vmatprep.subr.bf16.mxu0 %v12487_v1 }
0x1a80   :  { %9760 = vadd.xlane.f32.xlu0 %v9759_v10 }
0x1abf   :  { %v9752_v15 = vpop.xlane.xlu0 %9751 }
0x1ac0   :  { %v9762_v8 = vmul.f32 0.00390625, %v9752_v15 }
0x1ac1   :  { %v9755_v20 = vpop.xlane.xlu1 %9754 }
0x1ac2   :  { %v16553_v32 = vsub.f32 %v9740_v47, %v9762_v8  ;;  %v16555_v48 = vsub.f32 %v9741_v4, %v9762_v8  ;;  %v9763_v12 = vmul.f32 0.00390625, %v9755_v20  ;;  %v12456_v47 = vld [vmem:[#allocation37 + $0x54] ss:$8 sps:$4 sm:$0xff]   ;;  %v12457_v4 = vld [vmem:[#allocation37 + $0x60] ss:$8 sps:$4 sm:$0xff]  }
0x1ac3   :  { %10104 = vmatprep.subr.bf16.mxu1 %v12456_v47 }
0x1ac4   :  { %v9774_v41 = vmul.f32 %v16553_v32, %v16553_v32  ;;  %v9775_v50 = vmul.f32 %v16555_v48, %v16555_v48  ;;  %v16561_v61 = vsub.f32 %v9742_v44, %v9763_v12  ;;  %v16563_v5 = vsub.f32 %v9743_v59, %v9763_v12  ;;  %10105 = vmatpush1.bf16.msra.mxu1 %v12454_v28  ;;  %v12460_v44 = vld [vmem:[#allocation37 + $0x70] ss:$8 sps:$4 sm:$0xff]   ;;  %v12465_v59 = vld [vmem:[#allocation37 + $0x84] ss:$8 sps:$4 sm:$0xff]  }
0x1ac5   :  { %10106 = vmatprep.subr.bf16.mxu1 %v12459_v53 }
0x1ac6   :  { %v9776_v22 = vmul.f32 %v16561_v61, %v16561_v61  ;;  %v9777_v52 = vmul.f32 %v16563_v5, %v16563_v5  ;;  %v9782_v54 = vadd.f32 %v9775_v50, %v9774_v41 }
0x1ac8   :  { %9783 = vadd.xlane.f32.xlu1 %v9782_v54  ;;  %v9785_v34 = vadd.f32 %v9777_v52, %v9776_v22  ;;  %10107 = vmatpush1.bf16.msra.mxu1 %v12457_v4  ;;  %v9748_v22 = vld [vmem:[#allocation34] sm:$0x3] }
0x1ac9   :  { %10108 = vmatprep.subr.bf16.mxu1 %v12462_v31  ;;  %v9818_v21 = vrot.slane %v9748_v22, %v16809_v13  ;;  %v9822_v2 = vrot.slane %v9748_v22, %v16810_v27 }
0x1aca   :  { %9786 = vadd.xlane.f32.xlu0 %v9785_v34 }
0x1acc   :  { %10109 = vmatpush1.bf16.msra.mxu1 %v12460_v44 }
0x1acd   :  { %10110 = vmatprep.subr.bf16.mxu1 %v12465_v59 }
0x1ad0   :  { %10111 = vmatpush1.bf16.msra.mxu1 %v12463_v9 }
0x1ad1   :  { %10112 = vmatprep.subr.bf16.mxu1 %v12468_v11 }
0x1ad4   :  { %10113 = vmatpush1.bf16.msra.mxu1 %v12466_v39 }
0x1ad5   :  { %10114 = vmatprep.subr.bf16.mxu1 %v12471_v51 }
0x1ad8   :  { %10115 = vmatpush1.bf16.msra.mxu1 %v12469_v36 }
0x1ad9   :  { %10116 = vmatprep.subr.bf16.mxu1 %v12474_v46 }
0x1adc   :  { %10117 = vmatpush1.bf16.msra.mxu1 %v12472_v55 }
0x1b09   :  { %v9758_v38 = vpop.xlane.xlu0 %9757 }
0x1b0a   :  { %v9764_v0 = vmul.f32 0.00390625, %v9758_v38  ;;  %v9837_v38 = vrot.slane %v9749_v35, %v16809_v13 }
0x1b0c   :  { %v16569_v42 = vsub.f32 %v9744_v33, %v9764_v0  ;;  %v16571_v40 = vsub.f32 %v9745_v45, %v9764_v0  ;;  %v12477_v33 = vld [vmem:[#allocation37 + $0xc4] ss:$8 sps:$4 sm:$0xff]   ;;  %v12478_v45 = vld [vmem:[#allocation37 + $0xd0] ss:$8 sps:$4 sm:$0xff]  }
0x1b0d   :  { %v9761_v18 = vpop.xlane.xlu0 %9760  ;;  %10118 = vmatprep.subr.bf16.mxu1 %v12477_v33 }
0x1b0e   :  { %v9778_v24 = vmul.f32 %v16569_v42, %v16569_v42  ;;  %v9779_v60 = vmul.f32 %v16571_v40, %v16571_v40  ;;  %v9765_v25 = vmul.f32 0.00390625, %v9761_v18  ;;  %10119 = vmatpush1.bf16.msra.mxu1 %v12475_v7 }
0x1b0f   :  { %10120 = vmatprep.subr.bf16.mxu1 %v12480_v23 }
0x1b10   :  { %v16577_v43 = vsub.f32 %v9746_v16, %v9765_v25  ;;  %v16579_v3 = vsub.f32 %v9747_v49, %v9765_v25  ;;  %v9788_v63 = vadd.f32 %v9779_v60, %v9778_v24  ;;  %v12486_v16 = vld [vmem:[#allocation37 + $0xf4] ss:$8 sps:$4 sm:$0xff]   ;;  %v12484_v49 = vld [vmem:[#allocation37 + $0xf0] ss:$8 sps:$4 sm:$0xff]  }
0x1b12   :  { %v9780_v19 = vmul.f32 %v16577_v43, %v16577_v43  ;;  %v9781_v37 = vmul.f32 %v16579_v3, %v16579_v3  ;;  %9789 = vadd.xlane.f32.xlu1 %v9788_v63  ;;  %10121 = vmatpush1.bf16.msra.mxu1 %v12478_v45 }
0x1b13   :  { %10122 = vmatprep.subr.bf16.mxu1 %v12483_v56 }
0x1b14   :  { %v9791_v6 = vadd.f32 %v9781_v37, %v9780_v19 }
0x1b16   :  { %9792 = vadd.xlane.f32.xlu0 %v9791_v6  ;;  %10123 = vmatpush1.bf16.msra.mxu1 %v12481_v29 }
0x1b17   :  { %10124 = vmatprep.subr.bf16.mxu1 %v12486_v16 }
0x1b1a   :  { %10125 = vmatpush1.bf16.msra.mxu1 %v12484_v49 }
0x1b55   :  { %v9784_v15 = vpop.xlane.xlu1 %9783 }
0x1b56   :  { %v9794_v20 = vmul.f32 0.00390625, %v9784_v15 }
0x1b57   :  { %v9787_v10 = vpop.xlane.xlu0 %9786 }
0x1b58   :  { %v9795_v8 = vmul.f32 0.00390625, %v9787_v10  ;;  %v9798_v41 = vadd.f32 1e-05, %v9794_v20 }
0x1b5a   :  { %v9799_v12 = vadd.f32 1e-05, %v9795_v8 }
0x1b5c   :  { %12847 = vrsqrt.f32 %v9799_v12 }
0x1b5d   :  { %12849 = vrsqrt.f32 %v9798_v41 }
0x1b66   :  { %v12848_v50 = vpop.eup %12847 }
0x1b67   :  { %v12850_v52 = vpop.eup %12849  ;;  %v9808_v54 = vmul.f32 %v12848_v50, %v16561_v61  ;;  %v9809_v34 = vmul.f32 %v12848_v50, %v16563_v5  ;;  %v9841_v61 = vrot.slane %v9749_v35, %v16810_v27 }
0x1b68   :  { %v9806_v26 = vmul.f32 %v12850_v52, %v16553_v32  ;;  %v9807_v17 = vmul.f32 %v12850_v52, %v16555_v48 }
0x1b69   :  { %v9827_v62 = vmul.f32 %v9818_v21, %v9808_v54  ;;  %v9828_v30 = vmul.f32 %v9822_v2, %v9809_v34 }
0x1b6a   :  { %v9825_v5 = vmul.f32 %v9818_v21, %v9806_v26  ;;  %v9826_v18 = vmul.f32 %v9822_v2, %v9807_v17 }
0x1b6b   :  { %v9846_v60 = vadd.f32 %v9837_v38, %v9827_v62  ;;  %v9847_v25 = vadd.f32 %v9841_v61, %v9828_v30 }
0x1b6c   :  { %v9844_v19 = vadd.f32 %v9837_v38, %v9825_v5  ;;  %v9845_v32 = vadd.f32 %v9841_v61, %v9826_v18  ;;  %v12492_v5 = vld [vmem:[%s13723_s4 + $0x10] sm:$0xff]   ;;  %v12493_v18 = vld [vmem:[%s13723_s4 + $0x58] sm:$0xff]  }
0x1b6e   :  { %v9852_v48 = vadd.f32 %v9846_v60, %v9844_v19  ;;  %v9859_v37 = vadd.f32 %v9847_v25, %v9845_v32  ;;  %v12495_v60 = vld [vmem:[%s13723_s4 + $0x60] sm:$0xff]   ;;  %v12498_v19 = vld [vmem:[%s13723_s4 + $0x28] sm:$0xff]   ;;  %v12499_v32 = vld [vmem:[%s13723_s4 + $0x70] sm:$0xff]  }
0x1b6f   :  { %v12496_v25 = vld [vmem:[%s13723_s4 + $0x20] sm:$0xff]  }
0x1b70   :  { %v9853_v47 = vrot.slane %v9852_v48, 4  ;;  %v9860_v28 = vrot.slane %v9859_v37, 4 }
0x1b72   :  { %v9854_v44 = vadd.f32 %v9853_v47, %v9852_v48  ;;  %v9861_v59 = vadd.f32 %v9860_v28, %v9859_v37  ;;  %v12500_v48 = vld [vmem:[%s13723_s4 + $0x30] sm:$0xff]   ;;  %v12501_v37 = vld [vmem:[%s13723_s4 + $0x78] sm:$0xff]  }
0x1b73   :  { %v9922_v47 = vld [vmem:[#allocation38] sm:$0x3]  ;;  %v10135_v28 = vld [vmem:[#allocation40] sm:$0x3] }
0x1b74   :  { %v9855_v55 = vrot.slane %v9854_v44, 2  ;;  %v9862_v33 = vrot.slane %v9861_v59, 2 }
0x1b76   :  { %v9863_v16 = vadd.f32 %v9862_v33, %v9861_v59 }
0x1b9f   :  { %v9790_v57 = vpop.xlane.xlu1 %9789 }
0x1ba0   :  { %v9796_v14 = vmul.f32 0.00390625, %v9790_v57 }
0x1ba2   :  { %v9800_v58 = vadd.f32 1e-05, %v9796_v14 }
0x1ba3   :  { %v9793_v0 = vpop.xlane.xlu0 %9792 }
0x1ba4   :  { %12851 = vrsqrt.f32 %v9800_v58  ;;  %v9797_v24 = vmul.f32 0.00390625, %v9793_v0  ;;  %v12488_v58 = vld [vmem:[%s13723_s4] sm:$0xff]   ;;  %v12491_v0 = vld [vmem:[%s13723_s4 + $0x50] sm:$0xff]  }
0x1ba5   :  { %11122 = vmatpush3.bf16.msra.mxu0 %v12488_v58 }
0x1ba6   :  { %v9801_v63 = vadd.f32 1e-05, %v9797_v24  ;;  %v12494_v24 = vld [vmem:[%s13723_s4 + $0x18] sm:$0xff]  }
0x1ba8   :  { %12853 = vrsqrt.f32 %v9801_v63  ;;  %v12497_v63 = vld [vmem:[%s13723_s4 + $0x68] sm:$0xff]  }
0x1bae   :  { %v12852_v6 = vpop.eup %12851 }
0x1baf   :  { %v9810_v53 = vmul.f32 %v12852_v6, %v16569_v42  ;;  %v9811_v4 = vmul.f32 %v12852_v6, %v16571_v40  ;;  %v9856_v40 = vadd.f32 %v9855_v55, %v9854_v44  ;;  %v12502_v6 = vld [vmem:[%s13723_s4 + $0x38] sm:$0xff]   ;;  %v10140_v44 = vrot.slane %v10135_v28, %v16809_v13 }
0x1bb1   :  { %v9829_v9 = vmul.f32 %v9818_v21, %v9810_v53  ;;  %v9830_v11 = vmul.f32 %v9822_v2, %v9811_v4  ;;  %v9857_v8 = vrot.slane %v9856_v40, 1  ;;  %v9927_v53 = vrot.slane %v9922_v47, %v16809_v13  ;;  %v10149_v4 = vld [vmem:[#allocation41] sm:$0x3] }
0x1bb2   :  { %v12854_v31 = vpop.eup %12853 }
0x1bb3   :  { %v9812_v39 = vmul.f32 %v12854_v31, %v16577_v43  ;;  %v9813_v51 = vmul.f32 %v12854_v31, %v16579_v3  ;;  %v9848_v7 = vadd.f32 %v9837_v38, %v9829_v9  ;;  %v9849_v23 = vadd.f32 %v9841_v61, %v9830_v11 }
0x1bb4   :  { %v9864_v43 = vrot.slane %v9863_v16, 1  ;;  %v9858_v50 = vadd.f32 %v9857_v8, %v9856_v40  ;;  %v9931_v31 = vrot.slane %v9922_v47, %v16810_v27  ;;  %v10144_v9 = vrot.slane %v10135_v28, %v16810_v27 }
0x1bb5   :  { %v9831_v36 = vmul.f32 %v9818_v21, %v9812_v39  ;;  %v9832_v46 = vmul.f32 %v9822_v2, %v9813_v51  ;;  %v10154_v39 = vrot.slane %v10149_v4, %v16809_v13 }
0x1bb6   :  { %v9865_v22 = vadd.f32 %v9864_v43, %v9863_v16  ;;  %v9867_v57 = vmul.f32 0.0625, %v9858_v50 }
0x1bb7   :  { %v9850_v45 = vadd.f32 %v9837_v38, %v9831_v36  ;;  %v9851_v56 = vadd.f32 %v9841_v61, %v9832_v46  ;;  %v12489_v38 = vld [vmem:[%s13723_s4 + $0x48] sm:$0xff]   ;;  %v10158_v46 = vrot.slane %v10149_v4, %v16810_v27 }
0x1bb8   :  { %v9868_v35 = vmul.f32 0.0625, %v9865_v22  ;;  %v12490_v61 = vld [vmem:[%s13723_s4 + $0x8] sm:$0xff]   ;;  %11123 = vmatprep.subr.bf16.mxu0 %v12489_v38  ;;  %s13552_s4 = smov [#allocation43]  }
0x1bb9   :  { %v9869_v42 = vadd.f32 %v9850_v45, %v9848_v7  ;;  %v9876_v29 = vadd.f32 %v9851_v56, %v9849_v23  ;;  %11124 = vmatpush3.bf16.msra.mxu0 %v12490_v61  ;;  %s10386_s21 = sshll.u32 %s13552_s4, 4  ;;  %s10387_s21 = int_to_ptr.vmem [resolvable:$true] %s10386_s21 }
0x1bba   :  { %11125 = vmatprep.subr.bf16.mxu0 %v12491_v0  ;;  %s13431_s17 = scalar_lea.vmem %s10387_s21, 32  ;;  %p13436_p13 = scmp.lt.s32.totalorder %s10387_s21, %s10387_s21 }
0x1bbb   :  { %v9870_v49 = vrot.slane %v9869_v42, 4  ;;  %v9877_v1 = vrot.slane %v9876_v29, 4  ;;  %p13432_p12 = scmp.ne.s32.totalorder %s10387_s21, %s13431_s17  ;;  %p13437_p0 = scmp.lt.s32.totalorder %s13431_s17, %s13431_s17 }
0x1bbd   :  { %v9871_v10 = vadd.f32 %v9870_v49, %v9869_v42  ;;  %v9878_v15 = vadd.f32 %v9877_v1, %v9876_v29  ;;  %11126 = vmatpush3.bf16.msra.mxu0 %v12492_v5  ;;  %p13438_p1 = por %p13437_p0, %p13436_p13 }
0x1bbe   :  { %11127 = vmatprep.subr.bf16.mxu0 %v12493_v18 }
0x1bbf   :  { %v9872_v20 = vrot.slane %v9871_v10, 2  ;;  %v9879_v3 = vrot.slane %v9878_v15, 2  ;;  %p13439_p2 = pnand %p13438_p1, %p13432_p12 }
0x1bc1   :  { %v9873_v12 = vadd.f32 %v9872_v20, %v9871_v10  ;;  %v9880_v41 = vadd.f32 %v9879_v3, %v9878_v15  ;;  %11128 = vmatpush3.bf16.msra.mxu0 %v12494_v24 }
0x1bc2   :  { %11129 = vmatprep.subr.bf16.mxu0 %v12495_v60 }
0x1bc3   :  { %v9874_v52 = vrot.slane %v9873_v12, 1  ;;  %v9881_v54 = vrot.slane %v9880_v41, 1 }
0x1bc5   :  { %v9875_v34 = vadd.f32 %v9874_v52, %v9873_v12  ;;  %v9882_v21 = vadd.f32 %v9881_v54, %v9880_v41  ;;  %11130 = vmatpush3.bf16.msra.mxu0 %v12496_v25  ;;  %v13551_v12 = vmov 1966171168   ;;  %v10910_v52 = vld [vmem:[%s13728_s3] ss:$0 sm:$0xff] }
0x1bc6   :  { %11131 = vmatprep.subr.bf16.mxu0 %v12497_v63  ;;  %v10356_v41 = vunpack.c.l.s4 %v13551_v12 }
0x1bc7   :  { %v9883_v2 = vmul.f32 0.0625, %v9875_v34  ;;  %v9884_v26 = vmul.f32 0.0625, %v9882_v21  ;;  %v16829_v21 = vld [vmem:[#allocation76_spill] sm:$0xff] }
0x1bc8   :  { %v10357_v50 = vunpack.c.0.s8 %v10356_v41 }
0x1bc9   :  { %v9886_v17 = vsel %vm9885_vm8, %v9867_v57, %v9883_v2  ;;  %v9887_v14 = vsel %vm9885_vm8, %v9868_v35, %v9884_v26  ;;  %11132 = vmatpush3.bf16.msra.mxu0 %v12498_v19 }
0x1bca   :  { %v9920_v62 = vpack.c.bf16 %v9886_v17, %v9886_v17  ;;  %v9921_v30 = vpack.c.bf16 %v9887_v14, %v9887_v14  ;;  %11133 = vmatprep.subr.bf16.mxu0 %v12499_v32  ;;  %v10360_v57 = vsub.s32 %v10357_v50, %v16829_v21 }
0x1bcc   :  { %10126 = vmatprep.mubr.bf16.mxu1 %v9921_v30 }
0x1bcd   :  { %10127 = vmatmul.mubr.bf16.vlgmr.msra.gmra.mrb[0].mxu1 %v9920_v62  ;;  %11134 = vmatpush3.bf16.msra.mxu0 %v12500_v48 }
0x1bce   :  { %11135 = vmatprep.subr.bf16.mxu0 %v12501_v37 }
0x1bd1   :  { %11136 = vmatpush3.bf16.msra.mxu0 %v12502_v6 }
0x1ca0   :  { %v10128_v59 = vpop.f32.mrb[0].mxu1 }
0x1ca1   :  { %v10129_v11 = vadd.f32 %v10128_v59, %v9927_v53  ;;  %v10130_v51 = vpop.f32.mrb[1].mxu1 }
0x1ca2   :  { %v10131_v36 = vadd.f32 %v10130_v51, %v9931_v31  ;;  %v10132_v55 = vpop.f32.mrb[2].mxu1 }
0x1ca3   :  { %v10147_v33 = vmul.f32 %v10140_v44, %v10129_v11  ;;  %v10133_v7 = vpop.f32.mrb[3].mxu1 }
0x1ca4   :  { %v10148_v23 = vmul.f32 %v10144_v9, %v10131_v36 }
0x1ca5   :  { %v10161_v45 = vadd.f32 %v10154_v39, %v10147_v33 }
0x1ca6   :  { %v10162_v56 = vadd.f32 %v10158_v46, %v10148_v23 }
0x1ca7   :  { %v10165_v42 = vmul.f32 1.442695, %v10161_v45  ;;  %vm10163_vm9 = vcmp.gt.f32.partialorder %v10161_v45, 0.0 }
0x1ca8   :  { %v10167_v29 = vmul.f32 1.442695, %v10162_v56  ;;  %vm10164_vm10 = vcmp.gt.f32.partialorder %v10162_v56, 0.0 }
0x1ca9   :  { %12855 = vpow2.f32 %v10165_v42 }
0x1caa   :  { %12857 = vpow2.f32 %v10167_v29 }
0x1cb3   :  { %v12856_v40 = vpop.eup %12855 }
0x1cb4   :  { %v12858_v16 = vpop.eup %12857  ;;  %v10908_v49 = vadd.f32 -1.0, %v12856_v40 }
0x1cb5   :  { %v10909_v1 = vadd.f32 -1.0, %v12858_v16 }
0x1cb6   :  { %v10171_v10 = vmul.f32 1.6732632, %v10908_v49 }
0x1cb7   :  { %v10172_v13 = vmul.f32 1.6732632, %v10909_v1 }
0x1cb8   :  { %v10173_v15 = vsel %vm10163_vm9, %v10161_v45, %v10171_v10 }
0x1cb9   :  { %v10175_v27 = vmul.f32 1.050701, %v10173_v15  ;;  %v10174_v8 = vsel %vm10164_vm10, %v10162_v56, %v10172_v13 }
0x1cba   :  { %v10176_v43 = vmul.f32 1.050701, %v10174_v8 }
0x1cbb   :  { %v10209_v3 = vpack.c.bf16 %v10175_v27, %v10175_v27 }
0x1cbc   :  { %v10210_v20 = vpack.c.bf16 %v10176_v43, %v10176_v43 }
0x1cbe   :  { %10346 = vmatprep.mubr.bf16.mxu0 %v10210_v20 }
0x1cbf   :  { %10347 = vmatmul.mubr.bf16.vlgmr.msra.gmra.mrb[236].mxu0 %v10209_v3 }
0x1d92   :  { %v11137_v22 = vpop.f32.mrb[236].mxu0 }
0x1d93   :  { %v11138_v54 = vpop.f32.mrb[237].mxu0 }
0x1d94   :  { %v11139_v34 = vadd.f32 %v11138_v54, %v11137_v22  ;;  %v11140_v35 = vpop.f32.mrb[238].mxu0 }
0x1d95   :  { %v11141_v2 = vpop.f32.mrb[239].mxu0 }
0x1d96   :  { %v10349_v26 = vadd.f32 %v11139_v34, %v10910_v52 }
0x1d98   :  { %v10361_v17 = vrot.slane %v10349_v26, %v10360_v57 }
0x1d9a   :  { %v10362_v14 = vcombine.high %v10361_v17, %v10361_v17  ;;  %10927 = vst.sshfl [vmem:[#allocation43] sm:$0x1 pattern:$0x73625140] %v10361_v17 }
0x1d9c   :  { %10928 = vst.sshfl [vmem:[#allocation43 + $0x1] sm:$0x1 pattern:$0x73625140] %v10362_v14 }
0x1d9d   :  { %13442 = shalt.err (!%p13439_p2)
}
0x1d9e   :  { %s13443_s3 = scalar_lea.hbm %s13733_s5, 32 }
0x1d9f   :  { %p13444_p3 = scmp.ne.s32.totalorder %s13733_s5, %s13443_s3  ;;  %p13447_p4 = scmp.lt.u32.totalorder %s13443_s3, %s13733_s5 }
0x1da1   :  { %p13449_p5 = pnand %p13447_p4, %p13444_p3 }
0x1da3   :  { %13452 = shalt.err (!%p13449_p5)
}
0x1da4   :  { %s13553_s7 = smov 16   ;;  %s13554_s10 = smov 1  }
0x1da5   :  { %10392 = dma.vmem_to_hbm [thread:$0]  %s10387_s21, 32, %s13733_s5, [#allocation4], %s13553_s7, %s13553_s7, %s13554_s10  }
0x1da6   :  { %13481 = dma.done.wait [#allocation4], 32  }
0x1da7   :  { %13482 = vsyncadd [#allocation4], 4294967264 }
0x1da8   :  { %10396 = vsyncpa [#allocation3], 1 }
0x1da9   :  { %10397 = vsyncpa [#allocation6], 1 }
0x1daa   :  { %10398 = vsyncpa [#allocation9], 1 }
0x1dab   :  { %10399 = vsyncpa [#allocation12], 1 }
0x1dac   :  { %10400 = vsyncpa [#allocation15], 1 }
0x1dad   :  { %10401 = vsyncpa [#allocation18], 1 }
0x1dae   :  { %10402 = vsyncpa [#allocation21], 1 }
0x1daf   :  { %10403 = vsyncpa [#allocation24], 1 }
0x1db0   :  { %10404 = vsyncpa [#allocation27], 1 }
0x1db1   :  { %10405 = vsyncpa [#allocation30], 1 }
0x1db2   :  { %10406 = vsyncpa [#allocation33], 1 }
0x1db3   :  { %10407 = vsyncpa [#allocation36], 1 }
0x1db4   :  { %10408 = vsyncpa [#allocation39], 1 }
0x1db5   :  { %10409 = vsyncpa [#allocation42], 1 }
0x1db6   :  { %10410 = vsyncpa [#allocation4], 1 }

</bundles_post_ra>
